<compile_context>
chip_gen: v5e
topology: v5e:2x2
jax: 0.10.0
libtpu: 0.0.40
codegen_flags: <defaults>
</compile_context>

<pallas_src>
import functools

import jax
import jax.numpy as jnp
import numpy as np
from jax.experimental import pallas as pl
from jax.experimental.pallas import tpu as pltpu

LEAK = 0.1
NUM_HEADS = 4
MAXPAD = NUM_HEADS                                  # largest kernel k=9 -> pad 4

_KS = tuple(3 + 2 * i for i in range(NUM_HEADS))    # (3, 5, 7, 9)
_PADS = tuple(1 + i for i in range(NUM_HEADS))      # (1, 2, 3, 4)
_DW_BASE = tuple(int(np.cumsum([0] + [k * k for k in _KS])[i])
                 for i in range(NUM_HEADS))         # (0, 9, 34, 83)
_NUM_TAPS = sum(k * k for k in _KS)                 # 164


def _leaky(v):
    return jnp.where(v >= 0, v, LEAK * v)


def _multiconv_kernel(x_ref, w_red_ref, b_red_ref, mw_ref, b_dw_ref,
                      w_fus_ref, b_fus_ref, w_fc1_ref, w_fc2_ref,
                      o_ref, pad_ref, *, H, W, C, PADF):
    C4 = C // 4
    HW = H * W

    x = x_ref[0]                                     # (C, HW)  pixels on lanes

    # ---- 1x1 reduction conv + LeakyReLU (channels on sublanes) -------------
    xr = _leaky(jnp.dot(w_red_ref[...], x, preferred_element_type=jnp.float32)
                + b_red_ref[...])                    # (C4, HW)
    gate = jax.nn.sigmoid(xr)                        # shared gate

    # ---- flat zero-padded scratch -------------------------------------------
    # Padding values are never *used* (the corresponding weights in mw are
    # masked to 0) but they must not be NaN garbage; re-zeroing every step
    # keeps the kernel megacore-safe regardless of batch-axis sharding.
    pad_ref[...] = jnp.zeros_like(pad_ref)
    pad_ref[:, PADF:PADF + HW] = xr                  # lane-aligned interior store

    # ---- depthwise convs: dedup'd 9x9 footprint, pre-masked weights ---------
    accs = [jnp.zeros((C4, HW), jnp.float32) for _ in range(NUM_HEADS)]
    for ry in range(-MAXPAD, MAXPAD + 1):
        for rx in range(-MAXPAD, MAXPAD + 1):
            d = ry * W + rx
            tap = pad_ref[:, PADF + d:PADF + d + HW]          # (C4, HW)
            for i in range(NUM_HEADS):
                p = _PADS[i]
                if abs(ry) <= p and abs(rx) <= p:             # static check
                    row = _DW_BASE[i] + (ry + p) * _KS[i] + (rx + p)
                    accs[i] = accs[i] + tap * mw_ref[row]     # one vmul + vadd

    # ---- per-head bias + LeakyReLU + gate; concat is a free sublane stack ---
    heads = [_leaky(accs[i] + b_dw_ref[i]) * gate for i in range(NUM_HEADS)]
    cat = jnp.concatenate(heads, axis=0)             # (C, HW)

    # ---- 1x1 fusion conv: one K=C matmul -------------------------------------
    fused = (jnp.dot(w_fus_ref[...], cat, preferred_element_type=jnp.float32)
             + b_fus_ref[...])                       # (C, HW)

    # ---- SE block (column orientation, no transposes) ------------------------
    y = jnp.mean(fused, axis=1, keepdims=True)                         # (C, 1)
    h = jnp.maximum(
        jnp.dot(w_fc1_ref[...], y, preferred_element_type=jnp.float32), 0.0)
    s = jax.nn.sigmoid(
        jnp.dot(w_fc2_ref[...], h, preferred_element_type=jnp.float32))

    # ---- residual + lane-dense store -----------------------------------------
    o_ref[0] = x + fused * s


def multi_conv_block(x_nchw, params):
    """MultiConvBlock forward.  x_nchw: (B, C, H, W) float32, C % 4 == 0."""
    B, C, H, W = x_nchw.shape
    C4 = C // 4
    HW = H * W
    x_flat = x_nchw.reshape(B, C, HW)                # free reshape, channel-major

    # Largest flat tap offset is MAXPAD*W + MAXPAD; round the scratch padding
    # up to a lane tile so the interior store stays 128-aligned.
    padf = ((MAXPAD * W + MAXPAD + 127) // 128) * 128

    # Pre-masked, lane-broadcast depthwise weight table: (164, C4, H*W).
    # mw[row, c, p] = w_head[dy, dx, c] * (tap (dy,dx) at pixel p lands inside
    # the image).  Folding the border mask into the weights makes every
    # in-kernel tap exactly one vmul + vadd, with zero-padding semantics.
    yy, xx = jnp.meshgrid(jnp.arange(H), jnp.arange(W), indexing="ij")
    rows = []
    for i in range(NUM_HEADS):
        pdd = _PADS[i]
        w = params["w_dw"][i]                        # (C4, k, k)
        for ry in range(-pdd, pdd + 1):
            for rx in range(-pdd, pdd + 1):
                valid = ((yy + ry >= 0) & (yy + ry < H) &
                         (xx + rx >= 0) & (xx + rx < W)).reshape(HW)
                rows.append(w[:, ry + pdd, rx + pdd][:, None]
                            * valid[None, :].astype(jnp.float32))
    mw = jnp.stack(rows, axis=0)                     # (164, C4, HW)
    assert mw.shape[0] == _NUM_TAPS

    b_dw = jnp.stack([b.reshape(C4, 1) for b in params["b_dw"]], axis=0)

    flat_w = [params["w_red"], params["b_red"].reshape(C4, 1),
              mw, b_dw,
              params["w_fus"], params["b_fus"].reshape(C, 1),
              params["w_fc1"], params["w_fc2"]]

    in_specs = [pl.BlockSpec((1, C, HW), lambda b: (b, 0, 0))]
    in_specs += [pl.BlockSpec(w.shape, lambda b, n=w.ndim: (0,) * n)
                 for w in flat_w]
    out_spec = pl.BlockSpec((1, C, HW), lambda b: (b, 0, 0))

    kernel = functools.partial(_multiconv_kernel, H=H, W=W, C=C, PADF=padf)

    out = pl.pallas_call(
        kernel,
        out_shape=jax.ShapeDtypeStruct((B, C, HW), jnp.float32),
        grid_spec=pltpu.PrefetchScalarGridSpec(
            num_scalar_prefetch=0,
            grid=(B,),
            in_specs=in_specs,
            out_specs=out_spec,
            scratch_shapes=[pltpu.VMEM((C4, 2 * padf + HW), jnp.float32)]),
        compiler_params=pltpu.CompilerParams(dimension_semantics=("parallel",)),
    )(x_flat, *flat_w)

    return out.reshape(B, C, H, W)


def _reference(x, p):
    """Pure-JAX reference of the PyTorch forward (independent of the kernel)."""
    hi = jax.lax.Precision.HIGHEST
    B, C, H, W = x.shape
    C4 = C // 4
    dn = ("NCHW", "OIHW", "NCHW")
    xr = jax.lax.conv_general_dilated(
        x, p["w_red"][:, :, None, None], (1, 1), "VALID",
        dimension_numbers=dn, precision=hi)
    xr = _leaky(xr + p["b_red"][None, :, None, None])
    gate = jax.nn.sigmoid(xr)
    heads = []
    for i in range(NUM_HEADS):
        pdd = _PADS[i]
        w = p["w_dw"][i][:, None, :, :]              # (C4, 1, k, k) depthwise
        conv = jax.lax.conv_general_dilated(
            xr, w, (1, 1), ((pdd, pdd), (pdd, pdd)),
            dimension_numbers=dn, feature_group_count=C4, precision=hi)
        heads.append(_leaky(conv + p["b_dw"][i][None, :, None, None]) * gate)
    cat = jnp.concatenate(heads, axis=1)
    fused = jax.lax.conv_general_dilated(
        cat, p["w_fus"][:, :, None, None], (1, 1), "VALID",
        dimension_numbers=dn, precision=hi)
    fused = fused + p["b_fus"][None, :, None, None]
    y = jnp.mean(fused, axis=(2, 3))                 # (B, C)
    y = jnp.maximum(jnp.dot(y, p["w_fc1"].T, precision=hi), 0.0)
    y = jax.nn.sigmoid(jnp.dot(y, p["w_fc2"].T, precision=hi))
    return x + fused * y[:, :, None, None]


if __name__ == "__main__":
    B, C, H, W = 2, 32, 16, 16           # dim=32 -> dim//4=8, SE hidden = 2
    C4 = C // 4
    Cr = max(1, C // 16)

    keys = iter(jax.random.split(jax.random.PRNGKey(0), 32))

    def rnd(shape, scale=0.1):
        return scale * jax.random.normal(next(keys), shape, jnp.float32)

    params = {
        "w_red": rnd((C4, C)),                                    # 1x1: dim -> dim//4
        "b_red": rnd((C4,), 0.05),
        "w_dw": [rnd((C4, 3 + 2 * i, 3 + 2 * i)) for i in range(NUM_HEADS)],
        "b_dw": [rnd((C4,), 0.05) for _ in range(NUM_HEADS)],
        "w_fus": rnd((C, C)),                                     # 1x1: dim -> dim
        "b_fus": rnd((C,), 0.05),
        "w_fc1": rnd((Cr, C)),                                    # SE fc1 (no bias)
        "w_fc2": rnd((C, Cr)),                                    # SE fc2 (no bias)
    }
    x = jax.random.normal(next(keys), (B, C, H, W), jnp.float32)

    out = jax.block_until_ready(multi_conv_block(x, params))
    ref = jax.block_until_ready(_reference(x, params))

    assert out.shape == (B, C, H, W)
    np.testing.assert_allclose(np.asarray(out), np.asarray(ref),
                               rtol=1e-3, atol=1e-3)
    print("KERNEL_OK")
</pallas_src>

<mosaic_0001>
module attributes {stable_mosaic.version = 11 : i64} {
  func.func @_multiconv_kernel(%arg0: i32, %arg1: memref<1x32x256xf32, #tpu.memory_space<vmem>>, %arg2: memref<8x32xf32, #tpu.memory_space<vmem>>, %arg3: memref<8x1xf32, #tpu.memory_space<vmem>>, %arg4: memref<164x8x256xf32, #tpu.memory_space<vmem>>, %arg5: memref<4x8x1xf32, #tpu.memory_space<vmem>>, %arg6: memref<32x32xf32, #tpu.memory_space<vmem>>, %arg7: memref<32x1xf32, #tpu.memory_space<vmem>>, %arg8: memref<2x32xf32, #tpu.memory_space<vmem>>, %arg9: memref<32x2xf32, #tpu.memory_space<vmem>>, %arg10: memref<1x32x256xf32, #tpu.memory_space<vmem>>, %arg11: memref<8x512xf32, #tpu.memory_space<vmem>>) attributes {dimension_semantics = [#tpu.dimension_semantics<parallel>], iteration_bounds = array<i64: 2>, scalar_prefetch = 0 : i64, scratch_operands = 1 : i64, tpu.core_type = #tpu.core_type<tc>, window_params = [{transform_indices = @transform_0, window_bounds = array<i64: 1, 32, 256>}, {pipeline_mode = #tpu.pipeline_mode<synchronous>, transform_indices = @transform_1, window_bounds = array<i64: 8, 32>}, {pipeline_mode = #tpu.pipeline_mode<synchronous>, transform_indices = @transform_2, window_bounds = array<i64: 8, 1>}, {pipeline_mode = #tpu.pipeline_mode<synchronous>, transform_indices = @transform_3, window_bounds = array<i64: 164, 8, 256>}, {pipeline_mode = #tpu.pipeline_mode<synchronous>, transform_indices = @transform_4, window_bounds = array<i64: 4, 8, 1>}, {pipeline_mode = #tpu.pipeline_mode<synchronous>, transform_indices = @transform_5, window_bounds = array<i64: 32, 32>}, {pipeline_mode = #tpu.pipeline_mode<synchronous>, transform_indices = @transform_6, window_bounds = array<i64: 32, 1>}, {pipeline_mode = #tpu.pipeline_mode<synchronous>, transform_indices = @transform_7, window_bounds = array<i64: 2, 32>}, {pipeline_mode = #tpu.pipeline_mode<synchronous>, transform_indices = @transform_8, window_bounds = array<i64: 32, 2>}, {transform_indices = @transform_9, window_bounds = array<i64: 1, 32, 256>}]} {
    %c0 = arith.constant 0 : index
    %c0_0 = arith.constant 0 : index
    %c0_1 = arith.constant 0 : index
    %0 = vector.load %arg1[%c0, %c0_0, %c0_1] : memref<1x32x256xf32, #tpu.memory_space<vmem>>, vector<1x32x256xf32>
    %1 = vector.shape_cast %0 : vector<1x32x256xf32> to vector<32x256xf32>
    %c0_2 = arith.constant 0 : index
    %c0_3 = arith.constant 0 : index
    %2 = vector.load %arg2[%c0_2, %c0_3] : memref<8x32xf32, #tpu.memory_space<vmem>>, vector<8x32xf32>
    %cst = arith.constant dense<0.000000e+00> : vector<8x256xf32>
    %3 = tpu.matmul %2, %1, %cst {dimension_numbers = #tpu.dot_dimension_numbers<[1], [0], [0], [1], [0, 0, 1, 1], [], []>} : vector<8x32xf32>, vector<32x256xf32>, vector<8x256xf32> -> vector<8x256xf32>
    %c0_4 = arith.constant 0 : index
    %c0_5 = arith.constant 0 : index
    %4 = vector.load %arg3[%c0_4, %c0_5] : memref<8x1xf32, #tpu.memory_space<vmem>>, vector<8x1xf32>
    %5 = vector.broadcast %4 : vector<8x1xf32> to vector<8x256xf32>
    %6 = arith.addf %3, %5 : vector<8x256xf32>
    %cst_6 = arith.constant 0.000000e+00 : f32
    %7 = vector.broadcast %cst_6 : f32 to vector<8x256xf32>
    %8 = arith.cmpf oge, %6, %7 : vector<8x256xf32>
    %cst_7 = arith.constant 1.000000e-01 : f32
    %9 = vector.broadcast %cst_7 : f32 to vector<8x256xf32>
    %10 = arith.mulf %9, %6 : vector<8x256xf32>
    %11 = arith.select %8, %6, %10 : vector<8x256xi1>, vector<8x256xf32>
    %12 = arith.negf %11 : vector<8x256xf32>
    %13 = math.exp %12 : vector<8x256xf32>
    %cst_8 = arith.constant 1.000000e+00 : f32
    %14 = vector.broadcast %cst_8 : f32 to vector<8x256xf32>
    %15 = arith.addf %14, %13 : vector<8x256xf32>
    %16 = arith.divf %14, %15 : vector<8x256xf32>
    %cst_9 = arith.constant 0.000000e+00 : f32
    %17 = vector.broadcast %cst_9 : f32 to vector<8x512xf32>
    %c0_10 = arith.constant 0 : index
    %c0_11 = arith.constant 0 : index
    %18 = vector.load %arg11[%c0_10, %c0_11] : memref<8x512xf32, #tpu.memory_space<vmem>>, vector<8x512xf32>
    tpu.vector_store %arg11[%c0_10, %c0_11], %17 {strides = array<i32>} : memref<8x512xf32, #tpu.memory_space<vmem>>, vector<8x512xf32>,
    %c0_12 = arith.constant 0 : index
    %c128 = arith.constant 128 : index
    %19 = vector.load %arg11[%c0_12, %c128] : memref<8x512xf32, #tpu.memory_space<vmem>>, vector<8x256xf32>
    tpu.vector_store %arg11[%c0_12, %c128], %11 {strides = array<i32>} : memref<8x512xf32, #tpu.memory_space<vmem>>, vector<8x256xf32>,
    %cst_13 = arith.constant 0.000000e+00 : f32
    %20 = vector.broadcast %cst_13 : f32 to vector<8x256xf32>
    %cst_14 = arith.constant 0.000000e+00 : f32
    %21 = vector.broadcast %cst_14 : f32 to vector<8x256xf32>
    %cst_15 = arith.constant 0.000000e+00 : f32
    %22 = vector.broadcast %cst_15 : f32 to vector<8x256xf32>
    %cst_16 = arith.constant 0.000000e+00 : f32
    %23 = vector.broadcast %cst_16 : f32 to vector<8x256xf32>
    %c0_17 = arith.constant 0 : index
    %c60 = arith.constant 60 : index
    %24 = vector.load %arg11[%c0_17, %c60] : memref<8x512xf32, #tpu.memory_space<vmem>>, vector<8x256xf32>
    %c83 = arith.constant 83 : index
    %c0_18 = arith.constant 0 : index
    %c0_19 = arith.constant 0 : index
    %25 = vector.load %arg4[%c83, %c0_18, %c0_19] : memref<164x8x256xf32, #tpu.memory_space<vmem>>, vector<1x8x256xf32>
    %26 = vector.shape_cast %25 : vector<1x8x256xf32> to vector<8x256xf32>
    %27 = arith.mulf %24, %26 : vector<8x256xf32>
    %28 = arith.addf %23, %27 : vector<8x256xf32>
    %c0_20 = arith.constant 0 : index
    %c61 = arith.constant 61 : index
    %29 = vector.load %arg11[%c0_20, %c61] : memref<8x512xf32, #tpu.memory_space<vmem>>, vector<8x256xf32>
    %c84 = arith.constant 84 : index
    %c0_21 = arith.constant 0 : index
    %c0_22 = arith.constant 0 : index
    %30 = vector.load %arg4[%c84, %c0_21, %c0_22] : memref<164x8x256xf32, #tpu.memory_space<vmem>>, vector<1x8x256xf32>
    %31 = vector.shape_cast %30 : vector<1x8x256xf32> to vector<8x256xf32>
    %32 = arith.mulf %29, %31 : vector<8x256xf32>
    %33 = arith.addf %28, %32 : vector<8x256xf32>
    %c0_23 = arith.constant 0 : index
    %c62 = arith.constant 62 : index
    %34 = vector.load %arg11[%c0_23, %c62] : memref<8x512xf32, #tpu.memory_space<vmem>>, vector<8x256xf32>
    %c85 = arith.constant 85 : index
    %c0_24 = arith.constant 0 : index
    %c0_25 = arith.constant 0 : index
    %35 = vector.load %arg4[%c85, %c0_24, %c0_25] : memref<164x8x256xf32, #tpu.memory_space<vmem>>, vector<1x8x256xf32>
    %36 = vector.shape_cast %35 : vector<1x8x256xf32> to vector<8x256xf32>
    %37 = arith.mulf %34, %36 : vector<8x256xf32>
    %38 = arith.addf %33, %37 : vector<8x256xf32>
    %c0_26 = arith.constant 0 : index
    %c63 = arith.constant 63 : index
    %39 = vector.load %arg11[%c0_26, %c63] : memref<8x512xf32, #tpu.memory_space<vmem>>, vector<8x256xf32>
    %c86 = arith.constant 86 : index
    %c0_27 = arith.constant 0 : index
    %c0_28 = arith.constant 0 : index
    %40 = vector.load %arg4[%c86, %c0_27, %c0_28] : memref<164x8x256xf32, #tpu.memory_space<vmem>>, vector<1x8x256xf32>
    %41 = vector.shape_cast %40 : vector<1x8x256xf32> to vector<8x256xf32>
    %42 = arith.mulf %39, %41 : vector<8x256xf32>
    %43 = arith.addf %38, %42 : vector<8x256xf32>
    %c0_29 = arith.constant 0 : index
    %c64 = arith.constant 64 : index
    %44 = vector.load %arg11[%c0_29, %c64] : memref<8x512xf32, #tpu.memory_space<vmem>>, vector<8x256xf32>
    %c87 = arith.constant 87 : index
    %c0_30 = arith.constant 0 : index
    %c0_31 = arith.constant 0 : index
    %45 = vector.load %arg4[%c87, %c0_30, %c0_31] : memref<164x8x256xf32, #tpu.memory_space<vmem>>, vector<1x8x256xf32>
    %46 = vector.shape_cast %45 : vector<1x8x256xf32> to vector<8x256xf32>
    %47 = arith.mulf %44, %46 : vector<8x256xf32>
    %48 = arith.addf %43, %47 : vector<8x256xf32>
    %c0_32 = arith.constant 0 : index
    %c65 = arith.constant 65 : index
    %49 = vector.load %arg11[%c0_32, %c65] : memref<8x512xf32, #tpu.memory_space<vmem>>, vector<8x256xf32>
    %c88 = arith.constant 88 : index
    %c0_33 = arith.constant 0 : index
    %c0_34 = arith.constant 0 : index
    %50 = vector.load %arg4[%c88, %c0_33, %c0_34] : memref<164x8x256xf32, #tpu.memory_space<vmem>>, vector<1x8x256xf32>
    %51 = vector.shape_cast %50 : vector<1x8x256xf32> to vector<8x256xf32>
    %52 = arith.mulf %49, %51 : vector<8x256xf32>
    %53 = arith.addf %48, %52 : vector<8x256xf32>
    %c0_35 = arith.constant 0 : index
    %c66 = arith.constant 66 : index
    %54 = vector.load %arg11[%c0_35, %c66] : memref<8x512xf32, #tpu.memory_space<vmem>>, vector<8x256xf32>
    %c89 = arith.constant 89 : index
    %c0_36 = arith.constant 0 : index
    %c0_37 = arith.constant 0 : index
    %55 = vector.load %arg4[%c89, %c0_36, %c0_37] : memref<164x8x256xf32, #tpu.memory_space<vmem>>, vector<1x8x256xf32>
    %56 = vector.shape_cast %55 : vector<1x8x256xf32> to vector<8x256xf32>
    %57 = arith.mulf %54, %56 : vector<8x256xf32>
    %58 = arith.addf %53, %57 : vector<8x256xf32>
    %c0_38 = arith.constant 0 : index
    %c67 = arith.constant 67 : index
    %59 = vector.load %arg11[%c0_38, %c67] : memref<8x512xf32, #tpu.memory_space<vmem>>, vector<8x256xf32>
    %c90 = arith.constant 90 : index
    %c0_39 = arith.constant 0 : index
    %c0_40 = arith.constant 0 : index
    %60 = vector.load %arg4[%c90, %c0_39, %c0_40] : memref<164x8x256xf32, #tpu.memory_space<vmem>>, vector<1x8x256xf32>
    %61 = vector.shape_cast %60 : vector<1x8x256xf32> to vector<8x256xf32>
    %62 = arith.mulf %59, %61 : vector<8x256xf32>
    %63 = arith.addf %58, %62 : vector<8x256xf32>
    %c0_41 = arith.constant 0 : index
    %c68 = arith.constant 68 : index
    %64 = vector.load %arg11[%c0_41, %c68] : memref<8x512xf32, #tpu.memory_space<vmem>>, vector<8x256xf32>
    %c91 = arith.constant 91 : index
    %c0_42 = arith.constant 0 : index
    %c0_43 = arith.constant 0 : index
    %65 = vector.load %arg4[%c91, %c0_42, %c0_43] : memref<164x8x256xf32, #tpu.memory_space<vmem>>, vector<1x8x256xf32>
    %66 = vector.shape_cast %65 : vector<1x8x256xf32> to vector<8x256xf32>
    %67 = arith.mulf %64, %66 : vector<8x256xf32>
    %68 = arith.addf %63, %67 : vector<8x256xf32>
    %c0_44 = arith.constant 0 : index
    %c76 = arith.constant 76 : index
    %69 = vector.load %arg11[%c0_44, %c76] : memref<8x512xf32, #tpu.memory_space<vmem>>, vector<8x256xf32>
    %c92 = arith.constant 92 : index
    %c0_45 = arith.constant 0 : index
    %c0_46 = arith.constant 0 : index
    %70 = vector.load %arg4[%c92, %c0_45, %c0_46] : memref<164x8x256xf32, #tpu.memory_space<vmem>>, vector<1x8x256xf32>
    %71 = vector.shape_cast %70 : vector<1x8x256xf32> to vector<8x256xf32>
    %72 = arith.mulf %69, %71 : vector<8x256xf32>
    %73 = arith.addf %68, %72 : vector<8x256xf32>
    %c0_47 = arith.constant 0 : index
    %c77 = arith.constant 77 : index
    %74 = vector.load %arg11[%c0_47, %c77] : memref<8x512xf32, #tpu.memory_space<vmem>>, vector<8x256xf32>
    %c34 = arith.constant 34 : index
    %c0_48 = arith.constant 0 : index
    %c0_49 = arith.constant 0 : index
    %75 = vector.load %arg4[%c34, %c0_48, %c0_49] : memref<164x8x256xf32, #tpu.memory_space<vmem>>, vector<1x8x256xf32>
    %76 = vector.shape_cast %75 : vector<1x8x256xf32> to vector<8x256xf32>
    %77 = arith.mulf %74, %76 : vector<8x256xf32>
    %78 = arith.addf %22, %77 : vector<8x256xf32>
    %c93 = arith.constant 93 : index
    %c0_50 = arith.constant 0 : index
    %c0_51 = arith.constant 0 : index
    %79 = vector.load %arg4[%c93, %c0_50, %c0_51] : memref<164x8x256xf32, #tpu.memory_space<vmem>>, vector<1x8x256xf32>
    %80 = vector.shape_cast %79 : vector<1x8x256xf32> to vector<8x256xf32>
    %81 = arith.mulf %74, %80 : vector<8x256xf32>
    %82 = arith.addf %73, %81 : vector<8x256xf32>
    %c0_52 = arith.constant 0 : index
    %c78 = arith.constant 78 : index
    %83 = vector.load %arg11[%c0_52, %c78] : memref<8x512xf32, #tpu.memory_space<vmem>>, vector<8x256xf32>
    %c35 = arith.constant 35 : index
    %c0_53 = arith.constant 0 : index
    %c0_54 = arith.constant 0 : index
    %84 = vector.load %arg4[%c35, %c0_53, %c0_54] : memref<164x8x256xf32, #tpu.memory_space<vmem>>, vector<1x8x256xf32>
    %85 = vector.shape_cast %84 : vector<1x8x256xf32> to vector<8x256xf32>
    %86 = arith.mulf %83, %85 : vector<8x256xf32>
    %87 = arith.addf %78, %86 : vector<8x256xf32>
    %c94 = arith.constant 94 : index
    %c0_55 = arith.constant 0 : index
    %c0_56 = arith.constant 0 : index
    %88 = vector.load %arg4[%c94, %c0_55, %c0_56] : memref<164x8x256xf32, #tpu.memory_space<vmem>>, vector<1x8x256xf32>
    %89 = vector.shape_cast %88 : vector<1x8x256xf32> to vector<8x256xf32>
    %90 = arith.mulf %83, %89 : vector<8x256xf32>
    %91 = arith.addf %82, %90 : vector<8x256xf32>
    %c0_57 = arith.constant 0 : index
    %c79 = arith.constant 79 : index
    %92 = vector.load %arg11[%c0_57, %c79] : memref<8x512xf32, #tpu.memory_space<vmem>>, vector<8x256xf32>
    %c36 = arith.constant 36 : index
    %c0_58 = arith.constant 0 : index
    %c0_59 = arith.constant 0 : index
    %93 = vector.load %arg4[%c36, %c0_58, %c0_59] : memref<164x8x256xf32, #tpu.memory_space<vmem>>, vector<1x8x256xf32>
    %94 = vector.shape_cast %93 : vector<1x8x256xf32> to vector<8x256xf32>
    %95 = arith.mulf %92, %94 : vector<8x256xf32>
    %96 = arith.addf %87, %95 : vector<8x256xf32>
    %c95 = arith.constant 95 : index
    %c0_60 = arith.constant 0 : index
    %c0_61 = arith.constant 0 : index
    %97 = vector.load %arg4[%c95, %c0_60, %c0_61] : memref<164x8x256xf32, #tpu.memory_space<vmem>>, vector<1x8x256xf32>
    %98 = vector.shape_cast %97 : vector<1x8x256xf32> to vector<8x256xf32>
    %99 = arith.mulf %92, %98 : vector<8x256xf32>
    %100 = arith.addf %91, %99 : vector<8x256xf32>
    %c0_62 = arith.constant 0 : index
    %c80 = arith.constant 80 : index
    %101 = vector.load %arg11[%c0_62, %c80] : memref<8x512xf32, #tpu.memory_space<vmem>>, vector<8x256xf32>
    %c37 = arith.constant 37 : index
    %c0_63 = arith.constant 0 : index
    %c0_64 = arith.constant 0 : index
    %102 = vector.load %arg4[%c37, %c0_63, %c0_64] : memref<164x8x256xf32, #tpu.memory_space<vmem>>, vector<1x8x256xf32>
    %103 = vector.shape_cast %102 : vector<1x8x256xf32> to vector<8x256xf32>
    %104 = arith.mulf %101, %103 : vector<8x256xf32>
    %105 = arith.addf %96, %104 : vector<8x256xf32>
    %c96 = arith.constant 96 : index
    %c0_65 = arith.constant 0 : index
    %c0_66 = arith.constant 0 : index
    %106 = vector.load %arg4[%c96, %c0_65, %c0_66] : memref<164x8x256xf32, #tpu.memory_space<vmem>>, vector<1x8x256xf32>
    %107 = vector.shape_cast %106 : vector<1x8x256xf32> to vector<8x256xf32>
    %108 = arith.mulf %101, %107 : vector<8x256xf32>
    %109 = arith.addf %100, %108 : vector<8x256xf32>
    %c0_67 = arith.constant 0 : index
    %c81 = arith.constant 81 : index
    %110 = vector.load %arg11[%c0_67, %c81] : memref<8x512xf32, #tpu.memory_space<vmem>>, vector<8x256xf32>
    %c38 = arith.constant 38 : index
    %c0_68 = arith.constant 0 : index
    %c0_69 = arith.constant 0 : index
    %111 = vector.load %arg4[%c38, %c0_68, %c0_69] : memref<164x8x256xf32, #tpu.memory_space<vmem>>, vector<1x8x256xf32>
    %112 = vector.shape_cast %111 : vector<1x8x256xf32> to vector<8x256xf32>
    %113 = arith.mulf %110, %112 : vector<8x256xf32>
    %114 = arith.addf %105, %113 : vector<8x256xf32>
    %c97 = arith.constant 97 : index
    %c0_70 = arith.constant 0 : index
    %c0_71 = arith.constant 0 : index
    %115 = vector.load %arg4[%c97, %c0_70, %c0_71] : memref<164x8x256xf32, #tpu.memory_space<vmem>>, vector<1x8x256xf32>
    %116 = vector.shape_cast %115 : vector<1x8x256xf32> to vector<8x256xf32>
    %117 = arith.mulf %110, %116 : vector<8x256xf32>
    %118 = arith.addf %109, %117 : vector<8x256xf32>
    %c0_72 = arith.constant 0 : index
    %c82 = arith.constant 82 : index
    %119 = vector.load %arg11[%c0_72, %c82] : memref<8x512xf32, #tpu.memory_space<vmem>>, vector<8x256xf32>
    %c39 = arith.constant 39 : index
    %c0_73 = arith.constant 0 : index
    %c0_74 = arith.constant 0 : index
    %120 = vector.load %arg4[%c39, %c0_73, %c0_74] : memref<164x8x256xf32, #tpu.memory_space<vmem>>, vector<1x8x256xf32>
    %121 = vector.shape_cast %120 : vector<1x8x256xf32> to vector<8x256xf32>
    %122 = arith.mulf %119, %121 : vector<8x256xf32>
    %123 = arith.addf %114, %122 : vector<8x256xf32>
    %c98 = arith.constant 98 : index
    %c0_75 = arith.constant 0 : index
    %c0_76 = arith.constant 0 : index
    %124 = vector.load %arg4[%c98, %c0_75, %c0_76] : memref<164x8x256xf32, #tpu.memory_space<vmem>>, vector<1x8x256xf32>
    %125 = vector.shape_cast %124 : vector<1x8x256xf32> to vector<8x256xf32>
    %126 = arith.mulf %119, %125 : vector<8x256xf32>
    %127 = arith.addf %118, %126 : vector<8x256xf32>
    %c0_77 = arith.constant 0 : index
    %c83_78 = arith.constant 83 : index
    %128 = vector.load %arg11[%c0_77, %c83_78] : memref<8x512xf32, #tpu.memory_space<vmem>>, vector<8x256xf32>
    %c40 = arith.constant 40 : index
    %c0_79 = arith.constant 0 : index
    %c0_80 = arith.constant 0 : index
    %129 = vector.load %arg4[%c40, %c0_79, %c0_80] : memref<164x8x256xf32, #tpu.memory_space<vmem>>, vector<1x8x256xf32>
    %130 = vector.shape_cast %129 : vector<1x8x256xf32> to vector<8x256xf32>
    %131 = arith.mulf %128, %130 : vector<8x256xf32>
    %132 = arith.addf %123, %131 : vector<8x256xf32>
    %c99 = arith.constant 99 : index
    %c0_81 = arith.constant 0 : index
    %c0_82 = arith.constant 0 : index
    %133 = vector.load %arg4[%c99, %c0_81, %c0_82] : memref<164x8x256xf32, #tpu.memory_space<vmem>>, vector<1x8x256xf32>
    %134 = vector.shape_cast %133 : vector<1x8x256xf32> to vector<8x256xf32>
    %135 = arith.mulf %128, %134 : vector<8x256xf32>
    %136 = arith.addf %127, %135 : vector<8x256xf32>
    %c0_83 = arith.constant 0 : index
    %c84_84 = arith.constant 84 : index
    %137 = vector.load %arg11[%c0_83, %c84_84] : memref<8x512xf32, #tpu.memory_space<vmem>>, vector<8x256xf32>
    %c100 = arith.constant 100 : index
    %c0_85 = arith.constant 0 : index
    %c0_86 = arith.constant 0 : index
    %138 = vector.load %arg4[%c100, %c0_85, %c0_86] : memref<164x8x256xf32, #tpu.memory_space<vmem>>, vector<1x8x256xf32>
    %139 = vector.shape_cast %138 : vector<1x8x256xf32> to vector<8x256xf32>
    %140 = arith.mulf %137, %139 : vector<8x256xf32>
    %141 = arith.addf %136, %140 : vector<8x256xf32>
    %c0_87 = arith.constant 0 : index
    %c92_88 = arith.constant 92 : index
    %142 = vector.load %arg11[%c0_87, %c92_88] : memref<8x512xf32, #tpu.memory_space<vmem>>, vector<8x256xf32>
    %c101 = arith.constant 101 : index
    %c0_89 = arith.constant 0 : index
    %c0_90 = arith.constant 0 : index
    %143 = vector.load %arg4[%c101, %c0_89, %c0_90] : memref<164x8x256xf32, #tpu.memory_space<vmem>>, vector<1x8x256xf32>
    %144 = vector.shape_cast %143 : vector<1x8x256xf32> to vector<8x256xf32>
    %145 = arith.mulf %142, %144 : vector<8x256xf32>
    %146 = arith.addf %141, %145 : vector<8x256xf32>
    %c0_91 = arith.constant 0 : index
    %c93_92 = arith.constant 93 : index
    %147 = vector.load %arg11[%c0_91, %c93_92] : memref<8x512xf32, #tpu.memory_space<vmem>>, vector<8x256xf32>
    %c41 = arith.constant 41 : index
    %c0_93 = arith.constant 0 : index
    %c0_94 = arith.constant 0 : index
    %148 = vector.load %arg4[%c41, %c0_93, %c0_94] : memref<164x8x256xf32, #tpu.memory_space<vmem>>, vector<1x8x256xf32>
    %149 = vector.shape_cast %148 : vector<1x8x256xf32> to vector<8x256xf32>
    %150 = arith.mulf %147, %149 : vector<8x256xf32>
    %151 = arith.addf %132, %150 : vector<8x256xf32>
    %c102 = arith.constant 102 : index
    %c0_95 = arith.constant 0 : index
    %c0_96 = arith.constant 0 : index
    %152 = vector.load %arg4[%c102, %c0_95, %c0_96] : memref<164x8x256xf32, #tpu.memory_space<vmem>>, vector<1x8x256xf32>
    %153 = vector.shape_cast %152 : vector<1x8x256xf32> to vector<8x256xf32>
    %154 = arith.mulf %147, %153 : vector<8x256xf32>
    %155 = arith.addf %146, %154 : vector<8x256xf32>
    %c0_97 = arith.constant 0 : index
    %c94_98 = arith.constant 94 : index
    %156 = vector.load %arg11[%c0_97, %c94_98] : memref<8x512xf32, #tpu.memory_space<vmem>>, vector<8x256xf32>
    %c9 = arith.constant 9 : index
    %c0_99 = arith.constant 0 : index
    %c0_100 = arith.constant 0 : index
    %157 = vector.load %arg4[%c9, %c0_99, %c0_100] : memref<164x8x256xf32, #tpu.memory_space<vmem>>, vector<1x8x256xf32>
    %158 = vector.shape_cast %157 : vector<1x8x256xf32> to vector<8x256xf32>
    %159 = arith.mulf %156, %158 : vector<8x256xf32>
    %160 = arith.addf %21, %159 : vector<8x256xf32>
    %c42 = arith.constant 42 : index
    %c0_101 = arith.constant 0 : index
    %c0_102 = arith.constant 0 : index
    %161 = vector.load %arg4[%c42, %c0_101, %c0_102] : memref<164x8x256xf32, #tpu.memory_space<vmem>>, vector<1x8x256xf32>
    %162 = vector.shape_cast %161 : vector<1x8x256xf32> to vector<8x256xf32>
    %163 = arith.mulf %156, %162 : vector<8x256xf32>
    %164 = arith.addf %151, %163 : vector<8x256xf32>
    %c103 = arith.constant 103 : index
    %c0_103 = arith.constant 0 : index
    %c0_104 = arith.constant 0 : index
    %165 = vector.load %arg4[%c103, %c0_103, %c0_104] : memref<164x8x256xf32, #tpu.memory_space<vmem>>, vector<1x8x256xf32>
    %166 = vector.shape_cast %165 : vector<1x8x256xf32> to vector<8x256xf32>
    %167 = arith.mulf %156, %166 : vector<8x256xf32>
    %168 = arith.addf %155, %167 : vector<8x256xf32>
    %c0_105 = arith.constant 0 : index
    %c95_106 = arith.constant 95 : index
    %169 = vector.load %arg11[%c0_105, %c95_106] : memref<8x512xf32, #tpu.memory_space<vmem>>, vector<8x256xf32>
    %c10 = arith.constant 10 : index
    %c0_107 = arith.constant 0 : index
    %c0_108 = arith.constant 0 : index
    %170 = vector.load %arg4[%c10, %c0_107, %c0_108] : memref<164x8x256xf32, #tpu.memory_space<vmem>>, vector<1x8x256xf32>
    %171 = vector.shape_cast %170 : vector<1x8x256xf32> to vector<8x256xf32>
    %172 = arith.mulf %169, %171 : vector<8x256xf32>
    %173 = arith.addf %160, %172 : vector<8x256xf32>
    %c43 = arith.constant 43 : index
    %c0_109 = arith.constant 0 : index
    %c0_110 = arith.constant 0 : index
    %174 = vector.load %arg4[%c43, %c0_109, %c0_110] : memref<164x8x256xf32, #tpu.memory_space<vmem>>, vector<1x8x256xf32>
    %175 = vector.shape_cast %174 : vector<1x8x256xf32> to vector<8x256xf32>
    %176 = arith.mulf %169, %175 : vector<8x256xf32>
    %177 = arith.addf %164, %176 : vector<8x256xf32>
    %c104 = arith.constant 104 : index
    %c0_111 = arith.constant 0 : index
    %c0_112 = arith.constant 0 : index
    %178 = vector.load %arg4[%c104, %c0_111, %c0_112] : memref<164x8x256xf32, #tpu.memory_space<vmem>>, vector<1x8x256xf32>
    %179 = vector.shape_cast %178 : vector<1x8x256xf32> to vector<8x256xf32>
    %180 = arith.mulf %169, %179 : vector<8x256xf32>
    %181 = arith.addf %168, %180 : vector<8x256xf32>
    %c0_113 = arith.constant 0 : index
    %c96_114 = arith.constant 96 : index
    %182 = vector.load %arg11[%c0_113, %c96_114] : memref<8x512xf32, #tpu.memory_space<vmem>>, vector<8x256xf32>
    %c11 = arith.constant 11 : index
    %c0_115 = arith.constant 0 : index
    %c0_116 = arith.constant 0 : index
    %183 = vector.load %arg4[%c11, %c0_115, %c0_116] : memref<164x8x256xf32, #tpu.memory_space<vmem>>, vector<1x8x256xf32>
    %184 = vector.shape_cast %183 : vector<1x8x256xf32> to vector<8x256xf32>
    %185 = arith.mulf %182, %184 : vector<8x256xf32>
    %186 = arith.addf %173, %185 : vector<8x256xf32>
    %c44 = arith.constant 44 : index
    %c0_117 = arith.constant 0 : index
    %c0_118 = arith.constant 0 : index
    %187 = vector.load %arg4[%c44, %c0_117, %c0_118] : memref<164x8x256xf32, #tpu.memory_space<vmem>>, vector<1x8x256xf32>
    %188 = vector.shape_cast %187 : vector<1x8x256xf32> to vector<8x256xf32>
    %189 = arith.mulf %182, %188 : vector<8x256xf32>
    %190 = arith.addf %177, %189 : vector<8x256xf32>
    %c105 = arith.constant 105 : index
    %c0_119 = arith.constant 0 : index
    %c0_120 = arith.constant 0 : index
    %191 = vector.load %arg4[%c105, %c0_119, %c0_120] : memref<164x8x256xf32, #tpu.memory_space<vmem>>, vector<1x8x256xf32>
    %192 = vector.shape_cast %191 : vector<1x8x256xf32> to vector<8x256xf32>
    %193 = arith.mulf %182, %192 : vector<8x256xf32>
    %194 = arith.addf %181, %193 : vector<8x256xf32>
    %c0_121 = arith.constant 0 : index
    %c97_122 = arith.constant 97 : index
    %195 = vector.load %arg11[%c0_121, %c97_122] : memref<8x512xf32, #tpu.memory_space<vmem>>, vector<8x256xf32>
    %c12 = arith.constant 12 : index
    %c0_123 = arith.constant 0 : index
    %c0_124 = arith.constant 0 : index
    %196 = vector.load %arg4[%c12, %c0_123, %c0_124] : memref<164x8x256xf32, #tpu.memory_space<vmem>>, vector<1x8x256xf32>
    %197 = vector.shape_cast %196 : vector<1x8x256xf32> to vector<8x256xf32>
    %198 = arith.mulf %195, %197 : vector<8x256xf32>
    %199 = arith.addf %186, %198 : vector<8x256xf32>
    %c45 = arith.constant 45 : index
    %c0_125 = arith.constant 0 : index
    %c0_126 = arith.constant 0 : index
    %200 = vector.load %arg4[%c45, %c0_125, %c0_126] : memref<164x8x256xf32, #tpu.memory_space<vmem>>, vector<1x8x256xf32>
    %201 = vector.shape_cast %200 : vector<1x8x256xf32> to vector<8x256xf32>
    %202 = arith.mulf %195, %201 : vector<8x256xf32>
    %203 = arith.addf %190, %202 : vector<8x256xf32>
    %c106 = arith.constant 106 : index
    %c0_127 = arith.constant 0 : index
    %c0_128 = arith.constant 0 : index
    %204 = vector.load %arg4[%c106, %c0_127, %c0_128] : memref<164x8x256xf32, #tpu.memory_space<vmem>>, vector<1x8x256xf32>
    %205 = vector.shape_cast %204 : vector<1x8x256xf32> to vector<8x256xf32>
    %206 = arith.mulf %195, %205 : vector<8x256xf32>
    %207 = arith.addf %194, %206 : vector<8x256xf32>
    %c0_129 = arith.constant 0 : index
    %c98_130 = arith.constant 98 : index
    %208 = vector.load %arg11[%c0_129, %c98_130] : memref<8x512xf32, #tpu.memory_space<vmem>>, vector<8x256xf32>
    %c13 = arith.constant 13 : index
    %c0_131 = arith.constant 0 : index
    %c0_132 = arith.constant 0 : index
    %209 = vector.load %arg4[%c13, %c0_131, %c0_132] : memref<164x8x256xf32, #tpu.memory_space<vmem>>, vector<1x8x256xf32>
    %210 = vector.shape_cast %209 : vector<1x8x256xf32> to vector<8x256xf32>
    %211 = arith.mulf %208, %210 : vector<8x256xf32>
    %212 = arith.addf %199, %211 : vector<8x256xf32>
    %c46 = arith.constant 46 : index
    %c0_133 = arith.constant 0 : index
    %c0_134 = arith.constant 0 : index
    %213 = vector.load %arg4[%c46, %c0_133, %c0_134] : memref<164x8x256xf32, #tpu.memory_space<vmem>>, vector<1x8x256xf32>
    %214 = vector.shape_cast %213 : vector<1x8x256xf32> to vector<8x256xf32>
    %215 = arith.mulf %208, %214 : vector<8x256xf32>
    %216 = arith.addf %203, %215 : vector<8x256xf32>
    %c107 = arith.constant 107 : index
    %c0_135 = arith.constant 0 : index
    %c0_136 = arith.constant 0 : index
    %217 = vector.load %arg4[%c107, %c0_135, %c0_136] : memref<164x8x256xf32, #tpu.memory_space<vmem>>, vector<1x8x256xf32>
    %218 = vector.shape_cast %217 : vector<1x8x256xf32> to vector<8x256xf32>
    %219 = arith.mulf %208, %218 : vector<8x256xf32>
    %220 = arith.addf %207, %219 : vector<8x256xf32>
    %c0_137 = arith.constant 0 : index
    %c99_138 = arith.constant 99 : index
    %221 = vector.load %arg11[%c0_137, %c99_138] : memref<8x512xf32, #tpu.memory_space<vmem>>, vector<8x256xf32>
    %c47 = arith.constant 47 : index
    %c0_139 = arith.constant 0 : index
    %c0_140 = arith.constant 0 : index
    %222 = vector.load %arg4[%c47, %c0_139, %c0_140] : memref<164x8x256xf32, #tpu.memory_space<vmem>>, vector<1x8x256xf32>
    %223 = vector.shape_cast %222 : vector<1x8x256xf32> to vector<8x256xf32>
    %224 = arith.mulf %221, %223 : vector<8x256xf32>
    %225 = arith.addf %216, %224 : vector<8x256xf32>
    %c108 = arith.constant 108 : index
    %c0_141 = arith.constant 0 : index
    %c0_142 = arith.constant 0 : index
    %226 = vector.load %arg4[%c108, %c0_141, %c0_142] : memref<164x8x256xf32, #tpu.memory_space<vmem>>, vector<1x8x256xf32>
    %227 = vector.shape_cast %226 : vector<1x8x256xf32> to vector<8x256xf32>
    %228 = arith.mulf %221, %227 : vector<8x256xf32>
    %229 = arith.addf %220, %228 : vector<8x256xf32>
    %c0_143 = arith.constant 0 : index
    %c100_144 = arith.constant 100 : index
    %230 = vector.load %arg11[%c0_143, %c100_144] : memref<8x512xf32, #tpu.memory_space<vmem>>, vector<8x256xf32>
    %c109 = arith.constant 109 : index
    %c0_145 = arith.constant 0 : index
    %c0_146 = arith.constant 0 : index
    %231 = vector.load %arg4[%c109, %c0_145, %c0_146] : memref<164x8x256xf32, #tpu.memory_space<vmem>>, vector<1x8x256xf32>
    %232 = vector.shape_cast %231 : vector<1x8x256xf32> to vector<8x256xf32>
    %233 = arith.mulf %230, %232 : vector<8x256xf32>
    %234 = arith.addf %229, %233 : vector<8x256xf32>
    %c0_147 = arith.constant 0 : index
    %c108_148 = arith.constant 108 : index
    %235 = vector.load %arg11[%c0_147, %c108_148] : memref<8x512xf32, #tpu.memory_space<vmem>>, vector<8x256xf32>
    %c110 = arith.constant 110 : index
    %c0_149 = arith.constant 0 : index
    %c0_150 = arith.constant 0 : index
    %236 = vector.load %arg4[%c110, %c0_149, %c0_150] : memref<164x8x256xf32, #tpu.memory_space<vmem>>, vector<1x8x256xf32>
    %237 = vector.shape_cast %236 : vector<1x8x256xf32> to vector<8x256xf32>
    %238 = arith.mulf %235, %237 : vector<8x256xf32>
    %239 = arith.addf %234, %238 : vector<8x256xf32>
    %c0_151 = arith.constant 0 : index
    %c109_152 = arith.constant 109 : index
    %240 = vector.load %arg11[%c0_151, %c109_152] : memref<8x512xf32, #tpu.memory_space<vmem>>, vector<8x256xf32>
    %c48 = arith.constant 48 : index
    %c0_153 = arith.constant 0 : index
    %c0_154 = arith.constant 0 : index
    %241 = vector.load %arg4[%c48, %c0_153, %c0_154] : memref<164x8x256xf32, #tpu.memory_space<vmem>>, vector<1x8x256xf32>
    %242 = vector.shape_cast %241 : vector<1x8x256xf32> to vector<8x256xf32>
    %243 = arith.mulf %240, %242 : vector<8x256xf32>
    %244 = arith.addf %225, %243 : vector<8x256xf32>
    %c111 = arith.constant 111 : index
    %c0_155 = arith.constant 0 : index
    %c0_156 = arith.constant 0 : index
    %245 = vector.load %arg4[%c111, %c0_155, %c0_156] : memref<164x8x256xf32, #tpu.memory_space<vmem>>, vector<1x8x256xf32>
    %246 = vector.shape_cast %245 : vector<1x8x256xf32> to vector<8x256xf32>
    %247 = arith.mulf %240, %246 : vector<8x256xf32>
    %248 = arith.addf %239, %247 : vector<8x256xf32>
    %c0_157 = arith.constant 0 : index
    %c110_158 = arith.constant 110 : index
    %249 = vector.load %arg11[%c0_157, %c110_158] : memref<8x512xf32, #tpu.memory_space<vmem>>, vector<8x256xf32>
    %c14 = arith.constant 14 : index
    %c0_159 = arith.constant 0 : index
    %c0_160 = arith.constant 0 : index
    %250 = vector.load %arg4[%c14, %c0_159, %c0_160] : memref<164x8x256xf32, #tpu.memory_space<vmem>>, vector<1x8x256xf32>
    %251 = vector.shape_cast %250 : vector<1x8x256xf32> to vector<8x256xf32>
    %252 = arith.mulf %249, %251 : vector<8x256xf32>
    %253 = arith.addf %212, %252 : vector<8x256xf32>
    %c49 = arith.constant 49 : index
    %c0_161 = arith.constant 0 : index
    %c0_162 = arith.constant 0 : index
    %254 = vector.load %arg4[%c49, %c0_161, %c0_162] : memref<164x8x256xf32, #tpu.memory_space<vmem>>, vector<1x8x256xf32>
    %255 = vector.shape_cast %254 : vector<1x8x256xf32> to vector<8x256xf32>
    %256 = arith.mulf %249, %255 : vector<8x256xf32>
    %257 = arith.addf %244, %256 : vector<8x256xf32>
    %c112 = arith.constant 112 : index
    %c0_163 = arith.constant 0 : index
    %c0_164 = arith.constant 0 : index
    %258 = vector.load %arg4[%c112, %c0_163, %c0_164] : memref<164x8x256xf32, #tpu.memory_space<vmem>>, vector<1x8x256xf32>
    %259 = vector.shape_cast %258 : vector<1x8x256xf32> to vector<8x256xf32>
    %260 = arith.mulf %249, %259 : vector<8x256xf32>
    %261 = arith.addf %248, %260 : vector<8x256xf32>
    %c0_165 = arith.constant 0 : index
    %c111_166 = arith.constant 111 : index
    %262 = vector.load %arg11[%c0_165, %c111_166] : memref<8x512xf32, #tpu.memory_space<vmem>>, vector<8x256xf32>
    %c0_167 = arith.constant 0 : index
    %c0_168 = arith.constant 0 : index
    %c0_169 = arith.constant 0 : index
    %263 = vector.load %arg4[%c0_167, %c0_168, %c0_169] : memref<164x8x256xf32, #tpu.memory_space<vmem>>, vector<1x8x256xf32>
    %264 = vector.shape_cast %263 : vector<1x8x256xf32> to vector<8x256xf32>
    %265 = arith.mulf %262, %264 : vector<8x256xf32>
    %266 = arith.addf %20, %265 : vector<8x256xf32>
    %c15 = arith.constant 15 : index
    %c0_170 = arith.constant 0 : index
    %c0_171 = arith.constant 0 : index
    %267 = vector.load %arg4[%c15, %c0_170, %c0_171] : memref<164x8x256xf32, #tpu.memory_space<vmem>>, vector<1x8x256xf32>
    %268 = vector.shape_cast %267 : vector<1x8x256xf32> to vector<8x256xf32>
    %269 = arith.mulf %262, %268 : vector<8x256xf32>
    %270 = arith.addf %253, %269 : vector<8x256xf32>
    %c50 = arith.constant 50 : index
    %c0_172 = arith.constant 0 : index
    %c0_173 = arith.constant 0 : index
    %271 = vector.load %arg4[%c50, %c0_172, %c0_173] : memref<164x8x256xf32, #tpu.memory_space<vmem>>, vector<1x8x256xf32>
    %272 = vector.shape_cast %271 : vector<1x8x256xf32> to vector<8x256xf32>
    %273 = arith.mulf %262, %272 : vector<8x256xf32>
    %274 = arith.addf %257, %273 : vector<8x256xf32>
    %c113 = arith.constant 113 : index
    %c0_174 = arith.constant 0 : index
    %c0_175 = arith.constant 0 : index
    %275 = vector.load %arg4[%c113, %c0_174, %c0_175] : memref<164x8x256xf32, #tpu.memory_space<vmem>>, vector<1x8x256xf32>
    %276 = vector.shape_cast %275 : vector<1x8x256xf32> to vector<8x256xf32>
    %277 = arith.mulf %262, %276 : vector<8x256xf32>
    %278 = arith.addf %261, %277 : vector<8x256xf32>
    %c0_176 = arith.constant 0 : index
    %c112_177 = arith.constant 112 : index
    %279 = vector.load %arg11[%c0_176, %c112_177] : memref<8x512xf32, #tpu.memory_space<vmem>>, vector<8x256xf32>
    %c1 = arith.constant 1 : index
    %c0_178 = arith.constant 0 : index
    %c0_179 = arith.constant 0 : index
    %280 = vector.load %arg4[%c1, %c0_178, %c0_179] : memref<164x8x256xf32, #tpu.memory_space<vmem>>, vector<1x8x256xf32>
    %281 = vector.shape_cast %280 : vector<1x8x256xf32> to vector<8x256xf32>
    %282 = arith.mulf %279, %281 : vector<8x256xf32>
    %283 = arith.addf %266, %282 : vector<8x256xf32>
    %c16 = arith.constant 16 : index
    %c0_180 = arith.constant 0 : index
    %c0_181 = arith.constant 0 : index
    %284 = vector.load %arg4[%c16, %c0_180, %c0_181] : memref<164x8x256xf32, #tpu.memory_space<vmem>>, vector<1x8x256xf32>
    %285 = vector.shape_cast %284 : vector<1x8x256xf32> to vector<8x256xf32>
    %286 = arith.mulf %279, %285 : vector<8x256xf32>
    %287 = arith.addf %270, %286 : vector<8x256xf32>
    %c51 = arith.constant 51 : index
    %c0_182 = arith.constant 0 : index
    %c0_183 = arith.constant 0 : index
    %288 = vector.load %arg4[%c51, %c0_182, %c0_183] : memref<164x8x256xf32, #tpu.memory_space<vmem>>, vector<1x8x256xf32>
    %289 = vector.shape_cast %288 : vector<1x8x256xf32> to vector<8x256xf32>
    %290 = arith.mulf %279, %289 : vector<8x256xf32>
    %291 = arith.addf %274, %290 : vector<8x256xf32>
    %c114 = arith.constant 114 : index
    %c0_184 = arith.constant 0 : index
    %c0_185 = arith.constant 0 : index
    %292 = vector.load %arg4[%c114, %c0_184, %c0_185] : memref<164x8x256xf32, #tpu.memory_space<vmem>>, vector<1x8x256xf32>
    %293 = vector.shape_cast %292 : vector<1x8x256xf32> to vector<8x256xf32>
    %294 = arith.mulf %279, %293 : vector<8x256xf32>
    %295 = arith.addf %278, %294 : vector<8x256xf32>
    %c0_186 = arith.constant 0 : index
    %c113_187 = arith.constant 113 : index
    %296 = vector.load %arg11[%c0_186, %c113_187] : memref<8x512xf32, #tpu.memory_space<vmem>>, vector<8x256xf32>
    %c2 = arith.constant 2 : index
    %c0_188 = arith.constant 0 : index
    %c0_189 = arith.constant 0 : index
    %297 = vector.load %arg4[%c2, %c0_188, %c0_189] : memref<164x8x256xf32, #tpu.memory_space<vmem>>, vector<1x8x256xf32>
    %298 = vector.shape_cast %297 : vector<1x8x256xf32> to vector<8x256xf32>
    %299 = arith.mulf %296, %298 : vector<8x256xf32>
    %300 = arith.addf %283, %299 : vector<8x256xf32>
    %c17 = arith.constant 17 : index
    %c0_190 = arith.constant 0 : index
    %c0_191 = arith.constant 0 : index
    %301 = vector.load %arg4[%c17, %c0_190, %c0_191] : memref<164x8x256xf32, #tpu.memory_space<vmem>>, vector<1x8x256xf32>
    %302 = vector.shape_cast %301 : vector<1x8x256xf32> to vector<8x256xf32>
    %303 = arith.mulf %296, %302 : vector<8x256xf32>
    %304 = arith.addf %287, %303 : vector<8x256xf32>
    %c52 = arith.constant 52 : index
    %c0_192 = arith.constant 0 : index
    %c0_193 = arith.constant 0 : index
    %305 = vector.load %arg4[%c52, %c0_192, %c0_193] : memref<164x8x256xf32, #tpu.memory_space<vmem>>, vector<1x8x256xf32>
    %306 = vector.shape_cast %305 : vector<1x8x256xf32> to vector<8x256xf32>
    %307 = arith.mulf %296, %306 : vector<8x256xf32>
    %308 = arith.addf %291, %307 : vector<8x256xf32>
    %c115 = arith.constant 115 : index
    %c0_194 = arith.constant 0 : index
    %c0_195 = arith.constant 0 : index
    %309 = vector.load %arg4[%c115, %c0_194, %c0_195] : memref<164x8x256xf32, #tpu.memory_space<vmem>>, vector<1x8x256xf32>
    %310 = vector.shape_cast %309 : vector<1x8x256xf32> to vector<8x256xf32>
    %311 = arith.mulf %296, %310 : vector<8x256xf32>
    %312 = arith.addf %295, %311 : vector<8x256xf32>
    %c0_196 = arith.constant 0 : index
    %c114_197 = arith.constant 114 : index
    %313 = vector.load %arg11[%c0_196, %c114_197] : memref<8x512xf32, #tpu.memory_space<vmem>>, vector<8x256xf32>
    %c18 = arith.constant 18 : index
    %c0_198 = arith.constant 0 : index
    %c0_199 = arith.constant 0 : index
    %314 = vector.load %arg4[%c18, %c0_198, %c0_199] : memref<164x8x256xf32, #tpu.memory_space<vmem>>, vector<1x8x256xf32>
    %315 = vector.shape_cast %314 : vector<1x8x256xf32> to vector<8x256xf32>
    %316 = arith.mulf %313, %315 : vector<8x256xf32>
    %317 = arith.addf %304, %316 : vector<8x256xf32>
    %c53 = arith.constant 53 : index
    %c0_200 = arith.constant 0 : index
    %c0_201 = arith.constant 0 : index
    %318 = vector.load %arg4[%c53, %c0_200, %c0_201] : memref<164x8x256xf32, #tpu.memory_space<vmem>>, vector<1x8x256xf32>
    %319 = vector.shape_cast %318 : vector<1x8x256xf32> to vector<8x256xf32>
    %320 = arith.mulf %313, %319 : vector<8x256xf32>
    %321 = arith.addf %308, %320 : vector<8x256xf32>
    %c116 = arith.constant 116 : index
    %c0_202 = arith.constant 0 : index
    %c0_203 = arith.constant 0 : index
    %322 = vector.load %arg4[%c116, %c0_202, %c0_203] : memref<164x8x256xf32, #tpu.memory_space<vmem>>, vector<1x8x256xf32>
    %323 = vector.shape_cast %322 : vector<1x8x256xf32> to vector<8x256xf32>
    %324 = arith.mulf %313, %323 : vector<8x256xf32>
    %325 = arith.addf %312, %324 : vector<8x256xf32>
    %c0_204 = arith.constant 0 : index
    %c115_205 = arith.constant 115 : index
    %326 = vector.load %arg11[%c0_204, %c115_205] : memref<8x512xf32, #tpu.memory_space<vmem>>, vector<8x256xf32>
    %c54 = arith.constant 54 : index
    %c0_206 = arith.constant 0 : index
    %c0_207 = arith.constant 0 : index
    %327 = vector.load %arg4[%c54, %c0_206, %c0_207] : memref<164x8x256xf32, #tpu.memory_space<vmem>>, vector<1x8x256xf32>
    %328 = vector.shape_cast %327 : vector<1x8x256xf32> to vector<8x256xf32>
    %329 = arith.mulf %326, %328 : vector<8x256xf32>
    %330 = arith.addf %321, %329 : vector<8x256xf32>
    %c117 = arith.constant 117 : index
    %c0_208 = arith.constant 0 : index
    %c0_209 = arith.constant 0 : index
    %331 = vector.load %arg4[%c117, %c0_208, %c0_209] : memref<164x8x256xf32, #tpu.memory_space<vmem>>, vector<1x8x256xf32>
    %332 = vector.shape_cast %331 : vector<1x8x256xf32> to vector<8x256xf32>
    %333 = arith.mulf %326, %332 : vector<8x256xf32>
    %334 = arith.addf %325, %333 : vector<8x256xf32>
    %c0_210 = arith.constant 0 : index
    %c116_211 = arith.constant 116 : index
    %335 = vector.load %arg11[%c0_210, %c116_211] : memref<8x512xf32, #tpu.memory_space<vmem>>, vector<8x256xf32>
    %c118 = arith.constant 118 : index
    %c0_212 = arith.constant 0 : index
    %c0_213 = arith.constant 0 : index
    %336 = vector.load %arg4[%c118, %c0_212, %c0_213] : memref<164x8x256xf32, #tpu.memory_space<vmem>>, vector<1x8x256xf32>
    %337 = vector.shape_cast %336 : vector<1x8x256xf32> to vector<8x256xf32>
    %338 = arith.mulf %335, %337 : vector<8x256xf32>
    %339 = arith.addf %334, %338 : vector<8x256xf32>
    %c0_214 = arith.constant 0 : index
    %c124 = arith.constant 124 : index
    %340 = vector.load %arg11[%c0_214, %c124] : memref<8x512xf32, #tpu.memory_space<vmem>>, vector<8x256xf32>
    %c119 = arith.constant 119 : index
    %c0_215 = arith.constant 0 : index
    %c0_216 = arith.constant 0 : index
    %341 = vector.load %arg4[%c119, %c0_215, %c0_216] : memref<164x8x256xf32, #tpu.memory_space<vmem>>, vector<1x8x256xf32>
    %342 = vector.shape_cast %341 : vector<1x8x256xf32> to vector<8x256xf32>
    %343 = arith.mulf %340, %342 : vector<8x256xf32>
    %344 = arith.addf %339, %343 : vector<8x256xf32>
    %c0_217 = arith.constant 0 : index
    %c125 = arith.constant 125 : index
    %345 = vector.load %arg11[%c0_217, %c125] : memref<8x512xf32, #tpu.memory_space<vmem>>, vector<8x256xf32>
    %c55 = arith.constant 55 : index
    %c0_218 = arith.constant 0 : index
    %c0_219 = arith.constant 0 : index
    %346 = vector.load %arg4[%c55, %c0_218, %c0_219] : memref<164x8x256xf32, #tpu.memory_space<vmem>>, vector<1x8x256xf32>
    %347 = vector.shape_cast %346 : vector<1x8x256xf32> to vector<8x256xf32>
    %348 = arith.mulf %345, %347 : vector<8x256xf32>
    %349 = arith.addf %330, %348 : vector<8x256xf32>
    %c120 = arith.constant 120 : index
    %c0_220 = arith.constant 0 : index
    %c0_221 = arith.constant 0 : index
    %350 = vector.load %arg4[%c120, %c0_220, %c0_221] : memref<164x8x256xf32, #tpu.memory_space<vmem>>, vector<1x8x256xf32>
    %351 = vector.shape_cast %350 : vector<1x8x256xf32> to vector<8x256xf32>
    %352 = arith.mulf %345, %351 : vector<8x256xf32>
    %353 = arith.addf %344, %352 : vector<8x256xf32>
    %c0_222 = arith.constant 0 : index
    %c126 = arith.constant 126 : index
    %354 = vector.load %arg11[%c0_222, %c126] : memref<8x512xf32, #tpu.memory_space<vmem>>, vector<8x256xf32>
    %c19 = arith.constant 19 : index
    %c0_223 = arith.constant 0 : index
    %c0_224 = arith.constant 0 : index
    %355 = vector.load %arg4[%c19, %c0_223, %c0_224] : memref<164x8x256xf32, #tpu.memory_space<vmem>>, vector<1x8x256xf32>
    %356 = vector.shape_cast %355 : vector<1x8x256xf32> to vector<8x256xf32>
    %357 = arith.mulf %354, %356 : vector<8x256xf32>
    %358 = arith.addf %317, %357 : vector<8x256xf32>
    %c56 = arith.constant 56 : index
    %c0_225 = arith.constant 0 : index
    %c0_226 = arith.constant 0 : index
    %359 = vector.load %arg4[%c56, %c0_225, %c0_226] : memref<164x8x256xf32, #tpu.memory_space<vmem>>, vector<1x8x256xf32>
    %360 = vector.shape_cast %359 : vector<1x8x256xf32> to vector<8x256xf32>
    %361 = arith.mulf %354, %360 : vector<8x256xf32>
    %362 = arith.addf %349, %361 : vector<8x256xf32>
    %c121 = arith.constant 121 : index
    %c0_227 = arith.constant 0 : index
    %c0_228 = arith.constant 0 : index
    %363 = vector.load %arg4[%c121, %c0_227, %c0_228] : memref<164x8x256xf32, #tpu.memory_space<vmem>>, vector<1x8x256xf32>
    %364 = vector.shape_cast %363 : vector<1x8x256xf32> to vector<8x256xf32>
    %365 = arith.mulf %354, %364 : vector<8x256xf32>
    %366 = arith.addf %353, %365 : vector<8x256xf32>
    %c0_229 = arith.constant 0 : index
    %c127 = arith.constant 127 : index
    %367 = vector.load %arg11[%c0_229, %c127] : memref<8x512xf32, #tpu.memory_space<vmem>>, vector<8x256xf32>
    %c3 = arith.constant 3 : index
    %c0_230 = arith.constant 0 : index
    %c0_231 = arith.constant 0 : index
    %368 = vector.load %arg4[%c3, %c0_230, %c0_231] : memref<164x8x256xf32, #tpu.memory_space<vmem>>, vector<1x8x256xf32>
    %369 = vector.shape_cast %368 : vector<1x8x256xf32> to vector<8x256xf32>
    %370 = arith.mulf %367, %369 : vector<8x256xf32>
    %371 = arith.addf %300, %370 : vector<8x256xf32>
    %c20 = arith.constant 20 : index
    %c0_232 = arith.constant 0 : index
    %c0_233 = arith.constant 0 : index
    %372 = vector.load %arg4[%c20, %c0_232, %c0_233] : memref<164x8x256xf32, #tpu.memory_space<vmem>>, vector<1x8x256xf32>
    %373 = vector.shape_cast %372 : vector<1x8x256xf32> to vector<8x256xf32>
    %374 = arith.mulf %367, %373 : vector<8x256xf32>
    %375 = arith.addf %358, %374 : vector<8x256xf32>
    %c57 = arith.constant 57 : index
    %c0_234 = arith.constant 0 : index
    %c0_235 = arith.constant 0 : index
    %376 = vector.load %arg4[%c57, %c0_234, %c0_235] : memref<164x8x256xf32, #tpu.memory_space<vmem>>, vector<1x8x256xf32>
    %377 = vector.shape_cast %376 : vector<1x8x256xf32> to vector<8x256xf32>
    %378 = arith.mulf %367, %377 : vector<8x256xf32>
    %379 = arith.addf %362, %378 : vector<8x256xf32>
    %c122 = arith.constant 122 : index
    %c0_236 = arith.constant 0 : index
    %c0_237 = arith.constant 0 : index
    %380 = vector.load %arg4[%c122, %c0_236, %c0_237] : memref<164x8x256xf32, #tpu.memory_space<vmem>>, vector<1x8x256xf32>
    %381 = vector.shape_cast %380 : vector<1x8x256xf32> to vector<8x256xf32>
    %382 = arith.mulf %367, %381 : vector<8x256xf32>
    %383 = arith.addf %366, %382 : vector<8x256xf32>
    %c0_238 = arith.constant 0 : index
    %c128_239 = arith.constant 128 : index
    %384 = vector.load %arg11[%c0_238, %c128_239] : memref<8x512xf32, #tpu.memory_space<vmem>>, vector<8x256xf32>
    %c4 = arith.constant 4 : index
    %c0_240 = arith.constant 0 : index
    %c0_241 = arith.constant 0 : index
    %385 = vector.load %arg4[%c4, %c0_240, %c0_241] : memref<164x8x256xf32, #tpu.memory_space<vmem>>, vector<1x8x256xf32>
    %386 = vector.shape_cast %385 : vector<1x8x256xf32> to vector<8x256xf32>
    %387 = arith.mulf %384, %386 : vector<8x256xf32>
    %388 = arith.addf %371, %387 : vector<8x256xf32>
    %c21 = arith.constant 21 : index
    %c0_242 = arith.constant 0 : index
    %c0_243 = arith.constant 0 : index
    %389 = vector.load %arg4[%c21, %c0_242, %c0_243] : memref<164x8x256xf32, #tpu.memory_space<vmem>>, vector<1x8x256xf32>
    %390 = vector.shape_cast %389 : vector<1x8x256xf32> to vector<8x256xf32>
    %391 = arith.mulf %384, %390 : vector<8x256xf32>
    %392 = arith.addf %375, %391 : vector<8x256xf32>
    %c58 = arith.constant 58 : index
    %c0_244 = arith.constant 0 : index
    %c0_245 = arith.constant 0 : index
    %393 = vector.load %arg4[%c58, %c0_244, %c0_245] : memref<164x8x256xf32, #tpu.memory_space<vmem>>, vector<1x8x256xf32>
    %394 = vector.shape_cast %393 : vector<1x8x256xf32> to vector<8x256xf32>
    %395 = arith.mulf %384, %394 : vector<8x256xf32>
    %396 = arith.addf %379, %395 : vector<8x256xf32>
    %c123 = arith.constant 123 : index
    %c0_246 = arith.constant 0 : index
    %c0_247 = arith.constant 0 : index
    %397 = vector.load %arg4[%c123, %c0_246, %c0_247] : memref<164x8x256xf32, #tpu.memory_space<vmem>>, vector<1x8x256xf32>
    %398 = vector.shape_cast %397 : vector<1x8x256xf32> to vector<8x256xf32>
    %399 = arith.mulf %384, %398 : vector<8x256xf32>
    %400 = arith.addf %383, %399 : vector<8x256xf32>
    %c0_248 = arith.constant 0 : index
    %c129 = arith.constant 129 : index
    %401 = vector.load %arg11[%c0_248, %c129] : memref<8x512xf32, #tpu.memory_space<vmem>>, vector<8x256xf32>
    %c5 = arith.constant 5 : index
    %c0_249 = arith.constant 0 : index
    %c0_250 = arith.constant 0 : index
    %402 = vector.load %arg4[%c5, %c0_249, %c0_250] : memref<164x8x256xf32, #tpu.memory_space<vmem>>, vector<1x8x256xf32>
    %403 = vector.shape_cast %402 : vector<1x8x256xf32> to vector<8x256xf32>
    %404 = arith.mulf %401, %403 : vector<8x256xf32>
    %405 = arith.addf %388, %404 : vector<8x256xf32>
    %c22 = arith.constant 22 : index
    %c0_251 = arith.constant 0 : index
    %c0_252 = arith.constant 0 : index
    %406 = vector.load %arg4[%c22, %c0_251, %c0_252] : memref<164x8x256xf32, #tpu.memory_space<vmem>>, vector<1x8x256xf32>
    %407 = vector.shape_cast %406 : vector<1x8x256xf32> to vector<8x256xf32>
    %408 = arith.mulf %401, %407 : vector<8x256xf32>
    %409 = arith.addf %392, %408 : vector<8x256xf32>
    %c59 = arith.constant 59 : index
    %c0_253 = arith.constant 0 : index
    %c0_254 = arith.constant 0 : index
    %410 = vector.load %arg4[%c59, %c0_253, %c0_254] : memref<164x8x256xf32, #tpu.memory_space<vmem>>, vector<1x8x256xf32>
    %411 = vector.shape_cast %410 : vector<1x8x256xf32> to vector<8x256xf32>
    %412 = arith.mulf %401, %411 : vector<8x256xf32>
    %413 = arith.addf %396, %412 : vector<8x256xf32>
    %c124_255 = arith.constant 124 : index
    %c0_256 = arith.constant 0 : index
    %c0_257 = arith.constant 0 : index
    %414 = vector.load %arg4[%c124_255, %c0_256, %c0_257] : memref<164x8x256xf32, #tpu.memory_space<vmem>>, vector<1x8x256xf32>
    %415 = vector.shape_cast %414 : vector<1x8x256xf32> to vector<8x256xf32>
    %416 = arith.mulf %401, %415 : vector<8x256xf32>
    %417 = arith.addf %400, %416 : vector<8x256xf32>
    %c0_258 = arith.constant 0 : index
    %c130 = arith.constant 130 : index
    %418 = vector.load %arg11[%c0_258, %c130] : memref<8x512xf32, #tpu.memory_space<vmem>>, vector<8x256xf32>
    %c23 = arith.constant 23 : index
    %c0_259 = arith.constant 0 : index
    %c0_260 = arith.constant 0 : index
    %419 = vector.load %arg4[%c23, %c0_259, %c0_260] : memref<164x8x256xf32, #tpu.memory_space<vmem>>, vector<1x8x256xf32>
    %420 = vector.shape_cast %419 : vector<1x8x256xf32> to vector<8x256xf32>
    %421 = arith.mulf %418, %420 : vector<8x256xf32>
    %422 = arith.addf %409, %421 : vector<8x256xf32>
    %c60_261 = arith.constant 60 : index
    %c0_262 = arith.constant 0 : index
    %c0_263 = arith.constant 0 : index
    %423 = vector.load %arg4[%c60_261, %c0_262, %c0_263] : memref<164x8x256xf32, #tpu.memory_space<vmem>>, vector<1x8x256xf32>
    %424 = vector.shape_cast %423 : vector<1x8x256xf32> to vector<8x256xf32>
    %425 = arith.mulf %418, %424 : vector<8x256xf32>
    %426 = arith.addf %413, %425 : vector<8x256xf32>
    %c125_264 = arith.constant 125 : index
    %c0_265 = arith.constant 0 : index
    %c0_266 = arith.constant 0 : index
    %427 = vector.load %arg4[%c125_264, %c0_265, %c0_266] : memref<164x8x256xf32, #tpu.memory_space<vmem>>, vector<1x8x256xf32>
    %428 = vector.shape_cast %427 : vector<1x8x256xf32> to vector<8x256xf32>
    %429 = arith.mulf %418, %428 : vector<8x256xf32>
    %430 = arith.addf %417, %429 : vector<8x256xf32>
    %c0_267 = arith.constant 0 : index
    %c131 = arith.constant 131 : index
    %431 = vector.load %arg11[%c0_267, %c131] : memref<8x512xf32, #tpu.memory_space<vmem>>, vector<8x256xf32>
    %c61_268 = arith.constant 61 : index
    %c0_269 = arith.constant 0 : index
    %c0_270 = arith.constant 0 : index
    %432 = vector.load %arg4[%c61_268, %c0_269, %c0_270] : memref<164x8x256xf32, #tpu.memory_space<vmem>>, vector<1x8x256xf32>
    %433 = vector.shape_cast %432 : vector<1x8x256xf32> to vector<8x256xf32>
    %434 = arith.mulf %431, %433 : vector<8x256xf32>
    %435 = arith.addf %426, %434 : vector<8x256xf32>
    %c126_271 = arith.constant 126 : index
    %c0_272 = arith.constant 0 : index
    %c0_273 = arith.constant 0 : index
    %436 = vector.load %arg4[%c126_271, %c0_272, %c0_273] : memref<164x8x256xf32, #tpu.memory_space<vmem>>, vector<1x8x256xf32>
    %437 = vector.shape_cast %436 : vector<1x8x256xf32> to vector<8x256xf32>
    %438 = arith.mulf %431, %437 : vector<8x256xf32>
    %439 = arith.addf %430, %438 : vector<8x256xf32>
    %c0_274 = arith.constant 0 : index
    %c132 = arith.constant 132 : index
    %440 = vector.load %arg11[%c0_274, %c132] : memref<8x512xf32, #tpu.memory_space<vmem>>, vector<8x256xf32>
    %c127_275 = arith.constant 127 : index
    %c0_276 = arith.constant 0 : index
    %c0_277 = arith.constant 0 : index
    %441 = vector.load %arg4[%c127_275, %c0_276, %c0_277] : memref<164x8x256xf32, #tpu.memory_space<vmem>>, vector<1x8x256xf32>
    %442 = vector.shape_cast %441 : vector<1x8x256xf32> to vector<8x256xf32>
    %443 = arith.mulf %440, %442 : vector<8x256xf32>
    %444 = arith.addf %439, %443 : vector<8x256xf32>
    %c0_278 = arith.constant 0 : index
    %c140 = arith.constant 140 : index
    %445 = vector.load %arg11[%c0_278, %c140] : memref<8x512xf32, #tpu.memory_space<vmem>>, vector<8x256xf32>
    %c128_279 = arith.constant 128 : index
    %c0_280 = arith.constant 0 : index
    %c0_281 = arith.constant 0 : index
    %446 = vector.load %arg4[%c128_279, %c0_280, %c0_281] : memref<164x8x256xf32, #tpu.memory_space<vmem>>, vector<1x8x256xf32>
    %447 = vector.shape_cast %446 : vector<1x8x256xf32> to vector<8x256xf32>
    %448 = arith.mulf %445, %447 : vector<8x256xf32>
    %449 = arith.addf %444, %448 : vector<8x256xf32>
    %c0_282 = arith.constant 0 : index
    %c141 = arith.constant 141 : index
    %450 = vector.load %arg11[%c0_282, %c141] : memref<8x512xf32, #tpu.memory_space<vmem>>, vector<8x256xf32>
    %c62_283 = arith.constant 62 : index
    %c0_284 = arith.constant 0 : index
    %c0_285 = arith.constant 0 : index
    %451 = vector.load %arg4[%c62_283, %c0_284, %c0_285] : memref<164x8x256xf32, #tpu.memory_space<vmem>>, vector<1x8x256xf32>
    %452 = vector.shape_cast %451 : vector<1x8x256xf32> to vector<8x256xf32>
    %453 = arith.mulf %450, %452 : vector<8x256xf32>
    %454 = arith.addf %435, %453 : vector<8x256xf32>
    %c129_286 = arith.constant 129 : index
    %c0_287 = arith.constant 0 : index
    %c0_288 = arith.constant 0 : index
    %455 = vector.load %arg4[%c129_286, %c0_287, %c0_288] : memref<164x8x256xf32, #tpu.memory_space<vmem>>, vector<1x8x256xf32>
    %456 = vector.shape_cast %455 : vector<1x8x256xf32> to vector<8x256xf32>
    %457 = arith.mulf %450, %456 : vector<8x256xf32>
    %458 = arith.addf %449, %457 : vector<8x256xf32>
    %c0_289 = arith.constant 0 : index
    %c142 = arith.constant 142 : index
    %459 = vector.load %arg11[%c0_289, %c142] : memref<8x512xf32, #tpu.memory_space<vmem>>, vector<8x256xf32>
    %c24 = arith.constant 24 : index
    %c0_290 = arith.constant 0 : index
    %c0_291 = arith.constant 0 : index
    %460 = vector.load %arg4[%c24, %c0_290, %c0_291] : memref<164x8x256xf32, #tpu.memory_space<vmem>>, vector<1x8x256xf32>
    %461 = vector.shape_cast %460 : vector<1x8x256xf32> to vector<8x256xf32>
    %462 = arith.mulf %459, %461 : vector<8x256xf32>
    %463 = arith.addf %422, %462 : vector<8x256xf32>
    %c63_292 = arith.constant 63 : index
    %c0_293 = arith.constant 0 : index
    %c0_294 = arith.constant 0 : index
    %464 = vector.load %arg4[%c63_292, %c0_293, %c0_294] : memref<164x8x256xf32, #tpu.memory_space<vmem>>, vector<1x8x256xf32>
    %465 = vector.shape_cast %464 : vector<1x8x256xf32> to vector<8x256xf32>
    %466 = arith.mulf %459, %465 : vector<8x256xf32>
    %467 = arith.addf %454, %466 : vector<8x256xf32>
    %c130_295 = arith.constant 130 : index
    %c0_296 = arith.constant 0 : index
    %c0_297 = arith.constant 0 : index
    %468 = vector.load %arg4[%c130_295, %c0_296, %c0_297] : memref<164x8x256xf32, #tpu.memory_space<vmem>>, vector<1x8x256xf32>
    %469 = vector.shape_cast %468 : vector<1x8x256xf32> to vector<8x256xf32>
    %470 = arith.mulf %459, %469 : vector<8x256xf32>
    %471 = arith.addf %458, %470 : vector<8x256xf32>
    %c0_298 = arith.constant 0 : index
    %c143 = arith.constant 143 : index
    %472 = vector.load %arg11[%c0_298, %c143] : memref<8x512xf32, #tpu.memory_space<vmem>>, vector<8x256xf32>
    %c6 = arith.constant 6 : index
    %c0_299 = arith.constant 0 : index
    %c0_300 = arith.constant 0 : index
    %473 = vector.load %arg4[%c6, %c0_299, %c0_300] : memref<164x8x256xf32, #tpu.memory_space<vmem>>, vector<1x8x256xf32>
    %474 = vector.shape_cast %473 : vector<1x8x256xf32> to vector<8x256xf32>
    %475 = arith.mulf %472, %474 : vector<8x256xf32>
    %476 = arith.addf %405, %475 : vector<8x256xf32>
    %c25 = arith.constant 25 : index
    %c0_301 = arith.constant 0 : index
    %c0_302 = arith.constant 0 : index
    %477 = vector.load %arg4[%c25, %c0_301, %c0_302] : memref<164x8x256xf32, #tpu.memory_space<vmem>>, vector<1x8x256xf32>
    %478 = vector.shape_cast %477 : vector<1x8x256xf32> to vector<8x256xf32>
    %479 = arith.mulf %472, %478 : vector<8x256xf32>
    %480 = arith.addf %463, %479 : vector<8x256xf32>
    %c64_303 = arith.constant 64 : index
    %c0_304 = arith.constant 0 : index
    %c0_305 = arith.constant 0 : index
    %481 = vector.load %arg4[%c64_303, %c0_304, %c0_305] : memref<164x8x256xf32, #tpu.memory_space<vmem>>, vector<1x8x256xf32>
    %482 = vector.shape_cast %481 : vector<1x8x256xf32> to vector<8x256xf32>
    %483 = arith.mulf %472, %482 : vector<8x256xf32>
    %484 = arith.addf %467, %483 : vector<8x256xf32>
    %c131_306 = arith.constant 131 : index
    %c0_307 = arith.constant 0 : index
    %c0_308 = arith.constant 0 : index
    %485 = vector.load %arg4[%c131_306, %c0_307, %c0_308] : memref<164x8x256xf32, #tpu.memory_space<vmem>>, vector<1x8x256xf32>
    %486 = vector.shape_cast %485 : vector<1x8x256xf32> to vector<8x256xf32>
    %487 = arith.mulf %472, %486 : vector<8x256xf32>
    %488 = arith.addf %471, %487 : vector<8x256xf32>
    %c0_309 = arith.constant 0 : index
    %c144 = arith.constant 144 : index
    %489 = vector.load %arg11[%c0_309, %c144] : memref<8x512xf32, #tpu.memory_space<vmem>>, vector<8x256xf32>
    %c7 = arith.constant 7 : index
    %c0_310 = arith.constant 0 : index
    %c0_311 = arith.constant 0 : index
    %490 = vector.load %arg4[%c7, %c0_310, %c0_311] : memref<164x8x256xf32, #tpu.memory_space<vmem>>, vector<1x8x256xf32>
    %491 = vector.shape_cast %490 : vector<1x8x256xf32> to vector<8x256xf32>
    %492 = arith.mulf %489, %491 : vector<8x256xf32>
    %493 = arith.addf %476, %492 : vector<8x256xf32>
    %c26 = arith.constant 26 : index
    %c0_312 = arith.constant 0 : index
    %c0_313 = arith.constant 0 : index
    %494 = vector.load %arg4[%c26, %c0_312, %c0_313] : memref<164x8x256xf32, #tpu.memory_space<vmem>>, vector<1x8x256xf32>
    %495 = vector.shape_cast %494 : vector<1x8x256xf32> to vector<8x256xf32>
    %496 = arith.mulf %489, %495 : vector<8x256xf32>
    %497 = arith.addf %480, %496 : vector<8x256xf32>
    %c65_314 = arith.constant 65 : index
    %c0_315 = arith.constant 0 : index
    %c0_316 = arith.constant 0 : index
    %498 = vector.load %arg4[%c65_314, %c0_315, %c0_316] : memref<164x8x256xf32, #tpu.memory_space<vmem>>, vector<1x8x256xf32>
    %499 = vector.shape_cast %498 : vector<1x8x256xf32> to vector<8x256xf32>
    %500 = arith.mulf %489, %499 : vector<8x256xf32>
    %501 = arith.addf %484, %500 : vector<8x256xf32>
    %c132_317 = arith.constant 132 : index
    %c0_318 = arith.constant 0 : index
    %c0_319 = arith.constant 0 : index
    %502 = vector.load %arg4[%c132_317, %c0_318, %c0_319] : memref<164x8x256xf32, #tpu.memory_space<vmem>>, vector<1x8x256xf32>
    %503 = vector.shape_cast %502 : vector<1x8x256xf32> to vector<8x256xf32>
    %504 = arith.mulf %489, %503 : vector<8x256xf32>
    %505 = arith.addf %488, %504 : vector<8x256xf32>
    %c0_320 = arith.constant 0 : index
    %c145 = arith.constant 145 : index
    %506 = vector.load %arg11[%c0_320, %c145] : memref<8x512xf32, #tpu.memory_space<vmem>>, vector<8x256xf32>
    %c8 = arith.constant 8 : index
    %c0_321 = arith.constant 0 : index
    %c0_322 = arith.constant 0 : index
    %507 = vector.load %arg4[%c8, %c0_321, %c0_322] : memref<164x8x256xf32, #tpu.memory_space<vmem>>, vector<1x8x256xf32>
    %508 = vector.shape_cast %507 : vector<1x8x256xf32> to vector<8x256xf32>
    %509 = arith.mulf %506, %508 : vector<8x256xf32>
    %510 = arith.addf %493, %509 : vector<8x256xf32>
    %c27 = arith.constant 27 : index
    %c0_323 = arith.constant 0 : index
    %c0_324 = arith.constant 0 : index
    %511 = vector.load %arg4[%c27, %c0_323, %c0_324] : memref<164x8x256xf32, #tpu.memory_space<vmem>>, vector<1x8x256xf32>
    %512 = vector.shape_cast %511 : vector<1x8x256xf32> to vector<8x256xf32>
    %513 = arith.mulf %506, %512 : vector<8x256xf32>
    %514 = arith.addf %497, %513 : vector<8x256xf32>
    %c66_325 = arith.constant 66 : index
    %c0_326 = arith.constant 0 : index
    %c0_327 = arith.constant 0 : index
    %515 = vector.load %arg4[%c66_325, %c0_326, %c0_327] : memref<164x8x256xf32, #tpu.memory_space<vmem>>, vector<1x8x256xf32>
    %516 = vector.shape_cast %515 : vector<1x8x256xf32> to vector<8x256xf32>
    %517 = arith.mulf %506, %516 : vector<8x256xf32>
    %518 = arith.addf %501, %517 : vector<8x256xf32>
    %c133 = arith.constant 133 : index
    %c0_328 = arith.constant 0 : index
    %c0_329 = arith.constant 0 : index
    %519 = vector.load %arg4[%c133, %c0_328, %c0_329] : memref<164x8x256xf32, #tpu.memory_space<vmem>>, vector<1x8x256xf32>
    %520 = vector.shape_cast %519 : vector<1x8x256xf32> to vector<8x256xf32>
    %521 = arith.mulf %506, %520 : vector<8x256xf32>
    %522 = arith.addf %505, %521 : vector<8x256xf32>
    %c0_330 = arith.constant 0 : index
    %c146 = arith.constant 146 : index
    %523 = vector.load %arg11[%c0_330, %c146] : memref<8x512xf32, #tpu.memory_space<vmem>>, vector<8x256xf32>
    %c28 = arith.constant 28 : index
    %c0_331 = arith.constant 0 : index
    %c0_332 = arith.constant 0 : index
    %524 = vector.load %arg4[%c28, %c0_331, %c0_332] : memref<164x8x256xf32, #tpu.memory_space<vmem>>, vector<1x8x256xf32>
    %525 = vector.shape_cast %524 : vector<1x8x256xf32> to vector<8x256xf32>
    %526 = arith.mulf %523, %525 : vector<8x256xf32>
    %527 = arith.addf %514, %526 : vector<8x256xf32>
    %c67_333 = arith.constant 67 : index
    %c0_334 = arith.constant 0 : index
    %c0_335 = arith.constant 0 : index
    %528 = vector.load %arg4[%c67_333, %c0_334, %c0_335] : memref<164x8x256xf32, #tpu.memory_space<vmem>>, vector<1x8x256xf32>
    %529 = vector.shape_cast %528 : vector<1x8x256xf32> to vector<8x256xf32>
    %530 = arith.mulf %523, %529 : vector<8x256xf32>
    %531 = arith.addf %518, %530 : vector<8x256xf32>
    %c134 = arith.constant 134 : index
    %c0_336 = arith.constant 0 : index
    %c0_337 = arith.constant 0 : index
    %532 = vector.load %arg4[%c134, %c0_336, %c0_337] : memref<164x8x256xf32, #tpu.memory_space<vmem>>, vector<1x8x256xf32>
    %533 = vector.shape_cast %532 : vector<1x8x256xf32> to vector<8x256xf32>
    %534 = arith.mulf %523, %533 : vector<8x256xf32>
    %535 = arith.addf %522, %534 : vector<8x256xf32>
    %c0_338 = arith.constant 0 : index
    %c147 = arith.constant 147 : index
    %536 = vector.load %arg11[%c0_338, %c147] : memref<8x512xf32, #tpu.memory_space<vmem>>, vector<8x256xf32>
    %c68_339 = arith.constant 68 : index
    %c0_340 = arith.constant 0 : index
    %c0_341 = arith.constant 0 : index
    %537 = vector.load %arg4[%c68_339, %c0_340, %c0_341] : memref<164x8x256xf32, #tpu.memory_space<vmem>>, vector<1x8x256xf32>
    %538 = vector.shape_cast %537 : vector<1x8x256xf32> to vector<8x256xf32>
    %539 = arith.mulf %536, %538 : vector<8x256xf32>
    %540 = arith.addf %531, %539 : vector<8x256xf32>
    %c135 = arith.constant 135 : index
    %c0_342 = arith.constant 0 : index
    %c0_343 = arith.constant 0 : index
    %541 = vector.load %arg4[%c135, %c0_342, %c0_343] : memref<164x8x256xf32, #tpu.memory_space<vmem>>, vector<1x8x256xf32>
    %542 = vector.shape_cast %541 : vector<1x8x256xf32> to vector<8x256xf32>
    %543 = arith.mulf %536, %542 : vector<8x256xf32>
    %544 = arith.addf %535, %543 : vector<8x256xf32>
    %c0_344 = arith.constant 0 : index
    %c148 = arith.constant 148 : index
    %545 = vector.load %arg11[%c0_344, %c148] : memref<8x512xf32, #tpu.memory_space<vmem>>, vector<8x256xf32>
    %c136 = arith.constant 136 : index
    %c0_345 = arith.constant 0 : index
    %c0_346 = arith.constant 0 : index
    %546 = vector.load %arg4[%c136, %c0_345, %c0_346] : memref<164x8x256xf32, #tpu.memory_space<vmem>>, vector<1x8x256xf32>
    %547 = vector.shape_cast %546 : vector<1x8x256xf32> to vector<8x256xf32>
    %548 = arith.mulf %545, %547 : vector<8x256xf32>
    %549 = arith.addf %544, %548 : vector<8x256xf32>
    %c0_347 = arith.constant 0 : index
    %c156 = arith.constant 156 : index
    %550 = vector.load %arg11[%c0_347, %c156] : memref<8x512xf32, #tpu.memory_space<vmem>>, vector<8x256xf32>
    %c137 = arith.constant 137 : index
    %c0_348 = arith.constant 0 : index
    %c0_349 = arith.constant 0 : index
    %551 = vector.load %arg4[%c137, %c0_348, %c0_349] : memref<164x8x256xf32, #tpu.memory_space<vmem>>, vector<1x8x256xf32>
    %552 = vector.shape_cast %551 : vector<1x8x256xf32> to vector<8x256xf32>
    %553 = arith.mulf %550, %552 : vector<8x256xf32>
    %554 = arith.addf %549, %553 : vector<8x256xf32>
    %c0_350 = arith.constant 0 : index
    %c157 = arith.constant 157 : index
    %555 = vector.load %arg11[%c0_350, %c157] : memref<8x512xf32, #tpu.memory_space<vmem>>, vector<8x256xf32>
    %c69 = arith.constant 69 : index
    %c0_351 = arith.constant 0 : index
    %c0_352 = arith.constant 0 : index
    %556 = vector.load %arg4[%c69, %c0_351, %c0_352] : memref<164x8x256xf32, #tpu.memory_space<vmem>>, vector<1x8x256xf32>
    %557 = vector.shape_cast %556 : vector<1x8x256xf32> to vector<8x256xf32>
    %558 = arith.mulf %555, %557 : vector<8x256xf32>
    %559 = arith.addf %540, %558 : vector<8x256xf32>
    %c138 = arith.constant 138 : index
    %c0_353 = arith.constant 0 : index
    %c0_354 = arith.constant 0 : index
    %560 = vector.load %arg4[%c138, %c0_353, %c0_354] : memref<164x8x256xf32, #tpu.memory_space<vmem>>, vector<1x8x256xf32>
    %561 = vector.shape_cast %560 : vector<1x8x256xf32> to vector<8x256xf32>
    %562 = arith.mulf %555, %561 : vector<8x256xf32>
    %563 = arith.addf %554, %562 : vector<8x256xf32>
    %c0_355 = arith.constant 0 : index
    %c158 = arith.constant 158 : index
    %564 = vector.load %arg11[%c0_355, %c158] : memref<8x512xf32, #tpu.memory_space<vmem>>, vector<8x256xf32>
    %c29 = arith.constant 29 : index
    %c0_356 = arith.constant 0 : index
    %c0_357 = arith.constant 0 : index
    %565 = vector.load %arg4[%c29, %c0_356, %c0_357] : memref<164x8x256xf32, #tpu.memory_space<vmem>>, vector<1x8x256xf32>
    %566 = vector.shape_cast %565 : vector<1x8x256xf32> to vector<8x256xf32>
    %567 = arith.mulf %564, %566 : vector<8x256xf32>
    %568 = arith.addf %527, %567 : vector<8x256xf32>
    %c70 = arith.constant 70 : index
    %c0_358 = arith.constant 0 : index
    %c0_359 = arith.constant 0 : index
    %569 = vector.load %arg4[%c70, %c0_358, %c0_359] : memref<164x8x256xf32, #tpu.memory_space<vmem>>, vector<1x8x256xf32>
    %570 = vector.shape_cast %569 : vector<1x8x256xf32> to vector<8x256xf32>
    %571 = arith.mulf %564, %570 : vector<8x256xf32>
    %572 = arith.addf %559, %571 : vector<8x256xf32>
    %c139 = arith.constant 139 : index
    %c0_360 = arith.constant 0 : index
    %c0_361 = arith.constant 0 : index
    %573 = vector.load %arg4[%c139, %c0_360, %c0_361] : memref<164x8x256xf32, #tpu.memory_space<vmem>>, vector<1x8x256xf32>
    %574 = vector.shape_cast %573 : vector<1x8x256xf32> to vector<8x256xf32>
    %575 = arith.mulf %564, %574 : vector<8x256xf32>
    %576 = arith.addf %563, %575 : vector<8x256xf32>
    %c0_362 = arith.constant 0 : index
    %c159 = arith.constant 159 : index
    %577 = vector.load %arg11[%c0_362, %c159] : memref<8x512xf32, #tpu.memory_space<vmem>>, vector<8x256xf32>
    %c30 = arith.constant 30 : index
    %c0_363 = arith.constant 0 : index
    %c0_364 = arith.constant 0 : index
    %578 = vector.load %arg4[%c30, %c0_363, %c0_364] : memref<164x8x256xf32, #tpu.memory_space<vmem>>, vector<1x8x256xf32>
    %579 = vector.shape_cast %578 : vector<1x8x256xf32> to vector<8x256xf32>
    %580 = arith.mulf %577, %579 : vector<8x256xf32>
    %581 = arith.addf %568, %580 : vector<8x256xf32>
    %c71 = arith.constant 71 : index
    %c0_365 = arith.constant 0 : index
    %c0_366 = arith.constant 0 : index
    %582 = vector.load %arg4[%c71, %c0_365, %c0_366] : memref<164x8x256xf32, #tpu.memory_space<vmem>>, vector<1x8x256xf32>
    %583 = vector.shape_cast %582 : vector<1x8x256xf32> to vector<8x256xf32>
    %584 = arith.mulf %577, %583 : vector<8x256xf32>
    %585 = arith.addf %572, %584 : vector<8x256xf32>
    %c140_367 = arith.constant 140 : index
    %c0_368 = arith.constant 0 : index
    %c0_369 = arith.constant 0 : index
    %586 = vector.load %arg4[%c140_367, %c0_368, %c0_369] : memref<164x8x256xf32, #tpu.memory_space<vmem>>, vector<1x8x256xf32>
    %587 = vector.shape_cast %586 : vector<1x8x256xf32> to vector<8x256xf32>
    %588 = arith.mulf %577, %587 : vector<8x256xf32>
    %589 = arith.addf %576, %588 : vector<8x256xf32>
    %c0_370 = arith.constant 0 : index
    %c160 = arith.constant 160 : index
    %590 = vector.load %arg11[%c0_370, %c160] : memref<8x512xf32, #tpu.memory_space<vmem>>, vector<8x256xf32>
    %c31 = arith.constant 31 : index
    %c0_371 = arith.constant 0 : index
    %c0_372 = arith.constant 0 : index
    %591 = vector.load %arg4[%c31, %c0_371, %c0_372] : memref<164x8x256xf32, #tpu.memory_space<vmem>>, vector<1x8x256xf32>
    %592 = vector.shape_cast %591 : vector<1x8x256xf32> to vector<8x256xf32>
    %593 = arith.mulf %590, %592 : vector<8x256xf32>
    %594 = arith.addf %581, %593 : vector<8x256xf32>
    %c72 = arith.constant 72 : index
    %c0_373 = arith.constant 0 : index
    %c0_374 = arith.constant 0 : index
    %595 = vector.load %arg4[%c72, %c0_373, %c0_374] : memref<164x8x256xf32, #tpu.memory_space<vmem>>, vector<1x8x256xf32>
    %596 = vector.shape_cast %595 : vector<1x8x256xf32> to vector<8x256xf32>
    %597 = arith.mulf %590, %596 : vector<8x256xf32>
    %598 = arith.addf %585, %597 : vector<8x256xf32>
    %c141_375 = arith.constant 141 : index
    %c0_376 = arith.constant 0 : index
    %c0_377 = arith.constant 0 : index
    %599 = vector.load %arg4[%c141_375, %c0_376, %c0_377] : memref<164x8x256xf32, #tpu.memory_space<vmem>>, vector<1x8x256xf32>
    %600 = vector.shape_cast %599 : vector<1x8x256xf32> to vector<8x256xf32>
    %601 = arith.mulf %590, %600 : vector<8x256xf32>
    %602 = arith.addf %589, %601 : vector<8x256xf32>
    %c0_378 = arith.constant 0 : index
    %c161 = arith.constant 161 : index
    %603 = vector.load %arg11[%c0_378, %c161] : memref<8x512xf32, #tpu.memory_space<vmem>>, vector<8x256xf32>
    %c32 = arith.constant 32 : index
    %c0_379 = arith.constant 0 : index
    %c0_380 = arith.constant 0 : index
    %604 = vector.load %arg4[%c32, %c0_379, %c0_380] : memref<164x8x256xf32, #tpu.memory_space<vmem>>, vector<1x8x256xf32>
    %605 = vector.shape_cast %604 : vector<1x8x256xf32> to vector<8x256xf32>
    %606 = arith.mulf %603, %605 : vector<8x256xf32>
    %607 = arith.addf %594, %606 : vector<8x256xf32>
    %c73 = arith.constant 73 : index
    %c0_381 = arith.constant 0 : index
    %c0_382 = arith.constant 0 : index
    %608 = vector.load %arg4[%c73, %c0_381, %c0_382] : memref<164x8x256xf32, #tpu.memory_space<vmem>>, vector<1x8x256xf32>
    %609 = vector.shape_cast %608 : vector<1x8x256xf32> to vector<8x256xf32>
    %610 = arith.mulf %603, %609 : vector<8x256xf32>
    %611 = arith.addf %598, %610 : vector<8x256xf32>
    %c142_383 = arith.constant 142 : index
    %c0_384 = arith.constant 0 : index
    %c0_385 = arith.constant 0 : index
    %612 = vector.load %arg4[%c142_383, %c0_384, %c0_385] : memref<164x8x256xf32, #tpu.memory_space<vmem>>, vector<1x8x256xf32>
    %613 = vector.shape_cast %612 : vector<1x8x256xf32> to vector<8x256xf32>
    %614 = arith.mulf %603, %613 : vector<8x256xf32>
    %615 = arith.addf %602, %614 : vector<8x256xf32>
    %c0_386 = arith.constant 0 : index
    %c162 = arith.constant 162 : index
    %616 = vector.load %arg11[%c0_386, %c162] : memref<8x512xf32, #tpu.memory_space<vmem>>, vector<8x256xf32>
    %c33 = arith.constant 33 : index
    %c0_387 = arith.constant 0 : index
    %c0_388 = arith.constant 0 : index
    %617 = vector.load %arg4[%c33, %c0_387, %c0_388] : memref<164x8x256xf32, #tpu.memory_space<vmem>>, vector<1x8x256xf32>
    %618 = vector.shape_cast %617 : vector<1x8x256xf32> to vector<8x256xf32>
    %619 = arith.mulf %616, %618 : vector<8x256xf32>
    %620 = arith.addf %607, %619 : vector<8x256xf32>
    %c74 = arith.constant 74 : index
    %c0_389 = arith.constant 0 : index
    %c0_390 = arith.constant 0 : index
    %621 = vector.load %arg4[%c74, %c0_389, %c0_390] : memref<164x8x256xf32, #tpu.memory_space<vmem>>, vector<1x8x256xf32>
    %622 = vector.shape_cast %621 : vector<1x8x256xf32> to vector<8x256xf32>
    %623 = arith.mulf %616, %622 : vector<8x256xf32>
    %624 = arith.addf %611, %623 : vector<8x256xf32>
    %c143_391 = arith.constant 143 : index
    %c0_392 = arith.constant 0 : index
    %c0_393 = arith.constant 0 : index
    %625 = vector.load %arg4[%c143_391, %c0_392, %c0_393] : memref<164x8x256xf32, #tpu.memory_space<vmem>>, vector<1x8x256xf32>
    %626 = vector.shape_cast %625 : vector<1x8x256xf32> to vector<8x256xf32>
    %627 = arith.mulf %616, %626 : vector<8x256xf32>
    %628 = arith.addf %615, %627 : vector<8x256xf32>
    %c0_394 = arith.constant 0 : index
    %c163 = arith.constant 163 : index
    %629 = vector.load %arg11[%c0_394, %c163] : memref<8x512xf32, #tpu.memory_space<vmem>>, vector<8x256xf32>
    %c75 = arith.constant 75 : index
    %c0_395 = arith.constant 0 : index
    %c0_396 = arith.constant 0 : index
    %630 = vector.load %arg4[%c75, %c0_395, %c0_396] : memref<164x8x256xf32, #tpu.memory_space<vmem>>, vector<1x8x256xf32>
    %631 = vector.shape_cast %630 : vector<1x8x256xf32> to vector<8x256xf32>
    %632 = arith.mulf %629, %631 : vector<8x256xf32>
    %633 = arith.addf %624, %632 : vector<8x256xf32>
    %c144_397 = arith.constant 144 : index
    %c0_398 = arith.constant 0 : index
    %c0_399 = arith.constant 0 : index
    %634 = vector.load %arg4[%c144_397, %c0_398, %c0_399] : memref<164x8x256xf32, #tpu.memory_space<vmem>>, vector<1x8x256xf32>
    %635 = vector.shape_cast %634 : vector<1x8x256xf32> to vector<8x256xf32>
    %636 = arith.mulf %629, %635 : vector<8x256xf32>
    %637 = arith.addf %628, %636 : vector<8x256xf32>
    %c0_400 = arith.constant 0 : index
    %c164 = arith.constant 164 : index
    %638 = vector.load %arg11[%c0_400, %c164] : memref<8x512xf32, #tpu.memory_space<vmem>>, vector<8x256xf32>
    %c145_401 = arith.constant 145 : index
    %c0_402 = arith.constant 0 : index
    %c0_403 = arith.constant 0 : index
    %639 = vector.load %arg4[%c145_401, %c0_402, %c0_403] : memref<164x8x256xf32, #tpu.memory_space<vmem>>, vector<1x8x256xf32>
    %640 = vector.shape_cast %639 : vector<1x8x256xf32> to vector<8x256xf32>
    %641 = arith.mulf %638, %640 : vector<8x256xf32>
    %642 = arith.addf %637, %641 : vector<8x256xf32>
    %c0_404 = arith.constant 0 : index
    %c172 = arith.constant 172 : index
    %643 = vector.load %arg11[%c0_404, %c172] : memref<8x512xf32, #tpu.memory_space<vmem>>, vector<8x256xf32>
    %c146_405 = arith.constant 146 : index
    %c0_406 = arith.constant 0 : index
    %c0_407 = arith.constant 0 : index
    %644 = vector.load %arg4[%c146_405, %c0_406, %c0_407] : memref<164x8x256xf32, #tpu.memory_space<vmem>>, vector<1x8x256xf32>
    %645 = vector.shape_cast %644 : vector<1x8x256xf32> to vector<8x256xf32>
    %646 = arith.mulf %643, %645 : vector<8x256xf32>
    %647 = arith.addf %642, %646 : vector<8x256xf32>
    %c0_408 = arith.constant 0 : index
    %c173 = arith.constant 173 : index
    %648 = vector.load %arg11[%c0_408, %c173] : memref<8x512xf32, #tpu.memory_space<vmem>>, vector<8x256xf32>
    %c76_409 = arith.constant 76 : index
    %c0_410 = arith.constant 0 : index
    %c0_411 = arith.constant 0 : index
    %649 = vector.load %arg4[%c76_409, %c0_410, %c0_411] : memref<164x8x256xf32, #tpu.memory_space<vmem>>, vector<1x8x256xf32>
    %650 = vector.shape_cast %649 : vector<1x8x256xf32> to vector<8x256xf32>
    %651 = arith.mulf %648, %650 : vector<8x256xf32>
    %652 = arith.addf %633, %651 : vector<8x256xf32>
    %c147_412 = arith.constant 147 : index
    %c0_413 = arith.constant 0 : index
    %c0_414 = arith.constant 0 : index
    %653 = vector.load %arg4[%c147_412, %c0_413, %c0_414] : memref<164x8x256xf32, #tpu.memory_space<vmem>>, vector<1x8x256xf32>
    %654 = vector.shape_cast %653 : vector<1x8x256xf32> to vector<8x256xf32>
    %655 = arith.mulf %648, %654 : vector<8x256xf32>
    %656 = arith.addf %647, %655 : vector<8x256xf32>
    %c0_415 = arith.constant 0 : index
    %c174 = arith.constant 174 : index
    %657 = vector.load %arg11[%c0_415, %c174] : memref<8x512xf32, #tpu.memory_space<vmem>>, vector<8x256xf32>
    %c77_416 = arith.constant 77 : index
    %c0_417 = arith.constant 0 : index
    %c0_418 = arith.constant 0 : index
    %658 = vector.load %arg4[%c77_416, %c0_417, %c0_418] : memref<164x8x256xf32, #tpu.memory_space<vmem>>, vector<1x8x256xf32>
    %659 = vector.shape_cast %658 : vector<1x8x256xf32> to vector<8x256xf32>
    %660 = arith.mulf %657, %659 : vector<8x256xf32>
    %661 = arith.addf %652, %660 : vector<8x256xf32>
    %c148_419 = arith.constant 148 : index
    %c0_420 = arith.constant 0 : index
    %c0_421 = arith.constant 0 : index
    %662 = vector.load %arg4[%c148_419, %c0_420, %c0_421] : memref<164x8x256xf32, #tpu.memory_space<vmem>>, vector<1x8x256xf32>
    %663 = vector.shape_cast %662 : vector<1x8x256xf32> to vector<8x256xf32>
    %664 = arith.mulf %657, %663 : vector<8x256xf32>
    %665 = arith.addf %656, %664 : vector<8x256xf32>
    %c0_422 = arith.constant 0 : index
    %c175 = arith.constant 175 : index
    %666 = vector.load %arg11[%c0_422, %c175] : memref<8x512xf32, #tpu.memory_space<vmem>>, vector<8x256xf32>
    %c78_423 = arith.constant 78 : index
    %c0_424 = arith.constant 0 : index
    %c0_425 = arith.constant 0 : index
    %667 = vector.load %arg4[%c78_423, %c0_424, %c0_425] : memref<164x8x256xf32, #tpu.memory_space<vmem>>, vector<1x8x256xf32>
    %668 = vector.shape_cast %667 : vector<1x8x256xf32> to vector<8x256xf32>
    %669 = arith.mulf %666, %668 : vector<8x256xf32>
    %670 = arith.addf %661, %669 : vector<8x256xf32>
    %c149 = arith.constant 149 : index
    %c0_426 = arith.constant 0 : index
    %c0_427 = arith.constant 0 : index
    %671 = vector.load %arg4[%c149, %c0_426, %c0_427] : memref<164x8x256xf32, #tpu.memory_space<vmem>>, vector<1x8x256xf32>
    %672 = vector.shape_cast %671 : vector<1x8x256xf32> to vector<8x256xf32>
    %673 = arith.mulf %666, %672 : vector<8x256xf32>
    %674 = arith.addf %665, %673 : vector<8x256xf32>
    %c0_428 = arith.constant 0 : index
    %c176 = arith.constant 176 : index
    %675 = vector.load %arg11[%c0_428, %c176] : memref<8x512xf32, #tpu.memory_space<vmem>>, vector<8x256xf32>
    %c79_429 = arith.constant 79 : index
    %c0_430 = arith.constant 0 : index
    %c0_431 = arith.constant 0 : index
    %676 = vector.load %arg4[%c79_429, %c0_430, %c0_431] : memref<164x8x256xf32, #tpu.memory_space<vmem>>, vector<1x8x256xf32>
    %677 = vector.shape_cast %676 : vector<1x8x256xf32> to vector<8x256xf32>
    %678 = arith.mulf %675, %677 : vector<8x256xf32>
    %679 = arith.addf %670, %678 : vector<8x256xf32>
    %c150 = arith.constant 150 : index
    %c0_432 = arith.constant 0 : index
    %c0_433 = arith.constant 0 : index
    %680 = vector.load %arg4[%c150, %c0_432, %c0_433] : memref<164x8x256xf32, #tpu.memory_space<vmem>>, vector<1x8x256xf32>
    %681 = vector.shape_cast %680 : vector<1x8x256xf32> to vector<8x256xf32>
    %682 = arith.mulf %675, %681 : vector<8x256xf32>
    %683 = arith.addf %674, %682 : vector<8x256xf32>
    %c0_434 = arith.constant 0 : index
    %c177 = arith.constant 177 : index
    %684 = vector.load %arg11[%c0_434, %c177] : memref<8x512xf32, #tpu.memory_space<vmem>>, vector<8x256xf32>
    %c80_435 = arith.constant 80 : index
    %c0_436 = arith.constant 0 : index
    %c0_437 = arith.constant 0 : index
    %685 = vector.load %arg4[%c80_435, %c0_436, %c0_437] : memref<164x8x256xf32, #tpu.memory_space<vmem>>, vector<1x8x256xf32>
    %686 = vector.shape_cast %685 : vector<1x8x256xf32> to vector<8x256xf32>
    %687 = arith.mulf %684, %686 : vector<8x256xf32>
    %688 = arith.addf %679, %687 : vector<8x256xf32>
    %c151 = arith.constant 151 : index
    %c0_438 = arith.constant 0 : index
    %c0_439 = arith.constant 0 : index
    %689 = vector.load %arg4[%c151, %c0_438, %c0_439] : memref<164x8x256xf32, #tpu.memory_space<vmem>>, vector<1x8x256xf32>
    %690 = vector.shape_cast %689 : vector<1x8x256xf32> to vector<8x256xf32>
    %691 = arith.mulf %684, %690 : vector<8x256xf32>
    %692 = arith.addf %683, %691 : vector<8x256xf32>
    %c0_440 = arith.constant 0 : index
    %c178 = arith.constant 178 : index
    %693 = vector.load %arg11[%c0_440, %c178] : memref<8x512xf32, #tpu.memory_space<vmem>>, vector<8x256xf32>
    %c81_441 = arith.constant 81 : index
    %c0_442 = arith.constant 0 : index
    %c0_443 = arith.constant 0 : index
    %694 = vector.load %arg4[%c81_441, %c0_442, %c0_443] : memref<164x8x256xf32, #tpu.memory_space<vmem>>, vector<1x8x256xf32>
    %695 = vector.shape_cast %694 : vector<1x8x256xf32> to vector<8x256xf32>
    %696 = arith.mulf %693, %695 : vector<8x256xf32>
    %697 = arith.addf %688, %696 : vector<8x256xf32>
    %c152 = arith.constant 152 : index
    %c0_444 = arith.constant 0 : index
    %c0_445 = arith.constant 0 : index
    %698 = vector.load %arg4[%c152, %c0_444, %c0_445] : memref<164x8x256xf32, #tpu.memory_space<vmem>>, vector<1x8x256xf32>
    %699 = vector.shape_cast %698 : vector<1x8x256xf32> to vector<8x256xf32>
    %700 = arith.mulf %693, %699 : vector<8x256xf32>
    %701 = arith.addf %692, %700 : vector<8x256xf32>
    %c0_446 = arith.constant 0 : index
    %c179 = arith.constant 179 : index
    %702 = vector.load %arg11[%c0_446, %c179] : memref<8x512xf32, #tpu.memory_space<vmem>>, vector<8x256xf32>
    %c82_447 = arith.constant 82 : index
    %c0_448 = arith.constant 0 : index
    %c0_449 = arith.constant 0 : index
    %703 = vector.load %arg4[%c82_447, %c0_448, %c0_449] : memref<164x8x256xf32, #tpu.memory_space<vmem>>, vector<1x8x256xf32>
    %704 = vector.shape_cast %703 : vector<1x8x256xf32> to vector<8x256xf32>
    %705 = arith.mulf %702, %704 : vector<8x256xf32>
    %706 = arith.addf %697, %705 : vector<8x256xf32>
    %c153 = arith.constant 153 : index
    %c0_450 = arith.constant 0 : index
    %c0_451 = arith.constant 0 : index
    %707 = vector.load %arg4[%c153, %c0_450, %c0_451] : memref<164x8x256xf32, #tpu.memory_space<vmem>>, vector<1x8x256xf32>
    %708 = vector.shape_cast %707 : vector<1x8x256xf32> to vector<8x256xf32>
    %709 = arith.mulf %702, %708 : vector<8x256xf32>
    %710 = arith.addf %701, %709 : vector<8x256xf32>
    %c0_452 = arith.constant 0 : index
    %c180 = arith.constant 180 : index
    %711 = vector.load %arg11[%c0_452, %c180] : memref<8x512xf32, #tpu.memory_space<vmem>>, vector<8x256xf32>
    %c154 = arith.constant 154 : index
    %c0_453 = arith.constant 0 : index
    %c0_454 = arith.constant 0 : index
    %712 = vector.load %arg4[%c154, %c0_453, %c0_454] : memref<164x8x256xf32, #tpu.memory_space<vmem>>, vector<1x8x256xf32>
    %713 = vector.shape_cast %712 : vector<1x8x256xf32> to vector<8x256xf32>
    %714 = arith.mulf %711, %713 : vector<8x256xf32>
    %715 = arith.addf %710, %714 : vector<8x256xf32>
    %c0_455 = arith.constant 0 : index
    %c188 = arith.constant 188 : index
    %716 = vector.load %arg11[%c0_455, %c188] : memref<8x512xf32, #tpu.memory_space<vmem>>, vector<8x256xf32>
    %c155 = arith.constant 155 : index
    %c0_456 = arith.constant 0 : index
    %c0_457 = arith.constant 0 : index
    %717 = vector.load %arg4[%c155, %c0_456, %c0_457] : memref<164x8x256xf32, #tpu.memory_space<vmem>>, vector<1x8x256xf32>
    %718 = vector.shape_cast %717 : vector<1x8x256xf32> to vector<8x256xf32>
    %719 = arith.mulf %716, %718 : vector<8x256xf32>
    %720 = arith.addf %715, %719 : vector<8x256xf32>
    %c0_458 = arith.constant 0 : index
    %c189 = arith.constant 189 : index
    %721 = vector.load %arg11[%c0_458, %c189] : memref<8x512xf32, #tpu.memory_space<vmem>>, vector<8x256xf32>
    %c156_459 = arith.constant 156 : index
    %c0_460 = arith.constant 0 : index
    %c0_461 = arith.constant 0 : index
    %722 = vector.load %arg4[%c156_459, %c0_460, %c0_461] : memref<164x8x256xf32, #tpu.memory_space<vmem>>, vector<1x8x256xf32>
    %723 = vector.shape_cast %722 : vector<1x8x256xf32> to vector<8x256xf32>
    %724 = arith.mulf %721, %723 : vector<8x256xf32>
    %725 = arith.addf %720, %724 : vector<8x256xf32>
    %c0_462 = arith.constant 0 : index
    %c190 = arith.constant 190 : index
    %726 = vector.load %arg11[%c0_462, %c190] : memref<8x512xf32, #tpu.memory_space<vmem>>, vector<8x256xf32>
    %c157_463 = arith.constant 157 : index
    %c0_464 = arith.constant 0 : index
    %c0_465 = arith.constant 0 : index
    %727 = vector.load %arg4[%c157_463, %c0_464, %c0_465] : memref<164x8x256xf32, #tpu.memory_space<vmem>>, vector<1x8x256xf32>
    %728 = vector.shape_cast %727 : vector<1x8x256xf32> to vector<8x256xf32>
    %729 = arith.mulf %726, %728 : vector<8x256xf32>
    %730 = arith.addf %725, %729 : vector<8x256xf32>
    %c0_466 = arith.constant 0 : index
    %c191 = arith.constant 191 : index
    %731 = vector.load %arg11[%c0_466, %c191] : memref<8x512xf32, #tpu.memory_space<vmem>>, vector<8x256xf32>
    %c158_467 = arith.constant 158 : index
    %c0_468 = arith.constant 0 : index
    %c0_469 = arith.constant 0 : index
    %732 = vector.load %arg4[%c158_467, %c0_468, %c0_469] : memref<164x8x256xf32, #tpu.memory_space<vmem>>, vector<1x8x256xf32>
    %733 = vector.shape_cast %732 : vector<1x8x256xf32> to vector<8x256xf32>
    %734 = arith.mulf %731, %733 : vector<8x256xf32>
    %735 = arith.addf %730, %734 : vector<8x256xf32>
    %c0_470 = arith.constant 0 : index
    %c192 = arith.constant 192 : index
    %736 = vector.load %arg11[%c0_470, %c192] : memref<8x512xf32, #tpu.memory_space<vmem>>, vector<8x256xf32>
    %c159_471 = arith.constant 159 : index
    %c0_472 = arith.constant 0 : index
    %c0_473 = arith.constant 0 : index
    %737 = vector.load %arg4[%c159_471, %c0_472, %c0_473] : memref<164x8x256xf32, #tpu.memory_space<vmem>>, vector<1x8x256xf32>
    %738 = vector.shape_cast %737 : vector<1x8x256xf32> to vector<8x256xf32>
    %739 = arith.mulf %736, %738 : vector<8x256xf32>
    %740 = arith.addf %735, %739 : vector<8x256xf32>
    %c0_474 = arith.constant 0 : index
    %c193 = arith.constant 193 : index
    %741 = vector.load %arg11[%c0_474, %c193] : memref<8x512xf32, #tpu.memory_space<vmem>>, vector<8x256xf32>
    %c160_475 = arith.constant 160 : index
    %c0_476 = arith.constant 0 : index
    %c0_477 = arith.constant 0 : index
    %742 = vector.load %arg4[%c160_475, %c0_476, %c0_477] : memref<164x8x256xf32, #tpu.memory_space<vmem>>, vector<1x8x256xf32>
    %743 = vector.shape_cast %742 : vector<1x8x256xf32> to vector<8x256xf32>
    %744 = arith.mulf %741, %743 : vector<8x256xf32>
    %745 = arith.addf %740, %744 : vector<8x256xf32>
    %c0_478 = arith.constant 0 : index
    %c194 = arith.constant 194 : index
    %746 = vector.load %arg11[%c0_478, %c194] : memref<8x512xf32, #tpu.memory_space<vmem>>, vector<8x256xf32>
    %c161_479 = arith.constant 161 : index
    %c0_480 = arith.constant 0 : index
    %c0_481 = arith.constant 0 : index
    %747 = vector.load %arg4[%c161_479, %c0_480, %c0_481] : memref<164x8x256xf32, #tpu.memory_space<vmem>>, vector<1x8x256xf32>
    %748 = vector.shape_cast %747 : vector<1x8x256xf32> to vector<8x256xf32>
    %749 = arith.mulf %746, %748 : vector<8x256xf32>
    %750 = arith.addf %745, %749 : vector<8x256xf32>
    %c0_482 = arith.constant 0 : index
    %c195 = arith.constant 195 : index
    %751 = vector.load %arg11[%c0_482, %c195] : memref<8x512xf32, #tpu.memory_space<vmem>>, vector<8x256xf32>
    %c162_483 = arith.constant 162 : index
    %c0_484 = arith.constant 0 : index
    %c0_485 = arith.constant 0 : index
    %752 = vector.load %arg4[%c162_483, %c0_484, %c0_485] : memref<164x8x256xf32, #tpu.memory_space<vmem>>, vector<1x8x256xf32>
    %753 = vector.shape_cast %752 : vector<1x8x256xf32> to vector<8x256xf32>
    %754 = arith.mulf %751, %753 : vector<8x256xf32>
    %755 = arith.addf %750, %754 : vector<8x256xf32>
    %c0_486 = arith.constant 0 : index
    %c196 = arith.constant 196 : index
    %756 = vector.load %arg11[%c0_486, %c196] : memref<8x512xf32, #tpu.memory_space<vmem>>, vector<8x256xf32>
    %c163_487 = arith.constant 163 : index
    %c0_488 = arith.constant 0 : index
    %c0_489 = arith.constant 0 : index
    %757 = vector.load %arg4[%c163_487, %c0_488, %c0_489] : memref<164x8x256xf32, #tpu.memory_space<vmem>>, vector<1x8x256xf32>
    %758 = vector.shape_cast %757 : vector<1x8x256xf32> to vector<8x256xf32>
    %759 = arith.mulf %756, %758 : vector<8x256xf32>
    %760 = arith.addf %755, %759 : vector<8x256xf32>
    %c0_490 = arith.constant 0 : index
    %c0_491 = arith.constant 0 : index
    %c0_492 = arith.constant 0 : index
    %761 = vector.load %arg5[%c0_490, %c0_491, %c0_492] : memref<4x8x1xf32, #tpu.memory_space<vmem>>, vector<1x8x1xf32>
    %762 = vector.shape_cast %761 : vector<1x8x1xf32> to vector<8x1xf32>
    %763 = vector.broadcast %762 : vector<8x1xf32> to vector<8x256xf32>
    %764 = arith.addf %510, %763 : vector<8x256xf32>
    %cst_493 = arith.constant 0.000000e+00 : f32
    %765 = vector.broadcast %cst_493 : f32 to vector<8x256xf32>
    %766 = arith.cmpf oge, %764, %765 : vector<8x256xf32>
    %cst_494 = arith.constant 1.000000e-01 : f32
    %767 = vector.broadcast %cst_494 : f32 to vector<8x256xf32>
    %768 = arith.mulf %767, %764 : vector<8x256xf32>
    %769 = arith.select %766, %764, %768 : vector<8x256xi1>, vector<8x256xf32>
    %770 = arith.mulf %769, %16 : vector<8x256xf32>
    %c1_495 = arith.constant 1 : index
    %c0_496 = arith.constant 0 : index
    %c0_497 = arith.constant 0 : index
    %771 = vector.load %arg5[%c1_495, %c0_496, %c0_497] : memref<4x8x1xf32, #tpu.memory_space<vmem>>, vector<1x8x1xf32>
    %772 = vector.shape_cast %771 : vector<1x8x1xf32> to vector<8x1xf32>
    %773 = vector.broadcast %772 : vector<8x1xf32> to vector<8x256xf32>
    %774 = arith.addf %620, %773 : vector<8x256xf32>
    %cst_498 = arith.constant 0.000000e+00 : f32
    %775 = vector.broadcast %cst_498 : f32 to vector<8x256xf32>
    %776 = arith.cmpf oge, %774, %775 : vector<8x256xf32>
    %cst_499 = arith.constant 1.000000e-01 : f32
    %777 = vector.broadcast %cst_499 : f32 to vector<8x256xf32>
    %778 = arith.mulf %777, %774 : vector<8x256xf32>
    %779 = arith.select %776, %774, %778 : vector<8x256xi1>, vector<8x256xf32>
    %780 = arith.mulf %779, %16 : vector<8x256xf32>
    %c2_500 = arith.constant 2 : index
    %c0_501 = arith.constant 0 : index
    %c0_502 = arith.constant 0 : index
    %781 = vector.load %arg5[%c2_500, %c0_501, %c0_502] : memref<4x8x1xf32, #tpu.memory_space<vmem>>, vector<1x8x1xf32>
    %782 = vector.shape_cast %781 : vector<1x8x1xf32> to vector<8x1xf32>
    %783 = vector.broadcast %782 : vector<8x1xf32> to vector<8x256xf32>
    %784 = arith.addf %706, %783 : vector<8x256xf32>
    %cst_503 = arith.constant 0.000000e+00 : f32
    %785 = vector.broadcast %cst_503 : f32 to vector<8x256xf32>
    %786 = arith.cmpf oge, %784, %785 : vector<8x256xf32>
    %cst_504 = arith.constant 1.000000e-01 : f32
    %787 = vector.broadcast %cst_504 : f32 to vector<8x256xf32>
    %788 = arith.mulf %787, %784 : vector<8x256xf32>
    %789 = arith.select %786, %784, %788 : vector<8x256xi1>, vector<8x256xf32>
    %790 = arith.mulf %789, %16 : vector<8x256xf32>
    %c3_505 = arith.constant 3 : index
    %c0_506 = arith.constant 0 : index
    %c0_507 = arith.constant 0 : index
    %791 = vector.load %arg5[%c3_505, %c0_506, %c0_507] : memref<4x8x1xf32, #tpu.memory_space<vmem>>, vector<1x8x1xf32>
    %792 = vector.shape_cast %791 : vector<1x8x1xf32> to vector<8x1xf32>
    %793 = vector.broadcast %792 : vector<8x1xf32> to vector<8x256xf32>
    %794 = arith.addf %760, %793 : vector<8x256xf32>
    %cst_508 = arith.constant 0.000000e+00 : f32
    %795 = vector.broadcast %cst_508 : f32 to vector<8x256xf32>
    %796 = arith.cmpf oge, %794, %795 : vector<8x256xf32>
    %cst_509 = arith.constant 1.000000e-01 : f32
    %797 = vector.broadcast %cst_509 : f32 to vector<8x256xf32>
    %798 = arith.mulf %797, %794 : vector<8x256xf32>
    %799 = arith.select %796, %794, %798 : vector<8x256xi1>, vector<8x256xf32>
    %800 = arith.mulf %799, %16 : vector<8x256xf32>
    %801 = tpu.concatenate %770, %780, %790, %800 in 0 : vector<8x256xf32>, vector<8x256xf32>, vector<8x256xf32>, vector<8x256xf32> -> vector<32x256xf32>
    %c0_510 = arith.constant 0 : index
    %c0_511 = arith.constant 0 : index
    %802 = vector.load %arg6[%c0_510, %c0_511] : memref<32x32xf32, #tpu.memory_space<vmem>>, vector<32x32xf32>
    %cst_512 = arith.constant dense<0.000000e+00> : vector<32x256xf32>
    %803 = tpu.matmul %802, %801, %cst_512 {dimension_numbers = #tpu.dot_dimension_numbers<[1], [0], [0], [1], [0, 0, 1, 1], [], []>} : vector<32x32xf32>, vector<32x256xf32>, vector<32x256xf32> -> vector<32x256xf32>
    %c0_513 = arith.constant 0 : index
    %c0_514 = arith.constant 0 : index
    %804 = vector.load %arg7[%c0_513, %c0_514] : memref<32x1xf32, #tpu.memory_space<vmem>>, vector<32x1xf32>
    %805 = vector.broadcast %804 : vector<32x1xf32> to vector<32x256xf32>
    %806 = arith.addf %803, %805 : vector<32x256xf32>
    %cst_515 = arith.constant dense<0.000000e+00> : vector<32xf32>
    %807 = vector.multi_reduction <add>, %806, %cst_515 [1] : vector<32x256xf32> to vector<32xf32>
    %808 = vector.shape_cast %807 : vector<32xf32> to vector<32x1xf32>
    %cst_516 = arith.constant 2.560000e+02 : f32
    %809 = vector.broadcast %cst_516 : f32 to vector<32x1xf32>
    %810 = arith.divf %808, %809 : vector<32x1xf32>
    %c0_517 = arith.constant 0 : index
    %c0_518 = arith.constant 0 : index
    %811 = vector.load %arg8[%c0_517, %c0_518] : memref<2x32xf32, #tpu.memory_space<vmem>>, vector<2x32xf32>
    %cst_519 = arith.constant dense<0.000000e+00> : vector<2x1xf32>
    %812 = tpu.matmul %811, %810, %cst_519 {dimension_numbers = #tpu.dot_dimension_numbers<[1], [0], [0], [1], [0, 0, 1, 1], [], []>} : vector<2x32xf32>, vector<32x1xf32>, vector<2x1xf32> -> vector<2x1xf32>
    %cst_520 = arith.constant 0.000000e+00 : f32
    %813 = vector.broadcast %cst_520 : f32 to vector<2x1xf32>
    %814 = arith.maximumf %812, %813 : vector<2x1xf32>
    %c0_521 = arith.constant 0 : index
    %c0_522 = arith.constant 0 : index
    %815 = vector.load %arg9[%c0_521, %c0_522] : memref<32x2xf32, #tpu.memory_space<vmem>>, vector<32x2xf32>
    %cst_523 = arith.constant dense<0.000000e+00> : vector<32x1xf32>
    %816 = tpu.matmul %815, %814, %cst_523 {dimension_numbers = #tpu.dot_dimension_numbers<[1], [0], [0], [1], [0, 0, 1, 1], [], []>} : vector<32x2xf32>, vector<2x1xf32>, vector<32x1xf32> -> vector<32x1xf32>
    %817 = arith.negf %816 : vector<32x1xf32>
    %818 = math.exp %817 : vector<32x1xf32>
    %cst_524 = arith.constant 1.000000e+00 : f32
    %819 = vector.broadcast %cst_524 : f32 to vector<32x1xf32>
    %820 = arith.addf %819, %818 : vector<32x1xf32>
    %821 = arith.divf %819, %820 : vector<32x1xf32>
    %822 = vector.broadcast %821 : vector<32x1xf32> to vector<32x256xf32>
    %823 = arith.mulf %806, %822 : vector<32x256xf32>
    %824 = arith.addf %1, %823 : vector<32x256xf32>
    %c0_525 = arith.constant 0 : index
    %c0_526 = arith.constant 0 : index
    %c0_527 = arith.constant 0 : index
    %825 = vector.load %arg10[%c0_525, %c0_526, %c0_527] : memref<1x32x256xf32, #tpu.memory_space<vmem>>, vector<1x32x256xf32>
    %826 = vector.shape_cast %825 : vector<1x32x256xf32> to vector<32x256xf32>
    %827 = vector.shape_cast %824 : vector<32x256xf32> to vector<1x32x256xf32>
    tpu.vector_store %arg10[%c0_525, %c0_526, %c0_527], %827 {strides = array<i32>} : memref<1x32x256xf32, #tpu.memory_space<vmem>>, vector<1x32x256xf32>,
    return
  }
  func.func @transform_0(%arg0: i32) -> (i32, i32, i32) {
    %c0_i32 = arith.constant 0 : i32
    %c0_i32_0 = arith.constant 0 : i32
    %c0_i32_1 = arith.constant 0 : i32
    return %arg0, %c0_i32, %c0_i32_0 : i32, i32, i32
  }
  func.func @transform_1(%arg0: i32) -> (i32, i32) {
    %c0_i32 = arith.constant 0 : i32
    %c0_i32_0 = arith.constant 0 : i32
    %c0_i32_1 = arith.constant 0 : i32
    return %c0_i32, %c0_i32_0 : i32, i32
  }
  func.func @transform_2(%arg0: i32) -> (i32, i32) {
    %c0_i32 = arith.constant 0 : i32
    %c0_i32_0 = arith.constant 0 : i32
    %c0_i32_1 = arith.constant 0 : i32
    return %c0_i32, %c0_i32_0 : i32, i32
  }
  func.func @transform_3(%arg0: i32) -> (i32, i32, i32) {
    %c0_i32 = arith.constant 0 : i32
    %c0_i32_0 = arith.constant 0 : i32
    %c0_i32_1 = arith.constant 0 : i32
    %c0_i32_2 = arith.constant 0 : i32
    return %c0_i32, %c0_i32_0, %c0_i32_1 : i32, i32, i32
  }
  func.func @transform_4(%arg0: i32) -> (i32, i32, i32) {
    %c0_i32 = arith.constant 0 : i32
    %c0_i32_0 = arith.constant 0 : i32
    %c0_i32_1 = arith.constant 0 : i32
    %c0_i32_2 = arith.constant 0 : i32
    return %c0_i32, %c0_i32_0, %c0_i32_1 : i32, i32, i32
  }
  func.func @transform_5(%arg0: i32) -> (i32, i32) {
    %c0_i32 = arith.constant 0 : i32
    %c0_i32_0 = arith.constant 0 : i32
    %c0_i32_1 = arith.constant 0 : i32
    return %c0_i32, %c0_i32_0 : i32, i32
  }
  func.func @transform_6(%arg0: i32) -> (i32, i32) {
    %c0_i32 = arith.constant 0 : i32
    %c0_i32_0 = arith.constant 0 : i32
    %c0_i32_1 = arith.constant 0 : i32
    return %c0_i32, %c0_i32_0 : i32, i32
  }
  func.func @transform_7(%arg0: i32) -> (i32, i32) {
    %c0_i32 = arith.constant 0 : i32
    %c0_i32_0 = arith.constant 0 : i32
    %c0_i32_1 = arith.constant 0 : i32
    return %c0_i32, %c0_i32_0 : i32, i32
  }
  func.func @transform_8(%arg0: i32) -> (i32, i32) {
    %c0_i32 = arith.constant 0 : i32
    %c0_i32_0 = arith.constant 0 : i32
    %c0_i32_1 = arith.constant 0 : i32
    return %c0_i32, %c0_i32_0 : i32, i32
  }
  func.func @transform_9(%arg0: i32) -> (i32, i32, i32) {
    %c0_i32 = arith.constant 0 : i32
    %c0_i32_0 = arith.constant 0 : i32
    %c0_i32_1 = arith.constant 0 : i32
    return %arg0, %c0_i32, %c0_i32_0 : i32, i32, i32
  }
}

</mosaic_0001>

<bundles_post_ra>
// kernel: tpu_custom_call.1
= control target key start
LH: loop header
LB: loop body
LE: loop exit
PB: predicated region body
PF: predicated region fallthrough
CT: control target
= control target key end

     0   :  { %s11214_s0 = inlined_call_operand.hbm [shape: f32[2,32,256], index: 0, kind: input, shape index: {}]   ;;  %s11215_s1 = inlined_call_operand.hbm [shape: f32[8,32], index: 1, kind: input, shape index: {}]   ;;  %s11216_s2 = inlined_call_operand.vmem [shape: f32[8,1], index: 2, kind: input, shape index: {}]   ;;  %s11217_s3 = inlined_call_operand.hbm [shape: f32[164,8,256], index: 3, kind: input, shape index: {}]   ;;  %s11218_s4 = inlined_call_operand.vmem [shape: f32[4,8,1], index: 4, kind: input, shape index: {}]   ;;  %s11219_s5 = inlined_call_operand.hbm [shape: f32[32,32], index: 5, kind: input, shape index: {}]   ;;  %s11220_s6 = inlined_call_operand.vmem [shape: f32[32,1], index: 6, kind: input, shape index: {}]   ;;  %s11221_s7 = inlined_call_operand.hbm [shape: f32[2,32], index: 7, kind: input, shape index: {}]   ;;  %s11222_s8 = inlined_call_operand.vmem [shape: f32[32,2], index: 8, kind: input, shape index: {}]   ;;  %s11223_s9 = inlined_call_operand.hbm [shape: f32[2,32,256], index: 9, kind: output, shape index: {}]  }
   0x1   :  { %11714 = sst [smem:[#allocation383_spill]] %s11214_s0 }
   0x2   :  { %11715 = sst [smem:[#allocation384_spill]] %s11215_s1 }
   0x3   :  { %11716 = sst [smem:[#allocation385_spill]] %s11216_s2 }
   0x4   :  { %11717 = sst [smem:[#allocation386_spill]] %s11217_s3 }
   0x5   :  { %11718 = sst [smem:[#allocation387_spill]] %s11219_s5 }
   0x6   :  { %11719 = sst [smem:[#allocation388_spill]] %s11221_s7 }
   0x7   :  { %11720 = sst [smem:[#allocation389_spill]] %s11223_s9 }
   0x8   :  { %14 = vsyncpa [#allocation4], 0 }
   0x9   :  { %16 = vsyncpa [#allocation4 + $0x1], 0 }
   0xa   :  { %17 = vsyncpa [#allocation7], 0 }
   0xb   :  { %18 = vsyncpa [#allocation10], 0 }
   0xc   :  { %19 = vsyncpa [#allocation5], 0 }
   0xd   :  { %21 = vsyncpa [#allocation5 + $0x1], 0  ;;  %s7270_s30 = smov 0   ;;  %s7272_s10 = smov 0  }
   0xe   :  { %s7274_s11 = smov 0   ;;  %s7276_s12 = smov 0  }
   0xf LB: > { %11721 = sst [smem:[#allocation17_spill]] %s7092_s30  ;;  %s7291_s13 = sadd.s32 4294967295, %s7104_s12   ;;  %s7104_s12 = sphi %s7276_s12, %s12849_s12   ;;  %s7100_s11 = sphi %s7274_s11, %s12852_s11   ;;  %s7096_s10 = sphi %s7272_s10, %s12851_s10   ;;  %s7092_s30 = sphi %s7270_s30, %s12850_s30  }
  0x10   : > { %11722 = sst [smem:[#allocation18_spill]] %s7096_s10  ;;  %s6552_s14 = sadd.s32 4294967294, %s7104_s12  }
  0x11   : > { %11723 = sst [smem:[#allocation19_spill]] %s7100_s11  ;;  %p47_p0 = scmp.ne.s32.totalorder %s7096_s10, %s7092_s30 }
  0x12   : > { %11724 = sst [smem:[#allocation20_spill]] %s7104_s12  ;;  %p48_p1 = scmp.eq.s32.totalorder %s7291_s13, 0 }
  0x13   : > { %11725 = sst [smem:[#allocation21_spill]] %s7291_s13  ;;  %p239_p2 = scmp.eq.s32.totalorder %s7291_s13, 1 }
  0x14   : > { %p245_p3 = scmp.eq.s32.totalorder %s6552_s14, 1  ;;  %p7300_p4 = por %p48_p1, %p47_p0 }
  0x15   : > { %p6553_p5 = scmp.ge.s32.totalorder %s7104_s12, 1  ;;  %p252_p7 = scmp.lt.s32.totalorder %s7104_s12, 3 }
  0x16   : > { %p7305_p6 = por %p245_p3, %p47_p0  ;;  %s11729_s1 = sld [smem:[#allocation384_spill]] }
  0x17   : > { %p7313_p8 = pnand %p6553_p5, %p252_p7  ;;  %s7106_s21 = smov [#allocation6]  }
  0x18   : > { %s11727_s16 = scalar_select %p7305_p6, 1, 0 }
  0x19   : > { %p6621_p10 = pneg %p7313_p8  ;;  %s266_s22 = sshll.u32 %s7106_s21, 4  ;;  %s267_s22 = int_to_ptr.vmem [resolvable:$true] %s266_s22 }
  0x1a   : > { %11728 = sst [smem:[#allocation22_spill]] %s11727_s16  ;;  %s7107_s27 = smov [#allocation9]  }
  0x1b   : > { %s11731_s5 = sld [smem:[#allocation387_spill]]  ;;  %p7325_p11 = pnand %p6621_p10, %p48_p1 }
  0x1c   : > { %s264_s19 = sshll.u32 %s11729_s1, 4  ;;  %s297_s28 = sshll.u32 %s7107_s27, 4  ;;  %s265_s19 = int_to_ptr.hbm [resolvable:$true] %s264_s19  ;;  %s298_s28 = int_to_ptr.vmem [resolvable:$true] %s297_s28 }
  0x1d   : > { %6624 = dma.hbm_to_vmem [thread:$0]  (!%p7325_p11), %s265_s19, 128, %s267_s22, [#allocation7]  }
  0x1e   : > { %s7108_s29 = smov 128   ;;  %s7109_s14 = smov 8  }
  0x1f   : > { %s11733_s3 = sld [smem:[#allocation386_spill]]  ;;  %s7110_s23 = smov [#allocation8]  }
  0x20   : > { %s280_s24 = sshll.u32 %s7110_s23, 4  ;;  %s11734_s7 = sld [smem:[#allocation388_spill]]  ;;  %s281_s24 = int_to_ptr.vmem [resolvable:$true] %s280_s24 }
  0x21   : > { %s295_s25 = sshll.u32 %s11731_s5, 4  ;;  %s7347_s17 = sadd.s32 1, %s7104_s12   ;;  %s296_s25 = int_to_ptr.hbm [resolvable:$true] %s295_s25 }
  0x22   : > { %6630 = dma.hbm_to_vmem [thread:$0]  (!%p7325_p11), %s296_s25, 512, %s298_s28, [#allocation10], %s7108_s29, %s7108_s29, %s7109_s14  }
  0x23   : > { %s11224_s25 = smov 256   ;;  %s11225_s28 = smov 16  }
  0x24   : > { %s7113_s29 = smov [#allocation11]   ;;  %11735 = sst [smem:[#allocation23_spill]] %s7347_s17 }
  0x25   : > { %s278_s21 = sshll.u32 %s11733_s3, 4  ;;  %s315_s14 = sshll.u32 %s7113_s29, 4  ;;  %s279_s21 = int_to_ptr.hbm [resolvable:$true] %s278_s21  ;;  %s316_s14 = int_to_ptr.vmem [resolvable:$true] %s315_s14 }
  0x26   : > { %s313_s27 = sshll.u32 %s11734_s7, 4  ;;  %s34_s18 = sadd.s32 1, %s7100_s11  ;;  %s314_s27 = int_to_ptr.hbm [resolvable:$true] %s313_s27 }
  0x27   : > { %6627 = dma.hbm_to_vmem [thread:$0]  (!%p7325_p11), %s279_s21, 41984, %s281_s24, [#allocation7], %s11224_s25, %s11224_s25, %s11225_s28  }
  0x28   : > { %6633 = dma.hbm_to_vmem [thread:$0]  (!%p7325_p11), %s314_s27, 32, %s316_s14, [#allocation10]  }
  0x29   : > { %s31_s23 = ssub.s32 %s7104_s12, %s7347_s17  ;;  %p41_p12 = scmp.ne.s32.totalorder %s7100_s11, %s7096_s10 }
  0x2a   : > { %p32_p13 = scmp.eq.s32.totalorder %s31_s23, 0  ;;  %p42_p0 = scmp.eq.s32.totalorder %s7104_s12, 0 }
  0x2b   : > { %p7357_p3 = por %p239_p2, %p41_p12  ;;  %p6646_p5 = scmp.lt.s32.totalorder %s7104_s12, 2 }
  0x2c   : > { %s7363_s21 = scalar_select %p32_p13, %s7100_s11, %s34_s18  }
  0x2d   : > { %s11736_s19 = scalar_select %p7357_p3, 1, 0 }
  0x2e   : > { %11738 = sst [smem:[#allocation25_spill]] %s7363_s21  ;;  %p43_p7 = por %p42_p0, %p41_p12 }
  0x2f   : > { %11737 = sst [smem:[#allocation24_spill]] %s11736_s19  ;;  %s329_s24 = sand.u32 1, %s7100_s11  }
  0x30   : > { %s6559_s26 = sshll.u32 %s329_s24, 6  ;;  %s6599_s22 = sshll.u32 %s7104_s12, 6 }
  0x31   : > { %s11739_s0 = sld [smem:[#allocation383_spill]]  ;;  %s333_s25 = scalar_lea.vmem [#allocation3], %s6559_s26 }
  0x32   : > { %s341_s28 = sshll.u32 %s333_s25, 4  ;;  %p7370_p2 = pnand %p6646_p5, %p43_p7  ;;  %s342_s28 = int_to_ptr.vmem [resolvable:$true] %s341_s28 }
  0x33   : > { %s330_s18 = scalar_lea.sflag [#allocation4], %s329_s24 }
  0x34   : > { %p7004_p11 = pneg %p7370_p2 }
  0x37   : > { %s338_s14 = scalar_lea.hbm %s11739_s0, %s6599_s22  ;;  %s7007_s25 = scalar_lea.hbm %s11739_s0, 128 }
  0x38   : > { %s339_s23 = sshll.u32 %s338_s14, 4  ;;  %s340_s23 = int_to_ptr.hbm [resolvable:$true] %s339_s23 }
  0x39   : > { %s7000_s3 = sshra.s32 %s340_s23, 4  ;;  %s7001_s3 = int_to_ptr.hbm [resolvable:$true] %s7000_s3 }
  0x3a   : > { %s7002_s5 = scalar_lea.hbm %s7001_s3, 64  ;;  %p7008_p0 = scmp.lt.s32.totalorder %s7001_s3, %s11739_s0 }
  0x3b   : > { %p7003_p10 = scmp.ne.s32.totalorder %s7001_s3, %s7002_s5  ;;  %p7009_p5 = scmp.lt.s32.totalorder %s7007_s25, %s7002_s5 }
  0x3d   : > { %p7005_p12 = pnand %p7004_p11, %p7003_p10  ;;  %p7010_p7 = por %p7009_p5, %p7008_p0 }
  0x3f   : > { %p7006_p13 = pneg %p7005_p12 }
  0x41   : > { %p7011_p9 = pnand %p7010_p7, %p7006_p13 }
  0x43   : > { %7014 = shalt.err (!%p7011_p9)
}
  0x44   : > { %s11741_s24 = smov 16   ;;  %s11742_s14 = smov 256  }
  0x45   : > { %6637 = dma.hbm_to_vmem [thread:$0]  (!%p7370_p2), %s340_s23, 1024, %s342_s28, %s330_s18, %s11742_s14, %s11742_s14, %s11741_s24  }
  0x46   : > { %353 = sbr.rel (%p7313_p8) target bundleno = 14354 (0x3812), region = 56 }
  0x4b   : > { %s7390_s22 = sand.u32 1, %s7096_s10  }
  0x4c   : > { %11743 = sst [smem:[#allocation26_spill]] %s7390_s22  ;;  %s11226_s3 = sshll.u32 %s7390_s22, 6 }
  0x4d   : > { %s356_s5 = scalar_lea.sflag [#allocation4], %s7390_s22  ;;  %s7396_s26 = scalar_lea.vmem [#allocation3], %s11226_s3 }
  0x4e   : > { %11744 = sst [smem:[#allocation27_spill]] %s7396_s26 }
  0x4f   : > { %7075 = dma.done.wait (%p7300_p4), %s356_s5, 1024  }
  0x50   : > { %7077 = vsyncadd (%p7300_p4), %s356_s5, 4294966272 }
  0x51   : > { %7079 = dma.done.wait (%p48_p1), [#allocation7], 42112  }
  0x52   : > { %7081 = vsyncadd (%p48_p1), [#allocation7], 4294925184 }
  0x53   : > { %7083 = dma.done.wait (%p48_p1), [#allocation10], 544  }
  0x54   : > { %7085 = vsyncadd (%p48_p1), [#allocation10], 4294966752  ;;  %v7114_v0 = vmov 0   ;;  %v549_v1 = vld [vmem:[#allocation8 + $0x548] sm:$0xff]  ;;  %v529_v2 = vld [vmem:[#allocation8 + $0x538] sm:$0xff]  ;;  %s11745_s2 = sld [smem:[#allocation385_spill]] }
  0x55   : > { %6798 = vset.pattern.permute.xlu0 %v7114_v0  ;;  %6799 = vset.pattern.permute.xlu2 %v7114_v0  ;;  %s11237_s20 = smov 61   ;;  %s11235_s28 = smov 60   ;;  %v421_v4 = vld [vmem:[%s7396_s26 + $0x30] sm:$0xff]  ;;  %v419_v5 = vld [vmem:[%s7396_s26 + $0x20] sm:$0xff]  ;;  %vm11633_vm0 = vcmask 261120   ;;  %v583_v9 = vld [vmem:[#allocation8 + $0x550] sm:$0xff] }
  0x56   : > { %6800 = vset.pattern.permute.xlu1 %v7114_v0  ;;  %554 = vrot.lane.b32.xlu2 %v549_v1, %s11237_s20  ;;  %v417_v6 = vld [vmem:[%s7396_s26 + $0x10] sm:$0xff]  ;;  %v415_v7 = vld [vmem:[%s7396_s26] sm:$0xff]  ;;  %v548_v10 = vld [vmem:[#allocation8 + $0x540] sm:$0xff]  ;;  %s11239_s23 = smov 62   ;;  %s11241_s18 = smov 63   ;;  %vm11360_vm2 = vcmask 515072  }
  0x57   : > { %534 = vrot.lane.b32.xlu1 %v529_v2, %s11235_s28  ;;  %446 = vmatpush.msra.mxu0 %v421_v4  ;;  %v423_v8 = vld [vmem:[#allocation6] sm:$0xff]  ;;  %v528_v11 = vld [vmem:[#allocation8 + $0x530] sm:$0xff]  ;;  %v420_v13 = vld [vmem:[%s7396_s26 + $0x28] sm:$0xff]  ;;  %s11231_s25 = smov 65   ;;  %s11243_s27 = smov 64   ;;  %vm11304_vm3 = vcmask 539648  }
  0x58   : > { %v422_v12 = vld [vmem:[%s7396_s26 + $0x38] sm:$0xff]  ;;  %v416_v15 = vld [vmem:[%s7396_s26 + $0x8] sm:$0xff]  ;;  %v619_v16 = vld [vmem:[#allocation8 + $0x568] sm:$0xff]  ;;  %s11233_s29 = smov 66   ;;  %s11227_s24 = smov 68   ;;  %vm11352_vm4 = vcmask 506880  }
  0x59   : > { %447 = vmatpush.msra.mxu0 %v419_v5  ;;  %v418_v14 = vld [vmem:[%s7396_s26 + $0x18] sm:$0xff]  ;;  %v618_v17 = vld [vmem:[#allocation8 + $0x560] sm:$0xff]  ;;  %v584_v18 = vld [vmem:[#allocation8 + $0x558] sm:$0xff]  ;;  %s11229_s14 = smov 67   ;;  %s11249_s5 = smov 76   ;;  %vm11388_vm5 = vcmask 621568  }
  0x5a   : > { %v424_v3 = vld [vmem:[%s11745_s2] sm:$0xff]  ;;  %v688_v19 = vld [vmem:[#allocation8 + $0x580] sm:$0xff]  ;;  %v653_v21 = vld [vmem:[#allocation8 + $0x570] sm:$0xff]  ;;  %s11251_s1 = smov 77   ;;  %s11253_s15 = smov 78   ;;  %vm11314_vm6 = vcmask 531456  }
  0x5b   : > { %427 = vperm.xlu0 %6798, %v424_v3   ;;  %448 = vmatpush.msra.mxu0 %v417_v6  ;;  %v654_v20 = vld [vmem:[#allocation8 + $0x578] sm:$0xff]  ;;  %v723_v23 = vld [vmem:[#allocation8 + $0x590] sm:$0xff]  ;;  %v689_v24 = vld [vmem:[#allocation8 + $0x588] sm:$0xff]  ;;  %s11311_s3 = smov 126   ;;  %vm11288_vm7 = vcmask 556032   ;;  %vm11421_vm8 = vcmask 637952  }
  0x5c   : > { %v724_v22 = vld [vmem:[#allocation8 + $0x598] sm:$0xff]  ;;  %v793_v25 = vld [vmem:[#allocation8 + $0x5b0] sm:$0xff]  ;;  %v759_v26 = vld [vmem:[#allocation8 + $0x5a8] sm:$0xff]  ;;  %vm11347_vm10 = vcmask 498688   ;;  %vm11416_vm11 = vcmask 629760   ;;  %vm11370_vm12 = vcmask 523264  }
  0x5d   : > { %449 = vmatpush.msra.mxu0 %v415_v7  ;;  %v758_v27 = vld [vmem:[#allocation8 + $0x5a0] sm:$0xff]  ;;  %v829_v28 = vld [vmem:[#allocation8 + $0x5c8] sm:$0xff]  ;;  %v794_v30 = vld [vmem:[#allocation8 + $0x5b8] sm:$0xff]  ;;  %vm11296_vm13 = vcmask 547840   ;;  %vm11428_vm14 = vcmask 646144   ;;  %vm11445_vm15 = vcmask 654336  }
  0x5e   : > { %6569 = vmatmul.msk.f32.vlgmr.msra.gmra.mxu0 %vm11633_vm0, %v423_v8  ;;  %587 = vrot.lane.b32.xlu2 %v583_v9, %s11239_s23  ;;  %v828_v29 = vld [vmem:[#allocation8 + $0x5c0] sm:$0xff]  ;;  %v883_v31 = vld [vmem:[#allocation8 + $0x5d0] sm:$0xff]  ;;  %v864_v32 = vld [vmem:[#allocation8 + $0x228] sm:$0xff]  ;;  %s7167_s0 = smov 115   ;;  %s11944_s2 = smov 62  }
  0x5f   : > { %552 = vrot.lane.b32.xlu1 %v548_v10, %s11237_s20  ;;  %466 = vmatpush.msrb.mxu0 %v422_v12  ;;  %v863_v33 = vld [vmem:[#allocation8 + $0x220] sm:$0xff]  ;;  %v918_v34 = vld [vmem:[#allocation8 + $0x238] sm:$0xff]  ;;  %v917_v35 = vld [vmem:[#allocation8 + $0x230] sm:$0xff]  ;;  %s11375_s20 = smov 111   ;;  %s11948_s7 = smov 112  }
  0x60   : > { %v884_v36 = vld [vmem:[#allocation8 + $0x5d8] sm:$0xff]  ;;  %s11952_s21 = smov 95   ;;  %s11960_s11 = smov 111  }
  0x61   : > { %467 = vmatpush.msrb.mxu0 %v420_v13  ;;  %s11962_s10 = smov 94   ;;  %s11963_s17 = smov 60  }
  0x62   : > { %s7171_s12 = smov 1   ;;  %s11969_s16 = smov 110  }
  0x63   : > { %532 = vrot.lane.b32.xlu0 %v528_v11, %s11235_s28  ;;  %468 = vmatpush.msrb.mxu0 %v418_v14  ;;  %s11284_s28 = smov 124   ;;  %s12112_s30 = smov 46  }
  0x64   : > { %s12115_s19 = smov 30   ;;  %s12123_s9 = smov 48  }
  0x65   : > { %469 = vmatpush.msrb.mxu0 %v416_v15  ;;  %s11644_s13 = smov 26   ;;  %s12173_s22 = smov 12  }
  0x66   : > { %624 = vrot.lane.b32.xlu2 %v619_v16, %s11241_s18  ;;  %6570 = vmatmul.msk.f32.vlgmr.msrb.gmra.mxu0 %vm11633_vm0, %v423_v8  ;;  %s12184_s26 = smov 25  }
  0x67   : > { %622 = vrot.lane.b32.xlu1 %v618_v17, %s11241_s18  ;;  %s11247_s18 = smov 121  }
  0x6b   : > { %589 = vrot.lane.b32.xlu0 %v584_v18, %s11239_s23  ;;  %s11276_s23 = smov 122  }
  0x6e   : > { %692 = vrot.lane.b32.xlu2 %v688_v19, %s11231_s25 }
  0x6f   : > { %659 = vrot.lane.b32.xlu1 %v654_v20, %s11243_s27 }
  0x73   : > { %657 = vrot.lane.b32.xlu0 %v653_v21, %s11243_s27  ;;  %s11386_s27 = smov 112  }
  0x76   : > { %729 = vrot.lane.b32.xlu2 %v724_v22, %s11233_s29 }
  0x77   : > { %727 = vrot.lane.b32.xlu1 %v723_v23, %s11233_s29  ;;  %s11320_s29 = smov 125  }
  0x7b   : > { %694 = vrot.lane.b32.xlu0 %v689_v24, %s11231_s25  ;;  %s11245_s25 = smov 120  }
  0x7e   : > { %797 = vrot.lane.b32.xlu2 %v793_v25, %s11227_s24 }
  0x7f   : > { %764 = vrot.lane.b32.xlu1 %v759_v26, %s11229_s14 }
  0x83   : > { %762 = vrot.lane.b32.xlu0 %v758_v27, %s11229_s14  ;;  %s11333_s14 = smov 127  }
  0x86   : > { %834 = vrot.lane.b32.xlu2 %v829_v28, %s11249_s5 }
  0x87   : > { %832 = vrot.lane.b32.xlu1 %v828_v29, %s11249_s5  ;;  %s7139_s5 = smov 109  }
  0x8b   : > { %799 = vrot.lane.b32.xlu0 %v794_v30, %s11227_s24  ;;  %s11270_s24 = smov 123  }
  0x8e   : > { %887 = vrot.lane.b32.xlu2 %v883_v31, %s11251_s1 }
  0x8f   : > { %869 = vrot.lane.b32.xlu1 %v864_v32, %s11251_s1 }
  0x93   : > { %867 = vrot.lane.b32.xlu0 %v863_v33, %s11251_s1 }
  0x96   : > { %923 = vrot.lane.b32.xlu2 %v918_v34, %s11253_s15 }
  0x97   : > { %921 = vrot.lane.b32.xlu1 %v917_v35, %s11253_s15 }
  0x9b   : > { %889 = vrot.lane.b32.xlu0 %v884_v36, %s11251_s1  ;;  %s11257_s1 = smov 80  }
  0xb0   : > { %v7449_v37 = vpop.permute.xlu2 %554 }
  0xb8   : > { %v588_v38 = vpop.permute.xlu2 %587 }
  0xb9   : > { %v596_v39 = vmul.f32 0.0, %v588_v38 }
  0xbb   : > { %602 = vrot.lane.b32.xlu1 %v596_v39, %s11311_s3 }
  0xc0   : > { %v7452_v40 = vpop.permute.xlu2 %624 }
  0xc8   : > { %v7454_v41 = vpop.permute.xlu2 %692 }
  0xc9   : > { %v7456_v42 = vpop.permute.xlu1 %534  ;;  %v701_v43 = vmul.f32 0.0, %v7454_v41 }
  0xcb   : > { %707 = vrot.lane.b32.xlu1 %v701_v43, %s11270_s24 }
  0xcd   : > { %v7459_v44 = vpop.permute.xlu0 %427 }
  0xd0   : > { %v7462_v45 = vpop.permute.xlu2 %729 }
  0xd1   : > { %v7464_v46 = vpop.permute.xlu1 %552 }
  0xd2   : > { %v561_v48 = vmul.f32 0.0, %v7464_v46  ;;  %v557_v34 = vsel %vm11347_vm10, %v7464_v46, %v7449_v37  ;;  %vm11678_vm10 = vcmask 891904  }
  0xd4   : > { %567 = vrot.lane.b32.xlu2 %v561_v48, %s11333_s14 }
  0xd5   : > { %v7466_v47 = vpop.permute.xlu0 %532 }
  0xd8   : > { %v7470_v49 = vpop.permute.xlu2 %797 }
  0xd9   : > { %v806_v50 = vmul.f32 0.0, %v7470_v49  ;;  %v623_v51 = vpop.permute.xlu1 %622 }
  0xda   : > { %v631_v52 = vmul.f32 0.0, %v623_v51  ;;  %v627_v3 = vsel %vm11360_vm2, %v623_v51, %v7452_v40  ;;  %vm11674_vm2 = vcmask 908288  }
  0xdb   : > { %812 = vrot.lane.b32.xlu1 %v806_v50, %s11245_s25  ;;  %v451_v57 = vpop.f32.mrf.mxu0  ;;  %v952_v50 = vld [vmem:[#allocation8 + $0x5e8] sm:$0xff] }
  0xdc   : > { %637 = vrot.lane.b32.xlu0 %v631_v52, %s11320_s29  ;;  %v452_v59 = vadd.f32 %v451_v57, %v7459_v44 }
  0xdd   : > { %v7473_v53 = vpop.permute.xlu0 %589 }
  0xde   : > { %v476_v63 = vmul.f32 0.1, %v452_v59  ;;  %vm474_vm1 = vcmp.ge.f32.partialorder %v452_v59, 0.0  ;;  %v592_v11 = vsel %vm11352_vm4, %v588_v38, %v7473_v53  ;;  %vm11673_vm4 = vcmask 900096  }
  0xe0   : > { %v7477_v54 = vpop.permute.xlu2 %834  ;;  %v7492_v2 = vsel %vm474_vm1, %v452_v59, %v476_v63  ;;  %vm1129_vm1 = vcmask 662528  }
  0xe1   : > { %v7479_v55 = vpop.permute.xlu1 %659  ;;  %v632_v5 = vmul.f32 %v627_v3, %v7492_v2  ;;  %v597_v14 = vmul.f32 %v592_v11, %v7492_v2  ;;  %v562_v35 = vmul.f32 %v557_v34, %v7492_v2 }
  0xe3   : > { %v471_v21 = vpop.f32.mrf.mxu0 }
  0xe4   : > { %v472_v22 = vadd.f32 %v471_v21, %v7459_v44 }
  0xe5   : > { %v7481_v56 = vpop.permute.xlu0 %657 }
  0xe6   : > { %v666_v58 = vmul.f32 0.0, %v7481_v56  ;;  %v477_v30 = vmul.f32 0.1, %v472_v22  ;;  %vm475_vm9 = vcmp.ge.f32.partialorder %v472_v22, 0.0  ;;  %v662_v39 = vsel %vm11370_vm12, %v7481_v56, %v7479_v55  ;;  %v951_v56 = vld [vmem:[#allocation8 + $0x5e0] sm:$0xff] }
  0xe7   : > { %vm853_vm12 = vcmask 916480  }
  0xe8   : > { %672 = vrot.lane.b32.xlu2 %v666_v58, %s11284_s28  ;;  %v7486_v60 = vpop.permute.xlu2 %887  ;;  %v7539_v32 = vsel %vm475_vm9, %v472_v22, %v477_v30  ;;  %vm1197_vm9 = vcmask 670720  }
  0xe9   : > { %v895_v61 = vmul.f32 0.0, %v7486_v60  ;;  %v728_v62 = vpop.permute.xlu1 %727  ;;  %v563_v36 = vmul.f32 %v7449_v37, %v7539_v32  ;;  %v633_v43 = vmul.f32 %v7452_v40, %v7539_v32  ;;  %v668_v37 = vmul.f32 %v7479_v55, %v7539_v32 }
  0xea   : > { %v736_v1 = vmul.f32 0.0, %v728_v62  ;;  %v732_v8 = vsel %vm11304_vm3, %v728_v62, %v7462_v45  ;;  %v738_v48 = vmul.f32 %v7462_v45, %v7539_v32  ;;  %v843_v51 = vmul.f32 %v7477_v54, %v7539_v32 }
  0xeb   : > { %901 = vrot.lane.b32.xlu1 %v895_v61, %s11375_s20  ;;  %v737_v10 = vmul.f32 %v732_v8, %v7492_v2  ;;  %vm1385_vm3 = vcmask 785408  }
  0xec   : > { %742 = vrot.lane.b32.xlu0 %v736_v1, %s11276_s23 }
  0xed   : > { %v7489_v0 = vpop.permute.xlu0 %694 }
  0xee   : > { %v697_v16 = vsel %vm11314_vm6, %v7454_v41, %v7489_v0  ;;  %v667_v41 = vmul.f32 %v662_v39, %v7492_v2  ;;  %v703_v45 = vmul.f32 %v7489_v0, %v7539_v32  ;;  %vm1755_vm6 = vcmask 793600  }
  0xef   : > { %v702_v20 = vmul.f32 %v697_v16, %v7492_v2 }
  0xf0   : > { %v924_v24 = vpop.permute.xlu2 %923 }
  0xf1   : > { %v7497_v4 = vpop.permute.xlu1 %764  ;;  %v932_v52 = vmul.f32 %v924_v24, %v7539_v32 }
  0xf2   : > { %v773_v40 = vmul.f32 %v7497_v4, %v7539_v32 }
  0xf3   : > { %639 = vrot.lane.b32.xlu1 %v632_v5, %s11320_s29 }
  0xf5   : > { %v7500_v6 = vpop.permute.xlu0 %762 }
  0xf6   : > { %v771_v7 = vmul.f32 0.0, %v7500_v6  ;;  %v767_v44 = vsel %vm11296_vm13, %v7500_v6, %v7497_v4  ;;  %vm11690_vm13 = vcmask 777216  }
  0xf7   : > { %v772_v46 = vmul.f32 %v767_v44, %v7492_v2 }
  0xf8   : > { %777 = vrot.lane.b32.xlu2 %v771_v7, %s11247_s18 }
  0xf9   : > { %v833_v9 = vpop.permute.xlu1 %832 }
  0xfa   : > { %v841_v12 = vmul.f32 0.0, %v833_v9  ;;  %v837_v15 = vsel %vm11388_vm5, %v833_v9, %v7477_v54  ;;  %vm2507_vm5 = vcmask 924672  }
  0xfb   : > { %744 = vrot.lane.b32.xlu1 %v737_v10, %s11276_s23  ;;  %v842_v18 = vmul.f32 %v837_v15, %v7492_v2 }
  0xfc   : > { %847 = vrot.lane.b32.xlu0 %v841_v12, %s11386_s27 }
  0xfd   : > { %v7510_v13 = vpop.permute.xlu0 %799 }
  0xfe   : > { %v802_v23 = vsel %vm11288_vm7, %v7470_v49, %v7510_v13  ;;  %v598_v49 = vmul.f32 %v7473_v53, %v7539_v32  ;;  %v808_v53 = vmul.f32 %v7510_v13, %v7539_v32  ;;  %vm11692_vm7 = vcmask 769024  }
  0xff   : > { %v807_v28 = vmul.f32 %v802_v23, %v7492_v2 }
 0x100   : > { %604 = vrot.lane.b32.xlu2 %v597_v14, %s11311_s3 }
 0x101   : > { %v7521_v17 = vpop.permute.xlu1 %869 }
 0x102   : > { %11746 = vst [vmem:[#allocation28_spill] sm:$0xff] %v7521_v17 }
 0x103   : > { %849 = vrot.lane.b32.xlu1 %v842_v18, %s11386_s27 }
 0x105   : > { %v7524_v19 = vpop.permute.xlu0 %867 }
 0x106   : > { %11747 = vst [vmem:[#allocation29_spill] sm:$0xff] %v7524_v19 }
 0x108   : > { %709 = vrot.lane.b32.xlu2 %v702_v20, %s11270_s24 }
 0x109   : > { %v922_v25 = vpop.permute.xlu1 %921 }
 0x10a   : > { %v926_v26 = vsel %vm11421_vm8, %v922_v25, %v924_v24  ;;  %v930_v27 = vmul.f32 0.0, %v922_v25 }
 0x10b   : > { %v931_v29 = vmul.f32 %v926_v26, %v7492_v2  ;;  %v985_v26 = vld [vmem:[#allocation8 + $0x240] sm:$0xff] }
 0x10c   : > { %936 = vrot.lane.b32.xlu0 %v930_v27, %s11333_s14  ;;  %v986_v27 = vld [vmem:[#allocation8 + $0x248] sm:$0xff] }
 0x10d   : > { %v890_v31 = vpop.permute.xlu0 %889  ;;  %938 = vrot.lane.b32.xlu1 %v931_v29, %s11333_s14 }
 0x10e   : > { %v891_v33 = vsel %vm11416_vm11, %v7486_v60, %v890_v31  ;;  %v897_v55 = vmul.f32 %v890_v31, %v7539_v32  ;;  %vm11659_vm11 = vcmask 1022976  }
 0x10f   : > { %v896_v38 = vmul.f32 %v891_v33, %v7492_v2 }
 0x110   : > { %814 = vrot.lane.b32.xlu2 %v807_v28, %s11245_s25 }
 0x114   : > { %569 = vrot.lane.b32.xlu0 %v562_v35, %s11333_s14 }
 0x115   : > { %571 = vrot.lane.b32.xlu1 %v563_v36, %s11333_s14 }
 0x118   : > { %903 = vrot.lane.b32.xlu2 %v896_v38, %s11375_s20 }
 0x11c   : > { %674 = vrot.lane.b32.xlu0 %v667_v41, %s11284_s28 }
 0x11d   : > { %676 = vrot.lane.b32.xlu1 %v668_v37, %s11284_s28 }
 0x120   : > { %641 = vrot.lane.b32.xlu2 %v633_v43, %s11320_s29  ;;  %v1019_v43 = vld [vmem:[#allocation8 + $0x5f0] sm:$0xff] }
 0x124   : > { %779 = vrot.lane.b32.xlu0 %v772_v46, %s11247_s18 }
 0x125   : > { %781 = vrot.lane.b32.xlu1 %v773_v40, %s11247_s18  ;;  %s11255_s18 = smov 79  }
 0x128   : > { %746 = vrot.lane.b32.xlu2 %v738_v48, %s11276_s23 }
 0x12c   : > { %606 = vrot.lane.b32.xlu0 %v598_v49, %s11311_s3  ;;  %v1020_v49 = vld [vmem:[#allocation8 + $0x5f8] sm:$0xff] }
 0x12d   : > { %957 = vrot.lane.b32.xlu1 %v952_v50, %s11253_s15  ;;  %v7590_v54 = vpop.permute.xlu1 %602 }
 0x12e   : > { %v7637_v16 = vpop.permute.xlu2 %567 }
 0x130   : > { %851 = vrot.lane.b32.xlu2 %v843_v51, %s11386_s27 }
 0x134   : > { %711 = vrot.lane.b32.xlu0 %v703_v45, %s11270_s24 }
 0x138   : > { %940 = vrot.lane.b32.xlu2 %v932_v52, %s11333_s14 }
 0x13c   : > { %816 = vrot.lane.b32.xlu0 %v808_v53, %s11245_s25  ;;  %s11379_s25 = smov 110  }
 0x13d   : > { %v7594_v57 = vpop.permute.xlu1 %707 }
 0x142   : > { %v7641_v20 = vpop.permute.xlu2 %672 }
 0x144   : > { %905 = vrot.lane.b32.xlu0 %v897_v55, %s11375_s20 }
 0x14c   : > { %955 = vrot.lane.b32.xlu0 %v951_v56, %s11253_s15  ;;  %s7141_s15 = smov 108  }
 0x14d   : > { %v7597_v58 = vpop.permute.xlu1 %812 }
 0x14e   : > { %v7603_v61 = vpop.permute.xlu0 %637 }
 0x152   : > { %v7647_v25 = vpop.permute.xlu2 %777 }
 0x15a   : > { %v7651_v28 = vpop.permute.xlu2 %604 }
 0x15d   : > { %v7599_v59 = vpop.permute.xlu1 %901 }
 0x15e   : > { %v7607_v63 = vpop.permute.xlu0 %742 }
 0x162   : > { %v7653_v29 = vpop.permute.xlu2 %709 }
 0x165   : > { %v7601_v60 = vpop.permute.xlu1 %639 }
 0x16a   : > { %v7655_v30 = vpop.permute.xlu2 %814 }
 0x16d   : > { %v7605_v62 = vpop.permute.xlu1 %744 }
 0x16e   : > { %v7611_v1 = vpop.permute.xlu0 %847 }
 0x172   : > { %v7657_v31 = vpop.permute.xlu2 %903 }
 0x175   : > { %v7609_v0 = vpop.permute.xlu1 %849 }
 0x17a   : > { %v7659_v33 = vpop.permute.xlu2 %641 }
 0x17e   : > { %v7613_v3 = vpop.permute.xlu0 %936 }
 0x17f   : > { %11748 = vst [vmem:[#allocation30_spill] sm:$0xff] %v7613_v3  ;;  %v7615_v4 = vpop.permute.xlu1 %938 }
 0x180   : > { %11749 = vst [vmem:[#allocation31_spill] sm:$0xff] %v7615_v4 }
 0x182   : > { %v7661_v34 = vpop.permute.xlu2 %746 }
 0x183   : > { %11755 = vst [vmem:[#allocation37_spill] sm:$0xff] %v7661_v34  ;;  %v5563_v34 = vld [vmem:[#allocation8 + $0x998] sm:$0xff] }
 0x186   : > { %v7617_v5 = vpop.permute.xlu0 %569 }
 0x187   : > { %v7619_v6 = vpop.permute.xlu1 %571 }
 0x18a   : > { %v7663_v35 = vpop.permute.xlu2 %851 }
 0x18b   : > { %11756 = vst [vmem:[#allocation38_spill] sm:$0xff] %v7663_v35 }
 0x18e   : > { %v7621_v7 = vpop.permute.xlu0 %674 }
 0x18f   : > { %v7623_v8 = vpop.permute.xlu1 %676 }
 0x190   : > { %11750 = vst [vmem:[#allocation32_spill] sm:$0xff] %v7623_v8  ;;  %v4691_v8 = vld [vmem:[#allocation8 + $0x1f0] sm:$0xff] }
 0x192   : > { %v7665_v36 = vpop.permute.xlu2 %940 }
 0x193   : > { %11757 = vst [vmem:[#allocation39_spill] sm:$0xff] %v7665_v36 }
 0x196   : > { %v7625_v9 = vpop.permute.xlu0 %779 }
 0x197   : > { %v7627_v10 = vpop.permute.xlu1 %781 }
 0x198   : > { %11751 = vst [vmem:[#allocation33_spill] sm:$0xff] %v7627_v10 }
 0x19e   : > { %v7629_v11 = vpop.permute.xlu0 %606 }
 0x19f   : > { %v958_v12 = vpop.permute.xlu1 %957 }
 0x1a0   : > { %v965_v13 = vmul.f32 %v958_v12, %v7539_v32 }
 0x1a2   : > { %973 = vrot.lane.b32.xlu1 %v965_v13, %s11379_s25 }
 0x1a6   : > { %v7633_v14 = vpop.permute.xlu0 %711 }
 0x1a7   : > { %11752 = vst [vmem:[#allocation34_spill] sm:$0xff] %v7633_v14  ;;  %v5260_v14 = vld [vmem:[#allocation8 + $0x4e0] sm:$0xff] }
 0x1ae   : > { %v7635_v15 = vpop.permute.xlu0 %816 }
 0x1af   : > { %11753 = vst [vmem:[#allocation35_spill] sm:$0xff] %v7635_v15 }
 0x1b6   : > { %v7639_v18 = vpop.permute.xlu0 %905 }
 0x1b7   : > { %11754 = vst [vmem:[#allocation36_spill] sm:$0xff] %v7639_v18 }
 0x1be   : > { %v956_v21 = vpop.permute.xlu0 %955 }
 0x1bf   : > { %v959_v22 = vsel %vm11421_vm8, %v956_v21, %v958_v12  ;;  %v963_v23 = vmul.f32 0.0, %v956_v21  ;;  %v1053_v21 = vld [vmem:[#allocation8 + $0x250] sm:$0xff]  ;;  %vm11651_vm8 = vcmask 1031168  }
 0x1c0   : > { %v964_v24 = vmul.f32 %v959_v22, %v7492_v2  ;;  %v1054_v22 = vld [vmem:[#allocation8 + $0x258] sm:$0xff] }
 0x1c1   : > { %969 = vrot.lane.b32.xlu2 %v963_v23, %s11379_s25 }
 0x1c2   : > { %971 = vrot.lane.b32.xlu0 %v964_v24, %s11379_s25 }
 0x1c9   : > { %989 = vrot.lane.b32.xlu2 %v985_v26, %s11255_s18 }
 0x1ca   : > { %991 = vrot.lane.b32.xlu0 %v986_v27, %s11255_s18 }
 0x214   : > { %v7679_v50 = vpop.permute.xlu1 %973 }
 0x215   : > { %11758 = vst [vmem:[#allocation40_spill] sm:$0xff] %v7679_v50 }
 0x21b   : > { %v7667_v38 = vpop.permute.xlu2 %969 }
 0x223   : > { %v990_v39 = vpop.permute.xlu2 %989 }
 0x224   : > { %v998_v41 = vmul.f32 0.0, %v990_v39 }
 0x226   : > { %1004 = vrot.lane.b32.xlu1 %v998_v41, %s11311_s3 }
 0x22e   : > { %1023 = vrot.lane.b32.xlu1 %v1019_v43, %s11255_s18 }
 0x234   : > { %v7671_v37 = vpop.permute.xlu0 %971 }
 0x23c   : > { %v992_v44 = vpop.permute.xlu0 %991 }
 0x23d   : > { %v994_v46 = vsel %vm11428_vm14, %v990_v39, %v992_v44  ;;  %v1000_v48 = vmul.f32 %v992_v44, %v7539_v32 }
 0x23e   : > { %v999_v40 = vmul.f32 %v994_v46, %v7492_v2 }
 0x23f   : > { %1008 = vrot.lane.b32.xlu0 %v1000_v48, %s11311_s3  ;;  %v1087_v48 = vld [vmem:[#allocation8 + $0x600] sm:$0xff] }
 0x240   : > { %1006 = vrot.lane.b32.xlu2 %v999_v40, %s11311_s3  ;;  %v1088_v40 = vld [vmem:[#allocation8 + $0x608] sm:$0xff] }
 0x248   : > { %1025 = vrot.lane.b32.xlu2 %v1020_v49, %s11255_s18  ;;  %s7142_s18 = smov 81  }
 0x298   : > { %v7681_v51 = vpop.permute.xlu1 %1004 }
 0x299   : > { %11759 = vst [vmem:[#allocation41_spill] sm:$0xff] %v7681_v51 }
 0x29a   : > { %v7683_v45 = vpop.permute.xlu2 %1006 }
 0x29b   : > { %11760 = vst [vmem:[#allocation42_spill] sm:$0xff] %v7683_v45 }
 0x2a0   : > { %v1024_v52 = vpop.permute.xlu1 %1023 }
 0x2a1   : > { %v1031_v53 = vmul.f32 0.0, %v1024_v52 }
 0x2a2   : > { %v1026_v55 = vpop.permute.xlu2 %1025 }
 0x2a3   : > { %v1027_v56 = vsel %vm11428_vm14, %v1024_v52, %v1026_v55  ;;  %v1033_v12 = vmul.f32 %v1026_v55, %v7539_v32  ;;  %1037 = vrot.lane.b32.xlu0 %v1031_v53, %s7139_s5  ;;  %vm11650_vm14 = vcmask 1039360  }
 0x2a4   : > { %v1032_v13 = vmul.f32 %v1027_v56, %v7492_v2  ;;  %v1121_v56 = vld [vmem:[#allocation8 + $0x260] sm:$0xff] }
 0x2a5   : > { %1041 = vrot.lane.b32.xlu2 %v1033_v12, %s7139_s5 }
 0x2a6   : > { %1039 = vrot.lane.b32.xlu1 %v1032_v13, %s7139_s5 }
 0x2ab   : > { %1057 = vrot.lane.b32.xlu0 %v1053_v21, %s11257_s1 }
 0x2ae   : > { %1059 = vrot.lane.b32.xlu1 %v1054_v22, %s11257_s1 }
 0x2b1   : > { %v7693_v23 = vpop.permute.xlu0 %1008 }
 0x2b2   : > { %11761 = vst [vmem:[#allocation43_spill] sm:$0xff] %v7693_v23 }
 0x2ff   : > { %v7707_v49 = vpop.permute.xlu2 %1041 }
 0x300   : > { %11762 = vst [vmem:[#allocation44_spill] sm:$0xff] %v7707_v49 }
 0x315   : > { %v7695_v24 = vpop.permute.xlu0 %1037 }
 0x318   : > { %v7697_v26 = vpop.permute.xlu1 %1039 }
 0x31d   : > { %v1058_v27 = vpop.permute.xlu0 %1057 }
 0x31e   : > { %v1066_v39 = vmul.f32 0.0, %v1058_v27 }
 0x320   : > { %1072 = vrot.lane.b32.xlu2 %v1066_v39, %s11320_s29  ;;  %v1060_v41 = vpop.permute.xlu1 %1059  ;;  %v1122_v39 = vld [vmem:[#allocation8 + $0x268] sm:$0xff] }
 0x321   : > { %v1062_v43 = vsel %vm11445_vm15, %v1058_v27, %v1060_v41  ;;  %v1068_v44 = vmul.f32 %v1060_v41, %v7539_v32 }
 0x322   : > { %v1067_v46 = vmul.f32 %v1062_v43, %v7492_v2 }
 0x323   : > { %1076 = vrot.lane.b32.xlu1 %v1068_v44, %s11320_s29 }
 0x324   : > { %1074 = vrot.lane.b32.xlu0 %v1067_v46, %s11320_s29 }
 0x328   : > { %1091 = vrot.lane.b32.xlu2 %v1087_v48, %s11257_s1 }
 0x32c   : > { %1093 = vrot.lane.b32.xlu0 %v1088_v40, %s11257_s1  ;;  %s11264_s1 = smov 107  }
 0x37a   : > { %v7709_v52 = vpop.permute.xlu2 %1072 }
 0x37b   : > { %11763 = vst [vmem:[#allocation45_spill] sm:$0xff] %v7709_v52 }
 0x382   : > { %v1092_v53 = vpop.permute.xlu2 %1091 }
 0x383   : > { %v1099_v55 = vmul.f32 0.0, %v1092_v53 }
 0x385   : > { %1105 = vrot.lane.b32.xlu1 %v1099_v55, %s7141_s15 }
 0x38d   : > { %1125 = vrot.lane.b32.xlu1 %v1121_v56, %s7142_s18 }
 0x395   : > { %v7719_v41 = vpop.permute.xlu1 %1076 }
 0x396   : > { %v7712_v12 = vpop.permute.xlu0 %1074  ;;  %11765 = vst [vmem:[#allocation47_spill] sm:$0xff] %v7719_v41 }
 0x397   : > { %11764 = vst [vmem:[#allocation46_spill] sm:$0xff] %v7712_v12 }
 0x39e   : > { %v1094_v13 = vpop.permute.xlu0 %1093 }
 0x39f   : > { %v1095_v21 = vsel %vm11445_vm15, %v1092_v53, %v1094_v13  ;;  %v1101_v22 = vmul.f32 %v1094_v13, %v7539_v32  ;;  %v1155_v13 = vld [vmem:[#allocation8 + $0x610] sm:$0xff]  ;;  %vm3250_vm15 = vcmask 7168  }
 0x3a0   : > { %v1100_v27 = vmul.f32 %v1095_v21, %v7492_v2  ;;  %v1156_v21 = vld [vmem:[#allocation8 + $0x618] sm:$0xff] }
 0x3a1   : > { %1109 = vrot.lane.b32.xlu0 %v1101_v22, %s7141_s15 }
 0x3a2   : > { %1107 = vrot.lane.b32.xlu2 %v1100_v27, %s7141_s15 }
 0x3aa   : > { %1127 = vrot.lane.b32.xlu2 %v1122_v39, %s7142_s18 }
 0x3f7   : > { %v7721_v43 = vpop.permute.xlu1 %1105 }
 0x3fc   : > { %v7723_v44 = vpop.permute.xlu2 %1107 }
 0x3ff   : > { %v1126_v46 = vpop.permute.xlu1 %1125 }
 0x400   : > { %v1134_v48 = vmul.f32 0.0, %v1126_v46 }
 0x402   : > { %1140 = vrot.lane.b32.xlu0 %v1134_v48, %s11284_s28 }
 0x404   : > { %v1128_v40 = vpop.permute.xlu2 %1127 }
 0x405   : > { %v1130_v53 = vsel %vm1129_vm1, %v1126_v46, %v1128_v40  ;;  %v1136_v55 = vmul.f32 %v1128_v40, %v7539_v32 }
 0x406   : > { %v1135_v56 = vmul.f32 %v1130_v53, %v7492_v2 }
 0x407   : > { %1144 = vrot.lane.b32.xlu2 %v1136_v55, %s11284_s28 }
 0x408   : > { %1142 = vrot.lane.b32.xlu1 %v1135_v56, %s11284_s28  ;;  %s11368_s28 = smov 94  }
 0x40a   : > { %1159 = vrot.lane.b32.xlu0 %v1155_v13, %s7142_s18  ;;  %v1189_v13 = vld [vmem:[#allocation8 + $0x270] sm:$0xff] }
 0x410   : > { %1161 = vrot.lane.b32.xlu1 %v1156_v21, %s7142_s18  ;;  %s7144_s18 = smov 82   ;;  %v1190_v21 = vld [vmem:[#allocation8 + $0x278] sm:$0xff] }
 0x413   : > { %v7731_v22 = vpop.permute.xlu0 %1109 }
 0x414   : > { %11766 = vst [vmem:[#allocation48_spill] sm:$0xff] %v7731_v22 }
 0x461   : > { %v7743_v41 = vpop.permute.xlu2 %1144 }
 0x462   : > { %11769 = vst [vmem:[#allocation51_spill] sm:$0xff] %v7743_v41 }
 0x474   : > { %v7733_v27 = vpop.permute.xlu0 %1140 }
 0x475   : > { %11767 = vst [vmem:[#allocation49_spill] sm:$0xff] %v7733_v27 }
 0x47a   : > { %v7735_v39 = vpop.permute.xlu1 %1142 }
 0x47b   : > { %11768 = vst [vmem:[#allocation50_spill] sm:$0xff] %v7735_v39 }
 0x47c   : > { %v1160_v48 = vpop.permute.xlu0 %1159 }
 0x47d   : > { %v1167_v46 = vmul.f32 0.0, %v1160_v48 }
 0x47f   : > { %1173 = vrot.lane.b32.xlu2 %v1167_v46, %s11264_s1 }
 0x482   : > { %v1162_v40 = vpop.permute.xlu1 %1161 }
 0x483   : > { %v1163_v53 = vsel %vm1129_vm1, %v1160_v48, %v1162_v40  ;;  %v1169_v55 = vmul.f32 %v1162_v40, %v7539_v32  ;;  %v1223_v48 = vld [vmem:[#allocation8 + $0x620] sm:$0xff]  ;;  %vm1265_vm1 = vcmask 678912  }
 0x484   : > { %v1168_v56 = vmul.f32 %v1163_v53, %v7492_v2 }
 0x485   : > { %1177 = vrot.lane.b32.xlu1 %v1169_v55, %s11264_s1 }
 0x486   : > { %1175 = vrot.lane.b32.xlu0 %v1168_v56, %s11264_s1  ;;  %s11272_s1 = smov 106  }
 0x487   : > { %1193 = vrot.lane.b32.xlu2 %v1189_v13, %s7144_s18 }
 0x48e   : > { %1195 = vrot.lane.b32.xlu0 %v1190_v21, %s7144_s18  ;;  %v1224_v21 = vld [vmem:[#allocation8 + $0x628] sm:$0xff] }
 0x4d9   : > { %v7745_v23 = vpop.permute.xlu2 %1173 }
 0x4e1   : > { %v1194_v46 = vpop.permute.xlu2 %1193 }
 0x4e2   : > { %v1202_v36 = vmul.f32 0.0, %v1194_v46 }
 0x4e4   : > { %1208 = vrot.lane.b32.xlu1 %v1202_v36, %s11270_s24 }
 0x4ec   : > { %1227 = vrot.lane.b32.xlu1 %v1223_v48, %s7144_s18 }
 0x4f7   : > { %v7755_v41 = vpop.permute.xlu1 %1177 }
 0x4f8   : > { %v7748_v40 = vpop.permute.xlu0 %1175  ;;  %11770 = vst [vmem:[#allocation52_spill] sm:$0xff] %v7755_v41 }
 0x500   : > { %v1196_v53 = vpop.permute.xlu0 %1195 }
 0x501   : > { %v1198_v55 = vsel %vm1197_vm9, %v1194_v46, %v1196_v53  ;;  %v1204_v56 = vmul.f32 %v1196_v53, %v7539_v32  ;;  %v1257_v53 = vld [vmem:[#allocation8 + $0x280] sm:$0xff] }
 0x502   : > { %v1203_v13 = vmul.f32 %v1198_v55, %v7492_v2 }
 0x503   : > { %1212 = vrot.lane.b32.xlu0 %v1204_v56, %s11270_s24 }
 0x504   : > { %1210 = vrot.lane.b32.xlu2 %v1203_v13, %s11270_s24  ;;  %s7147_s24 = smov 105  }
 0x50c   : > { %1229 = vrot.lane.b32.xlu2 %v1224_v21, %s7144_s18  ;;  %s7146_s18 = smov 83   ;;  %v1258_v21 = vld [vmem:[#allocation8 + $0x288] sm:$0xff] }
 0x556   : > { %v7757_v36 = vpop.permute.xlu1 %1208 }
 0x557   : > { %11771 = vst [vmem:[#allocation53_spill] sm:$0xff] %v7757_v36 }
 0x55e   : > { %v1228_v48 = vpop.permute.xlu1 %1227  ;;  %v7759_v17 = vpop.permute.xlu2 %1210 }
 0x55f   : > { %11772 = vst [vmem:[#allocation54_spill] sm:$0xff] %v7759_v17  ;;  %v1235_v27 = vmul.f32 0.0, %v1228_v48 }
 0x561   : > { %1241 = vrot.lane.b32.xlu0 %v1235_v27, %s11272_s1 }
 0x566   : > { %v1230_v46 = vpop.permute.xlu2 %1229 }
 0x567   : > { %v1231_v55 = vsel %vm1197_vm9, %v1228_v48, %v1230_v46  ;;  %v1237_v56 = vmul.f32 %v1230_v46, %v7539_v32  ;;  %v1291_v48 = vld [vmem:[#allocation8 + $0x630] sm:$0xff]  ;;  %vm1333_vm9 = vcmask 687104  }
 0x568   : > { %v1236_v13 = vmul.f32 %v1231_v55, %v7492_v2 }
 0x569   : > { %1261 = vrot.lane.b32.xlu0 %v1257_v53, %s7146_s18  ;;  %1245 = vrot.lane.b32.xlu2 %v1237_v56, %s11272_s1 }
 0x56a   : > { %1243 = vrot.lane.b32.xlu1 %v1236_v13, %s11272_s1  ;;  %v1292_v13 = vld [vmem:[#allocation8 + $0x638] sm:$0xff]  ;;  %s7148_s1 = smov 84  }
 0x572   : > { %1263 = vrot.lane.b32.xlu1 %v1258_v21, %s7146_s18 }
 0x575   : > { %v7767_v36 = vpop.permute.xlu0 %1212 }
 0x576   : > { %11773 = vst [vmem:[#allocation55_spill] sm:$0xff] %v7767_v36 }
 0x5c3   : > { %v7779_v21 = vpop.permute.xlu2 %1245 }
 0x5c4   : > { %11774 = vst [vmem:[#allocation56_spill] sm:$0xff] %v7779_v21 }
 0x5d3   : > { %v7769_v17 = vpop.permute.xlu0 %1241 }
 0x5db   : > { %v1262_v27 = vpop.permute.xlu0 %1261 }
 0x5dc   : > { %v1270_v39 = vmul.f32 0.0, %v1262_v27  ;;  %v7771_v52 = vpop.permute.xlu1 %1243 }
 0x5de   : > { %1276 = vrot.lane.b32.xlu2 %v1270_v39, %s11276_s23 }
 0x5e4   : > { %v1264_v46 = vpop.permute.xlu1 %1263 }
 0x5e5   : > { %v1266_v53 = vsel %vm1265_vm1, %v1262_v27, %v1264_v46  ;;  %v1272_v55 = vmul.f32 %v1264_v46, %v7539_v32  ;;  %v1325_v27 = vld [vmem:[#allocation8 + $0x640] sm:$0xff] }
 0x5e6   : > { %1295 = vrot.lane.b32.xlu2 %v1291_v48, %s7146_s18  ;;  %v1271_v56 = vmul.f32 %v1266_v53, %v7492_v2 }
 0x5e7   : > { %1280 = vrot.lane.b32.xlu1 %v1272_v55, %s11276_s23 }
 0x5e8   : > { %1278 = vrot.lane.b32.xlu0 %v1271_v56, %s11276_s23  ;;  %s11324_s23 = smov 92  }
 0x5f0   : > { %1297 = vrot.lane.b32.xlu0 %v1292_v13, %s7146_s18  ;;  %v1326_v13 = vld [vmem:[#allocation8 + $0x648] sm:$0xff]  ;;  %s7149_s18 = smov 104  }
 0x638   : > { %v7781_v36 = vpop.permute.xlu2 %1276 }
 0x639   : > { %11775 = vst [vmem:[#allocation57_spill] sm:$0xff] %v7781_v36 }
 0x640   : > { %v1296_v39 = vpop.permute.xlu2 %1295 }
 0x641   : > { %v1303_v12 = vmul.f32 0.0, %v1296_v39 }
 0x643   : > { %1309 = vrot.lane.b32.xlu1 %v1303_v12, %s7147_s24 }
 0x64b   : > { %1329 = vrot.lane.b32.xlu1 %v1325_v27, %s7148_s1 }
 0x659   : > { %v7788_v36 = vpop.permute.xlu1 %1280 }
 0x65a   : > { %v7783_v48 = vpop.permute.xlu0 %1278  ;;  %11777 = vst [vmem:[#allocation59_spill] sm:$0xff] %v7788_v36 }
 0x65b   : > { %11776 = vst [vmem:[#allocation58_spill] sm:$0xff] %v7783_v48  ;;  %v1360_v48 = vld [vmem:[#allocation8 + $0x650] sm:$0xff] }
 0x662   : > { %v1298_v46 = vpop.permute.xlu0 %1297 }
 0x663   : > { %v1299_v53 = vsel %vm1265_vm1, %v1296_v39, %v1298_v46  ;;  %v1305_v55 = vmul.f32 %v1298_v46, %v7539_v32  ;;  %vm11477_vm1 = vcmask 752640  }
 0x664   : > { %v1304_v56 = vmul.f32 %v1299_v53, %v7492_v2 }
 0x665   : > { %1313 = vrot.lane.b32.xlu0 %v1305_v55, %s7147_s24 }
 0x666   : > { %1311 = vrot.lane.b32.xlu2 %v1304_v56, %s7147_s24  ;;  %v1361_v56 = vld [vmem:[#allocation8 + $0x658] sm:$0xff]  ;;  %s11392_s24 = smov 96  }
 0x66e   : > { %1331 = vrot.lane.b32.xlu2 %v1326_v13, %s7148_s1  ;;  %s11331_s1 = smov 93  }
 0x6b5   : > { %v7790_v51 = vpop.permute.xlu1 %1309 }
 0x6bd   : > { %v1330_v12 = vpop.permute.xlu1 %1329 }
 0x6be   : > { %v1338_v45 = vmul.f32 0.0, %v1330_v12 }
 0x6c0   : > { %1344 = vrot.lane.b32.xlu0 %v1338_v45, %s7149_s18  ;;  %v7792_v27 = vpop.permute.xlu2 %1311 }
 0x6c8   : > { %1364 = vrot.lane.b32.xlu0 %v1360_v48, %s11324_s23  ;;  %v1332_v39 = vpop.permute.xlu2 %1331 }
 0x6c9   : > { %v1334_v46 = vsel %vm1333_vm9, %v1330_v12, %v1332_v39  ;;  %v1340_v53 = vmul.f32 %v1332_v39, %v7539_v32  ;;  %v1395_v12 = vld [vmem:[#allocation8 + $0x290] sm:$0xff]  ;;  %vm11643_vm9 = vcmask 760832  }
 0x6ca   : > { %v1339_v55 = vmul.f32 %v1334_v46, %v7492_v2 }
 0x6cb   : > { %1348 = vrot.lane.b32.xlu2 %v1340_v53, %s7149_s18 }
 0x6cc   : > { %1346 = vrot.lane.b32.xlu1 %v1339_v55, %s7149_s18  ;;  %s11381_s18 = smov 95  }
 0x6d4   : > { %1366 = vrot.lane.b32.xlu1 %v1361_v56, %s11324_s23  ;;  %v1396_v56 = vld [vmem:[#allocation8 + $0x298] sm:$0xff] }
 0x6d7   : > { %v7798_v13 = vpop.permute.xlu0 %1313 }
 0x6d8   : > { %11778 = vst [vmem:[#allocation60_spill] sm:$0xff] %v7798_v13 }
 0x732   : > { %v7800_v45 = vpop.permute.xlu0 %1344 }
 0x73a   : > { %v1365_v36 = vpop.permute.xlu0 %1364 }
 0x73b   : > { %v1373_v19 = vmul.f32 0.0, %v1365_v36 }
 0x73d   : > { %1379 = vrot.lane.b32.xlu2 %v1373_v19, %s11392_s24  ;;  %v7812_v19 = vpop.permute.xlu2 %1348 }
 0x73e   : > { %v7803_v48 = vpop.permute.xlu1 %1346  ;;  %11779 = vst [vmem:[#allocation61_spill] sm:$0xff] %v7812_v19  ;;  %v1430_v19 = vld [vmem:[#allocation8 + $0x668] sm:$0xff] }
 0x745   : > { %1399 = vrot.lane.b32.xlu2 %v1395_v12, %s11331_s1 }
 0x746   : > { %v1367_v39 = vpop.permute.xlu1 %1366 }
 0x747   : > { %v1369_v46 = vsel %vm11477_vm1, %v1365_v36, %v1367_v39  ;;  %v1375_v53 = vmul.f32 %v1367_v39, %v7539_v32  ;;  %v1429_v36 = vld [vmem:[#allocation8 + $0x660] sm:$0xff]  ;;  %vm3553_vm1 = vcmask 31744  }
 0x748   : > { %v1374_v55 = vmul.f32 %v1369_v46, %v7492_v2 }
 0x749   : > { %1383 = vrot.lane.b32.xlu1 %v1375_v53, %s11392_s24 }
 0x74a   : > { %1381 = vrot.lane.b32.xlu0 %v1374_v55, %s11392_s24 }
 0x752   : > { %1401 = vrot.lane.b32.xlu0 %v1396_v56, %s11331_s1 }
 0x797   : > { %v7814_v3 = vpop.permute.xlu2 %1379 }
 0x798   : > { %11780 = vst [vmem:[#allocation62_spill] sm:$0xff] %v7814_v3  ;;  %v5327_v3 = vld [vmem:[#allocation8 + $0x4f8] sm:$0xff] }
 0x79f   : > { %v1400_v4 = vpop.permute.xlu2 %1399 }
 0x7a0   : > { %v1408_v12 = vmul.f32 0.0, %v1400_v4 }
 0x7a2   : > { %1414 = vrot.lane.b32.xlu1 %v1408_v12, %s11386_s27 }
 0x7aa   : > { %1433 = vrot.lane.b32.xlu1 %v1429_v36, %s11331_s1 }
 0x7bb   : > { %v7826_v12 = vpop.permute.xlu1 %1383 }
 0x7bc   : > { %v7818_v39 = vpop.permute.xlu0 %1381  ;;  %11782 = vst [vmem:[#allocation64_spill] sm:$0xff] %v7826_v12  ;;  %v1484_v12 = vld [vmem:[#allocation8 + $0x2a8] sm:$0xff] }
 0x7bd   : > { %11781 = vst [vmem:[#allocation63_spill] sm:$0xff] %v7818_v39 }
 0x7c4   : > { %v1402_v46 = vpop.permute.xlu0 %1401 }
 0x7c5   : > { %v1404_v53 = vsel %vm11643_vm9, %v1400_v4, %v1402_v46  ;;  %v1410_v55 = vmul.f32 %v1402_v46, %v7539_v32  ;;  %v1463_v46 = vld [vmem:[#allocation8 + $0x90] sm:$0xff] }
 0x7c6   : > { %v1409_v56 = vmul.f32 %v1404_v53, %v7492_v2 }
 0x7c7   : > { %1418 = vrot.lane.b32.xlu0 %v1410_v55, %s11386_s27 }
 0x7c8   : > { %1416 = vrot.lane.b32.xlu2 %v1409_v56, %s11386_s27 }
 0x7d0   : > { %1435 = vrot.lane.b32.xlu2 %v1430_v19, %s11331_s1 }
 0x814   : > { %v7828_v36 = vpop.permute.xlu1 %1414 }
 0x815   : > { %11783 = vst [vmem:[#allocation65_spill] sm:$0xff] %v7828_v36  ;;  %v1464_v36 = vld [vmem:[#allocation8 + $0x98] sm:$0xff] }
 0x81c   : > { %v1434_v13 = vpop.permute.xlu1 %1433 }
 0x81d   : > { %v1441_v21 = vmul.f32 0.0, %v1434_v13 }
 0x81f   : > { %1447 = vrot.lane.b32.xlu0 %v1441_v21, %s11381_s18  ;;  %v1483_v21 = vld [vmem:[#allocation8 + $0x2a0] sm:$0xff] }
 0x822   : > { %v7831_v4 = vpop.permute.xlu2 %1416 }
 0x823   : > { %11784 = vst [vmem:[#allocation66_spill] sm:$0xff] %v7831_v4 }
 0x827   : > { %1467 = vrot.lane.b32.xlu0 %v1463_v46, %s11368_s28 }
 0x82a   : > { %v1436_v53 = vpop.permute.xlu2 %1435 }
 0x82b   : > { %v1437_v55 = vsel %vm11643_vm9, %v1434_v13, %v1436_v53  ;;  %v1443_v19 = vmul.f32 %v1436_v53, %v7539_v32  ;;  %vm11648_vm9 = vcmask 982016  }
 0x82c   : > { %v1442_v56 = vmul.f32 %v1437_v55, %v7492_v2 }
 0x82d   : > { %1451 = vrot.lane.b32.xlu2 %v1443_v19, %s11381_s18  ;;  %v1516_v19 = vld [vmem:[#allocation8 + $0x670] sm:$0xff] }
 0x82e   : > { %1449 = vrot.lane.b32.xlu1 %v1442_v56, %s11381_s18 }
 0x82f   : > { %1489 = vrot.lane.b32.xlu0 %v1484_v12, %s11368_s28 }
 0x835   : > { %1487 = vrot.lane.b32.xlu2 %v1483_v21, %s11368_s28 }
 0x836   : > { %1469 = vrot.lane.b32.xlu1 %v1464_v36, %s11368_s28 }
 0x839   : > { %v7844_v13 = vpop.permute.xlu0 %1418 }
 0x83a   : > { %11786 = vst [vmem:[#allocation68_spill] sm:$0xff] %v7844_v13  ;;  %v1517_v13 = vld [vmem:[#allocation8 + $0x678] sm:$0xff] }
 0x887   : > { %v7842_v46 = vpop.permute.xlu2 %1451 }
 0x888   : > { %11785 = vst [vmem:[#allocation67_spill] sm:$0xff] %v7842_v46 }
 0x88f   : > { %v1488_v53 = vpop.permute.xlu2 %1487 }
 0x890   : > { %v1495_v4 = vmul.f32 0.0, %v1488_v53 }
 0x891   : > { %v7846_v55 = vpop.permute.xlu0 %1447 }
 0x892   : > { %11787 = vst [vmem:[#allocation69_spill] sm:$0xff] %v7846_v55  ;;  %1501 = vrot.lane.b32.xlu1 %v1495_v4, %s11375_s20  ;;  %v5816_v55 = vld [vmem:[#allocation8 + $0xa18] sm:$0xff] }
 0x899   : > { %v7849_v56 = vpop.permute.xlu0 %1467 }
 0x89a   : > { %11788 = vst [vmem:[#allocation70_spill] sm:$0xff] %v7849_v56  ;;  %1520 = vrot.lane.b32.xlu1 %v1516_v19, %s11368_s28 }
 0x8a0   : > { %v7858_v4 = vpop.permute.xlu1 %1449 }
 0x8a1   : > { %v1490_v12 = vpop.permute.xlu0 %1489  ;;  %11789 = vst [vmem:[#allocation71_spill] sm:$0xff] %v7858_v4  ;;  %v4993_v4 = vld [vmem:[#allocation8 + $0x4b8] sm:$0xff] }
 0x8a2   : > { %v1491_v21 = vsel %vm11692_vm7, %v1488_v53, %v1490_v12  ;;  %v1497_v36 = vmul.f32 %v1490_v12, %v7539_v32 }
 0x8a3   : > { %v1496_v46 = vmul.f32 %v1491_v21, %v7492_v2 }
 0x8a4   : > { %1505 = vrot.lane.b32.xlu0 %v1497_v36, %s11375_s20 }
 0x8a5   : > { %1503 = vrot.lane.b32.xlu2 %v1496_v46, %s11375_s20 }
 0x8a8   : > { %v7860_v56 = vpop.permute.xlu1 %1469 }
 0x8a9   : > { %11790 = vst [vmem:[#allocation72_spill] sm:$0xff] %v7860_v56  ;;  %v1550_v56 = vld [vmem:[#allocation8 + $0xa8] sm:$0xff] }
 0x8ad   : > { %1522 = vrot.lane.b32.xlu2 %v1517_v13, %s11368_s28  ;;  %v1549_v13 = vld [vmem:[#allocation8 + $0xa0] sm:$0xff] }
 0x8ff   : > { %v7862_v19 = vpop.permute.xlu2 %1503 }
 0x900   : > { %11791 = vst [vmem:[#allocation73_spill] sm:$0xff] %v7862_v19 }
 0x904   : > { %v7864_v41 = vpop.permute.xlu1 %1501 }
 0x905   : > { %11792 = vst [vmem:[#allocation74_spill] sm:$0xff] %v7864_v41 }
 0x907   : > { %v1523_v53 = vpop.permute.xlu2 %1522 }
 0x908   : > { %v1530_v12 = vmul.f32 %v1523_v53, %v7539_v32 }
 0x90a   : > { %1538 = vrot.lane.b32.xlu2 %v1530_v12, %s11368_s28 }
 0x90c   : > { %v1521_v21 = vpop.permute.xlu1 %1520 }
 0x90d   : > { %v1524_v36 = vsel %vm11692_vm7, %v1521_v21, %v1523_v53  ;;  %v1528_v46 = vmul.f32 0.0, %v1521_v21 }
 0x90e   : > { %v1529_v22 = vmul.f32 %v1524_v36, %v7492_v2 }
 0x90f   : > { %1534 = vrot.lane.b32.xlu0 %v1528_v46, %s11368_s28 }
 0x910   : > { %1536 = vrot.lane.b32.xlu1 %v1529_v22, %s11368_s28 }
 0x916   : > { %v7874_v41 = vpop.permute.xlu0 %1505 }
 0x917   : > { %1553 = vrot.lane.b32.xlu0 %v1549_v13, %s11381_s18  ;;  %11793 = vst [vmem:[#allocation75_spill] sm:$0xff] %v7874_v41  ;;  %v1583_v13 = vld [vmem:[#allocation8 + $0x2b8] sm:$0xff] }
 0x918   : > { %1555 = vrot.lane.b32.xlu1 %v1550_v56, %s11381_s18  ;;  %v1582_v56 = vld [vmem:[#allocation8 + $0x2b0] sm:$0xff] }
 0x964   : > { %v7888_v41 = vpop.permute.xlu2 %1538 }
 0x965   : > { %11796 = vst [vmem:[#allocation78_spill] sm:$0xff] %v7888_v41 }
 0x981   : > { %v7876_v19 = vpop.permute.xlu0 %1534 }
 0x982   : > { %11794 = vst [vmem:[#allocation76_spill] sm:$0xff] %v7876_v19  ;;  %v7878_v12 = vpop.permute.xlu1 %1536 }
 0x983   : > { %11795 = vst [vmem:[#allocation77_spill] sm:$0xff] %v7878_v12  ;;  %v5261_v12 = vld [vmem:[#allocation8 + $0x4e8] sm:$0xff] }
 0x989   : > { %v1554_v53 = vpop.permute.xlu0 %1553 }
 0x98a   : > { %v1561_v21 = vmul.f32 0.0, %v1554_v53  ;;  %v1556_v36 = vpop.permute.xlu1 %1555 }
 0x98b   : > { %v1557_v46 = vsel %vm11690_vm13, %v1554_v53, %v1556_v36  ;;  %v1563_v22 = vmul.f32 %v1556_v36, %v7539_v32 }
 0x98c   : > { %v1562_v49 = vmul.f32 %v1557_v46, %v7492_v2  ;;  %1567 = vrot.lane.b32.xlu2 %v1561_v21, %s11333_s14  ;;  %v1615_v46 = vld [vmem:[#allocation8 + $0x680] sm:$0xff] }
 0x98d   : > { %1571 = vrot.lane.b32.xlu1 %v1563_v22, %s11333_s14 }
 0x98e   : > { %1569 = vrot.lane.b32.xlu0 %v1562_v49, %s11333_s14  ;;  %s7159_s14 = smov 99  }
 0x994   : > { %1586 = vrot.lane.b32.xlu2 %v1582_v56, %s11381_s18 }
 0x996   : > { %1588 = vrot.lane.b32.xlu0 %v1583_v13, %s11381_s18 }
 0x9e6   : > { %v7890_v50 = vpop.permute.xlu2 %1567 }
 0x9e7   : > { %11797 = vst [vmem:[#allocation79_spill] sm:$0xff] %v7890_v50  ;;  %v1616_v50 = vld [vmem:[#allocation8 + $0x688] sm:$0xff] }
 0x9ee   : > { %v1587_v53 = vpop.permute.xlu2 %1586 }
 0x9ef   : > { %v1594_v36 = vmul.f32 0.0, %v1587_v53 }
 0x9f1   : > { %1600 = vrot.lane.b32.xlu1 %v1594_v36, %s11379_s25 }
 0x9f9   : > { %1619 = vrot.lane.b32.xlu1 %v1615_v46, %s11381_s18 }
 0x9ff   : > { %v7902_v36 = vpop.permute.xlu1 %1571 }
 0xa00   : > { %v7894_v21 = vpop.permute.xlu0 %1569  ;;  %11799 = vst [vmem:[#allocation81_spill] sm:$0xff] %v7902_v36 }
 0xa01   : > { %11798 = vst [vmem:[#allocation80_spill] sm:$0xff] %v7894_v21 }
 0xa08   : > { %v1589_v49 = vpop.permute.xlu0 %1588 }
 0xa09   : > { %v1590_v22 = vsel %vm11690_vm13, %v1587_v53, %v1589_v49  ;;  %v1596_v56 = vmul.f32 %v1589_v49, %v7539_v32 }
 0xa0a   : > { %v1595_v13 = vmul.f32 %v1590_v22, %v7492_v2 }
 0xa0b   : > { %1604 = vrot.lane.b32.xlu0 %v1596_v56, %s11379_s25 }
 0xa0c   : > { %1602 = vrot.lane.b32.xlu2 %v1595_v13, %s11379_s25  ;;  %v1649_v13 = vld [vmem:[#allocation8 + $0xb8] sm:$0xff] }
 0xa14   : > { %1621 = vrot.lane.b32.xlu2 %v1616_v50, %s11381_s18  ;;  %v1648_v50 = vld [vmem:[#allocation8 + $0xb0] sm:$0xff] }
 0xa63   : > { %v7904_v41 = vpop.permute.xlu1 %1600 }
 0xa64   : > { %11800 = vst [vmem:[#allocation82_spill] sm:$0xff] %v7904_v41 }
 0xa66   : > { %v7906_v46 = vpop.permute.xlu2 %1602 }
 0xa67   : > { %11801 = vst [vmem:[#allocation83_spill] sm:$0xff] %v7906_v46 }
 0xa6b   : > { %v1620_v21 = vpop.permute.xlu1 %1619 }
 0xa6c   : > { %v1627_v18 = vmul.f32 0.0, %v1620_v21 }
 0xa6e   : > { %1633 = vrot.lane.b32.xlu0 %v1627_v18, %s11331_s1  ;;  %v1622_v53 = vpop.permute.xlu2 %1621 }
 0xa6f   : > { %v1623_v49 = vsel %vm11690_vm13, %v1620_v21, %v1622_v53  ;;  %v1629_v22 = vmul.f32 %v1622_v53, %v7539_v32 }
 0xa70   : > { %v1628_v56 = vmul.f32 %v1623_v49, %v7492_v2 }
 0xa71   : > { %1637 = vrot.lane.b32.xlu2 %v1629_v22, %s11331_s1 }
 0xa72   : > { %1635 = vrot.lane.b32.xlu1 %v1628_v56, %s11331_s1  ;;  %s11340_s1 = smov 90  }
 0xa76   : > { %1652 = vrot.lane.b32.xlu0 %v1648_v50, %s11392_s24 }
 0xa7a   : > { %1654 = vrot.lane.b32.xlu1 %v1649_v13, %s11392_s24  ;;  %v1681_v13 = vld [vmem:[#allocation8 + $0x2c0] sm:$0xff] }
 0xa7d   : > { %v7916_v36 = vpop.permute.xlu0 %1604 }
 0xa7e   : > { %11802 = vst [vmem:[#allocation84_spill] sm:$0xff] %v7916_v36  ;;  %v1682_v36 = vld [vmem:[#allocation8 + $0x2c8] sm:$0xff] }
 0xacb   : > { %v7930_v46 = vpop.permute.xlu2 %1637 }
 0xacc   : > { %11805 = vst [vmem:[#allocation87_spill] sm:$0xff] %v7930_v46 }
 0xae0   : > { %v7918_v18 = vpop.permute.xlu0 %1633 }
 0xae1   : > { %11803 = vst [vmem:[#allocation85_spill] sm:$0xff] %v7918_v18  ;;  %v5129_v18 = vld [vmem:[#allocation8 + $0x4c8] sm:$0xff] }
 0xae4   : > { %v7920_v41 = vpop.permute.xlu1 %1635 }
 0xae5   : > { %11804 = vst [vmem:[#allocation86_spill] sm:$0xff] %v7920_v41  ;;  %v5161_v41 = vld [vmem:[#allocation8 + $0x930] sm:$0xff] }
 0xae8   : > { %v1653_v21 = vpop.permute.xlu0 %1652 }
 0xae9   : > { %v1660_v53 = vmul.f32 0.0, %v1653_v21 }
 0xaeb   : > { %1666 = vrot.lane.b32.xlu2 %v1660_v53, %s11311_s3 }
 0xaec   : > { %v1655_v49 = vpop.permute.xlu1 %1654 }
 0xaed   : > { %v1656_v22 = vsel %vm1385_vm3, %v1653_v21, %v1655_v49  ;;  %v1662_v56 = vmul.f32 %v1655_v49, %v7539_v32  ;;  %v1714_v49 = vld [vmem:[#allocation8 + $0x690] sm:$0xff] }
 0xaee   : > { %v1661_v50 = vmul.f32 %v1656_v22, %v7492_v2 }
 0xaef   : > { %1670 = vrot.lane.b32.xlu1 %v1662_v56, %s11311_s3 }
 0xaf0   : > { %1668 = vrot.lane.b32.xlu0 %v1661_v50, %s11311_s3  ;;  %s7155_s3 = smov 97  }
 0xaf3   : > { %1685 = vrot.lane.b32.xlu2 %v1681_v13, %s11392_s24 }
 0xaf8   : > { %1687 = vrot.lane.b32.xlu0 %v1682_v36, %s11392_s24 }
 0xb45   : > { %v7932_v53 = vpop.permute.xlu2 %1666 }
 0xb46   : > { %11806 = vst [vmem:[#allocation88_spill] sm:$0xff] %v7932_v53  ;;  %v1715_v53 = vld [vmem:[#allocation8 + $0x698] sm:$0xff] }
 0xb4d   : > { %v1686_v35 = vpop.permute.xlu2 %1685 }
 0xb4e   : > { %v1693_v21 = vmul.f32 0.0, %v1686_v35 }
 0xb50   : > { %1699 = vrot.lane.b32.xlu1 %v1693_v21, %s7139_s5 }
 0xb58   : > { %1718 = vrot.lane.b32.xlu1 %v1714_v49, %s11392_s24 }
 0xb61   : > { %v7944_v21 = vpop.permute.xlu1 %1670 }
 0xb62   : > { %v7936_v22 = vpop.permute.xlu0 %1668  ;;  %11808 = vst [vmem:[#allocation90_spill] sm:$0xff] %v7944_v21 }
 0xb63   : > { %11807 = vst [vmem:[#allocation89_spill] sm:$0xff] %v7936_v22 }
 0xb6a   : > { %v1688_v56 = vpop.permute.xlu0 %1687 }
 0xb6b   : > { %v1689_v50 = vsel %vm1385_vm3, %v1686_v35, %v1688_v56  ;;  %v1695_v13 = vmul.f32 %v1688_v56, %v7539_v32 }
 0xb6c   : > { %v1694_v36 = vmul.f32 %v1689_v50, %v7492_v2 }
 0xb6d   : > { %1703 = vrot.lane.b32.xlu0 %v1695_v13, %s7139_s5 }
 0xb6e   : > { %1701 = vrot.lane.b32.xlu2 %v1694_v36, %s7139_s5  ;;  %v1747_v36 = vld [vmem:[#allocation8 + $0xc0] sm:$0xff] }
 0xb76   : > { %1720 = vrot.lane.b32.xlu2 %v1715_v53, %s11392_s24  ;;  %v1748_v53 = vld [vmem:[#allocation8 + $0xc8] sm:$0xff] }
 0xbc2   : > { %v7946_v46 = vpop.permute.xlu1 %1699 }
 0xbc3   : > { %11809 = vst [vmem:[#allocation91_spill] sm:$0xff] %v7946_v46 }
 0xbc8   : > { %v7948_v49 = vpop.permute.xlu2 %1701 }
 0xbc9   : > { %11810 = vst [vmem:[#allocation92_spill] sm:$0xff] %v7948_v49 }
 0xbca   : > { %v1719_v22 = vpop.permute.xlu1 %1718 }
 0xbcb   : > { %v1726_v15 = vmul.f32 0.0, %v1719_v22 }
 0xbcd   : > { %1732 = vrot.lane.b32.xlu0 %v1726_v15, %s11324_s23 }
 0xbd0   : > { %v1721_v35 = vpop.permute.xlu2 %1720 }
 0xbd1   : > { %v1722_v56 = vsel %vm1385_vm3, %v1719_v22, %v1721_v35  ;;  %v1728_v50 = vmul.f32 %v1721_v35, %v7539_v32 }
 0xbd2   : > { %v1727_v13 = vmul.f32 %v1722_v56, %v7492_v2 }
 0xbd3   : > { %1736 = vrot.lane.b32.xlu2 %v1728_v50, %s11324_s23 }
 0xbd4   : > { %1734 = vrot.lane.b32.xlu1 %v1727_v13, %s11324_s23  ;;  %s11823_s23 = smov 124  }
 0xbd5   : > { %1751 = vrot.lane.b32.xlu0 %v1747_v36, %s7155_s3  ;;  %v1781_v36 = vld [vmem:[#allocation8 + $0x2d0] sm:$0xff] }
 0xbdc   : > { %1753 = vrot.lane.b32.xlu1 %v1748_v53, %s7155_s3  ;;  %v1782_v53 = vld [vmem:[#allocation8 + $0x2d8] sm:$0xff] }
 0xbdf   : > { %v7958_v21 = vpop.permute.xlu0 %1703 }
 0xbe0   : > { %11811 = vst [vmem:[#allocation93_spill] sm:$0xff] %v7958_v21 }
 0xc2d   : > { %v7972_v21 = vpop.permute.xlu2 %1736 }
 0xc2e   : > { %11814 = vst [vmem:[#allocation96_spill] sm:$0xff] %v7972_v21 }
 0xc3f   : > { %v7960_v15 = vpop.permute.xlu0 %1732 }
 0xc40   : > { %11812 = vst [vmem:[#allocation94_spill] sm:$0xff] %v7960_v15 }
 0xc46   : > { %v7962_v22 = vpop.permute.xlu1 %1734 }
 0xc47   : > { %11813 = vst [vmem:[#allocation95_spill] sm:$0xff] %v7962_v22  ;;  %v1752_v35 = vpop.permute.xlu0 %1751 }
 0xc48   : > { %v1760_v46 = vmul.f32 0.0, %v1752_v35 }
 0xc4a   : > { %1766 = vrot.lane.b32.xlu2 %v1760_v46, %s11320_s29 }
 0xc4e   : > { %v1754_v56 = vpop.permute.xlu1 %1753 }
 0xc4f   : > { %v1756_v50 = vsel %vm1755_vm6, %v1752_v35, %v1754_v56  ;;  %v1762_v13 = vmul.f32 %v1754_v56, %v7539_v32  ;;  %v1814_v56 = vld [vmem:[#allocation8 + $0x6a0] sm:$0xff] }
 0xc50   : > { %v1761_v49 = vmul.f32 %v1756_v50, %v7492_v2 }
 0xc51   : > { %1770 = vrot.lane.b32.xlu1 %v1762_v13, %s11320_s29 }
 0xc52   : > { %1785 = vrot.lane.b32.xlu2 %v1781_v36, %s7155_s3  ;;  %1768 = vrot.lane.b32.xlu0 %v1761_v49, %s11320_s29  ;;  %s11328_s29 = smov 91  }
 0xc5a   : > { %1787 = vrot.lane.b32.xlu0 %v1782_v53, %s7155_s3 }
 0xca4   : > { %v7974_v46 = vpop.permute.xlu2 %1766 }
 0xca5   : > { %11815 = vst [vmem:[#allocation97_spill] sm:$0xff] %v7974_v46  ;;  %v1815_v46 = vld [vmem:[#allocation8 + $0x6a8] sm:$0xff] }
 0xcac   : > { %v1786_v15 = vpop.permute.xlu2 %1785 }
 0xcad   : > { %v1793_v35 = vmul.f32 0.0, %v1786_v15 }
 0xcaf   : > { %1799 = vrot.lane.b32.xlu1 %v1793_v35, %s7141_s15 }
 0xcb7   : > { %1818 = vrot.lane.b32.xlu1 %v1814_v56, %s7155_s3 }
 0xcc3   : > { %v7986_v35 = vpop.permute.xlu1 %1770 }
 0xcc4   : > { %v7978_v50 = vpop.permute.xlu0 %1768  ;;  %11817 = vst [vmem:[#allocation99_spill] sm:$0xff] %v7986_v35 }
 0xcc5   : > { %11816 = vst [vmem:[#allocation98_spill] sm:$0xff] %v7978_v50 }
 0xccc   : > { %v1788_v13 = vpop.permute.xlu0 %1787 }
 0xccd   : > { %v1789_v36 = vsel %vm1755_vm6, %v1786_v15, %v1788_v13  ;;  %v1795_v49 = vmul.f32 %v1788_v13, %v7539_v32  ;;  %v1848_v15 = vld [vmem:[#allocation8 + $0xd0] sm:$0xff] }
 0xcce   : > { %v1794_v53 = vmul.f32 %v1789_v36, %v7492_v2 }
 0xccf   : > { %1803 = vrot.lane.b32.xlu0 %v1795_v49, %s7141_s15 }
 0xcd0   : > { %1801 = vrot.lane.b32.xlu2 %v1794_v53, %s7141_s15 }
 0xcd8   : > { %1820 = vrot.lane.b32.xlu2 %v1815_v46, %s7155_s3  ;;  %s7157_s3 = smov 98   ;;  %v1849_v46 = vld [vmem:[#allocation8 + $0xd8] sm:$0xff] }
 0xd21   : > { %v7988_v21 = vpop.permute.xlu1 %1799 }
 0xd22   : > { %11818 = vst [vmem:[#allocation100_spill] sm:$0xff] %v7988_v21 }
 0xd29   : > { %v1819_v56 = vpop.permute.xlu1 %1818 }
 0xd2a   : > { %v1826_v50 = vmul.f32 0.0, %v1819_v56  ;;  %v7990_v22 = vpop.permute.xlu2 %1801 }
 0xd2b   : > { %11819 = vst [vmem:[#allocation101_spill] sm:$0xff] %v7990_v22 }
 0xd2c   : > { %1832 = vrot.lane.b32.xlu0 %v1826_v50, %s11328_s29 }
 0xd32   : > { %v1821_v13 = vpop.permute.xlu2 %1820 }
 0xd33   : > { %v1822_v36 = vsel %vm1755_vm6, %v1819_v56, %v1821_v13  ;;  %v1828_v49 = vmul.f32 %v1821_v13, %v7539_v32  ;;  %vm1856_vm6 = vcmask 801792   ;;  %v1882_v13 = vld [vmem:[#allocation8 + $0x2e0] sm:$0xff] }
 0xd34   : > { %v1827_v53 = vmul.f32 %v1822_v36, %v7492_v2  ;;  %1852 = vrot.lane.b32.xlu0 %v1848_v15, %s7157_s3 }
 0xd35   : > { %1836 = vrot.lane.b32.xlu2 %v1828_v49, %s11328_s29 }
 0xd36   : > { %1834 = vrot.lane.b32.xlu1 %v1827_v53, %s11328_s29  ;;  %s11826_s29 = smov 107  }
 0xd3e   : > { %1854 = vrot.lane.b32.xlu1 %v1849_v46, %s7157_s3  ;;  %v1883_v46 = vld [vmem:[#allocation8 + $0x2e8] sm:$0xff] }
 0xd41   : > { %v8000_v35 = vpop.permute.xlu0 %1803 }
 0xd42   : > { %11820 = vst [vmem:[#allocation102_spill] sm:$0xff] %v8000_v35 }
 0xd8f   : > { %v8014_v35 = vpop.permute.xlu2 %1836 }
 0xd90   : > { %11824 = vst [vmem:[#allocation105_spill] sm:$0xff] %v8014_v35 }
 0xd9e   : > { %v8002_v50 = vpop.permute.xlu0 %1832 }
 0xd9f   : > { %11821 = vst [vmem:[#allocation103_spill] sm:$0xff] %v8002_v50 }
 0xda6   : > { %v1853_v21 = vpop.permute.xlu0 %1852 }
 0xda7   : > { %v1861_v56 = vmul.f32 0.0, %v1853_v21 }
 0xda8   : > { %v8004_v22 = vpop.permute.xlu1 %1834 }
 0xda9   : > { %11822 = vst [vmem:[#allocation104_spill] sm:$0xff] %v8004_v22  ;;  %1867 = vrot.lane.b32.xlu2 %v1861_v56, %s11823_s23 }
 0xdb0   : > { %v1855_v15 = vpop.permute.xlu1 %1854 }
 0xdb1   : > { %v1857_v36 = vsel %vm1856_vm6, %v1853_v21, %v1855_v15  ;;  %v1863_v49 = vmul.f32 %v1855_v15, %v7539_v32  ;;  %1886 = vrot.lane.b32.xlu2 %v1882_v13, %s7157_s3  ;;  %v1915_v21 = vld [vmem:[#allocation8 + $0x6b0] sm:$0xff] }
 0xdb2   : > { %v1862_v53 = vmul.f32 %v1857_v36, %v7492_v2 }
 0xdb3   : > { %1871 = vrot.lane.b32.xlu1 %v1863_v49, %s11823_s23 }
 0xdb4   : > { %1869 = vrot.lane.b32.xlu0 %v1862_v53, %s11823_s23 }
 0xdbc   : > { %1888 = vrot.lane.b32.xlu0 %v1883_v46, %s7157_s3  ;;  %v1916_v46 = vld [vmem:[#allocation8 + $0x6b8] sm:$0xff] }
 0xe03   : > { %v8016_v56 = vpop.permute.xlu2 %1867 }
 0xe04   : > { %11825 = vst [vmem:[#allocation106_spill] sm:$0xff] %v8016_v56 }
 0xe0b   : > { %v1887_v50 = vpop.permute.xlu2 %1886 }
 0xe0c   : > { %v1894_v22 = vmul.f32 0.0, %v1887_v50 }
 0xe0e   : > { %1900 = vrot.lane.b32.xlu1 %v1894_v22, %s11826_s29 }
 0xe16   : > { %1919 = vrot.lane.b32.xlu1 %v1915_v21, %s7157_s3 }
 0xe25   : > { %v8028_v22 = vpop.permute.xlu1 %1871 }
 0xe26   : > { %v8020_v13 = vpop.permute.xlu0 %1869  ;;  %11828 = vst [vmem:[#allocation108_spill] sm:$0xff] %v8028_v22  ;;  %v1950_v22 = vld [vmem:[#allocation8 + $0x2f8] sm:$0xff] }
 0xe27   : > { %11827 = vst [vmem:[#allocation107_spill] sm:$0xff] %v8020_v13 }
 0xe2e   : > { %v1889_v15 = vpop.permute.xlu0 %1888 }
 0xe2f   : > { %v1890_v36 = vsel %vm1856_vm6, %v1887_v50, %v1889_v15  ;;  %v1896_v49 = vmul.f32 %v1889_v15, %v7539_v32  ;;  %v1949_v15 = vld [vmem:[#allocation8 + $0x2f0] sm:$0xff] }
 0xe30   : > { %v1895_v53 = vmul.f32 %v1890_v36, %v7492_v2 }
 0xe31   : > { %1904 = vrot.lane.b32.xlu0 %v1896_v49, %s11826_s29 }
 0xe32   : > { %1902 = vrot.lane.b32.xlu2 %v1895_v53, %s11826_s29  ;;  %s11833_s29 = smov 106  }
 0xe3a   : > { %1921 = vrot.lane.b32.xlu2 %v1916_v46, %s7157_s3  ;;  %s7160_s3 = smov 89  }
 0xe80   : > { %v8030_v56 = vpop.permute.xlu1 %1900 }
 0xe81   : > { %11829 = vst [vmem:[#allocation109_spill] sm:$0xff] %v8030_v56 }
 0xe88   : > { %v1920_v21 = vpop.permute.xlu1 %1919 }
 0xe89   : > { %v1927_v13 = vmul.f32 0.0, %v1920_v21 }
 0xe8b   : > { %1933 = vrot.lane.b32.xlu0 %v1927_v13, %s11340_s1 }
 0xe8c   : > { %v8033_v50 = vpop.permute.xlu2 %1902 }
 0xe8d   : > { %11830 = vst [vmem:[#allocation110_spill] sm:$0xff] %v8033_v50 }
 0xe93   : > { %1953 = vrot.lane.b32.xlu0 %v1949_v15, %s7159_s14 }
 0xe94   : > { %v1922_v36 = vpop.permute.xlu2 %1921 }
 0xe95   : > { %v1923_v49 = vsel %vm1856_vm6, %v1920_v21, %v1922_v36  ;;  %v1929_v53 = vmul.f32 %v1922_v36, %v7539_v32  ;;  %v1983_v21 = vld [vmem:[#allocation8 + $0x6c0] sm:$0xff]  ;;  %vm1957_vm6 = vcmask 809984  }
 0xe96   : > { %v1928_v46 = vmul.f32 %v1923_v49, %v7492_v2 }
 0xe97   : > { %1937 = vrot.lane.b32.xlu2 %v1929_v53, %s11340_s1 }
 0xe98   : > { %1935 = vrot.lane.b32.xlu1 %v1928_v46, %s11340_s1  ;;  %v1984_v46 = vld [vmem:[#allocation8 + $0x6c8] sm:$0xff]  ;;  %s7161_s1 = smov 100  }
 0xea0   : > { %1955 = vrot.lane.b32.xlu1 %v1950_v22, %s7159_s14 }
 0xea3   : > { %v8040_v56 = vpop.permute.xlu0 %1904 }
 0xea4   : > { %11831 = vst [vmem:[#allocation111_spill] sm:$0xff] %v8040_v56 }
 0xef1   : > { %v8052_v56 = vpop.permute.xlu2 %1937 }
 0xef2   : > { %11835 = vst [vmem:[#allocation114_spill] sm:$0xff] %v8052_v56 }
 0xefd   : > { %v8042_v13 = vpop.permute.xlu0 %1933 }
 0xefe   : > { %11832 = vst [vmem:[#allocation112_spill] sm:$0xff] %v8042_v13 }
 0xf05   : > { %v1954_v50 = vpop.permute.xlu0 %1953 }
 0xf06   : > { %v1962_v35 = vmul.f32 0.0, %v1954_v50 }
 0xf08   : > { %1968 = vrot.lane.b32.xlu2 %v1962_v35, %s11833_s29 }
 0xf0a   : > { %v8045_v15 = vpop.permute.xlu1 %1935 }
 0xf0b   : > { %11834 = vst [vmem:[#allocation113_spill] sm:$0xff] %v8045_v15  ;;  %v2017_v15 = vld [vmem:[#allocation8 + $0x6d0] sm:$0xff] }
 0xf10   : > { %1987 = vrot.lane.b32.xlu2 %v1983_v21, %s7159_s14 }
 0xf12   : > { %v1956_v36 = vpop.permute.xlu1 %1955 }
 0xf13   : > { %v1958_v49 = vsel %vm1957_vm6, %v1954_v50, %v1956_v36  ;;  %v1964_v53 = vmul.f32 %v1956_v36, %v7539_v32 }
 0xf14   : > { %v1963_v22 = vmul.f32 %v1958_v49, %v7492_v2 }
 0xf15   : > { %1972 = vrot.lane.b32.xlu1 %v1964_v53, %s11833_s29 }
 0xf16   : > { %1970 = vrot.lane.b32.xlu0 %v1963_v22, %s11833_s29  ;;  %s11850_s29 = smov 79  }
 0xf1e   : > { %1989 = vrot.lane.b32.xlu0 %v1984_v46, %s7159_s14  ;;  %v2018_v46 = vld [vmem:[#allocation8 + $0x6d8] sm:$0xff]  ;;  %s7162_s14 = smov 88  }
 0xf62   : > { %v8054_v35 = vpop.permute.xlu2 %1968 }
 0xf63   : > { %11836 = vst [vmem:[#allocation115_spill] sm:$0xff] %v8054_v35 }
 0xf6a   : > { %v1988_v13 = vpop.permute.xlu2 %1987 }
 0xf6b   : > { %v1995_v21 = vmul.f32 0.0, %v1988_v13 }
 0xf6d   : > { %2001 = vrot.lane.b32.xlu1 %v1995_v21, %s7160_s3 }
 0xf75   : > { %2021 = vrot.lane.b32.xlu1 %v2017_v15, %s7161_s1 }
 0xf87   : > { %v8061_v35 = vpop.permute.xlu1 %1972 }
 0xf88   : > { %v8056_v50 = vpop.permute.xlu0 %1970  ;;  %11838 = vst [vmem:[#allocation117_spill] sm:$0xff] %v8061_v35 }
 0xf89   : > { %11837 = vst [vmem:[#allocation116_spill] sm:$0xff] %v8056_v50  ;;  %v2052_v50 = vld [vmem:[#allocation8 + $0x6e0] sm:$0xff] }
 0xf90   : > { %v1990_v36 = vpop.permute.xlu0 %1989 }
 0xf91   : > { %v1991_v49 = vsel %vm1957_vm6, %v1988_v13, %v1990_v36  ;;  %v1997_v53 = vmul.f32 %v1990_v36, %v7539_v32  ;;  %vm2025_vm6 = vcmask 818176  }
 0xf92   : > { %v1996_v22 = vmul.f32 %v1991_v49, %v7492_v2 }
 0xf93   : > { %2005 = vrot.lane.b32.xlu0 %v1997_v53, %s7160_s3 }
 0xf94   : > { %2003 = vrot.lane.b32.xlu2 %v1996_v22, %s7160_s3  ;;  %v2053_v22 = vld [vmem:[#allocation8 + $0x6e8] sm:$0xff]  ;;  %s11860_s3 = smov 78  }
 0xf9c   : > { %2023 = vrot.lane.b32.xlu2 %v2018_v46, %s7161_s1  ;;  %s11843_s1 = smov 80  }
 0xfdf   : > { %v8063_v56 = vpop.permute.xlu1 %2001 }
 0xfe0   : > { %11839 = vst [vmem:[#allocation118_spill] sm:$0xff] %v8063_v56 }
 0xfe7   : > { %v2022_v21 = vpop.permute.xlu1 %2021 }
 0xfe8   : > { %v2030_v10 = vmul.f32 0.0, %v2022_v21 }
 0xfea   : > { %2036 = vrot.lane.b32.xlu0 %v2030_v10, %s7162_s14 }
 0xfee   : > { %v8065_v15 = vpop.permute.xlu2 %2003 }
 0xfef   : > { %11840 = vst [vmem:[#allocation119_spill] sm:$0xff] %v8065_v15 }
 0xff2   : > { %2056 = vrot.lane.b32.xlu0 %v2052_v50, %s7141_s15 }
 0xff6   : > { %v2024_v13 = vpop.permute.xlu2 %2023 }
 0xff7   : > { %v2026_v36 = vsel %vm2025_vm6, %v2022_v21, %v2024_v13  ;;  %v2032_v49 = vmul.f32 %v2024_v13, %v7539_v32  ;;  %v2085_v21 = vld [vmem:[#allocation8 + $0x300] sm:$0xff]  ;;  %vm11679_vm6 = vcmask 883712  }
 0xff8   : > { %v2031_v53 = vmul.f32 %v2026_v36, %v7492_v2 }
 0xff9   : > { %2040 = vrot.lane.b32.xlu2 %v2032_v49, %s7162_s14 }
 0xffa   : > { %2038 = vrot.lane.b32.xlu1 %v2031_v53, %s7162_s14  ;;  %s11873_s14 = smov 77  }
0x1002   : > { %2058 = vrot.lane.b32.xlu1 %v2053_v22, %s7141_s15  ;;  %v2086_v22 = vld [vmem:[#allocation8 + $0x308] sm:$0xff] }
0x1005   : > { %v8071_v46 = vpop.permute.xlu0 %2005 }
0x1006   : > { %11841 = vst [vmem:[#allocation120_spill] sm:$0xff] %v8071_v46 }
0x105c   : > { %v8073_v10 = vpop.permute.xlu0 %2036 }
0x105d   : > { %11842 = vst [vmem:[#allocation121_spill] sm:$0xff] %v8073_v10 }
0x1064   : > { %v2057_v35 = vpop.permute.xlu0 %2056 }
0x1065   : > { %v2064_v56 = vmul.f32 0.0, %v2057_v35 }
0x1067   : > { %2070 = vrot.lane.b32.xlu2 %v2064_v56, %s11843_s1  ;;  %v8085_v56 = vpop.permute.xlu2 %2040 }
0x1068   : > { %11845 = vst [vmem:[#allocation123_spill] sm:$0xff] %v8085_v56  ;;  %v2119_v56 = vld [vmem:[#allocation8 + $0x6f8] sm:$0xff] }
0x106c   : > { %v8076_v50 = vpop.permute.xlu1 %2038 }
0x106d   : > { %11844 = vst [vmem:[#allocation122_spill] sm:$0xff] %v8076_v50 }
0x106f   : > { %2089 = vrot.lane.b32.xlu2 %v2085_v21, %s7139_s5 }
0x1074   : > { %v2059_v13 = vpop.permute.xlu1 %2058 }
0x1075   : > { %v2060_v36 = vsel %vm11679_vm6, %v2057_v35, %v2059_v13  ;;  %v2066_v49 = vmul.f32 %v2059_v13, %v7539_v32  ;;  %v2118_v35 = vld [vmem:[#allocation8 + $0x6f0] sm:$0xff] }
0x1076   : > { %v2065_v53 = vmul.f32 %v2060_v36, %v7492_v2 }
0x1077   : > { %2074 = vrot.lane.b32.xlu1 %v2066_v49, %s11843_s1 }
0x1078   : > { %2072 = vrot.lane.b32.xlu0 %v2065_v53, %s11843_s1 }
0x1080   : > { %2091 = vrot.lane.b32.xlu0 %v2086_v22, %s7139_s5 }
0x10c1   : > { %v8087_v46 = vpop.permute.xlu2 %2070 }
0x10c2   : > { %11846 = vst [vmem:[#allocation124_spill] sm:$0xff] %v8087_v46 }
0x10c9   : > { %v2090_v21 = vpop.permute.xlu2 %2089 }
0x10ca   : > { %v2097_v10 = vmul.f32 0.0, %v2090_v21 }
0x10cc   : > { %2103 = vrot.lane.b32.xlu1 %v2097_v10, %s11392_s24 }
0x10d4   : > { %2122 = vrot.lane.b32.xlu1 %v2118_v35, %s7139_s5 }
0x10e9   : > { %v8099_v10 = vpop.permute.xlu1 %2074 }
0x10ea   : > { %v8091_v13 = vpop.permute.xlu0 %2072  ;;  %11848 = vst [vmem:[#allocation126_spill] sm:$0xff] %v8099_v10 }
0x10eb   : > { %11847 = vst [vmem:[#allocation125_spill] sm:$0xff] %v8091_v13 }
0x10f2   : > { %v2092_v36 = vpop.permute.xlu0 %2091 }
0x10f3   : > { %v2093_v49 = vsel %vm11678_vm10, %v2090_v21, %v2092_v36  ;;  %v2099_v53 = vmul.f32 %v2092_v36, %v7539_v32  ;;  %v2151_v21 = vld [vmem:[#allocation8 + $0xe0] sm:$0xff] }
0x10f4   : > { %v2098_v22 = vmul.f32 %v2093_v49, %v7492_v2 }
0x10f5   : > { %2107 = vrot.lane.b32.xlu0 %v2099_v53, %s11392_s24 }
0x10f6   : > { %2105 = vrot.lane.b32.xlu2 %v2098_v22, %s11392_s24  ;;  %v2152_v22 = vld [vmem:[#allocation8 + $0xe8] sm:$0xff]  ;;  %s11898_s24 = smov 92  }
0x10fe   : > { %2124 = vrot.lane.b32.xlu2 %v2119_v56, %s7139_s5 }
0x113e   : > { %v8101_v35 = vpop.permute.xlu1 %2103 }
0x113f   : > { %11849 = vst [vmem:[#allocation127_spill] sm:$0xff] %v8101_v35 }
0x1146   : > { %v2123_v46 = vpop.permute.xlu1 %2122 }
0x1147   : > { %v2130_v13 = vmul.f32 0.0, %v2123_v46 }
0x1149   : > { %2136 = vrot.lane.b32.xlu0 %v2130_v13, %s11850_s29 }
0x1150   : > { %v8104_v50 = vpop.permute.xlu2 %2105 }
0x1151   : > { %11851 = vst [vmem:[#allocation128_spill] sm:$0xff] %v8104_v50  ;;  %2155 = vrot.lane.b32.xlu0 %v2151_v21, %s11379_s25 }
0x1158   : > { %v2125_v36 = vpop.permute.xlu2 %2124 }
0x1159   : > { %v2126_v49 = vsel %vm11678_vm10, %v2123_v46, %v2125_v36  ;;  %v2132_v53 = vmul.f32 %v2125_v36, %v7539_v32  ;;  %v2184_v46 = vld [vmem:[#allocation8 + $0x310] sm:$0xff] }
0x115a   : > { %v2131_v56 = vmul.f32 %v2126_v49, %v7492_v2 }
0x115b   : > { %2140 = vrot.lane.b32.xlu2 %v2132_v53, %s11850_s29 }
0x115c   : > { %2138 = vrot.lane.b32.xlu1 %v2131_v56, %s11850_s29 }
0x1164   : > { %2157 = vrot.lane.b32.xlu1 %v2152_v22, %s11379_s25 }
0x1167   : > { %v8113_v13 = vpop.permute.xlu0 %2107 }
0x1168   : > { %11852 = vst [vmem:[#allocation129_spill] sm:$0xff] %v8113_v13  ;;  %v2185_v13 = vld [vmem:[#allocation8 + $0x318] sm:$0xff] }
0x11bb   : > { %v8115_v35 = vpop.permute.xlu0 %2136 }
0x11bc   : > { %11853 = vst [vmem:[#allocation130_spill] sm:$0xff] %v8115_v35 }
0x11c3   : > { %v2156_v50 = vpop.permute.xlu0 %2155 }
0x11c4   : > { %v2163_v21 = vmul.f32 0.0, %v2156_v50 }
0x11c6   : > { %2169 = vrot.lane.b32.xlu2 %v2163_v21, %s11386_s27  ;;  %v8127_v21 = vpop.permute.xlu2 %2140 }
0x11c7   : > { %11855 = vst [vmem:[#allocation132_spill] sm:$0xff] %v8127_v21 }
0x11ce   : > { %2188 = vrot.lane.b32.xlu2 %v2184_v46, %s11379_s25  ;;  %v8119_v36 = vpop.permute.xlu1 %2138 }
0x11cf   : > { %11854 = vst [vmem:[#allocation131_spill] sm:$0xff] %v8119_v36 }
0x11d6   : > { %v2158_v49 = vpop.permute.xlu1 %2157 }
0x11d7   : > { %v2159_v53 = vsel %vm11673_vm4, %v2156_v50, %v2158_v49  ;;  %v2165_v56 = vmul.f32 %v2158_v49, %v7539_v32  ;;  %v2217_v50 = vld [vmem:[#allocation8 + $0x700] sm:$0xff] }
0x11d8   : > { %v2164_v22 = vmul.f32 %v2159_v53, %v7492_v2 }
0x11d9   : > { %2173 = vrot.lane.b32.xlu1 %v2165_v56, %s11386_s27 }
0x11da   : > { %2171 = vrot.lane.b32.xlu0 %v2164_v22, %s11386_s27 }
0x11e2   : > { %2190 = vrot.lane.b32.xlu0 %v2185_v13, %s11379_s25 }
0x1220   : > { %v8129_v46 = vpop.permute.xlu2 %2169 }
0x1221   : > { %11856 = vst [vmem:[#allocation133_spill] sm:$0xff] %v8129_v46  ;;  %v2218_v46 = vld [vmem:[#allocation8 + $0x708] sm:$0xff] }
0x1228   : > { %v2189_v10 = vpop.permute.xlu2 %2188 }
0x1229   : > { %v2196_v35 = vmul.f32 0.0, %v2189_v10 }
0x122b   : > { %2202 = vrot.lane.b32.xlu1 %v2196_v35, %s11381_s18 }
0x1233   : > { %2221 = vrot.lane.b32.xlu1 %v2217_v50, %s11379_s25 }
0x124b   : > { %v8141_v35 = vpop.permute.xlu1 %2173 }
0x124c   : > { %v8133_v49 = vpop.permute.xlu0 %2171  ;;  %11858 = vst [vmem:[#allocation135_spill] sm:$0xff] %v8141_v35 }
0x124d   : > { %11857 = vst [vmem:[#allocation134_spill] sm:$0xff] %v8133_v49 }
0x1254   : > { %v2191_v53 = vpop.permute.xlu0 %2190 }
0x1255   : > { %v2192_v56 = vsel %vm11673_vm4, %v2189_v10, %v2191_v53  ;;  %v2198_v22 = vmul.f32 %v2191_v53, %v7539_v32  ;;  %v2249_v10 = vld [vmem:[#allocation8] sm:$0xff] }
0x1256   : > { %v2197_v13 = vmul.f32 %v2192_v56, %v7492_v2  ;;  %v2269_v56 = vld [vmem:[#allocation8 + $0xf8] sm:$0xff] }
0x1257   : > { %2206 = vrot.lane.b32.xlu0 %v2198_v22, %s11381_s18 }
0x1258   : > { %2204 = vrot.lane.b32.xlu2 %v2197_v13, %s11381_s18  ;;  %s7163_s18 = smov 113  }
0x1260   : > { %2223 = vrot.lane.b32.xlu2 %v2218_v46, %s11379_s25 }
0x129d   : > { %v8143_v21 = vpop.permute.xlu1 %2202 }
0x129e   : > { %11859 = vst [vmem:[#allocation136_spill] sm:$0xff] %v8143_v21  ;;  %v2250_v21 = vld [vmem:[#allocation8 + $0x8] sm:$0xff] }
0x12a5   : > { %v2222_v50 = vpop.permute.xlu1 %2221 }
0x12a6   : > { %v2229_v49 = vmul.f32 0.0, %v2222_v50 }
0x12a8   : > { %2235 = vrot.lane.b32.xlu0 %v2229_v49, %s11860_s3  ;;  %v2268_v49 = vld [vmem:[#allocation8 + $0xf0] sm:$0xff] }
0x12b0   : > { %2253 = vrot.lane.b32.xlu0 %v2249_v10, %s11375_s20 }
0x12b2   : > { %v8147_v53 = vpop.permute.xlu2 %2204 }
0x12b3   : > { %11861 = vst [vmem:[#allocation137_spill] sm:$0xff] %v8147_v53 }
0x12b8   : > { %2274 = vrot.lane.b32.xlu0 %v2269_v56, %s11375_s20 }
0x12ba   : > { %v2224_v22 = vpop.permute.xlu2 %2223 }
0x12bb   : > { %v2225_v13 = vsel %vm11673_vm4, %v2222_v50, %v2224_v22  ;;  %v2231_v46 = vmul.f32 %v2224_v22, %v7539_v32 }
0x12bc   : > { %v2230_v35 = vmul.f32 %v2225_v13, %v7492_v2  ;;  %v2301_v13 = vld [vmem:[#allocation8 + $0x320] sm:$0xff] }
0x12bd   : > { %2239 = vrot.lane.b32.xlu2 %v2231_v46, %s11860_s3 }
0x12be   : > { %2237 = vrot.lane.b32.xlu1 %v2230_v35, %s11860_s3 }
0x12c5   : > { %2272 = vrot.lane.b32.xlu2 %v2268_v49, %s11375_s20 }
0x12c6   : > { %2255 = vrot.lane.b32.xlu1 %v2250_v21, %s11375_s20 }
0x12c9   : > { %v8157_v10 = vpop.permute.xlu0 %2206 }
0x12ca   : > { %11862 = vst [vmem:[#allocation138_spill] sm:$0xff] %v8157_v10  ;;  %v2302_v10 = vld [vmem:[#allocation8 + $0x328] sm:$0xff] }
0x1317   : > { %v8159_v56 = vpop.permute.xlu2 %2239 }
0x1318   : > { %11863 = vst [vmem:[#allocation139_spill] sm:$0xff] %v8159_v56 }
0x131a   : > { %v8161_v53 = vpop.permute.xlu0 %2235 }
0x131b   : > { %11864 = vst [vmem:[#allocation140_spill] sm:$0xff] %v8161_v53 }
0x131f   : > { %v2273_v50 = vpop.permute.xlu2 %2272 }
0x1320   : > { %v2280_v22 = vmul.f32 0.0, %v2273_v50 }
0x1322   : > { %v8163_v36 = vpop.permute.xlu0 %2253  ;;  %2286 = vrot.lane.b32.xlu1 %v2280_v22, %s11375_s20 }
0x1323   : > { %11865 = vst [vmem:[#allocation141_spill] sm:$0xff] %v8163_v36 }
0x132a   : > { %v2275_v35 = vpop.permute.xlu0 %2274  ;;  %2305 = vrot.lane.b32.xlu1 %v2301_v13, %s11375_s20 }
0x132b   : > { %v2276_v46 = vsel %vm11674_vm2, %v2273_v50, %v2275_v35  ;;  %v2282_v21 = vmul.f32 %v2275_v35, %v7539_v32 }
0x132c   : > { %v2281_v49 = vmul.f32 %v2276_v46, %v7492_v2 }
0x132d   : > { %2290 = vrot.lane.b32.xlu0 %v2282_v21, %s11375_s20 }
0x132e   : > { %2288 = vrot.lane.b32.xlu2 %v2281_v49, %s11375_s20 }
0x1330   : > { %v8173_v36 = vpop.permute.xlu1 %2237 }
0x1331   : > { %11866 = vst [vmem:[#allocation142_spill] sm:$0xff] %v8173_v36 }
0x1336   : > { %2307 = vrot.lane.b32.xlu2 %v2302_v10, %s11375_s20  ;;  %v2334_v10 = vld [vmem:[#allocation8 + $0x710] sm:$0xff] }
0x1338   : > { %v8177_v56 = vpop.permute.xlu1 %2255 }
0x1339   : > { %11868 = vst [vmem:[#allocation144_spill] sm:$0xff] %v8177_v56 }
0x1388   : > { %v8175_v22 = vpop.permute.xlu2 %2288 }
0x1389   : > { %11867 = vst [vmem:[#allocation143_spill] sm:$0xff] %v8175_v22  ;;  %v2335_v22 = vld [vmem:[#allocation8 + $0x718] sm:$0xff] }
0x1390   : > { %v2308_v13 = vpop.permute.xlu2 %2307 }
0x1391   : > { %v2315_v50 = vmul.f32 %v2308_v13, %v7539_v32 }
0x1393   : > { %2323 = vrot.lane.b32.xlu2 %v2315_v50, %s11368_s28 }
0x1394   : > { %v8181_v35 = vpop.permute.xlu1 %2286 }
0x1395   : > { %11869 = vst [vmem:[#allocation145_spill] sm:$0xff] %v8181_v35 }
0x139c   : > { %v2306_v46 = vpop.permute.xlu1 %2305 }
0x139d   : > { %v2309_v21 = vsel %vm11674_vm2, %v2306_v46, %v2308_v13  ;;  %v2313_v49 = vmul.f32 0.0, %v2306_v46 }
0x139e   : > { %v2314_v53 = vmul.f32 %v2309_v21, %v7492_v2 }
0x139f   : > { %2319 = vrot.lane.b32.xlu0 %v2313_v49, %s11368_s28  ;;  %v8189_v56 = vpop.permute.xlu0 %2290 }
0x13a0   : > { %2321 = vrot.lane.b32.xlu1 %v2314_v53, %s11368_s28  ;;  %11870 = vst [vmem:[#allocation146_spill] sm:$0xff] %v8189_v56  ;;  %s11876_s28 = smov 127  }
0x13a7   : > { %2338 = vrot.lane.b32.xlu0 %v2334_v10, %s11375_s20  ;;  %v2368_v10 = vld [vmem:[#allocation8 + $0x18] sm:$0xff] }
0x13a8   : > { %2340 = vrot.lane.b32.xlu1 %v2335_v22, %s11375_s20  ;;  %v2367_v22 = vld [vmem:[#allocation8 + $0x10] sm:$0xff]  ;;  %s11884_s20 = smov 93  }
0x13ed   : > { %v8203_v56 = vpop.permute.xlu2 %2323 }
0x13ee   : > { %11874 = vst [vmem:[#allocation149_spill] sm:$0xff] %v8203_v56  ;;  %v2401_v56 = vld [vmem:[#allocation8 + $0x108] sm:$0xff] }
0x1411   : > { %v8191_v50 = vpop.permute.xlu0 %2319 }
0x1412   : > { %11871 = vst [vmem:[#allocation147_spill] sm:$0xff] %v8191_v50  ;;  %v8193_v35 = vpop.permute.xlu1 %2321 }
0x1413   : > { %11872 = vst [vmem:[#allocation148_spill] sm:$0xff] %v8193_v35 }
0x1419   : > { %v2339_v13 = vpop.permute.xlu0 %2338 }
0x141a   : > { %v2346_v46 = vmul.f32 0.0, %v2339_v13  ;;  %v2341_v36 = vpop.permute.xlu1 %2340 }
0x141b   : > { %v2342_v21 = vsel %vm11674_vm2, %v2339_v13, %v2341_v36  ;;  %v2348_v49 = vmul.f32 %v2341_v36, %v7539_v32 }
0x141c   : > { %v2347_v53 = vmul.f32 %v2342_v21, %v7492_v2  ;;  %2352 = vrot.lane.b32.xlu2 %v2346_v46, %s11873_s14  ;;  %v2400_v21 = vld [vmem:[#allocation8 + $0x100] sm:$0xff] }
0x141d   : > { %2356 = vrot.lane.b32.xlu1 %v2348_v49, %s11873_s14 }
0x141e   : > { %2354 = vrot.lane.b32.xlu0 %v2347_v53, %s11873_s14 }
0x1424   : > { %2371 = vrot.lane.b32.xlu2 %v2367_v22, %s11386_s27 }
0x1426   : > { %2373 = vrot.lane.b32.xlu0 %v2368_v10, %s11386_s27 }
0x1476   : > { %v8205_v50 = vpop.permute.xlu2 %2352 }
0x1477   : > { %11875 = vst [vmem:[#allocation150_spill] sm:$0xff] %v8205_v50 }
0x147e   : > { %v2372_v13 = vpop.permute.xlu2 %2371 }
0x147f   : > { %v2379_v36 = vmul.f32 0.0, %v2372_v13 }
0x1481   : > { %2385 = vrot.lane.b32.xlu1 %v2379_v36, %s11876_s28 }
0x1489   : > { %2404 = vrot.lane.b32.xlu1 %v2400_v21, %s11386_s27 }
0x148f   : > { %v8217_v36 = vpop.permute.xlu1 %2356 }
0x1490   : > { %v8209_v46 = vpop.permute.xlu0 %2354  ;;  %11878 = vst [vmem:[#allocation152_spill] sm:$0xff] %v8217_v36 }
0x1491   : > { %11877 = vst [vmem:[#allocation151_spill] sm:$0xff] %v8209_v46 }
0x1498   : > { %v2374_v49 = vpop.permute.xlu0 %2373 }
0x1499   : > { %v2375_v53 = vsel %vm853_vm12, %v2372_v13, %v2374_v49  ;;  %v2381_v22 = vmul.f32 %v2374_v49, %v7539_v32 }
0x149a   : > { %v2380_v10 = vmul.f32 %v2375_v53, %v7492_v2 }
0x149b   : > { %2389 = vrot.lane.b32.xlu0 %v2381_v22, %s11876_s28 }
0x149c   : > { %2387 = vrot.lane.b32.xlu2 %v2380_v10, %s11876_s28  ;;  %v2434_v10 = vld [vmem:[#allocation8 + $0x338] sm:$0xff] }
0x14a4   : > { %2406 = vrot.lane.b32.xlu2 %v2401_v56, %s11386_s27  ;;  %v2433_v56 = vld [vmem:[#allocation8 + $0x330] sm:$0xff] }
0x14f3   : > { %v8219_v21 = vpop.permute.xlu1 %2385 }
0x14f4   : > { %11879 = vst [vmem:[#allocation153_spill] sm:$0xff] %v8219_v21 }
0x14f6   : > { %v8221_v35 = vpop.permute.xlu2 %2387 }
0x14f7   : > { %11880 = vst [vmem:[#allocation154_spill] sm:$0xff] %v8221_v35 }
0x14fb   : > { %v2405_v50 = vpop.permute.xlu1 %2404 }
0x14fc   : > { %v2412_v46 = vmul.f32 0.0, %v2405_v50 }
0x14fe   : > { %2418 = vrot.lane.b32.xlu0 %v2412_v46, %s11379_s25  ;;  %v2407_v13 = vpop.permute.xlu2 %2406 }
0x14ff   : > { %v2408_v49 = vsel %vm853_vm12, %v2405_v50, %v2407_v13  ;;  %v2414_v53 = vmul.f32 %v2407_v13, %v7539_v32 }
0x1500   : > { %v2413_v22 = vmul.f32 %v2408_v49, %v7492_v2 }
0x1501   : > { %2422 = vrot.lane.b32.xlu2 %v2414_v53, %s11379_s25 }
0x1502   : > { %2420 = vrot.lane.b32.xlu1 %v2413_v22, %s11379_s25  ;;  %s11887_s25 = smov 76  }
0x1506   : > { %2437 = vrot.lane.b32.xlu0 %v2433_v56, %s11386_s27 }
0x150a   : > { %2439 = vrot.lane.b32.xlu1 %v2434_v10, %s11386_s27  ;;  %v2466_v10 = vld [vmem:[#allocation8 + $0x720] sm:$0xff] }
0x150d   : > { %v8231_v21 = vpop.permute.xlu0 %2389 }
0x150e   : > { %11881 = vst [vmem:[#allocation155_spill] sm:$0xff] %v8231_v21  ;;  %v2467_v21 = vld [vmem:[#allocation8 + $0x728] sm:$0xff] }
0x1570   : > { %v8233_v46 = vpop.permute.xlu0 %2418 }
0x1571   : > { %11882 = vst [vmem:[#allocation156_spill] sm:$0xff] %v8233_v46  ;;  %v8245_v46 = vpop.permute.xlu2 %2422 }
0x1572   : > { %11885 = vst [vmem:[#allocation158_spill] sm:$0xff] %v8245_v46  ;;  %v2500_v46 = vld [vmem:[#allocation8 + $0x28] sm:$0xff] }
0x1574   : > { %v8235_v35 = vpop.permute.xlu1 %2420 }
0x1575   : > { %11883 = vst [vmem:[#allocation157_spill] sm:$0xff] %v8235_v35 }
0x1578   : > { %v2438_v50 = vpop.permute.xlu0 %2437 }
0x1579   : > { %v2445_v13 = vmul.f32 0.0, %v2438_v50 }
0x157b   : > { %2451 = vrot.lane.b32.xlu2 %v2445_v13, %s11884_s20 }
0x157c   : > { %v2440_v49 = vpop.permute.xlu1 %2439 }
0x157d   : > { %v2441_v53 = vsel %vm853_vm12, %v2438_v50, %v2440_v49  ;;  %v2447_v22 = vmul.f32 %v2440_v49, %v7539_v32  ;;  %v2499_v49 = vld [vmem:[#allocation8 + $0x20] sm:$0xff] }
0x157e   : > { %v2446_v56 = vmul.f32 %v2441_v53, %v7492_v2 }
0x157f   : > { %2455 = vrot.lane.b32.xlu1 %v2447_v22, %s11884_s20 }
0x1580   : > { %2453 = vrot.lane.b32.xlu0 %v2446_v56, %s11884_s20 }
0x1583   : > { %2470 = vrot.lane.b32.xlu2 %v2466_v10, %s11386_s27 }
0x1588   : > { %2472 = vrot.lane.b32.xlu0 %v2467_v21, %s11386_s27  ;;  %s11892_s27 = smov 126  }
0x15d5   : > { %v8247_v13 = vpop.permute.xlu2 %2451 }
0x15d6   : > { %11886 = vst [vmem:[#allocation159_spill] sm:$0xff] %v8247_v13 }
0x15dd   : > { %v2471_v35 = vpop.permute.xlu2 %2470 }
0x15de   : > { %v2478_v50 = vmul.f32 0.0, %v2471_v35 }
0x15e0   : > { %2484 = vrot.lane.b32.xlu1 %v2478_v50, %s11887_s25 }
0x15e8   : > { %2503 = vrot.lane.b32.xlu1 %v2499_v49, %s7163_s18 }
0x15f1   : > { %v8259_v50 = vpop.permute.xlu1 %2455 }
0x15f2   : > { %v8251_v53 = vpop.permute.xlu0 %2453  ;;  %11889 = vst [vmem:[#allocation161_spill] sm:$0xff] %v8259_v50 }
0x15f3   : > { %11888 = vst [vmem:[#allocation160_spill] sm:$0xff] %v8251_v53 }
0x15fa   : > { %v2473_v22 = vpop.permute.xlu0 %2472 }
0x15fb   : > { %v2474_v56 = vsel %vm853_vm12, %v2471_v35, %v2473_v22  ;;  %v2480_v10 = vmul.f32 %v2473_v22, %v7539_v32 }
0x15fc   : > { %v2479_v21 = vmul.f32 %v2474_v56, %v7492_v2 }
0x15fd   : > { %2488 = vrot.lane.b32.xlu0 %v2480_v10, %s11887_s25 }
0x15fe   : > { %2486 = vrot.lane.b32.xlu2 %v2479_v21, %s11887_s25  ;;  %v2533_v21 = vld [vmem:[#allocation8 + $0x110] sm:$0xff] }
0x1606   : > { %2505 = vrot.lane.b32.xlu2 %v2500_v46, %s7163_s18  ;;  %v2534_v46 = vld [vmem:[#allocation8 + $0x118] sm:$0xff] }
0x1652   : > { %v8261_v13 = vpop.permute.xlu1 %2484 }
0x1653   : > { %11890 = vst [vmem:[#allocation162_spill] sm:$0xff] %v8261_v13 }
0x1658   : > { %v8263_v49 = vpop.permute.xlu2 %2486 }
0x1659   : > { %11891 = vst [vmem:[#allocation163_spill] sm:$0xff] %v8263_v49  ;;  %v2566_v49 = vld [vmem:[#allocation8 + $0x340] sm:$0xff] }
0x165a   : > { %v2504_v53 = vpop.permute.xlu1 %2503 }
0x165b   : > { %v2512_v36 = vmul.f32 0.0, %v2504_v53 }
0x165d   : > { %2518 = vrot.lane.b32.xlu0 %v2512_v36, %s11892_s27 }
0x1660   : > { %v2506_v35 = vpop.permute.xlu2 %2505 }
0x1661   : > { %v2508_v22 = vsel %vm2507_vm5, %v2504_v53, %v2506_v35  ;;  %v2514_v56 = vmul.f32 %v2506_v35, %v7539_v32 }
0x1662   : > { %v2513_v10 = vmul.f32 %v2508_v22, %v7492_v2 }
0x1663   : > { %2522 = vrot.lane.b32.xlu2 %v2514_v56, %s11892_s27 }
0x1664   : > { %2520 = vrot.lane.b32.xlu1 %v2513_v10, %s11892_s27 }
0x1665   : > { %2537 = vrot.lane.b32.xlu0 %v2533_v21, %s7163_s18 }
0x166c   : > { %2539 = vrot.lane.b32.xlu1 %v2534_v46, %s7163_s18  ;;  %v2567_v46 = vld [vmem:[#allocation8 + $0x348] sm:$0xff] }
0x166f   : > { %v8273_v50 = vpop.permute.xlu0 %2488 }
0x1670   : > { %11893 = vst [vmem:[#allocation164_spill] sm:$0xff] %v8273_v50 }
0x16cf   : > { %v8275_v36 = vpop.permute.xlu0 %2518 }
0x16d0   : > { %11894 = vst [vmem:[#allocation165_spill] sm:$0xff] %v8275_v36  ;;  %v8287_v36 = vpop.permute.xlu2 %2522 }
0x16d1   : > { %11896 = vst [vmem:[#allocation167_spill] sm:$0xff] %v8287_v36  ;;  %v2600_v36 = vld [vmem:[#allocation8 + $0x738] sm:$0xff] }
0x16d6   : > { %v8277_v13 = vpop.permute.xlu1 %2520 }
0x16d7   : > { %11895 = vst [vmem:[#allocation166_spill] sm:$0xff] %v8277_v13  ;;  %v2538_v53 = vpop.permute.xlu0 %2537 }
0x16d8   : > { %v2545_v35 = vmul.f32 0.0, %v2538_v53 }
0x16da   : > { %2551 = vrot.lane.b32.xlu2 %v2545_v35, %s7139_s5 }
0x16de   : > { %v2540_v22 = vpop.permute.xlu1 %2539 }
0x16df   : > { %v2541_v56 = vsel %vm2507_vm5, %v2538_v53, %v2540_v22  ;;  %v2547_v10 = vmul.f32 %v2540_v22, %v7539_v32  ;;  %v2599_v22 = vld [vmem:[#allocation8 + $0x730] sm:$0xff] }
0x16e0   : > { %v2546_v21 = vmul.f32 %v2541_v56, %v7492_v2 }
0x16e1   : > { %2555 = vrot.lane.b32.xlu1 %v2547_v10, %s7139_s5 }
0x16e2   : > { %2570 = vrot.lane.b32.xlu2 %v2566_v49, %s7163_s18  ;;  %2553 = vrot.lane.b32.xlu0 %v2546_v21, %s7139_s5  ;;  %s11401_s5 = smov 75  }
0x16ea   : > { %2572 = vrot.lane.b32.xlu0 %v2567_v46, %s7163_s18 }
0x1734   : > { %v8289_v35 = vpop.permute.xlu2 %2551 }
0x1735   : > { %11897 = vst [vmem:[#allocation168_spill] sm:$0xff] %v8289_v35 }
0x173c   : > { %v2571_v13 = vpop.permute.xlu2 %2570 }
0x173d   : > { %v2578_v53 = vmul.f32 0.0, %v2571_v13 }
0x173f   : > { %2584 = vrot.lane.b32.xlu1 %v2578_v53, %s11898_s24 }
0x1747   : > { %2603 = vrot.lane.b32.xlu1 %v2599_v22, %s7163_s18 }
0x1753   : > { %v8301_v53 = vpop.permute.xlu1 %2555 }
0x1754   : > { %v8293_v56 = vpop.permute.xlu0 %2553  ;;  %11900 = vst [vmem:[#allocation170_spill] sm:$0xff] %v8301_v53 }
0x1755   : > { %11899 = vst [vmem:[#allocation169_spill] sm:$0xff] %v8293_v56 }
0x175c   : > { %v2573_v10 = vpop.permute.xlu0 %2572 }
0x175d   : > { %v2574_v49 = vsel %vm2507_vm5, %v2571_v13, %v2573_v10  ;;  %v2580_v21 = vmul.f32 %v2573_v10, %v7539_v32  ;;  %v2633_v13 = vld [vmem:[#allocation8 + $0x120] sm:$0xff] }
0x175e   : > { %v2579_v46 = vmul.f32 %v2574_v49, %v7492_v2 }
0x175f   : > { %2588 = vrot.lane.b32.xlu0 %v2580_v21, %s11898_s24 }
0x1760   : > { %2586 = vrot.lane.b32.xlu2 %v2579_v46, %s11898_s24 }
0x1768   : > { %2605 = vrot.lane.b32.xlu2 %v2600_v36, %s7163_s18  ;;  %s7165_s18 = smov 114   ;;  %v2634_v36 = vld [vmem:[#allocation8 + $0x128] sm:$0xff] }
0x17b1   : > { %v8303_v35 = vpop.permute.xlu1 %2584 }
0x17b2   : > { %11901 = vst [vmem:[#allocation171_spill] sm:$0xff] %v8303_v35 }
0x17b9   : > { %v2604_v22 = vpop.permute.xlu1 %2603 }
0x17ba   : > { %v2611_v56 = vmul.f32 0.0, %v2604_v22  ;;  %v8305_v50 = vpop.permute.xlu2 %2586 }
0x17bb   : > { %11902 = vst [vmem:[#allocation172_spill] sm:$0xff] %v8305_v50 }
0x17bc   : > { %2617 = vrot.lane.b32.xlu0 %v2611_v56, %s11401_s5 }
0x17c2   : > { %v2606_v10 = vpop.permute.xlu2 %2605 }
0x17c3   : > { %v2607_v49 = vsel %vm2507_vm5, %v2604_v22, %v2606_v10  ;;  %v2613_v21 = vmul.f32 %v2606_v10, %v7539_v32  ;;  %vm2641_vm5 = vcmask 932864   ;;  %v2667_v10 = vld [vmem:[#allocation8 + $0x350] sm:$0xff] }
0x17c4   : > { %v2612_v46 = vmul.f32 %v2607_v49, %v7492_v2  ;;  %2637 = vrot.lane.b32.xlu0 %v2633_v13, %s7165_s18 }
0x17c5   : > { %2621 = vrot.lane.b32.xlu2 %v2613_v21, %s11401_s5 }
0x17c6   : > { %2619 = vrot.lane.b32.xlu1 %v2612_v46, %s11401_s5  ;;  %s11908_s5 = smov 91  }
0x17ce   : > { %2639 = vrot.lane.b32.xlu1 %v2634_v36, %s7165_s18  ;;  %v2668_v36 = vld [vmem:[#allocation8 + $0x358] sm:$0xff] }
0x17d1   : > { %v8315_v53 = vpop.permute.xlu0 %2588 }
0x17d2   : > { %11903 = vst [vmem:[#allocation173_spill] sm:$0xff] %v8315_v53 }
0x181f   : > { %v8329_v53 = vpop.permute.xlu2 %2621 }
0x1820   : > { %11906 = vst [vmem:[#allocation176_spill] sm:$0xff] %v8329_v53 }
0x182e   : > { %v8317_v56 = vpop.permute.xlu0 %2617 }
0x182f   : > { %11904 = vst [vmem:[#allocation174_spill] sm:$0xff] %v8317_v56 }
0x1836   : > { %v2638_v35 = vpop.permute.xlu0 %2637 }
0x1837   : > { %v2646_v22 = vmul.f32 0.0, %v2638_v35 }
0x1838   : > { %v8319_v50 = vpop.permute.xlu1 %2619 }
0x1839   : > { %11905 = vst [vmem:[#allocation175_spill] sm:$0xff] %v8319_v50  ;;  %2652 = vrot.lane.b32.xlu2 %v2646_v22, %s7141_s15 }
0x1840   : > { %v2640_v13 = vpop.permute.xlu1 %2639 }
0x1841   : > { %v2642_v49 = vsel %vm2641_vm5, %v2638_v35, %v2640_v13  ;;  %v2648_v21 = vmul.f32 %v2640_v13, %v7539_v32  ;;  %2671 = vrot.lane.b32.xlu2 %v2667_v10, %s7165_s18  ;;  %v2700_v35 = vld [vmem:[#allocation8 + $0x740] sm:$0xff] }
0x1842   : > { %v2647_v46 = vmul.f32 %v2642_v49, %v7492_v2 }
0x1843   : > { %2656 = vrot.lane.b32.xlu1 %v2648_v21, %s7141_s15 }
0x1844   : > { %2654 = vrot.lane.b32.xlu0 %v2647_v46, %s7141_s15  ;;  %s11409_s15 = smov 74  }
0x184c   : > { %2673 = vrot.lane.b32.xlu0 %v2668_v36, %s7165_s18  ;;  %v2701_v36 = vld [vmem:[#allocation8 + $0x748] sm:$0xff] }
0x1893   : > { %v8331_v22 = vpop.permute.xlu2 %2652 }
0x1894   : > { %11907 = vst [vmem:[#allocation177_spill] sm:$0xff] %v8331_v22 }
0x189b   : > { %v2672_v56 = vpop.permute.xlu2 %2671 }
0x189c   : > { %v2679_v50 = vmul.f32 0.0, %v2672_v56 }
0x189e   : > { %2685 = vrot.lane.b32.xlu1 %v2679_v50, %s11908_s5 }
0x18a6   : > { %2704 = vrot.lane.b32.xlu1 %v2700_v35, %s7165_s18 }
0x18b5   : > { %v8343_v50 = vpop.permute.xlu1 %2656 }
0x18b6   : > { %v8335_v10 = vpop.permute.xlu0 %2654  ;;  %11910 = vst [vmem:[#allocation179_spill] sm:$0xff] %v8343_v50  ;;  %v2735_v50 = vld [vmem:[#allocation8 + $0x368] sm:$0xff] }
0x18b7   : > { %11909 = vst [vmem:[#allocation178_spill] sm:$0xff] %v8335_v10 }
0x18be   : > { %v2674_v13 = vpop.permute.xlu0 %2673 }
0x18bf   : > { %v2675_v49 = vsel %vm2641_vm5, %v2672_v56, %v2674_v13  ;;  %v2681_v21 = vmul.f32 %v2674_v13, %v7539_v32  ;;  %v2734_v13 = vld [vmem:[#allocation8 + $0x360] sm:$0xff] }
0x18c0   : > { %v2680_v46 = vmul.f32 %v2675_v49, %v7492_v2 }
0x18c1   : > { %2689 = vrot.lane.b32.xlu0 %v2681_v21, %s11908_s5 }
0x18c2   : > { %2687 = vrot.lane.b32.xlu2 %v2680_v46, %s11908_s5  ;;  %s11915_s5 = smov 90  }
0x18ca   : > { %2706 = vrot.lane.b32.xlu2 %v2701_v36, %s7165_s18  ;;  %s7168_s18 = smov 73  }
0x1910   : > { %v8345_v22 = vpop.permute.xlu1 %2685 }
0x1911   : > { %11911 = vst [vmem:[#allocation180_spill] sm:$0xff] %v8345_v22 }
0x1918   : > { %v2705_v35 = vpop.permute.xlu1 %2704 }
0x1919   : > { %v2712_v10 = vmul.f32 0.0, %v2705_v35 }
0x191b   : > { %2718 = vrot.lane.b32.xlu0 %v2712_v10, %s11409_s15 }
0x191c   : > { %v8348_v56 = vpop.permute.xlu2 %2687 }
0x191d   : > { %11912 = vst [vmem:[#allocation181_spill] sm:$0xff] %v8348_v56 }
0x1923   : > { %2738 = vrot.lane.b32.xlu0 %v2734_v13, %s7167_s0 }
0x1924   : > { %v2707_v49 = vpop.permute.xlu2 %2706 }
0x1925   : > { %v2708_v21 = vsel %vm2641_vm5, %v2705_v35, %v2707_v49  ;;  %v2714_v46 = vmul.f32 %v2707_v49, %v7539_v32  ;;  %v2768_v35 = vld [vmem:[#allocation8 + $0x750] sm:$0xff]  ;;  %vm2742_vm5 = vcmask 941056  }
0x1926   : > { %v2713_v36 = vmul.f32 %v2708_v21, %v7492_v2 }
0x1927   : > { %2722 = vrot.lane.b32.xlu2 %v2714_v46, %s11409_s15 }
0x1928   : > { %2720 = vrot.lane.b32.xlu1 %v2713_v36, %s11409_s15  ;;  %v2769_v36 = vld [vmem:[#allocation8 + $0x758] sm:$0xff]  ;;  %s7169_s15 = smov 116  }
0x1930   : > { %2740 = vrot.lane.b32.xlu1 %v2735_v50, %s7167_s0 }
0x1933   : > { %v8355_v22 = vpop.permute.xlu0 %2689 }
0x1934   : > { %11913 = vst [vmem:[#allocation182_spill] sm:$0xff] %v8355_v22 }
0x1981   : > { %v8367_v22 = vpop.permute.xlu2 %2722 }
0x1982   : > { %11917 = vst [vmem:[#allocation185_spill] sm:$0xff] %v8367_v22 }
0x198d   : > { %v8357_v10 = vpop.permute.xlu0 %2718 }
0x198e   : > { %11914 = vst [vmem:[#allocation183_spill] sm:$0xff] %v8357_v10 }
0x1995   : > { %v2739_v56 = vpop.permute.xlu0 %2738 }
0x1996   : > { %v2747_v53 = vmul.f32 0.0, %v2739_v56 }
0x1998   : > { %2753 = vrot.lane.b32.xlu2 %v2747_v53, %s11915_s5 }
0x199a   : > { %v8360_v13 = vpop.permute.xlu1 %2720 }
0x199b   : > { %11916 = vst [vmem:[#allocation184_spill] sm:$0xff] %v8360_v13  ;;  %v2802_v13 = vld [vmem:[#allocation8 + $0x760] sm:$0xff] }
0x19a0   : > { %2772 = vrot.lane.b32.xlu2 %v2768_v35, %s7167_s0 }
0x19a2   : > { %v2741_v49 = vpop.permute.xlu1 %2740 }
0x19a3   : > { %v2743_v21 = vsel %vm2742_vm5, %v2739_v56, %v2741_v49  ;;  %v2749_v46 = vmul.f32 %v2741_v49, %v7539_v32 }
0x19a4   : > { %v2748_v50 = vmul.f32 %v2743_v21, %v7492_v2 }
0x19a5   : > { %2757 = vrot.lane.b32.xlu1 %v2749_v46, %s11915_s5 }
0x19a6   : > { %2755 = vrot.lane.b32.xlu0 %v2748_v50, %s11915_s5  ;;  %s11927_s5 = smov 125  }
0x19ae   : > { %2774 = vrot.lane.b32.xlu0 %v2769_v36, %s7167_s0  ;;  %v2803_v36 = vld [vmem:[#allocation8 + $0x768] sm:$0xff]  ;;  %s7170_s0 = smov 72  }
0x19f2   : > { %v8369_v53 = vpop.permute.xlu2 %2753 }
0x19f3   : > { %11918 = vst [vmem:[#allocation186_spill] sm:$0xff] %v8369_v53 }
0x19fa   : > { %v2773_v10 = vpop.permute.xlu2 %2772 }
0x19fb   : > { %v2780_v35 = vmul.f32 0.0, %v2773_v10 }
0x19fd   : > { %2786 = vrot.lane.b32.xlu1 %v2780_v35, %s7168_s18 }
0x1a05   : > { %2806 = vrot.lane.b32.xlu1 %v2802_v13, %s7169_s15 }
0x1a17   : > { %v8376_v53 = vpop.permute.xlu1 %2757 }
0x1a18   : > { %v8371_v56 = vpop.permute.xlu0 %2755  ;;  %11920 = vst [vmem:[#allocation188_spill] sm:$0xff] %v8376_v53 }
0x1a19   : > { %11919 = vst [vmem:[#allocation187_spill] sm:$0xff] %v8371_v56  ;;  %v2837_v56 = vld [vmem:[#allocation8 + $0x770] sm:$0xff] }
0x1a20   : > { %v2775_v49 = vpop.permute.xlu0 %2774 }
0x1a21   : > { %v2776_v21 = vsel %vm2742_vm5, %v2773_v10, %v2775_v49  ;;  %v2782_v46 = vmul.f32 %v2775_v49, %v7539_v32  ;;  %vm2810_vm5 = vcmask 949248  }
0x1a22   : > { %v2781_v50 = vmul.f32 %v2776_v21, %v7492_v2 }
0x1a23   : > { %2790 = vrot.lane.b32.xlu0 %v2782_v46, %s7168_s18 }
0x1a24   : > { %2788 = vrot.lane.b32.xlu2 %v2781_v50, %s7168_s18  ;;  %v2838_v50 = vld [vmem:[#allocation8 + $0x778] sm:$0xff]  ;;  %s11933_s18 = smov 63  }
0x1a2c   : > { %2808 = vrot.lane.b32.xlu2 %v2803_v36, %s7169_s15  ;;  %s11925_s15 = smov 64  }
0x1a6f   : > { %v8378_v22 = vpop.permute.xlu1 %2786 }
0x1a70   : > { %11921 = vst [vmem:[#allocation189_spill] sm:$0xff] %v8378_v22 }
0x1a77   : > { %v2807_v35 = vpop.permute.xlu1 %2806 }
0x1a78   : > { %v2815_v15 = vmul.f32 0.0, %v2807_v35 }
0x1a7a   : > { %2821 = vrot.lane.b32.xlu0 %v2815_v15, %s7170_s0 }
0x1a7e   : > { %v8380_v13 = vpop.permute.xlu2 %2788 }
0x1a7f   : > { %11922 = vst [vmem:[#allocation190_spill] sm:$0xff] %v8380_v13 }
0x1a82   : > { %2841 = vrot.lane.b32.xlu0 %v2837_v56, %s11823_s23 }
0x1a86   : > { %v2809_v10 = vpop.permute.xlu2 %2808 }
0x1a87   : > { %v2811_v49 = vsel %vm2810_vm5, %v2807_v35, %v2809_v10  ;;  %v2817_v21 = vmul.f32 %v2809_v10, %v7539_v32  ;;  %v2870_v35 = vld [vmem:[#allocation8 + $0x370] sm:$0xff]  ;;  %vm11656_vm5 = vcmask 1014784  }
0x1a88   : > { %v2816_v46 = vmul.f32 %v2811_v49, %v7492_v2 }
0x1a89   : > { %2825 = vrot.lane.b32.xlu2 %v2817_v21, %s7170_s0 }
0x1a8a   : > { %2823 = vrot.lane.b32.xlu1 %v2816_v46, %s7170_s0  ;;  %s11937_s0 = smov 96  }
0x1a92   : > { %2843 = vrot.lane.b32.xlu1 %v2838_v50, %s11823_s23  ;;  %v2871_v50 = vld [vmem:[#allocation8 + $0x378] sm:$0xff] }
0x1a95   : > { %v8386_v36 = vpop.permute.xlu0 %2790 }
0x1a96   : > { %11923 = vst [vmem:[#allocation191_spill] sm:$0xff] %v8386_v36 }
0x1aec   : > { %v8388_v15 = vpop.permute.xlu0 %2821 }
0x1aed   : > { %11924 = vst [vmem:[#allocation192_spill] sm:$0xff] %v8388_v15 }
0x1af4   : > { %v2842_v53 = vpop.permute.xlu0 %2841 }
0x1af5   : > { %v2849_v22 = vmul.f32 0.0, %v2842_v53 }
0x1af7   : > { %2855 = vrot.lane.b32.xlu2 %v2849_v22, %s11925_s15  ;;  %v8400_v22 = vpop.permute.xlu2 %2825 }
0x1af8   : > { %11928 = vst [vmem:[#allocation194_spill] sm:$0xff] %v8400_v22  ;;  %v2904_v22 = vld [vmem:[#allocation8 + $0x788] sm:$0xff] }
0x1afc   : > { %v8391_v56 = vpop.permute.xlu1 %2823 }
0x1afd   : > { %11926 = vst [vmem:[#allocation193_spill] sm:$0xff] %v8391_v56 }
0x1aff   : > { %2874 = vrot.lane.b32.xlu2 %v2870_v35, %s11927_s5 }
0x1b04   : > { %v2844_v10 = vpop.permute.xlu1 %2843 }
0x1b05   : > { %v2845_v49 = vsel %vm11656_vm5, %v2842_v53, %v2844_v10  ;;  %v2851_v21 = vmul.f32 %v2844_v10, %v7539_v32  ;;  %v2903_v53 = vld [vmem:[#allocation8 + $0x780] sm:$0xff] }
0x1b06   : > { %v2850_v46 = vmul.f32 %v2845_v49, %v7492_v2 }
0x1b07   : > { %2859 = vrot.lane.b32.xlu1 %v2851_v21, %s11925_s15 }
0x1b08   : > { %2857 = vrot.lane.b32.xlu0 %v2850_v46, %s11925_s15 }
0x1b10   : > { %2876 = vrot.lane.b32.xlu0 %v2871_v50, %s11927_s5 }
0x1b51   : > { %v8402_v36 = vpop.permute.xlu2 %2855 }
0x1b52   : > { %11929 = vst [vmem:[#allocation195_spill] sm:$0xff] %v8402_v36 }
0x1b59   : > { %v2875_v35 = vpop.permute.xlu2 %2874 }
0x1b5a   : > { %v2882_v15 = vmul.f32 0.0, %v2875_v35 }
0x1b5c   : > { %2888 = vrot.lane.b32.xlu1 %v2882_v15, %s11843_s1 }
0x1b64   : > { %2907 = vrot.lane.b32.xlu1 %v2903_v53, %s11927_s5 }
0x1b79   : > { %v8414_v15 = vpop.permute.xlu1 %2859 }
0x1b7a   : > { %v8406_v10 = vpop.permute.xlu0 %2857  ;;  %11931 = vst [vmem:[#allocation197_spill] sm:$0xff] %v8414_v15 }
0x1b7b   : > { %11930 = vst [vmem:[#allocation196_spill] sm:$0xff] %v8406_v10 }
0x1b82   : > { %v2877_v49 = vpop.permute.xlu0 %2876 }
0x1b83   : > { %v2878_v21 = vsel %vm11659_vm11, %v2875_v35, %v2877_v49  ;;  %v2884_v46 = vmul.f32 %v2877_v49, %v7539_v32  ;;  %v2936_v35 = vld [vmem:[#allocation8 + $0x130] sm:$0xff] }
0x1b84   : > { %v2883_v50 = vmul.f32 %v2878_v21, %v7492_v2 }
0x1b85   : > { %2892 = vrot.lane.b32.xlu0 %v2884_v46, %s11843_s1 }
0x1b86   : > { %2890 = vrot.lane.b32.xlu2 %v2883_v50, %s11843_s1  ;;  %v2937_v50 = vld [vmem:[#allocation8 + $0x138] sm:$0xff] }
0x1b8e   : > { %2909 = vrot.lane.b32.xlu2 %v2904_v22, %s11927_s5 }
0x1bce   : > { %v8416_v53 = vpop.permute.xlu1 %2888 }
0x1bcf   : > { %11932 = vst [vmem:[#allocation198_spill] sm:$0xff] %v8416_v53 }
0x1bd6   : > { %v2908_v36 = vpop.permute.xlu1 %2907 }
0x1bd7   : > { %v2915_v10 = vmul.f32 0.0, %v2908_v36 }
0x1bd9   : > { %2921 = vrot.lane.b32.xlu0 %v2915_v10, %s11933_s18 }
0x1be0   : > { %v8419_v56 = vpop.permute.xlu2 %2890 }
0x1be1   : > { %11934 = vst [vmem:[#allocation199_spill] sm:$0xff] %v8419_v56  ;;  %2940 = vrot.lane.b32.xlu0 %v2936_v35, %s11892_s27 }
0x1be8   : > { %v2910_v49 = vpop.permute.xlu2 %2909 }
0x1be9   : > { %v2911_v21 = vsel %vm11659_vm11, %v2908_v36, %v2910_v49  ;;  %v2917_v46 = vmul.f32 %v2910_v49, %v7539_v32  ;;  %v2969_v36 = vld [vmem:[#allocation8 + $0x380] sm:$0xff] }
0x1bea   : > { %v2916_v22 = vmul.f32 %v2911_v21, %v7492_v2 }
0x1beb   : > { %2925 = vrot.lane.b32.xlu2 %v2917_v46, %s11933_s18 }
0x1bec   : > { %2923 = vrot.lane.b32.xlu1 %v2916_v22, %s11933_s18 }
0x1bf4   : > { %2942 = vrot.lane.b32.xlu1 %v2937_v50, %s11892_s27 }
0x1bf7   : > { %v8428_v10 = vpop.permute.xlu0 %2892 }
0x1bf8   : > { %11935 = vst [vmem:[#allocation200_spill] sm:$0xff] %v8428_v10  ;;  %v2970_v10 = vld [vmem:[#allocation8 + $0x388] sm:$0xff] }
0x1c4b   : > { %v8430_v53 = vpop.permute.xlu0 %2921 }
0x1c4c   : > { %11936 = vst [vmem:[#allocation201_spill] sm:$0xff] %v8430_v53 }
0x1c53   : > { %v2941_v56 = vpop.permute.xlu0 %2940 }
0x1c54   : > { %v2948_v35 = vmul.f32 0.0, %v2941_v56 }
0x1c56   : > { %2954 = vrot.lane.b32.xlu2 %v2948_v35, %s11937_s0  ;;  %v8442_v35 = vpop.permute.xlu2 %2925 }
0x1c57   : > { %11939 = vst [vmem:[#allocation203_spill] sm:$0xff] %v8442_v35 }
0x1c5e   : > { %2973 = vrot.lane.b32.xlu2 %v2969_v36, %s11892_s27  ;;  %v8434_v49 = vpop.permute.xlu1 %2923 }
0x1c5f   : > { %11938 = vst [vmem:[#allocation202_spill] sm:$0xff] %v8434_v49 }
0x1c66   : > { %v2943_v21 = vpop.permute.xlu1 %2942 }
0x1c67   : > { %v2944_v46 = vsel %vm11651_vm8, %v2941_v56, %v2943_v21  ;;  %v2950_v22 = vmul.f32 %v2943_v21, %v7539_v32  ;;  %v3002_v56 = vld [vmem:[#allocation8 + $0x790] sm:$0xff] }
0x1c68   : > { %v2949_v50 = vmul.f32 %v2944_v46, %v7492_v2 }
0x1c69   : > { %2958 = vrot.lane.b32.xlu1 %v2950_v22, %s11937_s0 }
0x1c6a   : > { %2956 = vrot.lane.b32.xlu0 %v2949_v50, %s11937_s0 }
0x1c72   : > { %2975 = vrot.lane.b32.xlu0 %v2970_v10, %s11892_s27 }
0x1cb0   : > { %v8444_v36 = vpop.permute.xlu2 %2954 }
0x1cb1   : > { %11940 = vst [vmem:[#allocation204_spill] sm:$0xff] %v8444_v36  ;;  %v3003_v36 = vld [vmem:[#allocation8 + $0x798] sm:$0xff] }
0x1cb8   : > { %v2974_v15 = vpop.permute.xlu2 %2973 }
0x1cb9   : > { %v2981_v53 = vmul.f32 0.0, %v2974_v15 }
0x1cbb   : > { %2987 = vrot.lane.b32.xlu1 %v2981_v53, %s11850_s29 }
0x1cc3   : > { %3006 = vrot.lane.b32.xlu1 %v3002_v56, %s11892_s27 }
0x1cdb   : > { %v8456_v53 = vpop.permute.xlu1 %2958 }
0x1cdc   : > { %v8448_v21 = vpop.permute.xlu0 %2956  ;;  %11942 = vst [vmem:[#allocation206_spill] sm:$0xff] %v8456_v53  ;;  %v3036_v53 = vld [vmem:[#allocation8 + $0x38] sm:$0xff] }
0x1cdd   : > { %11941 = vst [vmem:[#allocation205_spill] sm:$0xff] %v8448_v21 }
0x1ce4   : > { %v2976_v46 = vpop.permute.xlu0 %2975 }
0x1ce5   : > { %v2977_v22 = vsel %vm11651_vm8, %v2974_v15, %v2976_v46  ;;  %v2983_v50 = vmul.f32 %v2976_v46, %v7539_v32  ;;  %v3035_v15 = vld [vmem:[#allocation8 + $0x30] sm:$0xff] }
0x1ce6   : > { %v2982_v10 = vmul.f32 %v2977_v22, %v7492_v2 }
0x1ce7   : > { %2991 = vrot.lane.b32.xlu0 %v2983_v50, %s11850_s29 }
0x1ce8   : > { %2989 = vrot.lane.b32.xlu2 %v2982_v10, %s11850_s29 }
0x1cf0   : > { %3008 = vrot.lane.b32.xlu2 %v3003_v36, %s11892_s27 }
0x1d2d   : > { %v8458_v35 = vpop.permute.xlu1 %2987 }
0x1d2e   : > { %11943 = vst [vmem:[#allocation207_spill] sm:$0xff] %v8458_v35 }
0x1d35   : > { %v3007_v56 = vpop.permute.xlu1 %3006 }
0x1d36   : > { %v3014_v21 = vmul.f32 0.0, %v3007_v56 }
0x1d38   : > { %3020 = vrot.lane.b32.xlu0 %v3014_v21, %s11944_s2 }
0x1d40   : > { %3039 = vrot.lane.b32.xlu0 %v3035_v15, %s11876_s28 }
0x1d42   : > { %v8462_v46 = vpop.permute.xlu2 %2989 }
0x1d43   : > { %11945 = vst [vmem:[#allocation208_spill] sm:$0xff] %v8462_v46 }
0x1d4a   : > { %v3009_v22 = vpop.permute.xlu2 %3008 }
0x1d4b   : > { %v3010_v50 = vsel %vm11651_vm8, %v3007_v56, %v3009_v22  ;;  %v3016_v10 = vmul.f32 %v3009_v22, %v7539_v32  ;;  %v3068_v56 = vld [vmem:[#allocation8 + $0x140] sm:$0xff] }
0x1d4c   : > { %v3015_v36 = vmul.f32 %v3010_v50, %v7492_v2 }
0x1d4d   : > { %3024 = vrot.lane.b32.xlu2 %v3016_v10, %s11944_s2 }
0x1d4e   : > { %3022 = vrot.lane.b32.xlu1 %v3015_v36, %s11944_s2 }
0x1d56   : > { %3041 = vrot.lane.b32.xlu1 %v3036_v53, %s11876_s28 }
0x1d59   : > { %v8470_v21 = vpop.permute.xlu0 %2991 }
0x1d5a   : > { %11946 = vst [vmem:[#allocation209_spill] sm:$0xff] %v8470_v21  ;;  %v3069_v21 = vld [vmem:[#allocation8 + $0x148] sm:$0xff] }
0x1daa   : > { %v8472_v35 = vpop.permute.xlu0 %3020 }
0x1dab   : > { %11947 = vst [vmem:[#allocation210_spill] sm:$0xff] %v8472_v35 }
0x1db2   : > { %v3040_v15 = vpop.permute.xlu0 %3039 }
0x1db3   : > { %v3047_v46 = vmul.f32 0.0, %v3040_v15 }
0x1db5   : > { %3053 = vrot.lane.b32.xlu2 %v3047_v46, %s11948_s7  ;;  %v8484_v46 = vpop.permute.xlu2 %3024 }
0x1db6   : > { %11950 = vst [vmem:[#allocation212_spill] sm:$0xff] %v8484_v46 }
0x1dbd   : > { %3072 = vrot.lane.b32.xlu2 %v3068_v56, %s11876_s28 }
0x1dc0   : > { %v8476_v22 = vpop.permute.xlu1 %3022 }
0x1dc1   : > { %11949 = vst [vmem:[#allocation211_spill] sm:$0xff] %v8476_v22 }
0x1dc8   : > { %v3042_v50 = vpop.permute.xlu1 %3041 }
0x1dc9   : > { %v3043_v10 = vsel %vm11650_vm14, %v3040_v15, %v3042_v50  ;;  %v3049_v36 = vmul.f32 %v3042_v50, %v7539_v32  ;;  %v3101_v15 = vld [vmem:[#allocation8 + $0x390] sm:$0xff] }
0x1dca   : > { %v3048_v53 = vmul.f32 %v3043_v10, %v7492_v2 }
0x1dcb   : > { %3057 = vrot.lane.b32.xlu1 %v3049_v36, %s11948_s7 }
0x1dcc   : > { %3055 = vrot.lane.b32.xlu0 %v3048_v53, %s11948_s7  ;;  %s11959_s7 = smov 61  }
0x1dd4   : > { %3074 = vrot.lane.b32.xlu0 %v3069_v21, %s11876_s28 }
0x1e0f   : > { %v8486_v56 = vpop.permute.xlu2 %3053 }
0x1e10   : > { %11951 = vst [vmem:[#allocation213_spill] sm:$0xff] %v8486_v56  ;;  %v3102_v56 = vld [vmem:[#allocation8 + $0x398] sm:$0xff] }
0x1e17   : > { %v3073_v35 = vpop.permute.xlu2 %3072 }
0x1e18   : > { %v3080_v22 = vmul.f32 0.0, %v3073_v35 }
0x1e1a   : > { %3086 = vrot.lane.b32.xlu1 %v3080_v22, %s11952_s21 }
0x1e22   : > { %3105 = vrot.lane.b32.xlu1 %v3101_v15, %s11876_s28 }
0x1e3d   : > { %v8498_v22 = vpop.permute.xlu1 %3057 }
0x1e3e   : > { %v8490_v50 = vpop.permute.xlu0 %3055  ;;  %11954 = vst [vmem:[#allocation215_spill] sm:$0xff] %v8498_v22  ;;  %v3135_v22 = vld [vmem:[#allocation8 + $0x7a8] sm:$0xff] }
0x1e3f   : > { %11953 = vst [vmem:[#allocation214_spill] sm:$0xff] %v8490_v50 }
0x1e46   : > { %v3075_v10 = vpop.permute.xlu0 %3074 }
0x1e47   : > { %v3076_v36 = vsel %vm11650_vm14, %v3073_v35, %v3075_v10  ;;  %v3082_v53 = vmul.f32 %v3075_v10, %v7539_v32  ;;  %v3134_v35 = vld [vmem:[#allocation8 + $0x7a0] sm:$0xff] }
0x1e48   : > { %v3081_v21 = vmul.f32 %v3076_v36, %v7492_v2 }
0x1e49   : > { %3090 = vrot.lane.b32.xlu0 %v3082_v53, %s11952_s21 }
0x1e4a   : > { %3088 = vrot.lane.b32.xlu2 %v3081_v21, %s11952_s21 }
0x1e52   : > { %3107 = vrot.lane.b32.xlu2 %v3102_v56, %s11876_s28 }
0x1e8c   : > { %v8500_v46 = vpop.permute.xlu1 %3086 }
0x1e8d   : > { %11955 = vst [vmem:[#allocation216_spill] sm:$0xff] %v8500_v46 }
0x1e94   : > { %v3106_v15 = vpop.permute.xlu1 %3105 }
0x1e95   : > { %v3113_v50 = vmul.f32 0.0, %v3106_v15 }
0x1e97   : > { %3119 = vrot.lane.b32.xlu0 %v3113_v50, %s11860_s3 }
0x1e9f   : > { %3138 = vrot.lane.b32.xlu0 %v3134_v35, %s11876_s28 }
0x1ea4   : > { %v8504_v10 = vpop.permute.xlu2 %3088 }
0x1ea5   : > { %11956 = vst [vmem:[#allocation217_spill] sm:$0xff] %v8504_v10 }
0x1eac   : > { %v3108_v36 = vpop.permute.xlu2 %3107 }
0x1ead   : > { %v3109_v53 = vsel %vm11650_vm14, %v3106_v15, %v3108_v36  ;;  %v3115_v21 = vmul.f32 %v3108_v36, %v7539_v32  ;;  %v3167_v15 = vld [vmem:[#allocation8 + $0x40] sm:$0xff] }
0x1eae   : > { %v3114_v56 = vmul.f32 %v3109_v53, %v7492_v2  ;;  %v3169_v36 = vmul.f32 %v3167_v15, %v7492_v2  ;;  %v3186_v53 = vld [vmem:[#allocation8 + $0x158] sm:$0xff]  ;;  %v3185_v15 = vld [vmem:[#allocation8 + $0x150] sm:$0xff] }
0x1eaf   : > { %3123 = vrot.lane.b32.xlu2 %v3115_v21, %s11860_s3 }
0x1eb0   : > { %3121 = vrot.lane.b32.xlu1 %v3114_v56, %s11860_s3  ;;  %v3188_v56 = vmul.f32 %v3186_v53, %v7539_v32  ;;  %v3243_v53 = vld [vmem:[#allocation8 + $0x58] sm:$0xff] }
0x1eb8   : > { %3140 = vrot.lane.b32.xlu1 %v3135_v22, %s11876_s28  ;;  %v3221_v22 = vld [vmem:[#allocation8 + $0x7b0] sm:$0xff] }
0x1ebb   : > { %v8512_v50 = vpop.permute.xlu0 %3090 }
0x1ebc   : > { %11957 = vst [vmem:[#allocation218_spill] sm:$0xff] %v8512_v50 }
0x1f09   : > { %v8514_v46 = vpop.permute.xlu0 %3119 }
0x1f0a   : > { %11958 = vst [vmem:[#allocation219_spill] sm:$0xff] %v8514_v46  ;;  %v3223_v46 = vmul.f32 %v3221_v22, %v7492_v2  ;;  %v3242_v22 = vld [vmem:[#allocation8 + $0x50] sm:$0xff] }
0x1f11   : > { %v3139_v35 = vpop.permute.xlu0 %3138 }
0x1f12   : > { %v3146_v10 = vmul.f32 0.0, %v3139_v35 }
0x1f14   : > { %3152 = vrot.lane.b32.xlu2 %v3146_v10, %s11959_s7 }
0x1f1c   : > { %3173 = vrot.lane.b32.xlu2 %v3169_v36, %s11960_s11  ;;  %v3168_v36 = vld [vmem:[#allocation8 + $0x48] sm:$0xff] }
0x1f22   : > { %v8519_v21 = vpop.permute.xlu1 %3121 }
0x1f23   : > { %11961 = vst [vmem:[#allocation220_spill] sm:$0xff] %v8519_v21  ;;  %v3170_v21 = vmul.f32 %v3168_v36, %v7539_v32 }
0x1f24   : > { %3193 = vrot.lane.b32.xlu2 %v3188_v56, %s11962_s10  ;;  %v3187_v56 = vmul.f32 %v3185_v15, %v7492_v2  ;;  %v8542_v15 = vpop.permute.xlu2 %3123 }
0x1f25   : > { %11964 = vst [vmem:[#allocation221_spill] sm:$0xff] %v8542_v15  ;;  %v3276_v15 = vld [vmem:[#allocation8 + $0x160] sm:$0xff] }
0x1f2a   : > { %v3141_v50 = vpop.permute.xlu1 %3140 }
0x1f2b   : > { %v3142_v49 = vsel %vm11650_vm14, %v3139_v35, %v3141_v50  ;;  %v3148_v10 = vmul.f32 %v3141_v50, %v7539_v32  ;;  %v3222_v35 = vld [vmem:[#allocation8 + $0x7b8] sm:$0xff] }
0x1f2c   : > { %v3147_v13 = vmul.f32 %v3142_v49, %v7492_v2  ;;  %3227 = vrot.lane.b32.xlu2 %v3223_v46, %s11963_s17  ;;  %v3204_v49 = vld [vmem:[#allocation8 + $0x3a8] sm:$0xff]  ;;  %v3203_v46 = vld [vmem:[#allocation8 + $0x3a0] sm:$0xff] }
0x1f2d   : > { %3156 = vrot.lane.b32.xlu1 %v3148_v10, %s11959_s7  ;;  %v3206_v50 = vmul.f32 %v3204_v49, %v7539_v32  ;;  %v3224_v10 = vmul.f32 %v3222_v35, %v7539_v32 }
0x1f2e   : > { %3154 = vrot.lane.b32.xlu0 %v3147_v13, %s11959_s7  ;;  %v3205_v13 = vmul.f32 %v3203_v46, %v7492_v2 }
0x1f34   : > { %3248 = vrot.lane.b32.xlu2 %v3243_v53, %s7171_s12 }
0x1f35   : > { %3191 = vrot.lane.b32.xlu1 %v3187_v56, %s11962_s10 }
0x1f36   : > { %3175 = vrot.lane.b32.xlu0 %v3170_v21, %s11960_s11 }
0x1f3d   : > { %3211 = vrot.lane.b32.xlu1 %v3206_v50, %s11873_s14 }
0x1f3e   : > { %3209 = vrot.lane.b32.xlu0 %v3205_v13, %s11873_s14 }
0x1f45   : > { %3246 = vrot.lane.b32.xlu1 %v3242_v22, %s7171_s12 }
0x1f46   : > { %3229 = vrot.lane.b32.xlu0 %v3224_v10, %s11963_s17 }
0x1f6e   : > { %v8544_v21 = vpop.permute.xlu2 %3152 }
0x1f6f   : > { %11965 = vst [vmem:[#allocation222_spill] sm:$0xff] %v8544_v21 }
0x1f76   : > { %v8546_v36 = vpop.permute.xlu2 %3173 }
0x1f77   : > { %11966 = vst [vmem:[#allocation223_spill] sm:$0xff] %v8546_v36 }
0x1f7e   : > { %v8548_v53 = vpop.permute.xlu2 %3193 }
0x1f7f   : > { %11967 = vst [vmem:[#allocation224_spill] sm:$0xff] %v8548_v53 }
0x1f86   : > { %v8550_v56 = vpop.permute.xlu2 %3227 }
0x1f87   : > { %11968 = vst [vmem:[#allocation225_spill] sm:$0xff] %v8550_v56 }
0x1f8e   : > { %v3249_v49 = vpop.permute.xlu2 %3248 }
0x1f8f   : > { %v3257_v46 = vmul.f32 0.0, %v3249_v49 }
0x1f91   : > { %3265 = vrot.lane.b32.xlu2 %v3257_v46, %s11969_s16  ;;  %v3277_v46 = vld [vmem:[#allocation8 + $0x168] sm:$0xff] }
0x1f9f   : > { %v8553_v50 = vpop.permute.xlu1 %3156 }
0x1fa0   : > { %11970 = vst [vmem:[#allocation226_spill] sm:$0xff] %v8553_v50 }
0x1fa7   : > { %v8555_v13 = vpop.permute.xlu1 %3191 }
0x1fa8   : > { %11971 = vst [vmem:[#allocation227_spill] sm:$0xff] %v8555_v13  ;;  %v8566_v13 = vpop.permute.xlu0 %3154 }
0x1fa9   : > { %11973 = vst [vmem:[#allocation229_spill] sm:$0xff] %v8566_v13 }
0x1faf   : > { %v8557_v35 = vpop.permute.xlu1 %3211 }
0x1fb0   : > { %11972 = vst [vmem:[#allocation228_spill] sm:$0xff] %v8557_v35  ;;  %v8568_v35 = vpop.permute.xlu0 %3175 }
0x1fb1   : > { %11974 = vst [vmem:[#allocation230_spill] sm:$0xff] %v8568_v35  ;;  %v3309_v35 = vld [vmem:[#allocation8 + $0x3b0] sm:$0xff] }
0x1fb7   : > { %v3247_v22 = vpop.permute.xlu1 %3246 }
0x1fb8   : > { %v3251_v10 = vsel %vm3250_vm15, %v3247_v22, %v3249_v49  ;;  %v3255_v36 = vmul.f32 %v3247_v22, %v7492_v2  ;;  %v8570_v50 = vpop.permute.xlu0 %3209 }
0x1fb9   : > { %v3256_v53 = vmul.f32 %v3251_v10, %v7539_v32  ;;  %11975 = vst [vmem:[#allocation231_spill] sm:$0xff] %v8570_v50  ;;  %v3310_v50 = vld [vmem:[#allocation8 + $0x3b8] sm:$0xff] }
0x1fba   : > { %3261 = vrot.lane.b32.xlu0 %v3255_v36, %s11969_s16 }
0x1fbb   : > { %3263 = vrot.lane.b32.xlu1 %v3256_v53, %s11969_s16  ;;  %s11473_s16 = smov 59  }
0x1fc0   : > { %v8572_v49 = vpop.permute.xlu0 %3229 }
0x1fc1   : > { %11976 = vst [vmem:[#allocation232_spill] sm:$0xff] %v8572_v49 }
0x1fc2   : > { %3280 = vrot.lane.b32.xlu0 %v3276_v15, %s7171_s12 }
0x1fc3   : > { %3282 = vrot.lane.b32.xlu1 %v3277_v46, %s7171_s12 }
0x202c   : > { %v8574_v22 = vpop.permute.xlu0 %3261 }
0x202d   : > { %11977 = vst [vmem:[#allocation233_spill] sm:$0xff] %v8574_v22  ;;  %v8576_v10 = vpop.permute.xlu1 %3263  ;;  %v8586_v22 = vpop.permute.xlu2 %3265 }
0x202e   : > { %11978 = vst [vmem:[#allocation234_spill] sm:$0xff] %v8576_v10 }
0x202f   : > { %11979 = vst [vmem:[#allocation235_spill] sm:$0xff] %v8586_v22  ;;  %v3343_v22 = vld [vmem:[#allocation8 + $0x7c8] sm:$0xff] }
0x2034   : > { %v3281_v36 = vpop.permute.xlu0 %3280 }
0x2035   : > { %v3288_v53 = vmul.f32 %v3281_v36, %v7492_v2  ;;  %v3283_v56 = vpop.permute.xlu1 %3282 }
0x2036   : > { %v3284_v15 = vsel %vm3250_vm15, %v3281_v36, %v3283_v56  ;;  %v3290_v21 = vmul.f32 0.0, %v3283_v56 }
0x2037   : > { %v3289_v46 = vmul.f32 %v3284_v15, %v7539_v32  ;;  %3294 = vrot.lane.b32.xlu2 %v3288_v53, %s11884_s20  ;;  %v3342_v53 = vld [vmem:[#allocation8 + $0x7c0] sm:$0xff] }
0x2038   : > { %3298 = vrot.lane.b32.xlu1 %v3290_v21, %s11884_s20 }
0x2039   : > { %3296 = vrot.lane.b32.xlu0 %v3289_v46, %s11884_s20  ;;  %s11990_s20 = smov 75  }
0x203f   : > { %3313 = vrot.lane.b32.xlu2 %v3309_v35, %s7171_s12 }
0x2041   : > { %3315 = vrot.lane.b32.xlu0 %v3310_v50, %s7171_s12 }
0x2091   : > { %v8588_v10 = vpop.permute.xlu2 %3294 }
0x2092   : > { %11980 = vst [vmem:[#allocation236_spill] sm:$0xff] %v8588_v10 }
0x2099   : > { %v3314_v36 = vpop.permute.xlu2 %3313 }
0x209a   : > { %v3321_v56 = vmul.f32 %v3314_v36, %v7492_v2 }
0x209c   : > { %3327 = vrot.lane.b32.xlu1 %v3321_v56, %s11887_s25 }
0x20a4   : > { %3346 = vrot.lane.b32.xlu1 %v3342_v53, %s7171_s12 }
0x20aa   : > { %v8600_v10 = vpop.permute.xlu1 %3298 }
0x20ab   : > { %v8593_v21 = vpop.permute.xlu0 %3296  ;;  %11982 = vst [vmem:[#allocation238_spill] sm:$0xff] %v8600_v10 }
0x20ac   : > { %11981 = vst [vmem:[#allocation237_spill] sm:$0xff] %v8593_v21 }
0x20b3   : > { %v3316_v15 = vpop.permute.xlu0 %3315 }
0x20b4   : > { %v3317_v46 = vsel %vm3250_vm15, %v3314_v36, %v3316_v15  ;;  %v3323_v35 = vmul.f32 0.0, %v3316_v15 }
0x20b5   : > { %v3322_v50 = vmul.f32 %v3317_v46, %v7539_v32 }
0x20b6   : > { %3331 = vrot.lane.b32.xlu0 %v3323_v35, %s11887_s25 }
0x20b7   : > { %3329 = vrot.lane.b32.xlu2 %v3322_v50, %s11887_s25  ;;  %v3377_v50 = vld [vmem:[#allocation8 + $0x178] sm:$0xff] }
0x20bf   : > { %3348 = vrot.lane.b32.xlu2 %v3343_v22, %s7171_s12  ;;  %v3376_v22 = vld [vmem:[#allocation8 + $0x170] sm:$0xff]  ;;  %s7173_s12 = smov 2  }
0x210e   : > { %v8602_v56 = vpop.permute.xlu1 %3327 }
0x210f   : > { %11983 = vst [vmem:[#allocation239_spill] sm:$0xff] %v8602_v56 }
0x2111   : > { %v8604_v53 = vpop.permute.xlu2 %3329 }
0x2112   : > { %11984 = vst [vmem:[#allocation240_spill] sm:$0xff] %v8604_v53 }
0x2116   : > { %v3347_v21 = vpop.permute.xlu1 %3346 }
0x2117   : > { %v3354_v49 = vmul.f32 %v3347_v21, %v7492_v2 }
0x2119   : > { %3360 = vrot.lane.b32.xlu0 %v3354_v49, %s11473_s16  ;;  %v3349_v36 = vpop.permute.xlu2 %3348 }
0x211a   : > { %v3350_v15 = vsel %vm3250_vm15, %v3347_v21, %v3349_v36  ;;  %v3356_v46 = vmul.f32 0.0, %v3349_v36  ;;  %vm11468_vm15 = vcmask 15360  }
0x211b   : > { %v3355_v35 = vmul.f32 %v3350_v15, %v7539_v32 }
0x211c   : > { %3364 = vrot.lane.b32.xlu2 %v3356_v46, %s11473_s16 }
0x211d   : > { %3362 = vrot.lane.b32.xlu1 %v3355_v35, %s11473_s16  ;;  %s7177_s16 = smov 4  }
0x2121   : > { %3380 = vrot.lane.b32.xlu0 %v3376_v22, %s7173_s12 }
0x2125   : > { %3382 = vrot.lane.b32.xlu1 %v3377_v50, %s7173_s12  ;;  %v3410_v50 = vld [vmem:[#allocation8 + $0x3c0] sm:$0xff] }
0x2128   : > { %v8614_v10 = vpop.permute.xlu0 %3331 }
0x2129   : > { %11985 = vst [vmem:[#allocation241_spill] sm:$0xff] %v8614_v10  ;;  %v3411_v10 = vld [vmem:[#allocation8 + $0x3c8] sm:$0xff] }
0x2176   : > { %v8628_v56 = vpop.permute.xlu2 %3364 }
0x2177   : > { %11988 = vst [vmem:[#allocation244_spill] sm:$0xff] %v8628_v56 }
0x218b   : > { %v8616_v49 = vpop.permute.xlu0 %3360 }
0x218c   : > { %11986 = vst [vmem:[#allocation242_spill] sm:$0xff] %v8616_v49 }
0x218f   : > { %v8618_v53 = vpop.permute.xlu1 %3362 }
0x2190   : > { %11987 = vst [vmem:[#allocation243_spill] sm:$0xff] %v8618_v53 }
0x2193   : > { %v3381_v21 = vpop.permute.xlu0 %3380 }
0x2194   : > { %v3389_v36 = vmul.f32 %v3381_v21, %v7492_v2 }
0x2196   : > { %3395 = vrot.lane.b32.xlu2 %v3389_v36, %s11898_s24 }
0x2197   : > { %v3383_v15 = vpop.permute.xlu1 %3382 }
0x2198   : > { %v3385_v46 = vsel %vm11468_vm15, %v3381_v21, %v3383_v15  ;;  %v3391_v35 = vmul.f32 0.0, %v3383_v15  ;;  %v3443_v15 = vld [vmem:[#allocation8 + $0x7d0] sm:$0xff] }
0x2199   : > { %v3390_v22 = vmul.f32 %v3385_v46, %v7539_v32 }
0x219a   : > { %3399 = vrot.lane.b32.xlu1 %v3391_v35, %s11898_s24 }
0x219b   : > { %3397 = vrot.lane.b32.xlu0 %v3390_v22, %s11898_s24  ;;  %s11471_s24 = smov 58  }
0x219e   : > { %3414 = vrot.lane.b32.xlu2 %v3410_v50, %s7173_s12 }
0x21a3   : > { %3416 = vrot.lane.b32.xlu0 %v3411_v10, %s7173_s12 }
0x21f0   : > { %v8630_v53 = vpop.permute.xlu2 %3395 }
0x21f1   : > { %11989 = vst [vmem:[#allocation245_spill] sm:$0xff] %v8630_v53  ;;  %v3444_v53 = vld [vmem:[#allocation8 + $0x7d8] sm:$0xff] }
0x21f8   : > { %v3415_v36 = vpop.permute.xlu2 %3414 }
0x21f9   : > { %v3422_v21 = vmul.f32 %v3415_v36, %v7492_v2 }
0x21fb   : > { %3428 = vrot.lane.b32.xlu1 %v3422_v21, %s11990_s20 }
0x2203   : > { %3447 = vrot.lane.b32.xlu1 %v3443_v15, %s7173_s12 }
0x220c   : > { %v8642_v56 = vpop.permute.xlu1 %3399 }
0x220d   : > { %v8635_v46 = vpop.permute.xlu0 %3397  ;;  %11992 = vst [vmem:[#allocation247_spill] sm:$0xff] %v8642_v56 }
0x220e   : > { %11991 = vst [vmem:[#allocation246_spill] sm:$0xff] %v8635_v46 }
0x2215   : > { %v3417_v35 = vpop.permute.xlu0 %3416 }
0x2216   : > { %v3418_v22 = vsel %vm11468_vm15, %v3415_v36, %v3417_v35  ;;  %v3424_v50 = vmul.f32 0.0, %v3417_v35 }
0x2217   : > { %v3423_v10 = vmul.f32 %v3418_v22, %v7539_v32 }
0x2218   : > { %3432 = vrot.lane.b32.xlu0 %v3424_v50, %s11990_s20 }
0x2219   : > { %3430 = vrot.lane.b32.xlu2 %v3423_v10, %s11990_s20  ;;  %v3477_v10 = vld [vmem:[#allocation8 + $0x3d0] sm:$0xff]  ;;  %s11998_s20 = smov 74  }
0x2221   : > { %3449 = vrot.lane.b32.xlu2 %v3444_v53, %s7173_s12  ;;  %s7175_s12 = smov 3   ;;  %v3478_v53 = vld [vmem:[#allocation8 + $0x3d8] sm:$0xff] }
0x226d   : > { %v8644_v21 = vpop.permute.xlu1 %3428 }
0x226e   : > { %11993 = vst [vmem:[#allocation248_spill] sm:$0xff] %v8644_v21 }
0x2273   : > { %v8646_v15 = vpop.permute.xlu2 %3430 }
0x2274   : > { %11994 = vst [vmem:[#allocation249_spill] sm:$0xff] %v8646_v15 }
0x2275   : > { %v3448_v46 = vpop.permute.xlu1 %3447 }
0x2276   : > { %v3455_v49 = vmul.f32 %v3448_v46, %v7492_v2 }
0x2278   : > { %3461 = vrot.lane.b32.xlu0 %v3455_v49, %s11471_s24 }
0x227b   : > { %v3450_v36 = vpop.permute.xlu2 %3449 }
0x227c   : > { %v3451_v35 = vsel %vm11468_vm15, %v3448_v46, %v3450_v36  ;;  %v3457_v22 = vmul.f32 0.0, %v3450_v36  ;;  %vm3485_vm15 = vcmask 23552  }
0x227d   : > { %v3456_v50 = vmul.f32 %v3451_v35, %v7539_v32 }
0x227e   : > { %3465 = vrot.lane.b32.xlu2 %v3457_v22, %s11471_s24 }
0x227f   : > { %3463 = vrot.lane.b32.xlu1 %v3456_v50, %s11471_s24  ;;  %v3511_v50 = vld [vmem:[#allocation8 + $0x7e0] sm:$0xff]  ;;  %s7176_s24 = smov 57  }
0x2280   : > { %3481 = vrot.lane.b32.xlu0 %v3477_v10, %s7175_s12 }
0x2287   : > { %3483 = vrot.lane.b32.xlu1 %v3478_v53, %s7175_s12  ;;  %v3512_v53 = vld [vmem:[#allocation8 + $0x7e8] sm:$0xff] }
0x228a   : > { %v8654_v56 = vpop.permute.xlu0 %3432 }
0x228b   : > { %11995 = vst [vmem:[#allocation250_spill] sm:$0xff] %v8654_v56 }
0x22d8   : > { %v8666_v56 = vpop.permute.xlu2 %3465 }
0x22d9   : > { %11999 = vst [vmem:[#allocation253_spill] sm:$0xff] %v8666_v56 }
0x22ea   : > { %v8656_v15 = vpop.permute.xlu0 %3461 }
0x22eb   : > { %11996 = vst [vmem:[#allocation251_spill] sm:$0xff] %v8656_v15 }
0x22f1   : > { %v8658_v49 = vpop.permute.xlu1 %3463 }
0x22f2   : > { %11997 = vst [vmem:[#allocation252_spill] sm:$0xff] %v8658_v49  ;;  %v3482_v21 = vpop.permute.xlu0 %3481 }
0x22f3   : > { %v3490_v46 = vmul.f32 %v3482_v21, %v7492_v2 }
0x22f5   : > { %3496 = vrot.lane.b32.xlu2 %v3490_v46, %s11998_s20 }
0x22f9   : > { %v3484_v36 = vpop.permute.xlu1 %3483 }
0x22fa   : > { %v3486_v35 = vsel %vm3485_vm15, %v3482_v21, %v3484_v36  ;;  %v3492_v22 = vmul.f32 0.0, %v3484_v36  ;;  %v3545_v21 = vld [vmem:[#allocation8 + $0x7f0] sm:$0xff] }
0x22fb   : > { %v3491_v10 = vmul.f32 %v3486_v35, %v7539_v32 }
0x22fc   : > { %3500 = vrot.lane.b32.xlu1 %v3492_v22, %s11998_s20 }
0x22fd   : > { %3515 = vrot.lane.b32.xlu2 %v3511_v50, %s7175_s12  ;;  %3498 = vrot.lane.b32.xlu0 %v3491_v10, %s11998_s20  ;;  %s11492_s20 = smov 13  }
0x2305   : > { %3517 = vrot.lane.b32.xlu0 %v3512_v53, %s7175_s12  ;;  %v3546_v53 = vld [vmem:[#allocation8 + $0x7f8] sm:$0xff]  ;;  %s7178_s12 = smov 56  }
0x234f   : > { %v8668_v49 = vpop.permute.xlu2 %3496 }
0x2350   : > { %12000 = vst [vmem:[#allocation254_spill] sm:$0xff] %v8668_v49 }
0x2357   : > { %v3516_v46 = vpop.permute.xlu2 %3515 }
0x2358   : > { %v3523_v15 = vmul.f32 %v3516_v46, %v7492_v2 }
0x235a   : > { %3529 = vrot.lane.b32.xlu1 %v3523_v15, %s7176_s24 }
0x2362   : > { %3549 = vrot.lane.b32.xlu1 %v3545_v21, %s7177_s16 }
0x236e   : > { %v8675_v49 = vpop.permute.xlu1 %3500 }
0x236f   : > { %v8671_v36 = vpop.permute.xlu0 %3498  ;;  %12002 = vst [vmem:[#allocation256_spill] sm:$0xff] %v8675_v49 }
0x2370   : > { %12001 = vst [vmem:[#allocation255_spill] sm:$0xff] %v8671_v36 }
0x2377   : > { %v3518_v35 = vpop.permute.xlu0 %3517 }
0x2378   : > { %v3519_v22 = vsel %vm3485_vm15, %v3516_v46, %v3518_v35  ;;  %v3525_v50 = vmul.f32 0.0, %v3518_v35  ;;  %v3580_v46 = vld [vmem:[#allocation8 + $0x800] sm:$0xff]  ;;  %vm11496_vm15 = vcmask 105472  }
0x2379   : > { %v3524_v10 = vmul.f32 %v3519_v22, %v7539_v32 }
0x237a   : > { %3533 = vrot.lane.b32.xlu0 %v3525_v50, %s7176_s24 }
0x237b   : > { %3531 = vrot.lane.b32.xlu2 %v3524_v10, %s7176_s24  ;;  %s11483_s24 = smov 12   ;;  %v3581_v10 = vld [vmem:[#allocation8 + $0x808] sm:$0xff] }
0x2383   : > { %3551 = vrot.lane.b32.xlu2 %v3546_v53, %s7177_s16  ;;  %s11598_s16 = smov 48  }
0x23cc   : > { %v8677_v56 = vpop.permute.xlu1 %3529 }
0x23cd   : > { %12003 = vst [vmem:[#allocation257_spill] sm:$0xff] %v8677_v56 }
0x23d4   : > { %v3550_v15 = vpop.permute.xlu1 %3549 }
0x23d5   : > { %v3558_v13 = vmul.f32 %v3550_v15, %v7492_v2  ;;  %v8680_v21 = vpop.permute.xlu2 %3531 }
0x23d6   : > { %12004 = vst [vmem:[#allocation258_spill] sm:$0xff] %v8680_v21 }
0x23d7   : > { %3564 = vrot.lane.b32.xlu0 %v3558_v13, %s7178_s12 }
0x23dd   : > { %v3552_v35 = vpop.permute.xlu2 %3551 }
0x23de   : > { %v3554_v36 = vsel %vm3553_vm1, %v3550_v15, %v3552_v35  ;;  %v3560_v22 = vmul.f32 0.0, %v3552_v35  ;;  %vm11487_vm1 = vcmask 97280  }
0x23df   : > { %v3559_v50 = vmul.f32 %v3554_v36, %v7539_v32  ;;  %3584 = vrot.lane.b32.xlu0 %v3580_v46, %s11483_s24  ;;  %v3615_v36 = vld [vmem:[#allocation8 + $0x3e0] sm:$0xff] }
0x23e0   : > { %3568 = vrot.lane.b32.xlu2 %v3560_v22, %s7178_s12 }
0x23e1   : > { %3566 = vrot.lane.b32.xlu1 %v3559_v50, %s7178_s12  ;;  %v3616_v50 = vld [vmem:[#allocation8 + $0x3e8] sm:$0xff]  ;;  %s11568_s12 = smov 47  }
0x23e9   : > { %3586 = vrot.lane.b32.xlu1 %v3581_v10, %s11483_s24  ;;  %s11521_s24 = smov 14  }
0x23ec   : > { %v8685_v53 = vpop.permute.xlu0 %3533 }
0x23ed   : > { %12005 = vst [vmem:[#allocation259_spill] sm:$0xff] %v8685_v53 }
0x243a   : > { %v8699_v10 = vpop.permute.xlu2 %3568 }
0x243b   : > { %12008 = vst [vmem:[#allocation262_spill] sm:$0xff] %v8699_v10  ;;  %v3650_v10 = vld [vmem:[#allocation8 + $0x818] sm:$0xff] }
0x2449   : > { %v8687_v49 = vpop.permute.xlu0 %3564 }
0x244a   : > { %12006 = vst [vmem:[#allocation260_spill] sm:$0xff] %v8687_v49 }
0x2451   : > { %v3585_v13 = vpop.permute.xlu0 %3584 }
0x2452   : > { %v3593_v21 = vmul.f32 %v3585_v13, %v7492_v2 }
0x2453   : > { %v8690_v56 = vpop.permute.xlu1 %3566 }
0x2454   : > { %12007 = vst [vmem:[#allocation261_spill] sm:$0xff] %v8690_v56  ;;  %3599 = vrot.lane.b32.xlu2 %v3593_v21, %s11598_s16 }
0x245b   : > { %v3587_v15 = vpop.permute.xlu1 %3586 }
0x245c   : > { %v3589_v46 = vsel %vm11487_vm1, %v3585_v13, %v3587_v15  ;;  %v3595_v35 = vmul.f32 0.0, %v3587_v15  ;;  %3619 = vrot.lane.b32.xlu2 %v3615_v36, %s11492_s20  ;;  %v3649_v15 = vld [vmem:[#allocation8 + $0x810] sm:$0xff]  ;;  %vm11505_vm1 = vcmask 113664  }
0x245d   : > { %v3594_v22 = vmul.f32 %v3589_v46, %v7539_v32 }
0x245e   : > { %3603 = vrot.lane.b32.xlu1 %v3595_v35, %s11598_s16 }
0x245f   : > { %3601 = vrot.lane.b32.xlu0 %v3594_v22, %s11598_s16 }
0x2467   : > { %3621 = vrot.lane.b32.xlu0 %v3616_v50, %s11492_s20 }
0x24ae   : > { %v8701_v21 = vpop.permute.xlu2 %3599 }
0x24af   : > { %12009 = vst [vmem:[#allocation263_spill] sm:$0xff] %v8701_v21 }
0x24b6   : > { %v3620_v56 = vpop.permute.xlu2 %3619 }
0x24b7   : > { %v3628_v13 = vmul.f32 %v3620_v56, %v7492_v2 }
0x24b9   : > { %3634 = vrot.lane.b32.xlu1 %v3628_v13, %s11925_s15 }
0x24c1   : > { %3653 = vrot.lane.b32.xlu1 %v3649_v15, %s11492_s20 }
0x24d0   : > { %v8713_v13 = vpop.permute.xlu1 %3603 }
0x24d1   : > { %v8706_v36 = vpop.permute.xlu0 %3601  ;;  %12011 = vst [vmem:[#allocation265_spill] sm:$0xff] %v8713_v13 }
0x24d2   : > { %12010 = vst [vmem:[#allocation264_spill] sm:$0xff] %v8706_v36 }
0x24d9   : > { %v3622_v46 = vpop.permute.xlu0 %3621 }
0x24da   : > { %v3624_v35 = vsel %vm11496_vm15, %v3620_v56, %v3622_v46  ;;  %v3630_v22 = vmul.f32 0.0, %v3622_v46  ;;  %v3683_v46 = vld [vmem:[#allocation8 + $0x180] sm:$0xff] }
0x24db   : > { %v3629_v50 = vmul.f32 %v3624_v35, %v7539_v32 }
0x24dc   : > { %3638 = vrot.lane.b32.xlu0 %v3630_v22, %s11925_s15 }
0x24dd   : > { %3636 = vrot.lane.b32.xlu2 %v3629_v50, %s11925_s15 }
0x24e5   : > { %3655 = vrot.lane.b32.xlu2 %v3650_v10, %s11492_s20  ;;  %s11523_s20 = smov 15  }
0x252b   : > { %v8715_v53 = vpop.permute.xlu1 %3634 }
0x252c   : > { %12012 = vst [vmem:[#allocation266_spill] sm:$0xff] %v8715_v53  ;;  %v3684_v53 = vld [vmem:[#allocation8 + $0x188] sm:$0xff] }
0x2533   : > { %v3654_v15 = vpop.permute.xlu1 %3653 }
0x2534   : > { %v3661_v36 = vmul.f32 %v3654_v15, %v7492_v2 }
0x2536   : > { %3667 = vrot.lane.b32.xlu0 %v3661_v36, %s11568_s12 }
0x2537   : > { %v8719_v56 = vpop.permute.xlu2 %3636 }
0x2538   : > { %12013 = vst [vmem:[#allocation267_spill] sm:$0xff] %v8719_v56 }
0x253e   : > { %3687 = vrot.lane.b32.xlu0 %v3683_v46, %s11521_s24 }
0x253f   : > { %v3656_v35 = vpop.permute.xlu2 %3655 }
0x2540   : > { %v3657_v22 = vsel %vm11496_vm15, %v3654_v15, %v3656_v35  ;;  %v3663_v10 = vmul.f32 0.0, %v3656_v35  ;;  %v3717_v35 = vld [vmem:[#allocation8 + $0x3f0] sm:$0xff]  ;;  %vm11514_vm15 = vcmask 121856  }
0x2541   : > { %v3662_v50 = vmul.f32 %v3657_v22, %v7539_v32 }
0x2542   : > { %3671 = vrot.lane.b32.xlu2 %v3663_v10, %s11568_s12 }
0x2543   : > { %3669 = vrot.lane.b32.xlu1 %v3662_v50, %s11568_s12 }
0x254b   : > { %3689 = vrot.lane.b32.xlu1 %v3684_v53, %s11521_s24 }
0x254e   : > { %v8727_v36 = vpop.permute.xlu0 %3638 }
0x254f   : > { %12014 = vst [vmem:[#allocation268_spill] sm:$0xff] %v8727_v36  ;;  %v3718_v36 = vld [vmem:[#allocation8 + $0x3f8] sm:$0xff] }
0x25a8   : > { %v8729_v56 = vpop.permute.xlu0 %3667 }
0x25a9   : > { %12015 = vst [vmem:[#allocation269_spill] sm:$0xff] %v8729_v56 }
0x25b0   : > { %v3688_v13 = vpop.permute.xlu0 %3687 }
0x25b1   : > { %v3696_v46 = vmul.f32 %v3688_v13, %v7492_v2 }
0x25b3   : > { %3702 = vrot.lane.b32.xlu2 %v3696_v46, %s11843_s1  ;;  %v8741_v46 = vpop.permute.xlu2 %3671 }
0x25b4   : > { %12017 = vst [vmem:[#allocation271_spill] sm:$0xff] %v8741_v46 }
0x25b5   : > { %v8733_v15 = vpop.permute.xlu1 %3669 }
0x25b6   : > { %12016 = vst [vmem:[#allocation270_spill] sm:$0xff] %v8733_v15 }
0x25bb   : > { %3721 = vrot.lane.b32.xlu2 %v3717_v35, %s11521_s24 }
0x25bd   : > { %v3690_v22 = vpop.permute.xlu1 %3689 }
0x25be   : > { %v3692_v10 = vsel %vm11505_vm1, %v3688_v13, %v3690_v22  ;;  %v3698_v50 = vmul.f32 0.0, %v3690_v22  ;;  %v3750_v13 = vld [vmem:[#allocation8 + $0x820] sm:$0xff] }
0x25bf   : > { %v3697_v53 = vmul.f32 %v3692_v10, %v7539_v32 }
0x25c0   : > { %3706 = vrot.lane.b32.xlu1 %v3698_v50, %s11843_s1 }
0x25c1   : > { %3704 = vrot.lane.b32.xlu0 %v3697_v53, %s11843_s1  ;;  %s11596_s1 = smov 46  }
0x25c9   : > { %3723 = vrot.lane.b32.xlu0 %v3718_v36, %s11521_s24 }
0x260d   : > { %v8743_v15 = vpop.permute.xlu2 %3702 }
0x260e   : > { %12018 = vst [vmem:[#allocation272_spill] sm:$0xff] %v8743_v15  ;;  %v3751_v15 = vld [vmem:[#allocation8 + $0x828] sm:$0xff] }
0x2615   : > { %v3722_v56 = vpop.permute.xlu2 %3721 }
0x2616   : > { %v3729_v35 = vmul.f32 %v3722_v56, %v7492_v2 }
0x2618   : > { %3735 = vrot.lane.b32.xlu1 %v3729_v35, %s11933_s18 }
0x2620   : > { %3754 = vrot.lane.b32.xlu1 %v3750_v13, %s11521_s24 }
0x2632   : > { %v8755_v46 = vpop.permute.xlu1 %3706 }
0x2633   : > { %v8748_v22 = vpop.permute.xlu0 %3704  ;;  %12020 = vst [vmem:[#allocation274_spill] sm:$0xff] %v8755_v46  ;;  %v3785_v46 = vld [vmem:[#allocation8 + $0x68] sm:$0xff] }
0x2634   : > { %12019 = vst [vmem:[#allocation273_spill] sm:$0xff] %v8748_v22 }
0x263b   : > { %v3724_v10 = vpop.permute.xlu0 %3723 }
0x263c   : > { %v3725_v50 = vsel %vm11505_vm1, %v3722_v56, %v3724_v10  ;;  %v3731_v53 = vmul.f32 0.0, %v3724_v10  ;;  %v3784_v10 = vld [vmem:[#allocation8 + $0x60] sm:$0xff] }
0x263d   : > { %v3730_v36 = vmul.f32 %v3725_v50, %v7539_v32 }
0x263e   : > { %3739 = vrot.lane.b32.xlu0 %v3731_v53, %s11933_s18 }
0x263f   : > { %3737 = vrot.lane.b32.xlu2 %v3730_v36, %s11933_s18 }
0x2647   : > { %3756 = vrot.lane.b32.xlu2 %v3751_v15, %s11521_s24  ;;  %s11534_s24 = smov 43  }
0x268a   : > { %v8757_v35 = vpop.permute.xlu1 %3735 }
0x268b   : > { %12021 = vst [vmem:[#allocation275_spill] sm:$0xff] %v8757_v35 }
0x2692   : > { %v3755_v13 = vpop.permute.xlu1 %3754 }
0x2693   : > { %v3762_v22 = vmul.f32 %v3755_v13, %v7492_v2 }
0x2695   : > { %3768 = vrot.lane.b32.xlu0 %v3762_v22, %s11596_s1 }
0x2699   : > { %v8761_v56 = vpop.permute.xlu2 %3737 }
0x269a   : > { %12022 = vst [vmem:[#allocation276_spill] sm:$0xff] %v8761_v56 }
0x269d   : > { %3788 = vrot.lane.b32.xlu0 %v3784_v10, %s11523_s20 }
0x26a1   : > { %v3757_v50 = vpop.permute.xlu2 %3756 }
0x26a2   : > { %v3758_v53 = vsel %vm11505_vm1, %v3755_v13, %v3757_v50  ;;  %v3764_v15 = vmul.f32 0.0, %v3757_v50  ;;  %v3818_v50 = vld [vmem:[#allocation8 + $0x190] sm:$0xff]  ;;  %vm11548_vm1 = vcmask 130048  }
0x26a3   : > { %v3763_v36 = vmul.f32 %v3758_v53, %v7539_v32 }
0x26a4   : > { %3772 = vrot.lane.b32.xlu2 %v3764_v15, %s11596_s1 }
0x26a5   : > { %3770 = vrot.lane.b32.xlu1 %v3763_v36, %s11596_s1 }
0x26ad   : > { %3790 = vrot.lane.b32.xlu1 %v3785_v46, %s11523_s20 }
0x26b0   : > { %v8769_v22 = vpop.permute.xlu0 %3739 }
0x26b1   : > { %12023 = vst [vmem:[#allocation277_spill] sm:$0xff] %v8769_v22  ;;  %v3819_v22 = vld [vmem:[#allocation8 + $0x198] sm:$0xff] }
0x2707   : > { %v8771_v56 = vpop.permute.xlu0 %3768 }
0x2708   : > { %12024 = vst [vmem:[#allocation278_spill] sm:$0xff] %v8771_v56 }
0x270f   : > { %v3789_v35 = vpop.permute.xlu0 %3788 }
0x2710   : > { %v3797_v10 = vmul.f32 %v3789_v35, %v7492_v2 }
0x2712   : > { %3803 = vrot.lane.b32.xlu2 %v3797_v10, %s11937_s0  ;;  %v8783_v10 = vpop.permute.xlu2 %3772 }
0x2713   : > { %12026 = vst [vmem:[#allocation280_spill] sm:$0xff] %v8783_v10 }
0x2717   : > { %v8775_v13 = vpop.permute.xlu1 %3770 }
0x2718   : > { %12025 = vst [vmem:[#allocation279_spill] sm:$0xff] %v8775_v13 }
0x271a   : > { %3822 = vrot.lane.b32.xlu2 %v3818_v50, %s11523_s20 }
0x271f   : > { %v3791_v53 = vpop.permute.xlu1 %3790 }
0x2720   : > { %v3793_v15 = vsel %vm11514_vm15, %v3789_v35, %v3791_v53  ;;  %v3799_v36 = vmul.f32 0.0, %v3791_v53  ;;  %v3851_v35 = vld [vmem:[#allocation8 + $0x400] sm:$0xff] }
0x2721   : > { %v3798_v46 = vmul.f32 %v3793_v15, %v7539_v32 }
0x2722   : > { %3807 = vrot.lane.b32.xlu1 %v3799_v36, %s11937_s0 }
0x2723   : > { %3805 = vrot.lane.b32.xlu0 %v3798_v46, %s11937_s0  ;;  %s11551_s0 = smov 16  }
0x272b   : > { %3824 = vrot.lane.b32.xlu0 %v3819_v22, %s11523_s20 }
0x276c   : > { %v8785_v13 = vpop.permute.xlu2 %3803 }
0x276d   : > { %12027 = vst [vmem:[#allocation281_spill] sm:$0xff] %v8785_v13  ;;  %v3852_v13 = vld [vmem:[#allocation8 + $0x408] sm:$0xff] }
0x2774   : > { %v3823_v56 = vpop.permute.xlu2 %3822 }
0x2775   : > { %v3830_v50 = vmul.f32 %v3823_v56, %v7492_v2 }
0x2777   : > { %3836 = vrot.lane.b32.xlu1 %v3830_v50, %s11850_s29 }
0x277f   : > { %3855 = vrot.lane.b32.xlu1 %v3851_v35, %s11523_s20 }
0x2794   : > { %v8797_v10 = vpop.permute.xlu1 %3807 }
0x2795   : > { %v8790_v53 = vpop.permute.xlu0 %3805  ;;  %12029 = vst [vmem:[#allocation283_spill] sm:$0xff] %v8797_v10  ;;  %v3885_v10 = vld [vmem:[#allocation8 + $0x838] sm:$0xff] }
0x2796   : > { %12028 = vst [vmem:[#allocation282_spill] sm:$0xff] %v8790_v53 }
0x279d   : > { %v3825_v15 = vpop.permute.xlu0 %3824 }
0x279e   : > { %v3826_v36 = vsel %vm11514_vm15, %v3823_v56, %v3825_v15  ;;  %v3832_v46 = vmul.f32 0.0, %v3825_v15  ;;  %v3884_v56 = vld [vmem:[#allocation8 + $0x830] sm:$0xff] }
0x279f   : > { %v3831_v22 = vmul.f32 %v3826_v36, %v7539_v32 }
0x27a0   : > { %3840 = vrot.lane.b32.xlu0 %v3832_v46, %s11850_s29 }
0x27a1   : > { %3838 = vrot.lane.b32.xlu2 %v3831_v22, %s11850_s29  ;;  %s11565_s29 = smov 45  }
0x27a9   : > { %3857 = vrot.lane.b32.xlu2 %v3852_v13, %s11523_s20 }
0x27e9   : > { %v8799_v50 = vpop.permute.xlu1 %3836 }
0x27ea   : > { %12030 = vst [vmem:[#allocation284_spill] sm:$0xff] %v8799_v50 }
0x27f1   : > { %v3856_v35 = vpop.permute.xlu1 %3855 }
0x27f2   : > { %v3863_v53 = vmul.f32 %v3856_v35, %v7492_v2 }
0x27f4   : > { %3869 = vrot.lane.b32.xlu0 %v3863_v53, %s11944_s2 }
0x27fb   : > { %v8803_v15 = vpop.permute.xlu2 %3838 }
0x27fc   : > { %12031 = vst [vmem:[#allocation285_spill] sm:$0xff] %v8803_v15  ;;  %3888 = vrot.lane.b32.xlu0 %v3884_v56, %s11523_s20 }
0x2803   : > { %v3858_v36 = vpop.permute.xlu2 %3857 }
0x2804   : > { %v3859_v46 = vsel %vm11514_vm15, %v3856_v35, %v3858_v36  ;;  %v3865_v22 = vmul.f32 0.0, %v3858_v36  ;;  %v3918_v35 = vld [vmem:[#allocation8 + $0x70] sm:$0xff] }
0x2805   : > { %v3864_v13 = vmul.f32 %v3859_v46, %v7539_v32 }
0x2806   : > { %3873 = vrot.lane.b32.xlu2 %v3865_v22, %s11944_s2 }
0x2807   : > { %3871 = vrot.lane.b32.xlu1 %v3864_v13, %s11944_s2 }
0x280f   : > { %3890 = vrot.lane.b32.xlu1 %v3885_v10, %s11523_s20  ;;  %s7191_s20 = smov 18  }
0x2812   : > { %v8811_v50 = vpop.permute.xlu0 %3840 }
0x2813   : > { %12032 = vst [vmem:[#allocation286_spill] sm:$0xff] %v8811_v50  ;;  %v3919_v50 = vld [vmem:[#allocation8 + $0x78] sm:$0xff] }
0x2866   : > { %v8813_v53 = vpop.permute.xlu0 %3869 }
0x2867   : > { %12033 = vst [vmem:[#allocation287_spill] sm:$0xff] %v8813_v53 }
0x286e   : > { %v3889_v15 = vpop.permute.xlu0 %3888 }
0x286f   : > { %v3896_v56 = vmul.f32 %v3889_v15, %v7492_v2 }
0x2871   : > { %3902 = vrot.lane.b32.xlu2 %v3896_v56, %s11565_s29  ;;  %v8825_v56 = vpop.permute.xlu2 %3873 }
0x2872   : > { %12035 = vst [vmem:[#allocation289_spill] sm:$0xff] %v8825_v56  ;;  %v3953_v56 = vld [vmem:[#allocation8 + $0x1a8] sm:$0xff] }
0x2879   : > { %3922 = vrot.lane.b32.xlu2 %v3918_v35, %s11551_s0  ;;  %v8818_v36 = vpop.permute.xlu1 %3871 }
0x287a   : > { %12034 = vst [vmem:[#allocation288_spill] sm:$0xff] %v8818_v36 }
0x2881   : > { %v3891_v46 = vpop.permute.xlu1 %3890 }
0x2882   : > { %v3892_v22 = vsel %vm11514_vm15, %v3889_v15, %v3891_v46  ;;  %v3898_v10 = vmul.f32 0.0, %v3891_v46  ;;  %v3952_v15 = vld [vmem:[#allocation8 + $0x1a0] sm:$0xff]  ;;  %vm11527_vm15 = vcmask 138240  }
0x2883   : > { %v3897_v13 = vmul.f32 %v3892_v22, %v7539_v32 }
0x2884   : > { %3906 = vrot.lane.b32.xlu1 %v3898_v10, %s11565_s29 }
0x2885   : > { %3904 = vrot.lane.b32.xlu0 %v3897_v13, %s11565_s29 }
0x288d   : > { %3924 = vrot.lane.b32.xlu0 %v3919_v50, %s11551_s0 }
0x28cb   : > { %v8827_v53 = vpop.permute.xlu2 %3902 }
0x28cc   : > { %12036 = vst [vmem:[#allocation290_spill] sm:$0xff] %v8827_v53 }
0x28d3   : > { %v3923_v35 = vpop.permute.xlu2 %3922 }
0x28d4   : > { %v3931_v36 = vmul.f32 %v3923_v35, %v7492_v2 }
0x28d6   : > { %3937 = vrot.lane.b32.xlu1 %v3931_v36, %s11952_s21 }
0x28de   : > { %3956 = vrot.lane.b32.xlu1 %v3952_v15, %s11551_s0 }
0x28f6   : > { %v8839_v36 = vpop.permute.xlu1 %3906 }
0x28f7   : > { %v8832_v46 = vpop.permute.xlu0 %3904  ;;  %12038 = vst [vmem:[#allocation292_spill] sm:$0xff] %v8839_v36 }
0x28f8   : > { %12037 = vst [vmem:[#allocation291_spill] sm:$0xff] %v8832_v46 }
0x28ff   : > { %v3925_v22 = vpop.permute.xlu0 %3924 }
0x2900   : > { %v3927_v10 = vsel %vm11548_vm1, %v3923_v35, %v3925_v22  ;;  %v3933_v13 = vmul.f32 0.0, %v3925_v22  ;;  %v3985_v35 = vld [vmem:[#allocation8 + $0x410] sm:$0xff] }
0x2901   : > { %v3932_v50 = vmul.f32 %v3927_v10, %v7539_v32 }
0x2902   : > { %3941 = vrot.lane.b32.xlu0 %v3933_v13, %s11952_s21 }
0x2903   : > { %3939 = vrot.lane.b32.xlu2 %v3932_v50, %s11952_s21  ;;  %s11575_s21 = smov 44  }
0x290b   : > { %3958 = vrot.lane.b32.xlu2 %v3953_v56, %s11551_s0 }
0x2948   : > { %v8841_v53 = vpop.permute.xlu1 %3937 }
0x2949   : > { %12039 = vst [vmem:[#allocation293_spill] sm:$0xff] %v8841_v53  ;;  %v3986_v53 = vld [vmem:[#allocation8 + $0x418] sm:$0xff] }
0x2950   : > { %v3957_v15 = vpop.permute.xlu1 %3956 }
0x2951   : > { %v3964_v46 = vmul.f32 %v3957_v15, %v7492_v2 }
0x2953   : > { %3970 = vrot.lane.b32.xlu0 %v3964_v46, %s11860_s3 }
0x295b   : > { %3989 = vrot.lane.b32.xlu0 %v3985_v35, %s11551_s0 }
0x295d   : > { %v8846_v22 = vpop.permute.xlu2 %3939 }
0x295e   : > { %12040 = vst [vmem:[#allocation294_spill] sm:$0xff] %v8846_v22 }
0x2965   : > { %v3959_v10 = vpop.permute.xlu2 %3958 }
0x2966   : > { %v3960_v13 = vsel %vm11548_vm1, %v3957_v15, %v3959_v10  ;;  %v3966_v50 = vmul.f32 0.0, %v3959_v10  ;;  %v4018_v15 = vld [vmem:[#allocation8 + $0x840] sm:$0xff] }
0x2967   : > { %v3965_v56 = vmul.f32 %v3960_v13, %v7539_v32 }
0x2968   : > { %3974 = vrot.lane.b32.xlu2 %v3966_v50, %s11860_s3 }
0x2969   : > { %3972 = vrot.lane.b32.xlu1 %v3965_v56, %s11860_s3  ;;  %s11530_s3 = smov 17  }
0x2971   : > { %3991 = vrot.lane.b32.xlu1 %v3986_v53, %s11551_s0 }
0x2974   : > { %v8853_v36 = vpop.permute.xlu0 %3941 }
0x2975   : > { %12041 = vst [vmem:[#allocation295_spill] sm:$0xff] %v8853_v36  ;;  %v4019_v36 = vld [vmem:[#allocation8 + $0x848] sm:$0xff] }
0x29c5   : > { %v8855_v46 = vpop.permute.xlu0 %3970 }
0x29c6   : > { %12042 = vst [vmem:[#allocation296_spill] sm:$0xff] %v8855_v46  ;;  %v8867_v46 = vpop.permute.xlu2 %3974 }
0x29c7   : > { %12044 = vst [vmem:[#allocation298_spill] sm:$0xff] %v8867_v46  ;;  %v4053_v46 = vld [vmem:[#allocation8 + $0x88] sm:$0xff] }
0x29cd   : > { %v3990_v35 = vpop.permute.xlu0 %3989 }
0x29ce   : > { %v3997_v22 = vmul.f32 %v3990_v35, %v7492_v2 }
0x29d0   : > { %4003 = vrot.lane.b32.xlu2 %v3997_v22, %s11959_s7 }
0x29d8   : > { %4022 = vrot.lane.b32.xlu2 %v4018_v15, %s11551_s0 }
0x29db   : > { %v8860_v10 = vpop.permute.xlu1 %3972 }
0x29dc   : > { %12043 = vst [vmem:[#allocation297_spill] sm:$0xff] %v8860_v10 }
0x29e3   : > { %v3992_v13 = vpop.permute.xlu1 %3991 }
0x29e4   : > { %v3993_v50 = vsel %vm11548_vm1, %v3990_v35, %v3992_v13  ;;  %v3999_v56 = vmul.f32 0.0, %v3992_v13  ;;  %v4052_v35 = vld [vmem:[#allocation8 + $0x80] sm:$0xff] }
0x29e5   : > { %v3998_v53 = vmul.f32 %v3993_v50, %v7539_v32 }
0x29e6   : > { %4007 = vrot.lane.b32.xlu1 %v3999_v56, %s11959_s7 }
0x29e7   : > { %4005 = vrot.lane.b32.xlu0 %v3998_v53, %s11959_s7 }
0x29ef   : > { %4024 = vrot.lane.b32.xlu0 %v4019_v36, %s11551_s0  ;;  %s11578_s0 = smov 30  }
0x2a2a   : > { %v8869_v22 = vpop.permute.xlu2 %4003 }
0x2a2b   : > { %12045 = vst [vmem:[#allocation299_spill] sm:$0xff] %v8869_v22 }
0x2a32   : > { %v4023_v15 = vpop.permute.xlu2 %4022 }
0x2a33   : > { %v4030_v10 = vmul.f32 %v4023_v15, %v7492_v2 }
0x2a35   : > { %4036 = vrot.lane.b32.xlu1 %v4030_v10, %s11575_s21 }
0x2a3d   : > { %4056 = vrot.lane.b32.xlu1 %v4052_v35, %s11530_s3 }
0x2a58   : > { %v8881_v10 = vpop.permute.xlu1 %4007 }
0x2a59   : > { %v8874_v13 = vpop.permute.xlu0 %4005  ;;  %12047 = vst [vmem:[#allocation301_spill] sm:$0xff] %v8881_v10  ;;  %v4087_v10 = vld [vmem:[#allocation8 + $0x1b8] sm:$0xff] }
0x2a5a   : > { %12046 = vst [vmem:[#allocation300_spill] sm:$0xff] %v8874_v13 }
0x2a61   : > { %v4025_v50 = vpop.permute.xlu0 %4024 }
0x2a62   : > { %v4026_v56 = vsel %vm11548_vm1, %v4023_v15, %v4025_v50  ;;  %v4032_v36 = vmul.f32 0.0, %v4025_v50  ;;  %v4086_v15 = vld [vmem:[#allocation8 + $0x1b0] sm:$0xff]  ;;  %vm11608_vm1 = vcmask 236544  }
0x2a63   : > { %v4031_v53 = vmul.f32 %v4026_v56, %v7539_v32 }
0x2a64   : > { %4040 = vrot.lane.b32.xlu0 %v4032_v36, %s11575_s21 }
0x2a65   : > { %4038 = vrot.lane.b32.xlu2 %v4031_v53, %s11575_s21 }
0x2a6d   : > { %4058 = vrot.lane.b32.xlu2 %v4053_v46, %s11530_s3 }
0x2aa7   : > { %v8883_v22 = vpop.permute.xlu1 %4036 }
0x2aa8   : > { %12048 = vst [vmem:[#allocation302_spill] sm:$0xff] %v8883_v22 }
0x2aaf   : > { %v4057_v35 = vpop.permute.xlu1 %4056 }
0x2ab0   : > { %v4065_v13 = vmul.f32 %v4057_v35, %v7492_v2 }
0x2ab2   : > { %4071 = vrot.lane.b32.xlu0 %v4065_v13, %s11962_s10 }
0x2aba   : > { %4090 = vrot.lane.b32.xlu0 %v4086_v15, %s11530_s3 }
0x2abf   : > { %v8888_v50 = vpop.permute.xlu2 %4038 }
0x2ac0   : > { %12049 = vst [vmem:[#allocation303_spill] sm:$0xff] %v8888_v50 }
0x2ac7   : > { %v4059_v56 = vpop.permute.xlu2 %4058 }
0x2ac8   : > { %v4061_v36 = vsel %vm11527_vm15, %v4057_v35, %v4059_v56  ;;  %v4067_v53 = vmul.f32 0.0, %v4059_v56  ;;  %v4119_v35 = vld [vmem:[#allocation8 + $0x420] sm:$0xff] }
0x2ac9   : > { %v4066_v46 = vmul.f32 %v4061_v36, %v7539_v32 }
0x2aca   : > { %4075 = vrot.lane.b32.xlu2 %v4067_v53, %s11962_s10 }
0x2acb   : > { %4073 = vrot.lane.b32.xlu1 %v4066_v46, %s11962_s10 }
0x2ad3   : > { %4092 = vrot.lane.b32.xlu1 %v4087_v10, %s11530_s3 }
0x2ad6   : > { %v8895_v13 = vpop.permute.xlu0 %4040 }
0x2ad7   : > { %12050 = vst [vmem:[#allocation304_spill] sm:$0xff] %v8895_v13 }
0x2b24   : > { %v8897_v22 = vpop.permute.xlu0 %4071  ;;  %v8909_v13 = vpop.permute.xlu2 %4075 }
0x2b25   : > { %12051 = vst [vmem:[#allocation305_spill] sm:$0xff] %v8897_v22  ;;  %v4120_v22 = vld [vmem:[#allocation8 + $0x428] sm:$0xff] }
0x2b26   : > { %12053 = vst [vmem:[#allocation307_spill] sm:$0xff] %v8909_v13  ;;  %v4153_v13 = vld [vmem:[#allocation8 + $0x858] sm:$0xff] }
0x2b2c   : > { %v4091_v15 = vpop.permute.xlu0 %4090 }
0x2b2d   : > { %v4098_v50 = vmul.f32 %v4091_v15, %v7492_v2 }
0x2b2f   : > { %4104 = vrot.lane.b32.xlu2 %v4098_v50, %s11873_s14 }
0x2b37   : > { %4123 = vrot.lane.b32.xlu2 %v4119_v35, %s11530_s3 }
0x2b3d   : > { %v8902_v56 = vpop.permute.xlu1 %4073 }
0x2b3e   : > { %12052 = vst [vmem:[#allocation306_spill] sm:$0xff] %v8902_v56 }
0x2b45   : > { %v4093_v36 = vpop.permute.xlu1 %4092 }
0x2b46   : > { %v4094_v53 = vsel %vm11527_vm15, %v4091_v15, %v4093_v36  ;;  %v4100_v46 = vmul.f32 0.0, %v4093_v36  ;;  %v4152_v15 = vld [vmem:[#allocation8 + $0x850] sm:$0xff] }
0x2b47   : > { %v4099_v10 = vmul.f32 %v4094_v53, %v7539_v32 }
0x2b48   : > { %4108 = vrot.lane.b32.xlu1 %v4100_v46, %s11873_s14 }
0x2b49   : > { %4106 = vrot.lane.b32.xlu0 %v4099_v10, %s11873_s14 }
0x2b51   : > { %4125 = vrot.lane.b32.xlu0 %v4120_v22, %s11530_s3 }
0x2b89   : > { %v8911_v50 = vpop.permute.xlu2 %4104 }
0x2b8a   : > { %12054 = vst [vmem:[#allocation308_spill] sm:$0xff] %v8911_v50 }
0x2b91   : > { %v4124_v35 = vpop.permute.xlu2 %4123 }
0x2b92   : > { %v4131_v56 = vmul.f32 %v4124_v35, %v7492_v2 }
0x2b94   : > { %4137 = vrot.lane.b32.xlu1 %v4131_v56, %s11963_s17 }
0x2b9c   : > { %4156 = vrot.lane.b32.xlu1 %v4152_v15, %s11530_s3 }
0x2bba   : > { %v8923_v50 = vpop.permute.xlu1 %4108 }
0x2bbb   : > { %v8916_v36 = vpop.permute.xlu0 %4106  ;;  %12056 = vst [vmem:[#allocation310_spill] sm:$0xff] %v8923_v50  ;;  %v4187_v50 = vld [vmem:[#allocation8 + $0x1c8] sm:$0xff] }
0x2bbc   : > { %12055 = vst [vmem:[#allocation309_spill] sm:$0xff] %v8916_v36 }
0x2bc3   : > { %v4126_v53 = vpop.permute.xlu0 %4125 }
0x2bc4   : > { %v4127_v46 = vsel %vm11527_vm15, %v4124_v35, %v4126_v53  ;;  %v4133_v10 = vmul.f32 0.0, %v4126_v53  ;;  %v4186_v35 = vld [vmem:[#allocation8 + $0x1c0] sm:$0xff] }
0x2bc5   : > { %v4132_v22 = vmul.f32 %v4127_v46, %v7539_v32 }
0x2bc6   : > { %4141 = vrot.lane.b32.xlu0 %v4133_v10, %s11963_s17 }
0x2bc7   : > { %4139 = vrot.lane.b32.xlu2 %v4132_v22, %s11963_s17 }
0x2bcf   : > { %4158 = vrot.lane.b32.xlu2 %v4153_v13, %s11530_s3  ;;  %s12064_s3 = smov 59  }
0x2c06   : > { %v8925_v56 = vpop.permute.xlu1 %4137 }
0x2c07   : > { %12057 = vst [vmem:[#allocation311_spill] sm:$0xff] %v8925_v56 }
0x2c0e   : > { %v4157_v15 = vpop.permute.xlu1 %4156 }
0x2c0f   : > { %v4164_v36 = vmul.f32 %v4157_v15, %v7492_v2 }
0x2c11   : > { %4170 = vrot.lane.b32.xlu0 %v4164_v36, %s11534_s24 }
0x2c19   : > { %4190 = vrot.lane.b32.xlu0 %v4186_v35, %s7191_s20 }
0x2c21   : > { %v8930_v53 = vpop.permute.xlu2 %4139 }
0x2c22   : > { %12058 = vst [vmem:[#allocation312_spill] sm:$0xff] %v8930_v53 }
0x2c29   : > { %v4159_v46 = vpop.permute.xlu2 %4158 }
0x2c2a   : > { %v4160_v10 = vsel %vm11527_vm15, %v4157_v15, %v4159_v46  ;;  %v4166_v13 = vmul.f32 0.0, %v4159_v46  ;;  %v4220_v15 = vld [vmem:[#allocation8 + $0x430] sm:$0xff]  ;;  %vm4194_vm15 = vcmask 146432  }
0x2c2b   : > { %v4165_v22 = vmul.f32 %v4160_v10, %v7539_v32 }
0x2c2c   : > { %4174 = vrot.lane.b32.xlu2 %v4166_v13, %s11534_s24 }
0x2c2d   : > { %4172 = vrot.lane.b32.xlu1 %v4165_v22, %s11534_s24  ;;  %s7193_s24 = smov 19  }
0x2c35   : > { %4192 = vrot.lane.b32.xlu1 %v4187_v50, %s7191_s20 }
0x2c38   : > { %v8937_v36 = vpop.permute.xlu0 %4141 }
0x2c39   : > { %12059 = vst [vmem:[#allocation313_spill] sm:$0xff] %v8937_v36  ;;  %v4221_v36 = vld [vmem:[#allocation8 + $0x438] sm:$0xff] }
0x2c83   : > { %v8939_v56 = vpop.permute.xlu0 %4170 }
0x2c84   : > { %12060 = vst [vmem:[#allocation314_spill] sm:$0xff] %v8939_v56 }
0x2c8b   : > { %v4191_v35 = vpop.permute.xlu0 %4190 }
0x2c8c   : > { %v4199_v53 = vmul.f32 %v4191_v35, %v7492_v2 }
0x2c8e   : > { %4205 = vrot.lane.b32.xlu2 %v4199_v53, %s11887_s25  ;;  %v8951_v53 = vpop.permute.xlu2 %4174 }
0x2c8f   : > { %12062 = vst [vmem:[#allocation316_spill] sm:$0xff] %v8951_v53 }
0x2c96   : > { %4224 = vrot.lane.b32.xlu2 %v4220_v15, %s7191_s20 }
0x2c9f   : > { %v8944_v46 = vpop.permute.xlu1 %4172 }
0x2ca0   : > { %12061 = vst [vmem:[#allocation315_spill] sm:$0xff] %v8944_v46 }
0x2ca7   : > { %v4193_v10 = vpop.permute.xlu1 %4192 }
0x2ca8   : > { %v4195_v13 = vsel %vm4194_vm15, %v4191_v35, %v4193_v10  ;;  %v4201_v22 = vmul.f32 0.0, %v4193_v10  ;;  %v4253_v35 = vld [vmem:[#allocation8 + $0x860] sm:$0xff] }
0x2ca9   : > { %v4200_v50 = vmul.f32 %v4195_v13, %v7539_v32 }
0x2caa   : > { %4209 = vrot.lane.b32.xlu1 %v4201_v22, %s11887_s25 }
0x2cab   : > { %4207 = vrot.lane.b32.xlu0 %v4200_v50, %s11887_s25  ;;  %s11541_s25 = smov 42  }
0x2cb3   : > { %4226 = vrot.lane.b32.xlu0 %v4221_v36, %s7191_s20 }
0x2ce8   : > { %v8953_v56 = vpop.permute.xlu2 %4205 }
0x2ce9   : > { %12063 = vst [vmem:[#allocation317_spill] sm:$0xff] %v8953_v56  ;;  %v4254_v56 = vld [vmem:[#allocation8 + $0x868] sm:$0xff] }
0x2cf0   : > { %v4225_v15 = vpop.permute.xlu2 %4224 }
0x2cf1   : > { %v4232_v46 = vmul.f32 %v4225_v15, %v7492_v2 }
0x2cf3   : > { %4238 = vrot.lane.b32.xlu1 %v4232_v46, %s12064_s3 }
0x2cfb   : > { %4257 = vrot.lane.b32.xlu1 %v4253_v35, %s7191_s20 }
0x2d1c   : > { %v8965_v53 = vpop.permute.xlu1 %4209 }
0x2d1d   : > { %v8958_v10 = vpop.permute.xlu0 %4207  ;;  %12066 = vst [vmem:[#allocation319_spill] sm:$0xff] %v8965_v53  ;;  %v4288_v53 = vld [vmem:[#allocation8 + $0x448] sm:$0xff] }
0x2d1e   : > { %12065 = vst [vmem:[#allocation318_spill] sm:$0xff] %v8958_v10 }
0x2d25   : > { %v4227_v13 = vpop.permute.xlu0 %4226 }
0x2d26   : > { %v4228_v22 = vsel %vm4194_vm15, %v4225_v15, %v4227_v13  ;;  %v4234_v50 = vmul.f32 0.0, %v4227_v13  ;;  %v4287_v15 = vld [vmem:[#allocation8 + $0x440] sm:$0xff] }
0x2d27   : > { %v4233_v36 = vmul.f32 %v4228_v22, %v7539_v32 }
0x2d28   : > { %4242 = vrot.lane.b32.xlu0 %v4234_v50, %s12064_s3 }
0x2d29   : > { %4240 = vrot.lane.b32.xlu2 %v4233_v36, %s12064_s3  ;;  %s7194_s3 = smov 41  }
0x2d31   : > { %4259 = vrot.lane.b32.xlu2 %v4254_v56, %s7191_s20  ;;  %s12071_s20 = smov 58  }
0x2d65   : > { %v8967_v46 = vpop.permute.xlu1 %4238 }
0x2d66   : > { %12067 = vst [vmem:[#allocation320_spill] sm:$0xff] %v8967_v46 }
0x2d6d   : > { %v4258_v35 = vpop.permute.xlu1 %4257 }
0x2d6e   : > { %v4265_v10 = vmul.f32 %v4258_v35, %v7492_v2 }
0x2d70   : > { %4271 = vrot.lane.b32.xlu0 %v4265_v10, %s11541_s25 }
0x2d78   : > { %4291 = vrot.lane.b32.xlu0 %v4287_v15, %s7193_s24 }
0x2d83   : > { %v8971_v13 = vpop.permute.xlu2 %4240 }
0x2d84   : > { %12068 = vst [vmem:[#allocation321_spill] sm:$0xff] %v8971_v13  ;;  %v4321_v13 = vld [vmem:[#allocation8 + $0x870] sm:$0xff] }
0x2d8b   : > { %v4260_v22 = vpop.permute.xlu2 %4259 }
0x2d8c   : > { %v4261_v50 = vsel %vm4194_vm15, %v4258_v35, %v4260_v22  ;;  %v4267_v36 = vmul.f32 0.0, %v4260_v22  ;;  %vm4295_vm15 = vcmask 154624  }
0x2d8d   : > { %v4266_v56 = vmul.f32 %v4261_v50, %v7539_v32 }
0x2d8e   : > { %4275 = vrot.lane.b32.xlu2 %v4267_v36, %s11541_s25 }
0x2d8f   : > { %4273 = vrot.lane.b32.xlu1 %v4266_v56, %s11541_s25  ;;  %v4322_v56 = vld [vmem:[#allocation8 + $0x878] sm:$0xff]  ;;  %s7195_s25 = smov 20  }
0x2d97   : > { %4293 = vrot.lane.b32.xlu1 %v4288_v53, %s7193_s24 }
0x2d9a   : > { %v8977_v46 = vpop.permute.xlu0 %4242 }
0x2d9b   : > { %12069 = vst [vmem:[#allocation322_spill] sm:$0xff] %v8977_v46 }
0x2de2   : > { %v8979_v10 = vpop.permute.xlu0 %4271 }
0x2de3   : > { %12070 = vst [vmem:[#allocation323_spill] sm:$0xff] %v8979_v10  ;;  %v4355_v10 = vld [vmem:[#allocation8 + $0x880] sm:$0xff] }
0x2de8   : > { %v8989_v46 = vpop.permute.xlu2 %4275 }
0x2de9   : > { %12073 = vst [vmem:[#allocation325_spill] sm:$0xff] %v8989_v46 }
0x2dea   : > { %v4292_v21 = vpop.permute.xlu0 %4291 }
0x2deb   : > { %v4300_v15 = vmul.f32 %v4292_v21, %v7492_v2 }
0x2ded   : > { %4306 = vrot.lane.b32.xlu2 %v4300_v15, %s12071_s20 }
0x2df5   : > { %4325 = vrot.lane.b32.xlu2 %v4321_v13, %s7193_s24 }
0x2e01   : > { %v8983_v35 = vpop.permute.xlu1 %4273 }
0x2e02   : > { %12072 = vst [vmem:[#allocation324_spill] sm:$0xff] %v8983_v35 }
0x2e09   : > { %v4294_v22 = vpop.permute.xlu1 %4293 }
0x2e0a   : > { %v4296_v50 = vsel %vm4295_vm15, %v4292_v21, %v4294_v22  ;;  %v4302_v36 = vmul.f32 0.0, %v4294_v22 }
0x2e0b   : > { %v4301_v53 = vmul.f32 %v4296_v50, %v7539_v32 }
0x2e0c   : > { %4310 = vrot.lane.b32.xlu1 %v4302_v36, %s12071_s20 }
0x2e0d   : > { %4308 = vrot.lane.b32.xlu0 %v4301_v53, %s12071_s20  ;;  %s11559_s20 = smov 28  }
0x2e15   : > { %4327 = vrot.lane.b32.xlu0 %v4322_v56, %s7193_s24  ;;  %v4356_v56 = vld [vmem:[#allocation8 + $0x888] sm:$0xff]  ;;  %s7196_s24 = smov 40  }
0x2e47   : > { %v8991_v15 = vpop.permute.xlu2 %4306 }
0x2e48   : > { %12074 = vst [vmem:[#allocation326_spill] sm:$0xff] %v8991_v15 }
0x2e4f   : > { %v4326_v13 = vpop.permute.xlu2 %4325 }
0x2e50   : > { %v4333_v35 = vmul.f32 %v4326_v13, %v7492_v2 }
0x2e52   : > { %4339 = vrot.lane.b32.xlu1 %v4333_v35, %s7194_s3 }
0x2e5a   : > { %4359 = vrot.lane.b32.xlu1 %v4355_v10, %s7195_s25  ;;  %v4390_v10 = vld [vmem:[#allocation8 + $0x890] sm:$0xff] }
0x2e7e   : > { %v8998_v15 = vpop.permute.xlu1 %4310 }
0x2e7f   : > { %v8994_v21 = vpop.permute.xlu0 %4308  ;;  %12076 = vst [vmem:[#allocation328_spill] sm:$0xff] %v8998_v15 }
0x2e80   : > { %12075 = vst [vmem:[#allocation327_spill] sm:$0xff] %v8994_v21 }
0x2e87   : > { %v4328_v22 = vpop.permute.xlu0 %4327 }
0x2e88   : > { %v4329_v50 = vsel %vm4295_vm15, %v4326_v13, %v4328_v22  ;;  %v4335_v36 = vmul.f32 0.0, %v4328_v22  ;;  %vm4363_vm15 = vcmask 162816  }
0x2e89   : > { %v4334_v53 = vmul.f32 %v4329_v50, %v7539_v32 }
0x2e8a   : > { %4343 = vrot.lane.b32.xlu0 %v4335_v36, %s7194_s3 }
0x2e8b   : > { %4341 = vrot.lane.b32.xlu2 %v4334_v53, %s7194_s3  ;;  %s11561_s3 = smov 29  }
0x2e93   : > { %4361 = vrot.lane.b32.xlu2 %v4356_v56, %s7195_s25  ;;  %v4391_v56 = vld [vmem:[#allocation8 + $0x898] sm:$0xff]  ;;  %s11587_s25 = smov 32  }
0x2ec4   : > { %v9000_v46 = vpop.permute.xlu1 %4339 }
0x2ec5   : > { %12077 = vst [vmem:[#allocation329_spill] sm:$0xff] %v9000_v46  ;;  %v5026_v46 = vld [vmem:[#allocation8 + $0x900] sm:$0xff] }
0x2ecc   : > { %v4360_v35 = vpop.permute.xlu1 %4359 }
0x2ecd   : > { %v4368_v49 = vmul.f32 %v4360_v35, %v7492_v2 }
0x2ecf   : > { %4374 = vrot.lane.b32.xlu0 %v4368_v49, %s7196_s24 }
0x2ed7   : > { %4394 = vrot.lane.b32.xlu0 %v4390_v10, %s11559_s20 }
0x2ee5   : > { %v9004_v13 = vpop.permute.xlu2 %4341 }
0x2ee6   : > { %12078 = vst [vmem:[#allocation330_spill] sm:$0xff] %v9004_v13  ;;  %v4424_v13 = vld [vmem:[#allocation8 + $0x450] sm:$0xff] }
0x2eed   : > { %v4362_v22 = vpop.permute.xlu2 %4361 }
0x2eee   : > { %v4364_v50 = vsel %vm4363_vm15, %v4360_v35, %v4362_v22  ;;  %v4370_v36 = vmul.f32 0.0, %v4362_v22  ;;  %vm11555_vm15 = vcmask 228352  }
0x2eef   : > { %v4369_v53 = vmul.f32 %v4364_v50, %v7539_v32 }
0x2ef0   : > { %4378 = vrot.lane.b32.xlu2 %v4370_v36, %s7196_s24 }
0x2ef1   : > { %4376 = vrot.lane.b32.xlu1 %v4369_v53, %s7196_s24  ;;  %s11571_s24 = smov 31  }
0x2ef9   : > { %4396 = vrot.lane.b32.xlu1 %v4391_v56, %s11559_s20  ;;  %v4425_v56 = vld [vmem:[#allocation8 + $0x458] sm:$0xff]  ;;  %s11581_s20 = smov 34  }
0x2efc   : > { %v9008_v15 = vpop.permute.xlu0 %4343 }
0x2efd   : > { %12079 = vst [vmem:[#allocation331_spill] sm:$0xff] %v9008_v15 }
0x2f41   : > { %v9010_v49 = vpop.permute.xlu0 %4374 }
0x2f42   : > { %12080 = vst [vmem:[#allocation332_spill] sm:$0xff] %v9010_v49  ;;  %v5651_v49 = vld [vmem:[#allocation8 + $0x9c8] sm:$0xff] }
0x2f49   : > { %v4395_v21 = vpop.permute.xlu0 %4394 }
0x2f4a   : > { %v4403_v10 = vmul.f32 %v4395_v21, %v7492_v2 }
0x2f4c   : > { %4409 = vrot.lane.b32.xlu2 %v4403_v10, %s11587_s25  ;;  %v9022_v10 = vpop.permute.xlu2 %4378 }
0x2f4d   : > { %12082 = vst [vmem:[#allocation334_spill] sm:$0xff] %v9022_v10  ;;  %v4459_v10 = vld [vmem:[#allocation8 + $0x8a8] sm:$0xff] }
0x2f54   : > { %4428 = vrot.lane.b32.xlu2 %v4424_v13, %s11561_s3 }
0x2f63   : > { %v9015_v35 = vpop.permute.xlu1 %4376 }
0x2f64   : > { %12081 = vst [vmem:[#allocation333_spill] sm:$0xff] %v9015_v35 }
0x2f6b   : > { %v4397_v22 = vpop.permute.xlu1 %4396 }
0x2f6c   : > { %v4399_v50 = vsel %vm11555_vm15, %v4395_v21, %v4397_v22  ;;  %v4405_v36 = vmul.f32 0.0, %v4397_v22  ;;  %v4458_v21 = vld [vmem:[#allocation8 + $0x8a0] sm:$0xff]  ;;  %vm11623_vm15 = vcmask 244736  }
0x2f6d   : > { %v4404_v53 = vmul.f32 %v4399_v50, %v7539_v32 }
0x2f6e   : > { %4413 = vrot.lane.b32.xlu1 %v4405_v36, %s11587_s25 }
0x2f6f   : > { %4411 = vrot.lane.b32.xlu0 %v4404_v53, %s11587_s25 }
0x2f77   : > { %4430 = vrot.lane.b32.xlu0 %v4425_v56, %s11561_s3 }
0x2fa6   : > { %v9024_v15 = vpop.permute.xlu2 %4409 }
0x2fa7   : > { %12083 = vst [vmem:[#allocation335_spill] sm:$0xff] %v9024_v15 }
0x2fae   : > { %v4429_v13 = vpop.permute.xlu2 %4428 }
0x2faf   : > { %v4437_v35 = vmul.f32 %v4429_v13, %v7492_v2 }
0x2fb1   : > { %4443 = vrot.lane.b32.xlu1 %v4437_v35, %s11598_s16 }
0x2fb9   : > { %4462 = vrot.lane.b32.xlu1 %v4458_v21, %s11561_s3 }
0x2fe0   : > { %v9036_v35 = vpop.permute.xlu1 %4413 }
0x2fe1   : > { %v9029_v22 = vpop.permute.xlu0 %4411  ;;  %12085 = vst [vmem:[#allocation337_spill] sm:$0xff] %v9036_v35 }
0x2fe2   : > { %12084 = vst [vmem:[#allocation336_spill] sm:$0xff] %v9029_v22 }
0x2fe9   : > { %v4431_v50 = vpop.permute.xlu0 %4430 }
0x2fea   : > { %v4433_v36 = vsel %vm11608_vm1, %v4429_v13, %v4431_v50  ;;  %v4439_v53 = vmul.f32 0.0, %v4431_v50  ;;  %v4492_v13 = vld [vmem:[#allocation8 + $0x1d0] sm:$0xff] }
0x2feb   : > { %v4438_v56 = vmul.f32 %v4433_v36, %v7539_v32 }
0x2fec   : > { %4447 = vrot.lane.b32.xlu0 %v4439_v53, %s11598_s16 }
0x2fed   : > { %4445 = vrot.lane.b32.xlu2 %v4438_v56, %s11598_s16 }
0x2ff5   : > { %4464 = vrot.lane.b32.xlu2 %v4459_v10, %s11561_s3  ;;  %s11563_s3 = smov 35  }
0x3023   : > { %v9038_v15 = vpop.permute.xlu1 %4443 }
0x3024   : > { %12086 = vst [vmem:[#allocation338_spill] sm:$0xff] %v9038_v15  ;;  %v4493_v15 = vld [vmem:[#allocation8 + $0x1d8] sm:$0xff] }
0x302b   : > { %v4463_v21 = vpop.permute.xlu1 %4462 }
0x302c   : > { %v4470_v22 = vmul.f32 %v4463_v21, %v7492_v2 }
0x302e   : > { %4476 = vrot.lane.b32.xlu0 %v4470_v22, %s11571_s24 }
0x3036   : > { %4496 = vrot.lane.b32.xlu0 %v4492_v13, %s11578_s0 }
0x3047   : > { %v9043_v50 = vpop.permute.xlu2 %4445 }
0x3048   : > { %12087 = vst [vmem:[#allocation339_spill] sm:$0xff] %v9043_v50 }
0x304f   : > { %v4465_v36 = vpop.permute.xlu2 %4464 }
0x3050   : > { %v4466_v53 = vsel %vm11608_vm1, %v4463_v21, %v4465_v36  ;;  %v4472_v10 = vmul.f32 0.0, %v4465_v36  ;;  %v4526_v21 = vld [vmem:[#allocation8 + $0x460] sm:$0xff]  ;;  %vm11642_vm1 = vcmask 252928  }
0x3051   : > { %v4471_v56 = vmul.f32 %v4466_v53, %v7539_v32 }
0x3052   : > { %4480 = vrot.lane.b32.xlu2 %v4472_v10, %s11571_s24 }
0x3053   : > { %4478 = vrot.lane.b32.xlu1 %v4471_v56, %s11571_s24 }
0x305b   : > { %4498 = vrot.lane.b32.xlu1 %v4493_v15, %s11578_s0 }
0x305e   : > { %v9050_v22 = vpop.permute.xlu0 %4447 }
0x305f   : > { %12088 = vst [vmem:[#allocation340_spill] sm:$0xff] %v9050_v22  ;;  %v4527_v22 = vld [vmem:[#allocation8 + $0x468] sm:$0xff] }
0x30a0   : > { %v9052_v35 = vpop.permute.xlu0 %4476 }
0x30a1   : > { %12089 = vst [vmem:[#allocation341_spill] sm:$0xff] %v9052_v35 }
0x30a8   : > { %v4497_v13 = vpop.permute.xlu0 %4496 }
0x30a9   : > { %v4505_v50 = vmul.f32 %v4497_v13, %v7492_v2 }
0x30ab   : > { %4511 = vrot.lane.b32.xlu2 %v4505_v50, %s11925_s15 }
0x30ac   : > { %v9064_v50 = vpop.permute.xlu2 %4480 }
0x30ad   : > { %12091 = vst [vmem:[#allocation343_spill] sm:$0xff] %v9064_v50  ;;  %v4658_v50 = vld [vmem:[#allocation8 + $0x8c0] sm:$0xff] }
0x30b3   : > { %4530 = vrot.lane.b32.xlu2 %v4526_v21, %s11578_s0 }
0x30c5   : > { %v9057_v36 = vpop.permute.xlu1 %4478 }
0x30c6   : > { %12090 = vst [vmem:[#allocation342_spill] sm:$0xff] %v9057_v36 }
0x30cd   : > { %v4499_v53 = vpop.permute.xlu1 %4498 }
0x30ce   : > { %v4501_v10 = vsel %vm11623_vm15, %v4497_v13, %v4499_v53  ;;  %v4507_v56 = vmul.f32 0.0, %v4499_v53  ;;  %v4559_v13 = vld [vmem:[#allocation8 + $0x8b0] sm:$0xff] }
0x30cf   : > { %v4506_v15 = vmul.f32 %v4501_v10, %v7539_v32 }
0x30d0   : > { %4515 = vrot.lane.b32.xlu1 %v4507_v56, %s11925_s15 }
0x30d1   : > { %4513 = vrot.lane.b32.xlu0 %v4506_v15, %s11925_s15 }
0x30d9   : > { %4532 = vrot.lane.b32.xlu0 %v4527_v22, %s11578_s0 }
0x3105   : > { %v9066_v35 = vpop.permute.xlu2 %4511 }
0x3106   : > { %12092 = vst [vmem:[#allocation344_spill] sm:$0xff] %v9066_v35  ;;  %v4560_v35 = vld [vmem:[#allocation8 + $0x8b8] sm:$0xff] }
0x310d   : > { %v4531_v21 = vpop.permute.xlu2 %4530 }
0x310e   : > { %v4538_v36 = vmul.f32 %v4531_v21, %v7492_v2 }
0x3110   : > { %4544 = vrot.lane.b32.xlu1 %v4538_v36, %s11568_s12  ;;  %v4758_v36 = vld [vmem:[#allocation8 + $0x8d8] sm:$0xff] }
0x3118   : > { %4563 = vrot.lane.b32.xlu1 %v4559_v13, %s11578_s0  ;;  %v4958_v13 = vld [vmem:[#allocation8 + $0x8f0] sm:$0xff] }
0x3143   : > { %v9071_v53 = vpop.permute.xlu0 %4513 }
0x3144   : > { %12093 = vst [vmem:[#allocation345_spill] sm:$0xff] %v9071_v53  ;;  %v4626_v53 = vld [vmem:[#allocation8 + $0x478] sm:$0xff] }
0x314b   : > { %v4533_v10 = vpop.permute.xlu0 %4532 }
0x314c   : > { %v4534_v56 = vsel %vm11623_vm15, %v4531_v21, %v4533_v10  ;;  %v4540_v15 = vmul.f32 0.0, %v4533_v10  ;;  %v5027_v21 = vld [vmem:[#allocation8 + $0x908] sm:$0xff]  ;;  %v9082_v10 = vpop.permute.xlu1 %4515 }
0x314d   : > { %v4539_v22 = vmul.f32 %v4534_v56, %v7539_v32  ;;  %12094 = vst [vmem:[#allocation346_spill] sm:$0xff] %v9082_v10  ;;  %v5095_v56 = vld [vmem:[#allocation8 + $0x920] sm:$0xff] }
0x314e   : > { %4548 = vrot.lane.b32.xlu0 %v4540_v15, %s11568_s12  ;;  %v5162_v15 = vld [vmem:[#allocation8 + $0x938] sm:$0xff]  ;;  %v5494_v10 = vld [vmem:[#allocation8 + $0x980] sm:$0xff] }
0x314f   : > { %4546 = vrot.lane.b32.xlu2 %v4539_v22, %s11568_s12 }
0x3157   : > { %4565 = vrot.lane.b32.xlu2 %v4560_v35, %s11578_s0 }
0x315f   : > { %4662 = vrot.lane.b32.xlu2 %v4658_v50, %s11571_s24 }
0x3167   : > { %4763 = vrot.lane.b32.xlu2 %v4758_v36, %s11587_s25  ;;  %v5293_v36 = vld [vmem:[#allocation8 + $0x950] sm:$0xff] }
0x316f   : > { %4962 = vrot.lane.b32.xlu2 %v4958_v13, %s11581_s20  ;;  %v4659_v13 = vld [vmem:[#allocation8 + $0x8c8] sm:$0xff] }
0x3177   : > { %5032 = vrot.lane.b32.xlu2 %v5027_v21, %s11563_s3  ;;  %v5360_v21 = vld [vmem:[#allocation8 + $0x968] sm:$0xff]  ;;  %s11592_s3 = smov 33  }
0x317f   : > { %5099 = vrot.lane.b32.xlu2 %v5095_v56, %s11575_s21  ;;  %v4857_v56 = vld [vmem:[#allocation8 + $0x8e0] sm:$0xff] }
0x3182   : > { %v9085_v35 = vpop.permute.xlu1 %4544 }
0x3183   : > { %12095 = vst [vmem:[#allocation347_spill] sm:$0xff] %v9085_v35 }
0x3187   : > { %5167 = vrot.lane.b32.xlu2 %v5162_v15, %s11565_s29  ;;  %s11589_s29 = smov 50   ;;  %v4959_v15 = vld [vmem:[#allocation8 + $0x8f8] sm:$0xff] }
0x318a   : > { %v4564_v50 = vpop.permute.xlu1 %4563 }
0x318b   : > { %v4571_v22 = vmul.f32 %v4564_v50, %v7492_v2 }
0x318d   : > { %4577 = vrot.lane.b32.xlu0 %v4571_v22, %s11578_s0 }
0x318f   : > { %5297 = vrot.lane.b32.xlu2 %v5293_v36, %s11568_s12  ;;  %v5060_v36 = vld [vmem:[#allocation8 + $0x910] sm:$0xff]  ;;  %s7206_s12 = smov 36  }
0x3195   : > { %4664 = vrot.lane.b32.xlu0 %v4659_v13, %s11571_s24  ;;  %v4724_v13 = vld [vmem:[#allocation8 + $0x480] sm:$0xff] }
0x3197   : > { %5365 = vrot.lane.b32.xlu2 %v5360_v21, %s11598_s16 }
0x319d   : > { %4861 = vrot.lane.b32.xlu0 %v4857_v56, %s11592_s3  ;;  %v5096_v56 = vld [vmem:[#allocation8 + $0x928] sm:$0xff] }
0x319f   : > { %5498 = vrot.lane.b32.xlu2 %v5494_v10, %s11589_s29 }
0x31a5   : > { %4964 = vrot.lane.b32.xlu0 %v4959_v15, %s11581_s20  ;;  %v5597_v15 = vld [vmem:[#allocation8 + $0x9a8] sm:$0xff] }
0x31a7   : > { %4631 = vrot.lane.b32.xlu2 %v4626_v53, %s11571_s24  ;;  %s11580_s24 = smov 52  }
0x31a9   : > { %v9097_v22 = vpop.permute.xlu2 %4546 }
0x31aa   : > { %12096 = vst [vmem:[#allocation348_spill] sm:$0xff] %v9097_v22  ;;  %v4925_v22 = vld [vmem:[#allocation8 + $0x4a0] sm:$0xff] }
0x31ad   : > { %5064 = vrot.lane.b32.xlu0 %v5060_v36, %s7206_s12  ;;  %v5227_v36 = vld [vmem:[#allocation8 + $0x940] sm:$0xff] }
0x31af   : > { %4728 = vrot.lane.b32.xlu2 %v4724_v13, %s11587_s25  ;;  %v4757_v13 = vld [vmem:[#allocation8 + $0x8d0] sm:$0xff] }
0x31b1   : > { %v9101_v21 = vpop.permute.xlu2 %4565 }
0x31b2   : > { %v4567_v10 = vsel %vm11623_vm15, %v4564_v50, %v9101_v21  ;;  %vm11641_vm15 = vcmask 269312  }
0x31b3   : > { %v4572_v35 = vmul.f32 %v4567_v10, %v7539_v32  ;;  %v5294_v10 = vld [vmem:[#allocation8 + $0x958] sm:$0xff] }
0x31b5   : > { %5101 = vrot.lane.b32.xlu0 %v5096_v56, %s11575_s21  ;;  %4579 = vrot.lane.b32.xlu1 %v4572_v35, %s11578_s0  ;;  %v4858_v56 = vld [vmem:[#allocation8 + $0x8e8] sm:$0xff]  ;;  %s12097_s21 = smov 47   ;;  %s11584_s0 = smov 49  }
0x31b7   : > { %5602 = vrot.lane.b32.xlu2 %v5597_v15, %s11580_s24  ;;  %v5426_v15 = vld [vmem:[#allocation8 + $0x970] sm:$0xff]  ;;  %s12098_s24 = smov 35  }
0x31b9   : > { %v9109_v53 = vpop.permute.xlu2 %4662 }
0x31bd   : > { %5231 = vrot.lane.b32.xlu0 %v5227_v36, %s11596_s1  ;;  %4761 = vrot.lane.b32.xlu1 %v4757_v13, %s11587_s25  ;;  %v5683_v36 = vld [vmem:[#allocation8 + $0x9d0] sm:$0xff]  ;;  %v5495_v13 = vld [vmem:[#allocation8 + $0x988] sm:$0xff] }
0x31bf   : > { %4929 = vrot.lane.b32.xlu2 %v4925_v22, %s11581_s20  ;;  %s12099_s20 = smov 45  }
0x31c1   : > { %v9114_v50 = vpop.permute.xlu2 %4763 }
0x31c5   : > { %5299 = vrot.lane.b32.xlu0 %v5294_v10, %s12097_s21  ;;  %4863 = vrot.lane.b32.xlu1 %v4858_v56, %s11592_s3  ;;  %v5061_v10 = vld [vmem:[#allocation8 + $0x918] sm:$0xff]  ;;  %v5562_v56 = vld [vmem:[#allocation8 + $0x990] sm:$0xff] }
0x31c7   : > { %5656 = vrot.lane.b32.xlu2 %v5651_v49, %s11959_s7 }
0x31c9   : > { %v9119_v35 = vpop.permute.xlu2 %4962 }
0x31cd   : > { %5430 = vrot.lane.b32.xlu0 %v5426_v15, %s11584_s0  ;;  %5030 = vrot.lane.b32.xlu1 %v5026_v46, %s12098_s24  ;;  %v5194_v15 = vld [vmem:[#allocation8 + $0x4d0] sm:$0xff]  ;;  %s11601_s0 = smov 51   ;;  %v4725_v46 = vld [vmem:[#allocation8 + $0x488] sm:$0xff] }
0x31cf   : > { %5687 = vrot.lane.b32.xlu2 %v5683_v36, %s11944_s2  ;;  %v5228_v36 = vld [vmem:[#allocation8 + $0x948] sm:$0xff] }
0x31d1   : > { %v9124_v22 = vpop.permute.xlu2 %5032 }
0x31d5   : > { %5500 = vrot.lane.b32.xlu0 %v5495_v13, %s11589_s29  ;;  %5066 = vrot.lane.b32.xlu1 %v5061_v10, %s7206_s12  ;;  %v5750_v13 = vld [vmem:[#allocation8 + $0x9f8] sm:$0xff]  ;;  %v5359_v10 = vld [vmem:[#allocation8 + $0x960] sm:$0xff]  ;;  %s12101_s12 = smov 34   ;;  %s12104_s29 = smov 29  }
0x31d7   : > { %5134 = vrot.lane.b32.xlu2 %v5129_v18, %s12099_s20  ;;  %v4824_v18 = vld [vmem:[#allocation8 + $0x490] sm:$0xff] }
0x31d9   : > { %v9129_v49 = vpop.permute.xlu2 %5099 }
0x31dd   : > { %5566 = vrot.lane.b32.xlu0 %v5562_v56, %s11601_s0  ;;  %5165 = vrot.lane.b32.xlu1 %v5161_v41, %s12099_s20  ;;  %v4926_v56 = vld [vmem:[#allocation8 + $0x4a8] sm:$0xff] }
0x31df   : > { %5198 = vrot.lane.b32.xlu2 %v5194_v15, %s11596_s1  ;;  %v5427_v15 = vld [vmem:[#allocation8 + $0x978] sm:$0xff] }
0x31e1   : > { %v9134_v19 = vpop.permute.xlu2 %5167 }
0x31e5   : > { %4730 = vrot.lane.b32.xlu0 %v4725_v46, %s11587_s25  ;;  %5233 = vrot.lane.b32.xlu1 %v5228_v36, %s11596_s1  ;;  %v4670_v46 = vmul.f32 %v9109_v53, %v7492_v2  ;;  %s12102_s25 = smov 49   ;;  %v9148_v36 = vpop.permute.xlu0 %4548  ;;  %s12109_s1 = smov 66  }
0x31e6   : > { %12103 = vst [vmem:[#allocation350_spill] sm:$0xff] %v9148_v36  ;;  %v5716_v36 = vld [vmem:[#allocation8 + $0x9e0] sm:$0xff] }
0x31e7   : > { %5755 = vrot.lane.b32.xlu2 %v5750_v13, %s11925_s15 }
0x31e9   : > { %v9141_v41 = vpop.permute.xlu2 %5297 }
0x31ea   : > { %12100 = vst [vmem:[#allocation349_spill] sm:$0xff] %v9141_v41  ;;  %v5326_v41 = vld [vmem:[#allocation8 + $0x4f0] sm:$0xff] }
0x31ed   : > { %4828 = vrot.lane.b32.xlu0 %v4824_v18, %s11592_s3  ;;  %5363 = vrot.lane.b32.xlu1 %v5359_v10, %s11598_s16  ;;  %v4992_v18 = vld [vmem:[#allocation8 + $0x4b0] sm:$0xff]  ;;  %s12106_s3 = smov 31  }
0x31ee   : > { %v4625_v10 = vld [vmem:[#allocation8 + $0x470] sm:$0xff] }
0x31ef   : > { %5266 = vrot.lane.b32.xlu2 %v5261_v12, %s12097_s21 }
0x31f1   : > { %v9151_v13 = vpop.permute.xlu2 %5365 }
0x31f2   : > { %12105 = vst [vmem:[#allocation351_spill] sm:$0xff] %v9151_v13  ;;  %v5596_v13 = vld [vmem:[#allocation8 + $0x9a0] sm:$0xff] }
0x31f5   : > { %4931 = vrot.lane.b32.xlu0 %v4926_v56, %s12101_s12  ;;  %5432 = vrot.lane.b32.xlu1 %v5427_v15, %s12102_s25  ;;  %v5684_v15 = vld [vmem:[#allocation8 + $0x9d8] sm:$0xff] }
0x31f7   : > { %4676 = vrot.lane.b32.xlu2 %v4670_v46, %s12104_s29 }
0x31f9   : > { %v9158_v56 = vpop.permute.xlu2 %5498 }
0x31fa   : > { %12108 = vst [vmem:[#allocation353_spill] sm:$0xff] %v9158_v56  ;;  %v5650_v56 = vld [vmem:[#allocation8 + $0x9c0] sm:$0xff] }
0x31fd   : > { %4996 = vrot.lane.b32.xlu0 %v4992_v18, %s12098_s24  ;;  %4629 = vrot.lane.b32.xlu1 %v4625_v10, %s12106_s3  ;;  %v5195_v10 = vld [vmem:[#allocation8 + $0x4d8] sm:$0xff] }
0x31ff   : > { %v9155_v12 = vpop.permute.xlu0 %4577  ;;  %5330 = vrot.lane.b32.xlu2 %v5326_v41, %s11598_s16  ;;  %s12111_s16 = smov 52  }
0x3200   : > { %12107 = vst [vmem:[#allocation352_spill] sm:$0xff] %v9155_v12  ;;  %v4825_v12 = vld [vmem:[#allocation8 + $0x498] sm:$0xff] }
0x3201   : > { %v9165_v18 = vpop.permute.xlu2 %4631 }
0x3202   : > { %12110 = vst [vmem:[#allocation354_spill] sm:$0xff] %v9165_v18  ;;  %v5782_v18 = vld [vmem:[#allocation8 + $0xa00] sm:$0xff] }
0x3205   : > { %5689 = vrot.lane.b32.xlu0 %v5684_v15, %s11944_s2  ;;  %5568 = vrot.lane.b32.xlu1 %v5563_v34, %s11601_s0  ;;  %s12113_s0 = smov 33  }
0x3207   : > { %v9162_v46 = vpop.permute.xlu0 %4664  ;;  %5821 = vrot.lane.b32.xlu2 %v5816_v55, %s12109_s1  ;;  %v4573_v55 = vmul.f32 0.0, %v9101_v21 }
0x3208   : > { %v4666_v21 = vsel %vm11642_vm1, %v9109_v53, %v9162_v46  ;;  %vm11665_vm1 = vcmask 990208  }
0x3209   : > { %v9173_v34 = vpop.permute.xlu2 %4728 }
0x320a   : > { %12114 = vst [vmem:[#allocation355_spill] sm:$0xff] %v9173_v34  ;;  %v4671_v34 = vmul.f32 %v4666_v21, %v7539_v32 }
0x320d   : > { %5720 = vrot.lane.b32.xlu0 %v5716_v36, %s11933_s18  ;;  %5600 = vrot.lane.b32.xlu1 %v5596_v13, %s12111_s16  ;;  %s12117_s16 = smov 65  }
0x320f   : > { %v9169_v41 = vpop.permute.xlu0 %4861 }
0x3211   : > { %v9182_v13 = vpop.permute.xlu2 %5602 }
0x3212   : > { %12116 = vst [vmem:[#allocation356_spill] sm:$0xff] %v9182_v13 }
0x3215   : > { %5200 = vrot.lane.b32.xlu0 %v5195_v10, %s12112_s30  ;;  %4830 = vrot.lane.b32.xlu1 %v4825_v12, %s12113_s0 }
0x3217   : > { %v9175_v15 = vpop.permute.xlu0 %4964 }
0x321d   : > { %4581 = vrot.lane.b32.xlu0 %v4573_v55, %s12115_s19  ;;  %5654 = vrot.lane.b32.xlu1 %v5650_v56, %s11959_s7  ;;  %v9193_v56 = vpop.permute.xlu2 %4929  ;;  %v5128_v55 = vld [vmem:[#allocation8 + $0x4c0] sm:$0xff] }
0x321e   : > { %12119 = vst [vmem:[#allocation358_spill] sm:$0xff] %v9193_v56  ;;  %v4592_v56 = vld [vmem:[#allocation8 + $0x1e0] sm:$0xff] }
0x321f   : > { %v9180_v36 = vpop.permute.xlu0 %5064 }
0x3225   : > { %5786 = vrot.lane.b32.xlu0 %v5782_v18, %s12117_s16  ;;  %4998 = vrot.lane.b32.xlu1 %v4993_v4, %s12098_s24  ;;  %s12121_s24 = smov 28   ;;  %v9202_v39 = vpop.permute.xlu2 %5656 }
0x3226   : > { %12122 = vst [vmem:[#allocation360_spill] sm:$0xff] %v9202_v39 }
0x3227   : > { %v9186_v12 = vpop.permute.xlu0 %5101  ;;  %v9188_v10 = vpop.permute.xlu1 %4579 }
0x3228   : > { %12118 = vst [vmem:[#allocation357_spill] sm:$0xff] %v9188_v10  ;;  %v5717_v10 = vld [vmem:[#allocation8 + $0x9e8] sm:$0xff] }
0x322d   : > { %5132 = vrot.lane.b32.xlu1 %v5128_v55, %s12099_s20  ;;  %4678 = vrot.lane.b32.xlu0 %v4671_v34, %s12104_s29  ;;  %v5392_v34 = vld [vmem:[#allocation8 + $0x500] sm:$0xff]  ;;  %v5749_v55 = vld [vmem:[#allocation8 + $0x9f0] sm:$0xff] }
0x322f   : > { %v9198_v18 = vpop.permute.xlu0 %5231  ;;  %v4762_v4 = vpop.permute.xlu1 %4761 }
0x3230   : > { %12120 = vst [vmem:[#allocation359_spill] sm:$0xff] %v9198_v18  ;;  %v4769_v13 = vmul.f32 %v4762_v4, %v7492_v2  ;;  %v4765_v18 = vsel %vm11633_vm0, %v4762_v4, %v9114_v50  ;;  %v5783_v4 = vld [vmem:[#allocation8 + $0xa08] sm:$0xff]  ;;  %vm11640_vm0 = vcmask 277504  }
0x3232   : > { %4775 = vrot.lane.b32.xlu2 %v4769_v13, %s12121_s24  ;;  %v9213_v13 = vpop.permute.xlu2 %5687 }
0x3233   : > { %12124 = vst [vmem:[#allocation361_spill] sm:$0xff] %v9213_v13  ;;  %v4869_v13 = vmul.f32 %v9169_v41, %v7492_v2 }
0x3235   : > { %5722 = vrot.lane.b32.xlu1 %v5717_v10, %s11933_s18  ;;  %5332 = vrot.lane.b32.xlu0 %v5327_v3, %s12123_s9  ;;  %v5849_v3 = vld [vmem:[#allocation8 + $0xa28] sm:$0xff]  ;;  %s12126_s9 = smov 67  }
0x3237   : > { %v9206_v53 = vpop.permute.xlu0 %5299  ;;  %v9208_v21 = vpop.permute.xlu1 %4863 }
0x323a   : > { %5396 = vrot.lane.b32.xlu2 %v5392_v34, %s12102_s25  ;;  %v4770_v34 = vmul.f32 %v4765_v18, %v7539_v32 }
0x323d   : > { %5753 = vrot.lane.b32.xlu1 %v5749_v55, %s11925_s15  ;;  %4596 = vrot.lane.b32.xlu0 %v4592_v56, %s12106_s3  ;;  %s11624_s15 = smov 27  }
0x323f   : > { %v9215_v39 = vpop.permute.xlu0 %5430  ;;  %v9217_v10 = vpop.permute.xlu1 %5030 }
0x3240   : > { %12125 = vst [vmem:[#allocation362_spill] sm:$0xff] %v9215_v39  ;;  %v9231_v39 = vpop.permute.xlu2 %5134 }
0x3241   : > { %12128 = vst [vmem:[#allocation364_spill] sm:$0xff] %v9231_v39  ;;  %v4672_v39 = vmul.f32 0.0, %v9162_v46 }
0x3242   : > { %5854 = vrot.lane.b32.xlu2 %v5849_v3, %s12126_s9  ;;  %v5393_v3 = vld [vmem:[#allocation8 + $0x508] sm:$0xff] }
0x3245   : > { %5264 = vrot.lane.b32.xlu1 %v5260_v14, %s12097_s21  ;;  %4777 = vrot.lane.b32.xlu0 %v4770_v34, %s12121_s24  ;;  %v5460_v34 = vld [vmem:[#allocation8 + $0x510] sm:$0xff]  ;;  %s12131_s21 = smov 50  }
0x3247   : > { %v9225_v56 = vpop.permute.xlu0 %5500  ;;  %v9227_v55 = vpop.permute.xlu1 %5066 }
0x3248   : > { %12127 = vst [vmem:[#allocation363_spill] sm:$0xff] %v9225_v56  ;;  %v9240_v56 = vpop.permute.xlu2 %5198 }
0x3249   : > { %12130 = vst [vmem:[#allocation366_spill] sm:$0xff] %v9240_v56 }
0x324a   : > { %4875 = vrot.lane.b32.xlu2 %v4869_v13, %s11624_s15  ;;  %s12132_s15 = smov 32  }
0x324d   : > { %5788 = vrot.lane.b32.xlu1 %v5783_v4, %s12117_s16  ;;  %5398 = vrot.lane.b32.xlu0 %v5393_v3, %s12102_s25  ;;  %v5882_v3 = vld [vmem:[#allocation8 + $0xa38] sm:$0xff]  ;;  %s12134_s25 = smov 68   ;;  %s12136_s16 = smov 27  }
0x324f   : > { %v9236_v14 = vpop.permute.xlu0 %5566  ;;  %v9238_v18 = vpop.permute.xlu1 %5165 }
0x3250   : > { %12129 = vst [vmem:[#allocation365_spill] sm:$0xff] %v9236_v14  ;;  %v4865_v14 = vsel %vm11641_vm15, %v9169_v41, %v9208_v21  ;;  %v9255_v46 = vpop.permute.xlu2 %5755  ;;  %v4593_v41 = vld [vmem:[#allocation8 + $0x1e8] sm:$0xff]  ;;  %vm11655_vm15 = vcmask 998400  }
0x3251   : > { %v4870_v56 = vmul.f32 %v4865_v14, %v7539_v32  ;;  %12135 = vst [vmem:[#allocation368_spill] sm:$0xff] %v9255_v46  ;;  %v5528_v46 = vld [vmem:[#allocation8 + $0x520] sm:$0xff] }
0x3252   : > { %5464 = vrot.lane.b32.xlu2 %v5460_v34, %s12131_s21  ;;  %v5815_v34 = vld [vmem:[#allocation8 + $0xa10] sm:$0xff] }
0x3255   : > { %4680 = vrot.lane.b32.xlu1 %v4672_v39, %s12104_s29  ;;  %4695 = vrot.lane.b32.xlu0 %v4691_v8, %s12132_s15 }
0x3257   : > { %v9246_v13 = vpop.permute.xlu0 %4730  ;;  %v9248_v4 = vpop.permute.xlu1 %5233 }
0x3258   : > { %12133 = vst [vmem:[#allocation367_spill] sm:$0xff] %v9246_v13  ;;  %v4970_v13 = vmul.f32 %v9119_v35, %v7492_v2  ;;  %v9268_v14 = vpop.permute.xlu2 %5266 }
0x3259   : > { %12139 = vst [vmem:[#allocation371_spill] sm:$0xff] %v9268_v14  ;;  %v4966_v14 = vsel %vm11640_vm0, %v9119_v35, %v9175_v15  ;;  %vm11654_vm0 = vcmask 1006592  }
0x325a   : > { %5887 = vrot.lane.b32.xlu2 %v5882_v3, %s12134_s25  ;;  %v5461_v3 = vld [vmem:[#allocation8 + $0x518] sm:$0xff] }
0x325d   : > { %5819 = vrot.lane.b32.xlu1 %v5815_v34, %s12109_s1  ;;  %4877 = vrot.lane.b32.xlu0 %v4870_v56, %s12136_s16  ;;  %s12142_s1 = smov 51  }
0x325f   : > { %v9259_v8 = vpop.permute.xlu0 %4828  ;;  %v9261_v39 = vpop.permute.xlu1 %5363 }
0x3260   : > { %12137 = vst [vmem:[#allocation369_spill] sm:$0xff] %v9259_v8  ;;  %v4790_v8 = vld [vmem:[#allocation8 + $0x200] sm:$0xff] }
0x3261   : > { %12138 = vst [vmem:[#allocation370_spill] sm:$0xff] %v9261_v39  ;;  %v4771_v39 = vmul.f32 0.0, %v9114_v50  ;;  %v574_v50 = vsel %vm11650_vm14, %v7637_v16, %v7617_v5 }
0x3262   : > { %4976 = vrot.lane.b32.xlu2 %v4970_v13, %s11644_s13 }
0x3265   : > { %4598 = vrot.lane.b32.xlu1 %v4593_v41, %s12106_s3  ;;  %5466 = vrot.lane.b32.xlu0 %v5461_v3, %s12131_s21  ;;  %v4892_v3 = vld [vmem:[#allocation8 + $0x218] sm:$0xff]  ;;  %s11646_s21 = smov 25  }
0x3267   : > { %v9270_v34 = vpop.permute.xlu0 %4931  ;;  %v9272_v56 = vpop.permute.xlu1 %5432 }
0x3268   : > { %12140 = vst [vmem:[#allocation372_spill] sm:$0xff] %v9270_v34  ;;  %v9285_v34 = vpop.permute.xlu2 %4676 }
0x3269   : > { %12141 = vst [vmem:[#allocation373_spill] sm:$0xff] %v9272_v56 }
0x326a   : > { %5532 = vrot.lane.b32.xlu2 %v5528_v46, %s12142_s1  ;;  %12145 = vst [vmem:[#allocation376_spill] sm:$0xff] %v9285_v34  ;;  %v5848_v46 = vld [vmem:[#allocation8 + $0xa20] sm:$0xff]  ;;  %v609_v34 = vsel %vm11651_vm8, %v7590_v54, %v7651_v28 }
0x326d   : > { %4779 = vrot.lane.b32.xlu1 %v4771_v39, %s12121_s24  ;;  %4794 = vrot.lane.b32.xlu0 %v4790_v8, %s12113_s0  ;;  %v4971_v8 = vmul.f32 %v4966_v14, %v7539_v32  ;;  %v541_v39 = vmul.f32 0.0, %v7466_v47  ;;  %v4692_v14 = vld [vmem:[#allocation8 + $0x1f8] sm:$0xff] }
0x326f   : > { %v9278_v13 = vpop.permute.xlu0 %4996  ;;  %v9280_v41 = vpop.permute.xlu1 %4629 }
0x3270   : > { %12143 = vst [vmem:[#allocation374_spill] sm:$0xff] %v9278_v13  ;;  %v579_v13 = vadd.f32 %v574_v50, %v541_v39  ;;  %v9303_v56 = vpop.permute.xlu2 %5330  ;;  %v644_v50 = vsel %vm11659_vm11, %v7603_v61, %v7601_v60 }
0x3271   : > { %12144 = vst [vmem:[#allocation375_spill] sm:$0xff] %v9280_v41 }
0x3272   : > { %4897 = vrot.lane.b32.xlu2 %v4892_v3, %s12101_s12  ;;  %v5040_v3 = vmul.f32 0.0, %v9124_v22  ;;  %v614_v16 = vadd.f32 %v609_v34, %v579_v13  ;;  %12146 = vst [vmem:[#allocation377_spill] sm:$0xff] %v9303_v56  ;;  %v12196_v56 = vld [vmem:[#allocation370_spill] sm:$0xff] }
0x3274   : > { %v649_v54 = vadd.f32 %v644_v50, %v614_v16  ;;  %v5038_v16 = vmul.f32 %v9217_v10, %v7492_v2  ;;  %v749_v50 = vsel %vm11655_vm15, %v7607_v63, %v7605_v62 }
0x3275   : > { %5852 = vrot.lane.b32.xlu1 %v5848_v46, %s12126_s9  ;;  %4978 = vrot.lane.b32.xlu0 %v4971_v8, %s11644_s13  ;;  %v5529_v46 = vld [vmem:[#allocation8 + $0x528] sm:$0xff]  ;;  %v679_v8 = vsel %vm11656_vm5, %v7641_v20, %v7621_v7  ;;  %s11653_s9 = smov 24   ;;  %v714_v20 = vsel %vm11654_vm0, %v7594_v57, %v7653_v29  ;;  %v784_v57 = vsel %vm11665_vm1, %v7647_v25, %v7625_v9  ;;  %s12149_s13 = smov 16  }
0x3276   : > { %v684_v39 = vadd.f32 %v679_v8, %v649_v54  ;;  %v819_v25 = vsel %vm11648_vm9, %v7597_v58, %v7655_v30  ;;  %vm11649_vm9 = vcmask 490496   ;;  %v5107_v58 = vmul.f32 %v9129_v49, %v7492_v2 }
0x3277   : > { %v9295_v41 = vpop.permute.xlu0 %5689  ;;  %v9297_v35 = vpop.permute.xlu1 %5568 }
0x3278   : > { %v9320_v61 = vpop.permute.xlu2 %5821 }
0x3279   : > { %12147 = vst [vmem:[#allocation378_spill] sm:$0xff] %v9320_v61  ;;  %v4791_v61 = vld [vmem:[#allocation8 + $0x208] sm:$0xff] }
0x327a   : > { %5048 = vrot.lane.b32.xlu2 %v5040_v3, %s11646_s21  ;;  %v5075_v3 = vmul.f32 0.0, %v9227_v55 }
0x327d   : > { %4697 = vrot.lane.b32.xlu1 %v4692_v14, %s12132_s15  ;;  %5534 = vrot.lane.b32.xlu0 %v5529_v46, %s12142_s1  ;;  %v4871_v14 = vmul.f32 0.0, %v9208_v21  ;;  %v719_v46 = vadd.f32 %v714_v20, %v684_v39  ;;  %v5109_v39 = vmul.f32 0.0, %v9186_v12  ;;  %v5881_v20 = vld [vmem:[#allocation8 + $0xa30] sm:$0xff] }
0x327f   : > { %v9314_v34 = vpop.permute.xlu0 %5720  ;;  %v9316_v13 = vpop.permute.xlu1 %5600  ;;  %v754_v54 = vadd.f32 %v749_v50, %v719_v46 }
0x3282   : > { %5083 = vrot.lane.b32.xlu2 %v5075_v3, %s11653_s9  ;;  %v789_v3 = vadd.f32 %v784_v57, %v754_v54  ;;  %v5175_v57 = vmul.f32 0.0, %v9134_v19  ;;  %v854_v54 = vsel %vm853_vm12, %v7611_v1, %v7609_v0  ;;  %v976_v1 = vsel %vm11673_vm4, %v7667_v38, %v7671_v37 }
0x3283   : > { %v1044_v38 = vsel %vm11678_vm10, %v7695_v24, %v7697_v26 }
0x3285   : > { %4879 = vrot.lane.b32.xlu1 %v4871_v14, %s12136_s16  ;;  %5044 = vrot.lane.b32.xlu0 %v5038_v16, %s11646_s21  ;;  %v5073_v14 = vmul.f32 %v9180_v36, %v7492_v2  ;;  %v824_v16 = vadd.f32 %v819_v25, %v789_v3  ;;  %s12150_s21 = smov 15   ;;  %v543_v3 = vmul.f32 %v7456_v42, %v7539_v32 }
0x3286   : > { %v537_v25 = vsel %vm11649_vm9, %v7466_v47, %v7456_v42  ;;  %v610_v42 = vsel %vm11651_vm8, %v7651_v28, %v7629_v11  ;;  %vm11652_vm9 = vcmask 875520   ;;  %vm1315_vm8 = vcmask 859136  }
0x3287   : > { %v9336_v8 = vpop.permute.xlu0 %5200  ;;  %v9338_v21 = vpop.permute.xlu1 %4830  ;;  %v1180_v28 = vsel %vm11652_vm9, %v7745_v23, %v7748_v40  ;;  %v645_v23 = vsel %vm11659_vm11, %v7601_v60, %v7659_v33  ;;  %vm1350_vm9 = vcmask 850944   ;;  %vm12177_vm11 = vcmask 752640  }
0x3288   : > { %12148 = vst [vmem:[#allocation379_spill] sm:$0xff] %v9336_v8  ;;  %v1351_v60 = vsel %vm1350_vm9, %v7800_v45, %v7803_v48  ;;  %v12161_v45 = vld [vmem:[#allocation359_spill] sm:$0xff] }
0x328a   : > { %5117 = vrot.lane.b32.xlu2 %v5109_v39, %s12149_s13  ;;  %v859_v39 = vadd.f32 %v854_v54, %v824_v16  ;;  %v575_v16 = vsel %vm11650_vm14, %v7617_v5, %v7619_v6  ;;  %v542_v54 = vmul.f32 %v537_v25, %v7492_v2  ;;  %v5241_v5 = vmul.f32 0.0, %v9248_v4 }
0x328b   : > { %vm11684_vm14 = vcmask 867328   ;;  %v5173_v25 = vmul.f32 %v9238_v18, %v7492_v2 }
0x328c   : > { %v9344_v63 = vpop.permute.xlu2 %4775 }
0x328d   : > { %5885 = vrot.lane.b32.xlu1 %v5881_v20, %s12134_s25  ;;  %5079 = vrot.lane.b32.xlu0 %v5073_v14, %s11653_s9  ;;  %v908_v14 = vsel %vm11674_vm2, %v7599_v59, %v7657_v31  ;;  %v581_v59 = vadd.f32 %v7619_v6, %v543_v3  ;;  %v1112_v6 = vsel %vm11679_vm6, %v7721_v43, %v7723_v44  ;;  %s12155_s25 = smov 26   ;;  %s12158_s9 = smov 13  }
0x328f   : > { %v9351_v46 = vpop.permute.xlu0 %4581  ;;  %v9353_v50 = vpop.permute.xlu1 %5654  ;;  %v616_v3 = vadd.f32 %v7629_v11, %v581_v59  ;;  %v1248_v11 = vsel %vm11684_vm14, %v7769_v17, %v7771_v52  ;;  %v1316_v59 = vsel %vm1315_vm8, %v7790_v51, %v7792_v27 }
0x3291   : > { %v651_v43 = vadd.f32 %v7659_v33, %v616_v3 }
0x3292   : > { %5183 = vrot.lane.b32.xlu2 %v5175_v57, %s12150_s21  ;;  %v913_v57 = vadd.f32 %v908_v14, %v859_v39  ;;  %v580_v39 = vadd.f32 %v575_v16, %v542_v54 }
0x3294   : > { %v9362_v20 = vpop.permute.xlu2 %5396  ;;  %v981_v47 = vadd.f32 %v976_v1, %v913_v57  ;;  %v615_v14 = vadd.f32 %v610_v42, %v580_v39  ;;  %v4972_v1 = vmul.f32 0.0, %v9175_v15 }
0x3295   : > { %12151 = vst [vmem:[#allocation380_spill] sm:$0xff] %v9362_v20  ;;  %4796 = vrot.lane.b32.xlu1 %v4791_v61, %s12113_s0  ;;  %5113 = vrot.lane.b32.xlu0 %v5107_v58, %s12149_s13  ;;  %s12153_s0 = smov 14   ;;  %v12183_v20 = vld [vmem:[#allocation103_spill] sm:$0xff] }
0x3296   : > { %v1049_v24 = vadd.f32 %v1044_v38, %v981_v47  ;;  %v650_v54 = vadd.f32 %v645_v23, %v615_v14  ;;  %v5307_v47 = vmul.f32 0.0, %v9206_v53 }
0x3297   : > { %v9385_v61 = vpop.permute.xlu0 %5786  ;;  %v9387_v58 = vpop.permute.xlu1 %4998 }
0x3298   : > { %12152 = vst [vmem:[#allocation381_spill] sm:$0xff] %v9385_v61  ;;  %v1117_v16 = vadd.f32 %v1112_v6, %v1049_v24  ;;  %v12157_v6 = vld [vmem:[#allocation34_spill] sm:$0xff] }
0x3299   : > { %v715_v51 = vsel %vm11654_vm0, %v7653_v29, %v12157_v6  ;;  %v4891_v24 = vld [vmem:[#allocation8 + $0x210] sm:$0xff]  ;;  %vm11661_vm0 = vcmask 285696  }
0x329a   : > { %5249 = vrot.lane.b32.xlu2 %v5241_v5, %s12153_s0  ;;  %v1185_v15 = vadd.f32 %v1180_v28, %v1117_v16  ;;  %v12156_v5 = vld [vmem:[#allocation32_spill] sm:$0xff]  ;;  %v12159_v28 = vld [vmem:[#allocation63_spill] sm:$0xff]  ;;  %v5239_v16 = vmul.f32 %v12161_v45, %v7492_v2  ;;  %v12163_v29 = vld [vmem:[#allocation69_spill] sm:$0xff] }
0x329b   : > { %v680_v33 = vsel %vm11656_vm5, %v7621_v7, %v12156_v5  ;;  %v686_v39 = vadd.f32 %v12156_v5, %v651_v43  ;;  %v12165_v5 = vld [vmem:[#allocation77_spill] sm:$0xff]  ;;  %vm1838_vm5 = vcmask 744448  }
0x329c   : > { %v9404_v57 = vpop.permute.xlu2 %5854  ;;  %v1253_v42 = vadd.f32 %v1248_v11, %v1185_v15  ;;  %v685_v14 = vadd.f32 %v680_v33, %v650_v54  ;;  %v12162_v15 = vld [vmem:[#allocation71_spill] sm:$0xff]  ;;  %v12166_v33 = vld [vmem:[#allocation76_spill] sm:$0xff] }
0x329d   : > { %12154 = vst [vmem:[#allocation382_spill] sm:$0xff] %v9404_v57  ;;  %4980 = vrot.lane.b32.xlu1 %v4972_v1, %s12155_s25  ;;  %5179 = vrot.lane.b32.xlu0 %v5173_v25, %s12150_s21  ;;  %v12160_v1 = vld [vmem:[#allocation62_spill] sm:$0xff]  ;;  %v721_v7 = vadd.f32 %v12157_v6, %v686_v39  ;;  %v12178_v57 = vld [vmem:[#allocation349_spill] sm:$0xff] }
0x329e   : > { %v1321_v3 = vadd.f32 %v1316_v59, %v1253_v42  ;;  %v1386_v25 = vsel %vm1385_vm3, %v12160_v1, %v12159_v28  ;;  %v720_v43 = vadd.f32 %v715_v51, %v685_v14  ;;  %v1454_v59 = vsel %vm11690_vm13, %v12163_v29, %v12162_v15  ;;  %v12164_v42 = vld [vmem:[#allocation37_spill] sm:$0xff]  ;;  %v12169_v14 = vld [vmem:[#allocation351_spill] sm:$0xff] }
0x329f   : > { %v9418_v38 = vpop.permute.xlu1 %5132  ;;  %v9420_v17 = vpop.permute.xlu0 %4678  ;;  %v756_v51 = vadd.f32 %v12164_v42, %v721_v7  ;;  %v5034_v1 = vsel %vm11661_vm0, %v9217_v10, %v9124_v22  ;;  %v5305_v22 = vmul.f32 %v12178_v57, %v7492_v2  ;;  %vm1939_vm0 = vcmask 736256  }
0x32a0   : > { %v1356_v11 = vadd.f32 %v1351_v60, %v1321_v3  ;;  %v1540_v60 = vsel %vm11692_vm7, %v12166_v33, %v12165_v5  ;;  %v12174_v33 = vld [vmem:[#allocation33_spill] sm:$0xff]  ;;  %v5039_v10 = vmul.f32 %v5034_v1, %v7539_v32 }
0x32a1   : > { %v785_v7 = vsel %vm11665_vm1, %v7625_v9, %v12174_v33  ;;  %vm2007_vm1 = vcmask 728064  }
0x32a2   : > { %5315 = vrot.lane.b32.xlu2 %v5307_v47, %s12158_s9  ;;  %v1391_v54 = vadd.f32 %v1386_v25, %v1356_v11  ;;  %v750_v47 = vsel %vm11655_vm15, %v7605_v62, %v12164_v42  ;;  %v12171_v62 = vld [vmem:[#allocation85_spill] sm:$0xff]  ;;  %vm12172_vm15 = vcmask 760832  }
0x32a3   : > { %v755_v25 = vadd.f32 %v750_v47, %v720_v43  ;;  %v791_v43 = vadd.f32 %v12174_v33, %v756_v51  ;;  %v12179_v47 = vld [vmem:[#allocation35_spill] sm:$0xff] }
0x32a4   : > { %v9440_v23 = vpop.permute.xlu2 %4875  ;;  %v1459_v3 = vadd.f32 %v1454_v59, %v1391_v54  ;;  %v12175_v59 = vld [vmem:[#allocation95_spill] sm:$0xff]  ;;  %v12176_v54 = vld [vmem:[#allocation94_spill] sm:$0xff] }
0x32a5   : > { %4895 = vrot.lane.b32.xlu1 %v4891_v24, %s12101_s12  ;;  %5245 = vrot.lane.b32.xlu0 %v5239_v16, %s12153_s0  ;;  %v5373_v24 = vmul.f32 0.0, %v12169_v14  ;;  %v12170_v16 = vld [vmem:[#allocation86_spill] sm:$0xff]  ;;  %v1738_v42 = vsel %vm12177_vm11, %v12176_v54, %v12175_v59  ;;  %v790_v9 = vadd.f32 %v785_v7, %v755_v25  ;;  %vm5068_vm11 = vcmask 293888  }
0x32a6   : > { %v1639_v11 = vsel %vm12172_vm15, %v12171_v62, %v12170_v16  ;;  %v1545_v29 = vadd.f32 %v1540_v60, %v1459_v3  ;;  %vm12180_vm15 = vcmask 982016   ;;  %v12182_v62 = vld [vmem:[#allocation104_spill] sm:$0xff]  ;;  %v826_v51 = vadd.f32 %v12179_v47, %v791_v43  ;;  %v12191_v43 = vld [vmem:[#allocation118_spill] sm:$0xff] }
0x32a7   : > { %v9453_v39 = vpop.permute.xlu1 %5722  ;;  %v9455_v6 = vpop.permute.xlu0 %5332  ;;  %v820_v60 = vsel %vm12180_vm15, %v7655_v30, %v12179_v47  ;;  %v1839_v54 = vsel %vm1838_vm5, %v12183_v20, %v12182_v62  ;;  %v12185_v30 = vld [vmem:[#allocation113_spill] sm:$0xff]  ;;  %vm2042_vm15 = vcmask 719872   ;;  %v5069_v20 = vsel %vm5068_vm11, %v9180_v36, %v9227_v55  ;;  %v12192_v47 = vld [vmem:[#allocation38_spill] sm:$0xff] }
0x32a8   : > { %12167 = vst [vmem:[#allocation32_spill] sm:$0xff] %v9453_v39  ;;  %v1644_v3 = vadd.f32 %v1639_v11, %v1545_v29  ;;  %v825_v33 = vadd.f32 %v820_v60, %v790_v9  ;;  %v12186_v11 = vld [vmem:[#allocation112_spill] sm:$0xff]  ;;  %v855_v60 = vsel %vm853_vm12, %v7609_v0, %v12192_v47  ;;  %v12194_v55 = vld [vmem:[#allocation122_spill] sm:$0xff]  ;;  %v5371_v0 = vmul.f32 %v12196_v56, %v7492_v2 }
0x32a9   : > { %12168 = vst [vmem:[#allocation34_spill] sm:$0xff] %v9455_v6  ;;  %v1940_v29 = vsel %vm1939_vm0, %v12186_v11, %v12185_v30  ;;  %v12190_v6 = vld [vmem:[#allocation119_spill] sm:$0xff]  ;;  %v12193_v9 = vld [vmem:[#allocation36_spill] sm:$0xff]  ;;  %v12195_v11 = vld [vmem:[#allocation121_spill] sm:$0xff]  ;;  %vm12201_vm11 = vcmask 654336  }
0x32aa   : > { %5381 = vrot.lane.b32.xlu2 %v5373_v24, %s12173_s22  ;;  %v1743_v1 = vadd.f32 %v1738_v42, %v1644_v3  ;;  %v2008_v42 = vsel %vm2007_vm1, %v12191_v43, %v12190_v6  ;;  %v861_v3 = vadd.f32 %v12192_v47, %v826_v51  ;;  %v860_v36 = vadd.f32 %v855_v60, %v825_v33  ;;  %v12197_v47 = vld [vmem:[#allocation40_spill] sm:$0xff]  ;;  %v12199_v33 = vld [vmem:[#allocation125_spill] sm:$0xff] }
0x32ab   : > { %v5074_v43 = vmul.f32 %v5069_v20, %v7539_v32  ;;  %v12200_v60 = vld [vmem:[#allocation124_spill] sm:$0xff] }
0x32ac   : > { %v9479_v24 = vpop.permute.xlu2 %5464  ;;  %v1844_v7 = vadd.f32 %v1839_v54, %v1743_v1  ;;  %v909_v54 = vsel %vm11674_vm2, %v7657_v31, %v12193_v9  ;;  %v915_v51 = vadd.f32 %v12193_v9, %v861_v3  ;;  %v977_v31 = vsel %vm11673_vm4, %v7671_v37, %v12197_v47  ;;  %v12203_v9 = vld [vmem:[#allocation44_spill] sm:$0xff] }
0x32ad   : > { %12181 = vst [vmem:[#allocation63_spill] sm:$0xff] %v9479_v24  ;;  %5046 = vrot.lane.b32.xlu1 %v5039_v10, %s12184_s26  ;;  %5311 = vrot.lane.b32.xlu0 %v5305_v22, %s12158_s9  ;;  %v12189_v10 = vld [vmem:[#allocation373_spill] sm:$0xff]  ;;  %s11671_s26 = smov 11   ;;  %v2076_v61 = vsel %vm12201_vm11, %v12200_v60, %v12199_v33  ;;  %v1045_v37 = vsel %vm11678_vm10, %v7697_v26, %v12203_v9  ;;  %vm12206_vm4 = vcmask 646144   ;;  %vm11712_vm2 = vcmask 359424  }
0x32ae   : > { %v5440_v22 = vmul.f32 0.0, %v12189_v10  ;;  %v1945_v1 = vadd.f32 %v1940_v29, %v1844_v7  ;;  %v983_v20 = vadd.f32 %v12197_v47, %v915_v51  ;;  %v12209_v51 = vld [vmem:[#allocation363_spill] sm:$0xff]  ;;  %vm12215_vm11 = vcmask 875520  }
0x32af   : > { %v9490_v24 = vpop.permute.xlu1 %5753  ;;  %v9492_v25 = vpop.permute.xlu0 %4596  ;;  %v5508_v47 = vmul.f32 0.0, %v12209_v51  ;;  %vm12218_vm10 = vcmask 629760  }
0x32b0   : > { %12187 = vst [vmem:[#allocation62_spill] sm:$0xff] %v9490_v24  ;;  %v2013_v29 = vadd.f32 %v2008_v42, %v1945_v1  ;;  %v12204_v42 = vld [vmem:[#allocation131_spill] sm:$0xff]  ;;  %v12205_v1 = vld [vmem:[#allocation130_spill] sm:$0xff] }
0x32b1   : > { %12188 = vst [vmem:[#allocation359_spill] sm:$0xff] %v9492_v25  ;;  %v2043_v25 = vsel %vm2042_vm15, %v12195_v11, %v12194_v55 }
0x32b2   : > { %5448 = vrot.lane.b32.xlu2 %v5440_v22, %s11671_s26  ;;  %v914_v22 = vadd.f32 %v909_v54, %v860_v36  ;;  %s12202_s26 = smov 24   ;;  %v2048_v11 = vadd.f32 %v2043_v25, %v2013_v29  ;;  %v2142_v54 = vsel %vm12206_vm4, %v12205_v1, %v12204_v42  ;;  %v5103_v25 = vsel %vm11712_vm2, %v9129_v49, %v9186_v12  ;;  %v12211_v29 = vld [vmem:[#allocation142_spill] sm:$0xff]  ;;  %v12216_v12 = vld [vmem:[#allocation151_spill] sm:$0xff] }
0x32b3   : > { %vm12213_vm4 = vcmask 637952  }
0x32b4   : > { %v9518_v7 = vpop.permute.xlu2 %5887  ;;  %v982_v3 = vadd.f32 %v977_v31, %v914_v22  ;;  %v12210_v31 = vld [vmem:[#allocation48_spill] sm:$0xff] }
0x32b5   : > { %12198 = vst [vmem:[#allocation71_spill] sm:$0xff] %v9518_v7  ;;  %5081 = vrot.lane.b32.xlu1 %v5074_v43, %s12202_s26  ;;  %5377 = vrot.lane.b32.xlu0 %v5371_v0, %s12173_s22  ;;  %v1051_v43 = vadd.f32 %v12203_v9, %v983_v20  ;;  %v2081_v0 = vadd.f32 %v2076_v61, %v2048_v11  ;;  %v12212_v22 = vld [vmem:[#allocation140_spill] sm:$0xff]  ;;  %s11680_s26 = smov 10   ;;  %v12217_v20 = vld [vmem:[#allocation150_spill] sm:$0xff] }
0x32b6   : > { %v1113_v26 = vsel %vm11679_vm6, %v7723_v44, %v12210_v31  ;;  %v2241_v1 = vsel %vm12213_vm4, %v12212_v22, %v12211_v29  ;;  %v1050_v7 = vadd.f32 %v1045_v37, %v982_v3  ;;  %v12214_v61 = vld [vmem:[#allocation52_spill] sm:$0xff]  ;;  %v2358_v11 = vsel %vm12218_vm10, %v12217_v20, %v12216_v12  ;;  %v12219_v9 = vld [vmem:[#allocation362_spill] sm:$0xff] }
0x32b7   : > { %v9532_v36 = vpop.permute.xlu1 %5264  ;;  %v9534_v60 = vpop.permute.xlu0 %4777  ;;  %v2147_v8 = vadd.f32 %v2142_v54, %v2081_v0  ;;  %v1181_v49 = vsel %vm12215_vm11, %v7748_v40, %v12214_v61  ;;  %v5108_v44 = vmul.f32 %v5103_v25, %v7539_v32  ;;  %v5438_v22 = vmul.f32 %v12219_v9, %v7492_v2  ;;  %v12221_v0 = vld [vmem:[#allocation163_spill] sm:$0xff]  ;;  %v12225_v20 = vld [vmem:[#allocation56_spill] sm:$0xff] }
0x32b8   : > { %12207 = vst [vmem:[#allocation69_spill] sm:$0xff] %v9532_v36  ;;  %v1119_v36 = vadd.f32 %v12210_v31, %v1051_v43  ;;  %v1118_v3 = vadd.f32 %v1113_v26, %v1050_v7  ;;  %vm2623_vm4 = vcmask 613376   ;;  %vm12223_vm6 = vcmask 621568   ;;  %v12226_v7 = vld [vmem:[#allocation175_spill] sm:$0xff]  ;;  %v12227_v26 = vld [vmem:[#allocation174_spill] sm:$0xff] }
0x32b9   : > { %12208 = vst [vmem:[#allocation37_spill] sm:$0xff] %v9534_v60  ;;  %v2246_v37 = vadd.f32 %v2241_v1, %v2147_v8  ;;  %vm2724_vm10 = vcmask 605184   ;;  %v1249_v8 = vsel %vm11684_vm14, %v7771_v52, %v12225_v20  ;;  %vm11711_vm11 = vcmask 367616  }
0x32ba   : > { %5516 = vrot.lane.b32.xlu2 %v5508_v47, %s11680_s26  ;;  %v1187_v43 = vadd.f32 %v12214_v61, %v1119_v36  ;;  %v12222_v47 = vld [vmem:[#allocation162_spill] sm:$0xff]  ;;  %s12224_s26 = smov 11   ;;  %v1186_v31 = vadd.f32 %v1181_v49, %v1118_v3  ;;  %v2624_v36 = vsel %vm2623_vm4, %v12227_v26, %v12226_v7  ;;  %v12231_v3 = vld [vmem:[#allocation60_spill] sm:$0xff]  ;;  %vm2827_vm14 = vcmask 588800  }
0x32bb   : > { %v2490_v40 = vsel %vm12223_vm6, %v12222_v47, %v12221_v0  ;;  %v2363_v25 = vadd.f32 %v2358_v11, %v2246_v37  ;;  %vm2792_vm6 = vcmask 596992   ;;  %v12230_v49 = vld [vmem:[#allocation354_spill] sm:$0xff]  ;;  %v1317_v52 = vsel %vm1315_vm8, %v7792_v27, %v12231_v3  ;;  %v12232_v37 = vld [vmem:[#allocation184_spill] sm:$0xff]  ;;  %v12237_v27 = vld [vmem:[#allocation353_spill] sm:$0xff] }
0x32bc   : > { %v9558_v54 = vpop.permute.xlu2 %4976  ;;  %v1255_v24 = vadd.f32 %v12225_v20, %v1187_v43  ;;  %v4639_v11 = vmul.f32 0.0, %v12230_v49  ;;  %v12233_v43 = vld [vmem:[#allocation183_spill] sm:$0xff]  ;;  %v1254_v20 = vadd.f32 %v1249_v8, %v1186_v31  ;;  %v5506_v39 = vmul.f32 %v12237_v27, %v7492_v2 }
0x32bd   : > { %12220 = vst [vmem:[#allocation77_spill] sm:$0xff] %v9558_v54  ;;  %5115 = vrot.lane.b32.xlu1 %v5108_v44, %s12149_s13  ;;  %5444 = vrot.lane.b32.xlu0 %v5438_v22, %s12224_s26  ;;  %v2495_v44 = vadd.f32 %v2490_v40, %v2363_v25  ;;  %v5169_v22 = vsel %vm11711_vm11, %v9238_v18, %v9134_v19  ;;  %v12234_v40 = vld [vmem:[#allocation61_spill] sm:$0xff]  ;;  %v12235_v19 = vld [vmem:[#allocation190_spill] sm:$0xff]  ;;  %s12242_s13 = smov 10   ;;  %vm12246_vm8 = vcmask 523264  }
0x32be   : > { %v2725_v47 = vsel %vm2724_vm10, %v12233_v43, %v12232_v37  ;;  %v1323_v26 = vadd.f32 %v12231_v3, %v1255_v24  ;;  %v1352_v25 = vsel %vm1350_vm9, %v7803_v48, %v12234_v40  ;;  %v12236_v18 = vld [vmem:[#allocation189_spill] sm:$0xff]  ;;  %v5174_v43 = vmul.f32 %v5169_v22, %v7539_v32  ;;  %v12241_v3 = vld [vmem:[#allocation192_spill] sm:$0xff] }
0x32bf   : > { %v9573_v1 = vpop.permute.xlu1 %5788  ;;  %v9575_v61 = vpop.permute.xlu0 %5398  ;;  %v1322_v31 = vadd.f32 %v1317_v52, %v1254_v20  ;;  %v12240_v48 = vld [vmem:[#allocation193_spill] sm:$0xff]  ;;  %v12243_v52 = vld [vmem:[#allocation67_spill] sm:$0xff]  ;;  %v12244_v20 = vld [vmem:[#allocation196_spill] sm:$0xff]  ;;  %vm3774_vm9 = vcmask 375808  }
0x32c0   : > { %12228 = vst [vmem:[#allocation76_spill] sm:$0xff] %v9573_v1  ;;  %v2793_v1 = vsel %vm2792_vm6, %v12236_v18, %v12235_v19  ;;  %v2828_v60 = vsel %vm2827_vm14, %v12241_v3, %v12240_v48 }
0x32c1   : > { %12229 = vst [vmem:[#allocation351_spill] sm:$0xff] %v9575_v61  ;;  %v2629_v61 = vadd.f32 %v2624_v36, %v2495_v44  ;;  %v1358_v36 = vadd.f32 %v12234_v40, %v1323_v26  ;;  %v12239_v44 = vld [vmem:[#allocation64_spill] sm:$0xff]  ;;  %v1357_v18 = vadd.f32 %v1352_v25, %v1322_v31  ;;  %v12245_v26 = vld [vmem:[#allocation195_spill] sm:$0xff]  ;;  %v12249_v31 = vld [vmem:[#allocation201_spill] sm:$0xff] }
0x32c2   : > { %4647 = vrot.lane.b32.xlu2 %v4639_v11, %s12112_s30  ;;  %v1387_v11 = vsel %vm1385_vm3, %v12159_v28, %v12239_v44  ;;  %v2861_v28 = vsel %vm12246_vm8, %v12245_v26, %v12244_v20  ;;  %vm12254_vm8 = vcmask 506880  }
0x32c3   : > { %v2730_v8 = vadd.f32 %v2725_v47, %v2629_v61  ;;  %v1393_v61 = vadd.f32 %v12239_v44, %v1358_v36  ;;  %v1455_v47 = vsel %vm11690_vm13, %v12162_v15, %v12243_v52  ;;  %v12248_v15 = vld [vmem:[#allocation202_spill] sm:$0xff]  ;;  %vm12250_vm13 = vcmask 515072  }
0x32c4   : > { %v9598_v24 = vpop.permute.xlu2 %5532  ;;  %v12251_v44 = vld [vmem:[#allocation78_spill] sm:$0xff] }
0x32c5   : > { %12238 = vst [vmem:[#allocation86_spill] sm:$0xff] %v9598_v24  ;;  %5181 = vrot.lane.b32.xlu1 %v5174_v43, %s12150_s21  ;;  %5512 = vrot.lane.b32.xlu0 %v5506_v39, %s12242_s13  ;;  %v2798_v22 = vadd.f32 %v2793_v1, %v2730_v8  ;;  %v1392_v43 = vadd.f32 %v1387_v11, %v1357_v18  ;;  %v5576_v1 = vmul.f32 0.0, %v9297_v35  ;;  %s7216_s21 = smov 9  }
0x32c6   : > { %v5235_v39 = vsel %vm3774_vm9, %v12161_v45, %v9248_v4  ;;  %v1461_v25 = vadd.f32 %v12243_v52, %v1393_v61  ;;  %v2927_v8 = vsel %vm12250_vm13, %v12249_v31, %v12248_v15  ;;  %v1541_v26 = vsel %vm11692_vm7, %v12165_v5, %v12251_v44  ;;  %v12252_v4 = vld [vmem:[#allocation211_spill] sm:$0xff]  ;;  %v12253_v45 = vld [vmem:[#allocation210_spill] sm:$0xff] }
0x32c7   : > { %v9616_v40 = vpop.permute.xlu1 %4680  ;;  %v9618_v3 = vpop.permute.xlu0 %4695  ;;  %v2833_v24 = vadd.f32 %v2828_v60, %v2798_v22  ;;  %v1460_v36 = vadd.f32 %v1455_v47, %v1392_v43  ;;  %v3026_v11 = vsel %vm12254_vm8, %v12253_v45, %v12252_v4  ;;  %v5240_v18 = vmul.f32 %v5235_v39, %v7539_v32  ;;  %v12255_v22 = vld [vmem:[#allocation375_spill] sm:$0xff]  ;;  %v12262_v39 = vld [vmem:[#allocation96_spill] sm:$0xff] }
0x32c8   : > { %12247 = vst [vmem:[#allocation85_spill] sm:$0xff] %v9618_v3  ;;  %v1547_v60 = vadd.f32 %v12251_v44, %v1461_v25  ;;  %v4637_v61 = vmul.f32 %v12255_v22, %v7492_v2  ;;  %v12256_v52 = vld [vmem:[#allocation87_spill] sm:$0xff]  ;;  %vm12257_vm13 = vcmask 760832   ;;  %v12260_v25 = vld [vmem:[#allocation222_spill] sm:$0xff]  ;;  %vm12261_vm7 = vcmask 498688  }
0x32c9   : > { %v2866_v3 = vadd.f32 %v2861_v28, %v2833_v24  ;;  %v1640_v47 = vsel %vm12257_vm13, %v12170_v16, %v12256_v52  ;;  %v1546_v28 = vadd.f32 %v1541_v26, %v1460_v36  ;;  %vm12263_vm8 = vcmask 752640   ;;  %v12265_v26 = vld [vmem:[#allocation105_spill] sm:$0xff] }
0x32ca   : > { %5584 = vrot.lane.b32.xlu2 %v5576_v1, %s7216_s21  ;;  %v1646_v43 = vadd.f32 %v12256_v52, %v1547_v60  ;;  %v12259_v1 = vld [vmem:[#allocation229_spill] sm:$0xff]  ;;  %v1739_v44 = vsel %vm12263_vm8, %v12175_v59, %v12262_v39  ;;  %vm3673_vm13 = vcmask 384000   ;;  %v1840_v60 = vsel %vm1838_vm5, %v12182_v62, %v12265_v26  ;;  %v12266_v52 = vld [vmem:[#allocation367_spill] sm:$0xff] }
0x32cb   : > { %v2932_v5 = vadd.f32 %v2927_v8, %v2866_v3  ;;  %v3158_v31 = vsel %vm12261_vm7, %v12260_v25, %v12259_v1  ;;  %v1645_v16 = vadd.f32 %v1640_v47, %v1546_v28  ;;  %v4738_v59 = vmul.f32 0.0, %v12266_v52 }
0x32cc   : > { %v9642_v24 = vpop.permute.xlu2 %4897  ;;  %v1745_v3 = vadd.f32 %v12262_v39, %v1646_v43  ;;  %vm3605_vm7 = vcmask 392192   ;;  %vm12284_vm8 = vcmask 637952  }
0x32cd   : > { %12258 = vst [vmem:[#allocation33_spill] sm:$0xff] %v9642_v24  ;;  %5247 = vrot.lane.b32.xlu1 %v5240_v18, %s12153_s0  ;;  %4643 = vrot.lane.b32.xlu0 %v4637_v61, %s12112_s30  ;;  %v3031_v45 = vadd.f32 %v3026_v11, %v2932_v5  ;;  %v5301_v61 = vsel %vm3673_vm13, %v12178_v57, %v9206_v53  ;;  %v12267_v5 = vld [vmem:[#allocation114_spill] sm:$0xff]  ;;  %v12269_v53 = vld [vmem:[#allocation120_spill] sm:$0xff]  ;;  %v12282_v24 = vld [vmem:[#allocation355_spill] sm:$0xff]  ;;  %s12310_s0 = smov 43  }
0x32ce   : > { %v1744_v11 = vadd.f32 %v1739_v44, %v1645_v16  ;;  %v1846_v47 = vadd.f32 %v12265_v26, %v1745_v3  ;;  %v1941_v28 = vsel %vm1939_vm0, %v12185_v30, %v12267_v5  ;;  %v5306_v62 = vmul.f32 %v5301_v61, %v7539_v32  ;;  %v12270_v44 = vld [vmem:[#allocation225_spill] sm:$0xff]  ;;  %v12271_v26 = vld [vmem:[#allocation123_spill] sm:$0xff]  ;;  %v12272_v61 = vld [vmem:[#allocation242_spill] sm:$0xff] }
0x32cf   : > { %v9654_v8 = vpop.permute.xlu1 %5819  ;;  %v9656_v36 = vpop.permute.xlu0 %4877  ;;  %v3163_v18 = vadd.f32 %v3158_v31, %v3031_v45  ;;  %v12268_v31 = vld [vmem:[#allocation365_spill] sm:$0xff]  ;;  %v2009_v57 = vsel %vm2007_vm1, %v12190_v6, %v12269_v53  ;;  %vm12276_vm1 = vcmask 654336  }
0x32d0   : > { %12264 = vst [vmem:[#allocation95_spill] sm:$0xff] %v9654_v8  ;;  %v1845_v43 = vadd.f32 %v1840_v60, %v1744_v11  ;;  %v1947_v25 = vadd.f32 %v12267_v5, %v1846_v47  ;;  %v5574_v39 = vmul.f32 %v12268_v31, %v7492_v2  ;;  %v2044_v60 = vsel %vm2042_vm15, %v12194_v55, %v12271_v26  ;;  %v12275_v5 = vld [vmem:[#allocation126_spill] sm:$0xff] }
0x32d1   : > { %v3235_v45 = vadd.f32 %v12270_v44, %v3163_v18  ;;  %v5367_v55 = vsel %vm3605_vm7, %v12196_v56, %v12169_v14  ;;  %vm12280_vm15 = vcmask 646144   ;;  %v12283_v14 = vld [vmem:[#allocation139_spill] sm:$0xff]  ;;  %v5609_v8 = vmul.f32 %v9316_v13, %v7492_v2 }
0x32d2   : > { %4746 = vrot.lane.b32.xlu2 %v4738_v59, %s12099_s20  ;;  %v1946_v3 = vadd.f32 %v1941_v28, %v1845_v43  ;;  %v2015_v30 = vadd.f32 %v12269_v53, %v1947_v25  ;;  %v2077_v28 = vsel %vm12276_vm1, %v12199_v33, %v12275_v5  ;;  %v12277_v43 = vld [vmem:[#allocation251_spill] sm:$0xff]  ;;  %v5372_v56 = vmul.f32 %v5367_v55, %v7539_v32 }
0x32d3   : > { %v3372_v59 = vadd.f32 %v12272_v61, %v3235_v45  ;;  %v12279_v45 = vld [vmem:[#allocation132_spill] sm:$0xff]  ;;  %vm11700_vm1 = vcmask 400384   ;;  %v12289_v55 = vld [vmem:[#allocation263_spill] sm:$0xff] }
0x32d4   : > { %v9678_v16 = vpop.permute.xlu2 %5048  ;;  %v2014_v11 = vadd.f32 %v2009_v57, %v1946_v3  ;;  %v2050_v6 = vadd.f32 %v12271_v26, %v2015_v30  ;;  %v2143_v3 = vsel %vm12280_vm15, %v12204_v42, %v12279_v45  ;;  %v12281_v30 = vld [vmem:[#allocation257_spill] sm:$0xff]  ;;  %vm12288_vm15 = vcmask 629760  }
0x32d5   : > { %5313 = vrot.lane.b32.xlu1 %v5306_v62, %s12158_s9  ;;  %5580 = vrot.lane.b32.xlu0 %v5574_v39, %s7216_s21  ;;  %v3473_v25 = vadd.f32 %v12277_v43, %v3372_v59  ;;  %v12278_v62 = vld [vmem:[#allocation356_spill] sm:$0xff]  ;;  %s7217_s9 = smov 8  }
0x32d6   : > { %v5611_v39 = vmul.f32 0.0, %v12278_v62  ;;  %v2049_v53 = vadd.f32 %v2044_v60, %v2014_v11  ;;  %v2083_v57 = vadd.f32 %v12275_v5, %v2050_v6  ;;  %v2242_v60 = vsel %vm12284_vm8, %v12211_v29, %v12283_v14  ;;  %v12285_v11 = vld [vmem:[#allocation260_spill] sm:$0xff] }
0x32d7   : > { %v9688_v18 = vpop.permute.xlu1 %4598  ;;  %v9690_v47 = vpop.permute.xlu0 %5466  ;;  %v3541_v26 = vadd.f32 %v12281_v30, %v3473_v25  ;;  %vm12292_vm8 = vcmask 621568  }
0x32d8   : > { %12273 = vst [vmem:[#allocation94_spill] sm:$0xff] %v9688_v18  ;;  %v2082_v33 = vadd.f32 %v2077_v28, %v2049_v53  ;;  %v2149_v59 = vadd.f32 %v12279_v45, %v2083_v57  ;;  %v12287_v28 = vld [vmem:[#allocation152_spill] sm:$0xff] }
0x32d9   : > { %12274 = vst [vmem:[#allocation349_spill] sm:$0xff] %v9690_v47  ;;  %v4736_v47 = vmul.f32 %v12282_v24, %v7492_v2  ;;  %v3576_v6 = vadd.f32 %v12285_v11, %v3541_v26 }
0x32da   : > { %5619 = vrot.lane.b32.xlu2 %v5611_v39, %s7217_s9  ;;  %v2148_v5 = vadd.f32 %v2143_v3, %v2082_v33  ;;  %v2248_v25 = vadd.f32 %v12283_v14, %v2149_v59  ;;  %v2359_v39 = vsel %vm12288_vm15, %v12216_v12, %v12287_v28  ;;  %v12291_v3 = vld [vmem:[#allocation164_spill] sm:$0xff]  ;;  %v12293_v59 = vld [vmem:[#allocation269_spill] sm:$0xff]  ;;  %v5434_v12 = vsel %vm11700_vm1, %v12219_v9, %v12189_v10 }
0x32db   : > { %v3611_v53 = vadd.f32 %v12289_v55, %v3576_v6  ;;  %v2491_v33 = vsel %vm12292_vm8, %v12221_v0, %v12291_v3  ;;  %v5439_v18 = vmul.f32 %v5434_v12, %v7539_v32  ;;  %v12298_v10 = vld [vmem:[#allocation185_spill] sm:$0xff]  ;;  %vm11699_vm15 = vcmask 408576  }
0x32dc   : > { %v9714_v42 = vpop.permute.xlu2 %5083  ;;  %v2247_v57 = vadd.f32 %v2242_v60, %v2148_v5  ;;  %v2365_v29 = vadd.f32 %v12287_v28, %v2248_v25  ;;  %v12295_v5 = vld [vmem:[#allocation176_spill] sm:$0xff]  ;;  %v12296_v28 = vld [vmem:[#allocation278_spill] sm:$0xff]  ;;  %v2726_v9 = vsel %vm2724_vm10, %v12232_v37, %v12298_v10  ;;  %vm12316_vm8 = vcmask 506880  }
0x32dd   : > { %12286 = vst [vmem:[#allocation35_spill] sm:$0xff] %v9714_v42  ;;  %5379 = vrot.lane.b32.xlu1 %v5372_v56, %s12173_s22  ;;  %4742 = vrot.lane.b32.xlu0 %v4736_v47, %s12099_s20  ;;  %v3679_v56 = vadd.f32 %v12293_v59, %v3611_v53  ;;  %v12294_v47 = vld [vmem:[#allocation369_spill] sm:$0xff]  ;;  %v2625_v25 = vsel %vm2623_vm4, %v12226_v7, %v12295_v5  ;;  %s12297_s22 = smov 44   ;;  %v12311_v42 = vld [vmem:[#allocation203_spill] sm:$0xff]  ;;  %vm3570_vm1 = vcmask 457728  }
0x32de   : > { %v4836_v14 = vmul.f32 %v12294_v47, %v7492_v2  ;;  %v2364_v60 = vadd.f32 %v2359_v39, %v2247_v57  ;;  %v2497_v6 = vadd.f32 %v12291_v3, %v2365_v29  ;;  %v12299_v39 = vld [vmem:[#allocation290_spill] sm:$0xff] }
0x32df   : > { %v9724_v45 = vpop.permute.xlu1 %4779  ;;  %v9726_v26 = vpop.permute.xlu0 %4794 }
0x32e0   : > { %12290 = vst [vmem:[#allocation104_spill] sm:$0xff] %v9726_v26  ;;  %v3780_v26 = vadd.f32 %v12296_v28, %v3679_v56  ;;  %v2496_v0 = vadd.f32 %v2491_v33, %v2364_v60  ;;  %v2631_v53 = vadd.f32 %v12295_v5, %v2497_v6  ;;  %v12301_v33 = vld [vmem:[#allocation191_spill] sm:$0xff]  ;;  %v12304_v5 = vld [vmem:[#allocation194_spill] sm:$0xff] }
0x32e1   : > { %v2794_v56 = vsel %vm2792_vm6, %v12235_v19, %v12301_v33  ;;  %v5502_v19 = vsel %vm11699_vm15, %v12237_v27, %v12209_v51  ;;  %vm12308_vm6 = vcmask 523264   ;;  %v12313_v27 = vld [vmem:[#allocation329_spill] sm:$0xff]  ;;  %vm11701_vm15 = vcmask 482304  }
0x32e2   : > { %4842 = vrot.lane.b32.xlu2 %v4836_v14, %s12297_s22  ;;  %v3914_v57 = vadd.f32 %v12299_v39, %v3780_v26  ;;  %v2630_v7 = vadd.f32 %v2625_v25, %v2496_v0  ;;  %v2732_v3 = vadd.f32 %v12298_v10, %v2631_v53  ;;  %v12302_v14 = vld [vmem:[#allocation302_spill] sm:$0xff]  ;;  %v2829_v25 = vsel %vm2827_vm14, %v12240_v48, %v12304_v5 }
0x32e3   : > { %v5631_v48 = vld [vmem:[#allocation8 + $0x9b0] sm:$0xff]  ;;  %vm12312_vm14 = vcmask 515072  }
0x32e4   : > { %v9751_v29 = vpop.permute.xlu2 %5117  ;;  %v4048_v12 = vadd.f32 %v12302_v14, %v3914_v57  ;;  %v2731_v60 = vadd.f32 %v2726_v9, %v2630_v7  ;;  %v2800_v37 = vadd.f32 %v12301_v33, %v2732_v3  ;;  %v12307_v57 = vld [vmem:[#allocation197_spill] sm:$0xff]  ;;  %v12309_v3 = vld [vmem:[#allocation323_spill] sm:$0xff]  ;;  %v2928_v51 = vsel %vm12312_vm14, %v12248_v15, %v12311_v42 }
0x32e5   : > { %12300 = vst [vmem:[#allocation103_spill] sm:$0xff] %v9751_v29  ;;  %5446 = vrot.lane.b32.xlu1 %v5439_v18, %s12224_s26  ;;  %5615 = vrot.lane.b32.xlu0 %v5609_v8, %s7217_s9  ;;  %v12305_v18 = vld [vmem:[#allocation314_spill] sm:$0xff]  ;;  %v2862_v7 = vsel %vm12308_vm6, %v12244_v20, %v12307_v57  ;;  %v5507_v29 = vmul.f32 %v5502_v19, %v7539_v32  ;;  %vm12319_vm6 = vcmask 498688   ;;  %vm12323_vm14 = vcmask 252928  }
0x32e6   : > { %v4182_v0 = vadd.f32 %v12305_v18, %v4048_v12  ;;  %v12306_v8 = vld [vmem:[#allocation358_spill] sm:$0xff]  ;;  %v2799_v10 = vadd.f32 %v2794_v56, %v2731_v60  ;;  %v2835_v9 = vadd.f32 %v12304_v5, %v2800_v37  ;;  %v12315_v5 = vld [vmem:[#allocation212_spill] sm:$0xff] }
0x32e7   : > { %v9761_v26 = vpop.permute.xlu1 %5852  ;;  %v9763_v6 = vpop.permute.xlu0 %4978  ;;  %v4937_v53 = vmul.f32 %v12306_v8, %v7492_v2 }
0x32e8   : > { %12303 = vst [vmem:[#allocation113_spill] sm:$0xff] %v9761_v26  ;;  %v4283_v33 = vadd.f32 %v12309_v3, %v4182_v0  ;;  %v2834_v12 = vadd.f32 %v2829_v25, %v2799_v10  ;;  %v2868_v26 = vadd.f32 %v12307_v57, %v2835_v9  ;;  %v3027_v25 = vsel %vm12316_vm8, %v12252_v4, %v12315_v5  ;;  %v12317_v0 = vld [vmem:[#allocation332_spill] sm:$0xff]  ;;  %v12318_v10 = vld [vmem:[#allocation226_spill] sm:$0xff] }
0x32e9   : > { %v3159_v9 = vsel %vm12319_vm6, %v12259_v1, %v12318_v10  ;;  %vm12324_vm8 = vcmask 269312   ;;  %vm12326_vm6 = vcmask 490496  }
0x32ea   : > { %4943 = vrot.lane.b32.xlu2 %v4937_v53, %s12310_s0  ;;  %v4351_v56 = vadd.f32 %v12313_v27, %v4283_v33  ;;  %v2867_v37 = vadd.f32 %v2862_v7, %v2834_v12  ;;  %v2934_v20 = vadd.f32 %v12311_v42, %v2868_v26  ;;  %v4633_v7 = vsel %vm12323_vm14, %v12255_v22, %v12230_v49  ;;  %v12325_v12 = vld [vmem:[#allocation232_spill] sm:$0xff] }
0x32eb   : > { %v4832_v4 = vsel %vm12324_vm8, %v12294_v47, %v9338_v21  ;;  %v5662_v33 = vmul.f32 %v9353_v50, %v7492_v2  ;;  %vm11702_vm14 = vcmask 474112   ;;  %v4638_v22 = vmul.f32 %v4633_v7, %v7539_v32  ;;  %v12333_v7 = vld [vmem:[#allocation252_spill] sm:$0xff] }
0x32ec   : > { %v9786_v60 = vpop.permute.xlu2 %5183  ;;  %v4386_v53 = vadd.f32 %v12317_v0, %v4351_v56  ;;  %v2933_v19 = vadd.f32 %v2928_v51, %v2867_v37  ;;  %v3033_v15 = vadd.f32 %v12315_v5, %v2934_v20  ;;  %v3231_v51 = vsel %vm12326_vm6, %v12270_v44, %v12325_v12  ;;  %v12327_v56 = vld [vmem:[#allocation341_spill] sm:$0xff]  ;;  %v12328_v20 = vld [vmem:[#allocation244_spill] sm:$0xff]  ;;  %v12329_v5 = vld [vmem:[#allocation243_spill] sm:$0xff] }
0x32ed   : > { %12314 = vst [vmem:[#allocation112_spill] sm:$0xff] %v9786_v60  ;;  %5514 = vrot.lane.b32.xlu1 %v5507_v29, %s12242_s13  ;;  %5635 = vrot.lane.b32.xlu0 %v5631_v48, %s11963_s17  ;;  %v12322_v29 = vld [vmem:[#allocation335_spill] sm:$0xff]  ;;  %v4837_v47 = vmul.f32 %v4832_v4, %v7539_v32  ;;  %vm11707_vm8 = vcmask 416768   ;;  %vm3535_vm6 = vcmask 465920   ;;  %s12487_s13 = smov 123  }
0x32ee   : > { %v4420_v26 = vadd.f32 %v12322_v29, %v4386_v53  ;;  %v3032_v48 = vadd.f32 %v3027_v25, %v2933_v19  ;;  %v3165_v1 = vadd.f32 %v12318_v10, %v3033_v15  ;;  %v3368_v25 = vsel %vm11701_vm15, %v12329_v5, %v12328_v20  ;;  %v12330_v53 = vld [vmem:[#allocation352_spill] sm:$0xff] }
0x32ef   : > { %v9799_v57 = vpop.permute.xlu1 %4697  ;;  %v9801_v42 = vpop.permute.xlu0 %5534 }
0x32f0   : > { %12320 = vst [vmem:[#allocation373_spill] sm:$0xff] %v9799_v57  ;;  %v4488_v37 = vadd.f32 %v12327_v56, %v4420_v26  ;;  %v3164_v49 = vadd.f32 %v3159_v9, %v3032_v48  ;;  %v3237_v44 = vadd.f32 %v12325_v12, %v3165_v1  ;;  %v3367_v9 = vsel %vm11701_vm15, %v12272_v61, %v12329_v5  ;;  %v12332_v26 = vld [vmem:[#allocation253_spill] sm:$0xff]  ;;  %v12335_v12 = vld [vmem:[#allocation259_spill] sm:$0xff]  ;;  %v12337_v61 = vld [vmem:[#allocation372_spill] sm:$0xff] }
0x32f1   : > { %12321 = vst [vmem:[#allocation119_spill] sm:$0xff] %v9801_v42  ;;  %v3469_v4 = vsel %vm11702_vm14, %v12333_v7, %v12332_v26  ;;  %v3468_v1 = vsel %vm11702_vm14, %v12277_v43, %v12333_v7  ;;  %vm12338_vm15 = vcmask 277504   ;;  %v12339_v5 = vld [vmem:[#allocation374_spill] sm:$0xff]  ;;  %v12340_v7 = vld [vmem:[#allocation31_spill] sm:$0xff]  ;;  %vm12342_vm14 = vcmask 1039360  }
0x32f2   : > { %5668 = vrot.lane.b32.xlu2 %v5662_v33, %s11876_s28  ;;  %v4588_v19 = vadd.f32 %v12330_v53, %v4488_v37  ;;  %v3236_v10 = vadd.f32 %v3231_v51, %v3164_v49  ;;  %v12334_v33 = vld [vmem:[#allocation376_spill] sm:$0xff]  ;;  %v3374_v37 = vadd.f32 %v3368_v25, %v3237_v44  ;;  %v12336_v51 = vld [vmem:[#allocation258_spill] sm:$0xff]  ;;  %v4933_v20 = vsel %vm12338_vm15, %v12306_v8, %v12337_v61  ;;  %v12344_v8 = vld [vmem:[#allocation261_spill] sm:$0xff] }
0x32f3   : > { %v3537_v49 = vsel %vm3535_vm6, %v12336_v51, %v12335_v12  ;;  %v5570_v25 = vsel %vm11707_vm8, %v12268_v31, %v9297_v35  ;;  %v12341_v12 = vld [vmem:[#allocation30_spill] sm:$0xff]  ;;  %v3536_v57 = vsel %vm3535_vm6, %v12281_v30, %v12336_v51  ;;  %v3571_v30 = vsel %vm3570_vm1, %v12285_v11, %v12344_v8  ;;  %v12348_v51 = vld [vmem:[#allocation264_spill] sm:$0xff]  ;;  %v12353_v11 = vld [vmem:[#allocation271_spill] sm:$0xff] }
0x32f4   : > { %v9824_v15 = vpop.permute.xlu2 %5249  ;;  %v4687_v48 = vadd.f32 %v12334_v33, %v4588_v19  ;;  %v5005_v19 = vmul.f32 %v12339_v5, %v7492_v2  ;;  %v3373_v44 = vadd.f32 %v3367_v9, %v3236_v10  ;;  %v3475_v26 = vadd.f32 %v3469_v4, %v3374_v37  ;;  %v12346_v4 = vld [vmem:[#allocation29_spill] sm:$0xff] }
0x32f5   : > { %12331 = vst [vmem:[#allocation118_spill] sm:$0xff] %v9824_v15  ;;  %4645 = vrot.lane.b32.xlu1 %v4638_v22, %s12112_s30  ;;  %4844 = vrot.lane.b32.xlu0 %v4837_v47, %s12297_s22  ;;  %v942_v42 = vsel %vm12342_vm14, %v12341_v12, %v12340_v7  ;;  %v12343_v15 = vld [vmem:[#allocation262_spill] sm:$0xff]  ;;  %s12345_s30 = smov 42   ;;  %v4938_v10 = vmul.f32 %v4933_v20, %v7539_v32  ;;  %v12347_v37 = vld [vmem:[#allocation265_spill] sm:$0xff]  ;;  %vm12352_vm15 = vcmask 1031168   ;;  %vm12361_vm14 = vcmask 498688  }
0x32f6   : > { %v4786_v43 = vadd.f32 %v9344_v63, %v4687_v48  ;;  %v3572_v60 = vsel %vm3570_vm1, %v12344_v8, %v12343_v15  ;;  %v3474_v35 = vadd.f32 %v3468_v1, %v3373_v44  ;;  %v3543_v31 = vadd.f32 %v3537_v49, %v3475_v26  ;;  %v12354_v26 = vld [vmem:[#allocation270_spill] sm:$0xff]  ;;  %v12368_v7 = vld [vmem:[#allocation292_spill] sm:$0xff] }
0x32f7   : > { %v9841_v22 = vpop.permute.xlu1 %4879  ;;  %v9843_v47 = vpop.permute.xlu0 %5044  ;;  %v5575_v9 = vmul.f32 %v5570_v25, %v7539_v32  ;;  %v876_v48 = vmul.f32 0.0, %v12346_v4  ;;  %v3607_v15 = vsel %vm3605_vm7, %v12348_v51, %v12347_v37  ;;  %v12351_v25 = vld [vmem:[#allocation41_spill] sm:$0xff]  ;;  %v3675_v8 = vsel %vm3673_vm13, %v12354_v26, %v12353_v11 }
0x32f8   : > { %v4887_v61 = vadd.f32 %v9440_v23, %v4786_v43  ;;  %v3542_v1 = vadd.f32 %v3536_v57, %v3474_v35  ;;  %v3578_v49 = vadd.f32 %v3572_v60, %v3543_v31  ;;  %v3606_v60 = vsel %vm3605_vm7, %v12289_v55, %v12348_v51  ;;  %v12355_v35 = vld [vmem:[#allocation280_spill] sm:$0xff]  ;;  %v12356_v31 = vld [vmem:[#allocation279_spill] sm:$0xff] }
0x32f9   : > { %v947_v20 = vadd.f32 %v942_v42, %v876_v48  ;;  %v3776_v42 = vsel %vm3774_vm9, %v12356_v31, %v12355_v35  ;;  %v12358_v48 = vld [vmem:[#allocation361_spill] sm:$0xff]  ;;  %vm12359_vm1 = vcmask 261120   ;;  %vm12364_vm6 = vcmask 1022976  }
0x32fa   : > { %5011 = vrot.lane.b32.xlu2 %v5005_v19, %s12345_s30  ;;  %v4988_v43 = vadd.f32 %v9558_v54, %v4887_v61  ;;  %v12350_v19 = vld [vmem:[#allocation42_spill] sm:$0xff]  ;;  %v3577_v61 = vadd.f32 %v3571_v30, %v3542_v1  ;;  %v3613_v57 = vadd.f32 %v3607_v15, %v3578_v49  ;;  %v4732_v30 = vsel %vm12359_vm1, %v12282_v24, %v12266_v52  ;;  %v12363_v1 = vld [vmem:[#allocation45_spill] sm:$0xff]  ;;  %v12369_v54 = vld [vmem:[#allocation291_spill] sm:$0xff] }
0x32fb   : > { %v1010_v44 = vsel %vm12352_vm15, %v12351_v25, %v12350_v19  ;;  %v5695_v25 = vmul.f32 %v12358_v48, %v7492_v2  ;;  %v12362_v15 = vld [vmem:[#allocation46_spill] sm:$0xff]  ;;  %v3674_v11 = vsel %vm3673_vm13, %v12293_v59, %v12354_v26  ;;  %v12366_v19 = vld [vmem:[#allocation49_spill] sm:$0xff]  ;;  %vm12367_vm15 = vcmask 1014784  }
0x32fc   : > { %v9874_v12 = vpop.permute.xlu2 %5315  ;;  %v5056_v37 = vadd.f32 %v9843_v47, %v4988_v43  ;;  %v12360_v43 = vld [vmem:[#allocation360_spill] sm:$0xff]  ;;  %v1078_v49 = vsel %vm12364_vm6, %v12363_v1, %v12362_v15  ;;  %v3681_v35 = vadd.f32 %v3675_v8, %v3613_v57  ;;  %v3612_v52 = vadd.f32 %v3606_v60, %v3577_v61  ;;  %v12372_v57 = vld [vmem:[#allocation54_spill] sm:$0xff] }
0x32fd   : > { %12349 = vst [vmem:[#allocation38_spill] sm:$0xff] %v9874_v12  ;;  %5582 = vrot.lane.b32.xlu1 %v5575_v9, %s7216_s21  ;;  %4945 = vrot.lane.b32.xlu0 %v4938_v10, %s12310_s0  ;;  %v5658_v55 = vsel %vm12361_vm14, %v9353_v50, %v12360_v43  ;;  %v12365_v12 = vld [vmem:[#allocation50_spill] sm:$0xff]  ;;  %v3910_v50 = vsel %vm11711_vm11, %v12369_v54, %v12368_v7  ;;  %v12370_v8 = vld [vmem:[#allocation304_spill] sm:$0xff]  ;;  %vm11708_vm1 = vcmask 351232   ;;  %vm5604_vm14 = vcmask 424960  }
0x32fe   : > { %v1146_v24 = vsel %vm12367_vm15, %v12366_v19, %v12365_v12  ;;  %v3782_v1 = vadd.f32 %v3776_v42, %v3681_v35  ;;  %v4737_v59 = vmul.f32 %v4732_v30, %v7539_v32  ;;  %v3680_v26 = vadd.f32 %v3674_v11, %v3612_v52  ;;  %v12371_v19 = vld [vmem:[#allocation303_spill] sm:$0xff] }
0x32ff   : > { %v9891_v10 = vpop.permute.xlu1 %5885  ;;  %v9893_v9 = vpop.permute.xlu0 %5079  ;;  %v4044_v61 = vsel %vm11712_vm2, %v12371_v19, %v12370_v8  ;;  %vm12374_vm6 = vcmask 1006592   ;;  %vm11709_vm15 = vcmask 343040   ;;  %vm12381_vm8 = vcmask 998400  }
0x3300   : > { %12357 = vst [vmem:[#allocation36_spill] sm:$0xff] %v9891_v10  ;;  %v5091_v51 = vadd.f32 %v9893_v9, %v5056_v37  ;;  %v1015_v10 = vadd.f32 %v1010_v44, %v947_v20  ;;  %v3775_v37 = vsel %vm3774_vm9, %v12296_v28, %v12356_v31  ;;  %v5663_v20 = vmul.f32 %v5658_v55, %v7539_v32  ;;  %v12373_v31 = vld [vmem:[#allocation53_spill] sm:$0xff]  ;;  %v12375_v55 = vld [vmem:[#allocation316_spill] sm:$0xff] }
0x3301   : > { %v3916_v7 = vadd.f32 %v3910_v50, %v3782_v1  ;;  %v1214_v42 = vsel %vm12374_vm6, %v12373_v31, %v12372_v57  ;;  %vm12378_vm6 = vcmask 285696   ;;  %v12379_v1 = vld [vmem:[#allocation58_spill] sm:$0xff] }
0x3302   : > { %5701 = vrot.lane.b32.xlu2 %v5695_v25, %s11892_s27  ;;  %v1083_v44 = vadd.f32 %v1078_v49, %v1015_v10  ;;  %v3781_v10 = vadd.f32 %v3775_v37, %v3680_v26  ;;  %v3909_v25 = vsel %vm11711_vm11, %v12299_v39, %v12369_v54  ;;  %v12376_v49 = vld [vmem:[#allocation315_spill] sm:$0xff]  ;;  %v5001_v50 = vsel %vm12378_vm6, %v12339_v5, %v9387_v58  ;;  %v12383_v26 = vld [vmem:[#allocation65_spill] sm:$0xff] }
0x3303   : > { %v4050_v30 = vadd.f32 %v4044_v61, %v3916_v7  ;;  %v4178_v11 = vsel %vm11708_vm1, %v12376_v49, %v12375_v55  ;;  %v5140_v54 = vmul.f32 %v9418_v38, %v7492_v2  ;;  %v12384_v5 = vld [vmem:[#allocation325_spill] sm:$0xff]  ;;  %v12385_v7 = vld [vmem:[#allocation324_spill] sm:$0xff]  ;;  %vm4380_vm6 = vcmask 326656  }
0x3304   : > { %v9925_v60 = vpop.permute.xlu2 %5381  ;;  %v1151_v28 = vadd.f32 %v1146_v24, %v1083_v44  ;;  %v5605_v24 = vsel %vm5604_vm14, %v9316_v13, %v12278_v62  ;;  %v12382_v44 = vld [vmem:[#allocation66_spill] sm:$0xff]  ;;  %v3915_v61 = vadd.f32 %v3909_v25, %v3781_v10  ;;  %v4043_v13 = vsel %vm11712_vm2, %v12302_v14, %v12371_v19  ;;  %v12386_v25 = vld [vmem:[#allocation331_spill] sm:$0xff] }
0x3305   : > { %4744 = vrot.lane.b32.xlu1 %v4737_v59, %s12099_s20  ;;  %5670 = vrot.lane.b32.xlu0 %v5663_v20, %s11876_s28  ;;  %v12380_v59 = vld [vmem:[#allocation57_spill] sm:$0xff]  ;;  %v1420_v8 = vsel %vm853_vm12, %v12383_v26, %v12382_v44  ;;  %v4184_v62 = vadd.f32 %v4178_v11, %v4050_v30  ;;  %v4279_v31 = vsel %vm11709_vm15, %v12385_v7, %v12384_v5  ;;  %vm4345_vm14 = vcmask 334848   ;;  %v12387_v14 = vld [vmem:[#allocation330_spill] sm:$0xff]  ;;  %v12394_v26 = vld [vmem:[#allocation83_spill] sm:$0xff]  ;;  %s12842_s20 = sld [smem:[#allocation389_spill]] }
0x3306   : > { %v1219_v37 = vadd.f32 %v1214_v42, %v1151_v28  ;;  %v1282_v20 = vsel %vm12381_vm8, %v12380_v59, %v12379_v1  ;;  %v5006_v28 = vmul.f32 %v5001_v50, %v7539_v32  ;;  %v4177_v10 = vsel %vm11708_vm1, %v12305_v18, %v12376_v49  ;;  %v12390_v50 = vld [vmem:[#allocation74_spill] sm:$0xff]  ;;  %v12393_v59 = vld [vmem:[#allocation333_spill] sm:$0xff] }
0x3307   : > { %v9938_v35 = vpop.permute.xlu1 %4796  ;;  %v9940_v52 = vpop.permute.xlu0 %5113  ;;  %v4347_v19 = vsel %vm4345_vm14, %v12387_v14, %v12386_v25  ;;  %v4049_v55 = vadd.f32 %v4043_v13, %v3915_v61  ;;  %v4285_v11 = vadd.f32 %v4279_v31, %v4184_v62  ;;  %vm12391_vm8 = vcmask 908288   ;;  %v12392_v49 = vld [vmem:[#allocation334_spill] sm:$0xff] }
0x3308   : > { %12377 = vst [vmem:[#allocation122_spill] sm:$0xff] %v9938_v35  ;;  %v5124_v39 = vadd.f32 %v9940_v52, %v5091_v51  ;;  %v5610_v51 = vmul.f32 %v5605_v24, %v7539_v32  ;;  %v1287_v42 = vadd.f32 %v1282_v20, %v1219_v37  ;;  %v4278_v18 = vsel %vm11709_vm15, %v12309_v3, %v12385_v7  ;;  %v12395_v61 = vld [vmem:[#allocation82_spill] sm:$0xff] }
0x3309   : > { %v4382_v20 = vsel %vm4380_vm6, %v12393_v59, %v12392_v49  ;;  %vm12396_vm1 = vcmask 900096   ;;  %v4183_v62 = vadd.f32 %v4177_v10, %v4049_v55  ;;  %v4353_v5 = vadd.f32 %v4347_v19, %v4285_v11  ;;  %v12402_v19 = vld [vmem:[#allocation91_spill] sm:$0xff] }
0x330a   : > { %5146 = vrot.lane.b32.xlu2 %v5140_v54, %s12132_s15  ;;  %v1425_v24 = vadd.f32 %v1420_v8, %v1287_v42  ;;  %v12389_v54 = vld [vmem:[#allocation73_spill] sm:$0xff]  ;;  %v1606_v13 = vsel %vm12396_vm1, %v12395_v61, %v12394_v26  ;;  %v4346_v8 = vsel %vm4345_vm14, %v12313_v27, %v12387_v14  ;;  %v12398_v42 = vld [vmem:[#allocation336_spill] sm:$0xff]  ;;  %vm12400_vm15 = vcmask 506880   ;;  %v12404_v61 = vld [vmem:[#allocation343_spill] sm:$0xff] }
0x330b   : > { %v1507_v37 = vsel %vm12391_vm8, %v12390_v50, %v12389_v54  ;;  %vm12399_vm8 = vcmask 261120   ;;  %v5691_v7 = vsel %vm12400_vm15, %v12358_v48, %v9295_v41  ;;  %v5728_v25 = vmul.f32 %v9314_v34, %v7492_v2  ;;  %v12401_v14 = vld [vmem:[#allocation92_spill] sm:$0xff]  ;;  %v5632_v35 = vld [vmem:[#allocation8 + $0x9b8] sm:$0xff] }
0x330c   : > { %v9971_v30 = vpop.permute.xlu2 %5448  ;;  %v1512_v55 = vadd.f32 %v1507_v37, %v1425_v24  ;;  %v4284_v50 = vadd.f32 %v4278_v18, %v4183_v62  ;;  %v4388_v27 = vadd.f32 %v4382_v20, %v4353_v5  ;;  %vm12403_vm1 = vcmask 891904   ;;  %v12407_v18 = vld [vmem:[#allocation101_spill] sm:$0xff]  ;;  %v12408_v20 = vld [vmem:[#allocation100_spill] sm:$0xff] }
0x330d   : > { %12388 = vst [vmem:[#allocation121_spill] sm:$0xff] %v9971_v30  ;;  %5617 = vrot.lane.b32.xlu1 %v5610_v51, %s7217_s9  ;;  %5013 = vrot.lane.b32.xlu0 %v5006_v28, %s12345_s30  ;;  %v12397_v28 = vld [vmem:[#allocation337_spill] sm:$0xff]  ;;  %v1705_v11 = vsel %vm12403_vm1, %v12402_v19, %v12401_v14  ;;  %v4381_v49 = vsel %vm4380_vm6, %v12317_v0, %v12393_v59  ;;  %vm12406_vm14 = vcmask 252928   ;;  %vm12409_vm15 = vcmask 883712  }
0x330e   : > { %v4416_v3 = vsel %vm12399_vm8, %v12398_v42, %v12397_v28  ;;  %v12405_v28 = vld [vmem:[#allocation342_spill] sm:$0xff]  ;;  %v1611_v30 = vadd.f32 %v1606_v13, %v1512_v55  ;;  %v5696_v37 = vmul.f32 %v5691_v7, %v7539_v32  ;;  %v1805_v62 = vsel %vm12409_vm15, %v12408_v20, %v12407_v18  ;;  %v12410_v59 = vld [vmem:[#allocation357_spill] sm:$0xff] }
0x330f   : > { %v4981_v31 = vpop.permute.xlu1 %4980  ;;  %v9990_v51 = vpop.permute.xlu0 %5179  ;;  %v4484_v48 = vsel %vm12406_vm14, %v12405_v28, %v12404_v61  ;;  %v4422_v24 = vadd.f32 %v4416_v3, %v4388_v27  ;;  %v4415_v0 = vsel %vm12399_vm8, %v12322_v29, %v12398_v42  ;;  %vm12411_vm6 = vcmask 244736   ;;  %v12412_v3 = vld [vmem:[#allocation110_spill] sm:$0xff]  ;;  %v12413_v7 = vld [vmem:[#allocation109_spill] sm:$0xff]  ;;  %v12419_v61 = vld [vmem:[#allocation364_spill] sm:$0xff] }
0x3310   : > { %v5190_v10 = vadd.f32 %v9990_v51, %v5124_v39  ;;  %v4352_v39 = vadd.f32 %v4346_v8, %v4284_v50  ;;  %v4584_v5 = vsel %vm12411_vm6, %v12410_v59, %v9351_v46  ;;  %vm12414_vm1 = vcmask 875520  }
0x3311   : > { %v4490_v8 = vadd.f32 %v4484_v48, %v4422_v24  ;;  %v1906_v55 = vsel %vm12414_vm1, %v12413_v7, %v12412_v3  ;;  %vm12415_vm14 = vcmask 236544   ;;  %vm12416_vm15 = vcmask 252928  }
0x3312   : > { %5734 = vrot.lane.b32.xlu2 %v5728_v25, %s11927_s5  ;;  %v1710_v25 = vadd.f32 %v1705_v11, %v1611_v30  ;;  %v4387_v13 = vadd.f32 %v4381_v49, %v4352_v39  ;;  %v4683_v29 = vsel %vm12415_vm14, %v9420_v17, %v9616_v40  ;;  %v4483_v46 = vsel %vm12416_vm15, %v12327_v56, %v12405_v28  ;;  %v12418_v11 = vld [vmem:[#allocation366_spill] sm:$0xff]  ;;  %v12420_v40 = vld [vmem:[#allocation37_spill] sm:$0xff]  ;;  %v12422_v56 = vld [vmem:[#allocation116_spill] sm:$0xff] }
0x3313   : > { %v4590_v30 = vadd.f32 %v4584_v5, %v4490_v8  ;;  %v5206_v49 = vmul.f32 %v12418_v11, %v7492_v2  ;;  %v5136_v48 = vsel %vm11711_vm11, %v9418_v38, %v12419_v61  ;;  %vm12421_vm8 = vcmask 228352   ;;  %v12423_v28 = vld [vmem:[#allocation115_spill] sm:$0xff] }
0x3314   : > { %v10021_v19 = vpop.permute.xlu2 %5516  ;;  %v1810_v42 = vadd.f32 %v1805_v62, %v1710_v25  ;;  %v4421_v50 = vadd.f32 %v4415_v0, %v4387_v13  ;;  %v4782_v39 = vsel %vm12421_vm8, %v12420_v40, %v9724_v45  ;;  %vm12424_vm6 = vcmask 867328   ;;  %v12425_v0 = vld [vmem:[#allocation128_spill] sm:$0xff]  ;;  %v12426_v5 = vld [vmem:[#allocation127_spill] sm:$0xff] }
0x3315   : > { %5637 = vrot.lane.b32.xlu1 %v5632_v35, %s11963_s17  ;;  %5703 = vrot.lane.b32.xlu0 %v5696_v37, %s11892_s27  ;;  %v1974_v20 = vsel %vm12424_vm6, %v12423_v28, %v12422_v56  ;;  %v4689_v62 = vadd.f32 %v4683_v29, %v4590_v30  ;;  %vm4881_vm1 = vcmask 220160   ;;  %v2109_v25 = vsel %vm1385_vm3, %v12426_v5, %v12425_v0  ;;  %v12439_v28 = vld [vmem:[#allocation62_spill] sm:$0xff] }
0x3316   : > { %v1911_v37 = vadd.f32 %v1906_v55, %v1810_v42  ;;  %v4489_v13 = vadd.f32 %v4483_v46, %v4421_v50  ;;  %vm12427_vm14 = vcmask 244736   ;;  %v4883_v45 = vsel %vm4881_vm1, %v9656_v36, %v9841_v22  ;;  %v12430_v50 = vld [vmem:[#allocation137_spill] sm:$0xff]  ;;  %v12431_v46 = vld [vmem:[#allocation136_spill] sm:$0xff] }
0x3317   : > { %v10034_v27 = vpop.permute.xlu1 %4895  ;;  %v10036_v35 = vpop.permute.xlu0 %5245  ;;  %v4583_v38 = vsel %vm12427_vm14, %v12330_v53, %v12410_v59  ;;  %v5141_v8 = vmul.f32 %v5136_v48, %v7539_v32  ;;  %v4788_v7 = vadd.f32 %v4782_v39, %v4689_v62  ;;  %vm4982_vm15 = vcmask 211968   ;;  %v12434_v48 = vld [vmem:[#allocation147_spill] sm:$0xff]  ;;  %v12437_v39 = vld [vmem:[#allocation32_spill] sm:$0xff] }
0x3318   : > { %12417 = vst [vmem:[#allocation370_spill] sm:$0xff] %v10034_v27  ;;  %v5256_v24 = vadd.f32 %v10036_v35, %v5190_v10  ;;  %v4838_v10 = vmul.f32 0.0, %v9338_v21  ;;  %v1979_v55 = vadd.f32 %v1974_v20, %v1911_v37  ;;  %vm12428_vm8 = vcmask 236544   ;;  %v12464_v27 = vld [vmem:[#allocation198_spill] sm:$0xff] }
0x3319   : > { %v4682_v29 = vsel %vm12428_vm8, %v12334_v33, %v9420_v17  ;;  %v4984_v53 = vsel %vm4982_vm15, %v9763_v6, %v4981_v31  ;;  %v4589_v42 = vadd.f32 %v4583_v38, %v4489_v13  ;;  %v4889_v22 = vadd.f32 %v4883_v45, %v4788_v7 }
0x331a   : > { %5212 = vrot.lane.b32.xlu2 %v5206_v49, %s12106_s3  ;;  %vm5050_vm6 = vcmask 203776   ;;  %v2114_v21 = vadd.f32 %v2109_v25, %v1979_v55  ;;  %vm12432_vm14 = vcmask 777216   ;;  %v12433_v49 = vld [vmem:[#allocation148_spill] sm:$0xff]  ;;  %vm12435_vm8 = vcmask 769024  }
0x331b   : > { %v2208_v30 = vsel %vm12432_vm14, %v12431_v46, %v12430_v50  ;;  %v2325_v17 = vsel %vm12435_vm8, %v12434_v48, %v12433_v49  ;;  %vm12436_vm11 = vcmask 228352   ;;  %v4688_v31 = vadd.f32 %v4682_v29, %v4589_v42  ;;  %v12442_v55 = vld [vmem:[#allocation160_spill] sm:$0xff]  ;;  %v12443_v29 = vld [vmem:[#allocation159_spill] sm:$0xff]  ;;  %v12445_v42 = vld [vmem:[#allocation77_spill] sm:$0xff] }
0x331c   : > { %v10067_v59 = vpop.permute.xlu2 %4647  ;;  %v4781_v33 = vsel %vm12436_vm11, %v9344_v63, %v12420_v40  ;;  %vm12438_vm2 = vcmask 515072   ;;  %v5761_v20 = vmul.f32 %v12439_v28, %v7492_v2  ;;  %v4990_v62 = vadd.f32 %v4984_v53, %v4889_v22  ;;  %v12448_v46 = vld [vmem:[#allocation171_spill] sm:$0xff] }
0x331d   : > { %12429 = vst [vmem:[#allocation40_spill] sm:$0xff] %v10067_v59  ;;  %4846 = vrot.lane.b32.xlu1 %v4838_v10, %s12297_s22  ;;  %5148 = vrot.lane.b32.xlu0 %v5141_v8, %s12132_s15  ;;  %v5724_v37 = vsel %vm12438_vm2, %v9314_v34, %v12437_v39  ;;  %v4882_v13 = vsel %vm4881_vm1, %v9440_v23, %v9656_v36  ;;  %v12440_v8 = vld [vmem:[#allocation28_spill] sm:$0xff]  ;;  %vm12441_vm2 = vcmask 629760   ;;  %vm12444_vm11 = vcmask 760832  }
0x331e   : > { %v2213_v45 = vadd.f32 %v2208_v30, %v2114_v21  ;;  %v4787_v10 = vadd.f32 %v4781_v33, %v4688_v31  ;;  %v872_v7 = vsel %vm12441_vm2, %v12346_v4, %v12440_v8  ;;  %v2457_v53 = vsel %vm12444_vm11, %v12443_v29, %v12442_v55  ;;  %v12447_v4 = vld [vmem:[#allocation172_spill] sm:$0xff] }
0x331f   : > { %v5047_v5 = vpop.permute.xlu1 %5046  ;;  %v10085_v25 = vpop.permute.xlu0 %5311  ;;  %v4983_v23 = vsel %vm4982_vm15, %v12445_v42, %v9763_v6  ;;  %v878_v21 = vmul.f32 %v12440_v8, %v7539_v32  ;;  %vm5085_vm14 = vcmask 195584   ;;  %v877_v6 = vmul.f32 %v872_v7, %v7492_v2  ;;  %v12456_v8 = vld [vmem:[#allocation186_spill] sm:$0xff] }
0x3320   : > { %v5051_v38 = vsel %vm5050_vm6, %v9843_v47, %v5047_v5  ;;  %v5052_v63 = vsel %vm5050_vm6, %v5047_v5, %v9678_v16  ;;  %v5322_v40 = vadd.f32 %v10085_v25, %v5256_v24  ;;  %v2330_v36 = vadd.f32 %v2325_v17, %v2213_v45  ;;  %v12446_v16 = vld [vmem:[#allocation372_spill] sm:$0xff]  ;;  %v12450_v17 = vld [vmem:[#allocation39_spill] sm:$0xff]  ;;  %v12453_v5 = vld [vmem:[#allocation181_spill] sm:$0xff] }
0x3321   : > { %v5058_v34 = vadd.f32 %v5052_v63, %v4990_v62  ;;  %v4939_v47 = vmul.f32 0.0, %v12446_v16  ;;  %v5729_v24 = vmul.f32 %v5724_v37, %v7539_v32  ;;  %v4888_v22 = vadd.f32 %v4882_v13, %v4787_v10  ;;  %v12451_v37 = vld [vmem:[#allocation31_spill] sm:$0xff]  ;;  %v12454_v13 = vld [vmem:[#allocation180_spill] sm:$0xff]  ;;  %v12458_v16 = vld [vmem:[#allocation69_spill] sm:$0xff] }
0x3322   : > { %5767 = vrot.lane.b32.xlu2 %v5761_v20, %s11823_s23  ;;  %vm12449_vm6 = vcmask 752640   ;;  %v2462_v33 = vadd.f32 %v2457_v53, %v2330_v36  ;;  %vm12452_vm8 = vcmask 1039360   ;;  %v949_v62 = vadd.f32 %v12450_v17, %v878_v21  ;;  %v12455_v10 = vld [vmem:[#allocation187_spill] sm:$0xff] }
0x3323   : > { %v2590_v30 = vsel %vm12449_vm6, %v12448_v46, %v12447_v4  ;;  %v4989_v31 = vadd.f32 %v4983_v23, %v4888_v22  ;;  %v943_v20 = vsel %vm12452_vm8, %v12451_v37, %v12450_v17  ;;  %v2691_v63 = vsel %vm1838_vm5, %v12454_v13, %v12453_v5  ;;  %v12457_v53 = vld [vmem:[#allocation379_spill] sm:$0xff] }
0x3324   : > { %v10110_v48 = vpop.permute.xlu2 %5584  ;;  %v2595_v45 = vadd.f32 %v2590_v30, %v2462_v33  ;;  %v2759_v29 = vsel %vm1939_vm0, %v12456_v8, %v12455_v10  ;;  %v5202_v42 = vsel %vm3774_vm9, %v12418_v11, %v12457_v53  ;;  %v12459_v22 = vld [vmem:[#allocation35_spill] sm:$0xff]  ;;  %v12461_v33 = vld [vmem:[#allocation42_spill] sm:$0xff]  ;;  %vm12462_vm2 = vcmask 1031168  }
0x3325   : > { %4947 = vrot.lane.b32.xlu1 %v4939_v47, %s12310_s0  ;;  %5736 = vrot.lane.b32.xlu0 %v5729_v24, %s11927_s5  ;;  %v5057_v7 = vadd.f32 %v5051_v38, %v4989_v31  ;;  %v5272_v47 = vmul.f32 %v12458_v16, %v7492_v2  ;;  %v12460_v30 = vld [vmem:[#allocation43_spill] sm:$0xff]  ;;  %v948_v38 = vadd.f32 %v943_v20, %v877_v6  ;;  %vm12465_vm11 = vcmask 654336  }
0x3326   : > { %v1011_v17 = vsel %vm12462_vm2, %v12461_v33, %v12460_v30  ;;  %v2696_v37 = vadd.f32 %v2691_v63, %v2595_v45  ;;  %v1017_v31 = vadd.f32 %v12460_v30, %v949_v62  ;;  %v12463_v8 = vld [vmem:[#allocation199_spill] sm:$0xff]  ;;  %vm12467_vm6 = vcmask 1022976  }
0x3327   : > { %v5082_v23 = vpop.permute.xlu1 %5081  ;;  %v10128_v36 = vpop.permute.xlu0 %5377  ;;  %v2894_v59 = vsel %vm12465_vm11, %v12464_v27, %v12463_v8  ;;  %v5207_v63 = vmul.f32 %v5202_v42, %v7539_v32  ;;  %v1016_v45 = vadd.f32 %v1011_v17, %v948_v38  ;;  %v12469_v6 = vld [vmem:[#allocation207_spill] sm:$0xff]  ;;  %vm12473_vm8 = vcmask 1014784   ;;  %v12474_v42 = vld [vmem:[#allocation220_spill] sm:$0xff]  ;;  %v12479_v17 = vld [vmem:[#allocation381_spill] sm:$0xff] }
0x3328   : > { %v5086_v24 = vsel %vm5085_vm14, %v9893_v9, %v5082_v23  ;;  %v5087_v21 = vsel %vm5085_vm14, %v5082_v23, %v12459_v22  ;;  %v5388_v46 = vadd.f32 %v10128_v36, %v5322_v40  ;;  %v12466_v9 = vld [vmem:[#allocation47_spill] sm:$0xff]  ;;  %v2764_v23 = vadd.f32 %v2759_v29, %v2696_v37 }
0x3329   : > { %v5092_v13 = vadd.f32 %v5086_v24, %v5057_v7  ;;  %v5093_v11 = vadd.f32 %v5087_v21, %v5058_v34  ;;  %v1079_v40 = vsel %vm12467_vm6, %v12362_v15, %v12466_v9  ;;  %v5664_v22 = vmul.f32 0.0, %v12360_v43  ;;  %v12468_v34 = vld [vmem:[#allocation208_spill] sm:$0xff]  ;;  %v12472_v29 = vld [vmem:[#allocation51_spill] sm:$0xff] }
0x332a   : > { %5278 = vrot.lane.b32.xlu2 %v5272_v47, %s12115_s19  ;;  %vm12470_vm14 = vcmask 646144   ;;  %v1085_v27 = vadd.f32 %v12466_v9, %v1017_v31  ;;  %v2899_v7 = vadd.f32 %v2894_v59, %v2764_v23  ;;  %v1084_v15 = vadd.f32 %v1079_v40, %v1016_v45  ;;  %v12475_v47 = vld [vmem:[#allocation219_spill] sm:$0xff]  ;;  %v12480_v9 = vld [vmem:[#allocation368_spill] sm:$0xff] }
0x332b   : > { %v2993_v20 = vsel %vm12470_vm14, %v12469_v6, %v12468_v34  ;;  %v1147_v43 = vsel %vm12473_vm8, %v12365_v12, %v12472_v29  ;;  %vm12476_vm2 = vcmask 637952   ;;  %v12477_v30 = vld [vmem:[#allocation55_spill] sm:$0xff]  ;;  %vm12478_vm11 = vcmask 1006592  }
0x332c   : > { %v10151_v62 = vpop.permute.xlu2 %4746  ;;  %v3125_v24 = vsel %vm12476_vm2, %v12475_v47, %v12474_v42  ;;  %v1153_v21 = vadd.f32 %v12472_v29, %v1085_v27  ;;  %v1215_v33 = vsel %vm12478_vm11, %v12372_v57, %v12477_v30  ;;  %v2998_v59 = vadd.f32 %v2993_v20, %v2899_v7  ;;  %v12483_v23 = vld [vmem:[#allocation103_spill] sm:$0xff] }
0x332d   : > { %12471 = vst [vmem:[#allocation125_spill] sm:$0xff] %v10151_v62  ;;  %5672 = vrot.lane.b32.xlu1 %v5664_v22, %s11876_s28  ;;  %5214 = vrot.lane.b32.xlu0 %v5207_v63, %s12106_s3  ;;  %v5794_v37 = vmul.f32 %v12479_v17, %v7492_v2  ;;  %vm12481_vm6 = vcmask 523264   ;;  %vm12482_vm14 = vcmask 130048   ;;  %v1152_v57 = vadd.f32 %v1147_v43, %v1084_v15  ;;  %v12485_v7 = vld [vmem:[#allocation59_spill] sm:$0xff]  ;;  %v12489_v15 = vld [vmem:[#allocation68_spill] sm:$0xff]  ;;  %s12521_s28 = smov 122  }
0x332e   : > { %v5757_v12 = vsel %vm12481_vm6, %v12439_v28, %v12480_v9  ;;  %vm12484_vm8 = vmmov %vm12482_vm14  ;;  %v3130_v45 = vadd.f32 %v3125_v24, %v2998_v59  ;;  %v1221_v27 = vadd.f32 %v12477_v30, %v1153_v21  ;;  %vm12486_vm2 = vcmask 998400   ;;  %v12488_v47 = vld [vmem:[#allocation231_spill] sm:$0xff]  ;;  %v12494_v59 = vld [vmem:[#allocation248_spill] sm:$0xff] }
0x332f   : > { %v5116_v38 = vpop.permute.xlu1 %5115  ;;  %v10168_v31 = vpop.permute.xlu0 %5444  ;;  %v1283_v29 = vsel %vm12486_vm2, %v12379_v1, %v12485_v7  ;;  %v1220_v28 = vadd.f32 %v1215_v33, %v1152_v57  ;;  %v5007_v62 = vmul.f32 0.0, %v9387_v58  ;;  %v12491_v24 = vld [vmem:[#allocation239_spill] sm:$0xff]  ;;  %vm12493_vm11 = vcmask 908288  }
0x3330   : > { %v5119_v40 = vsel %vm12482_vm14, %v9940_v52, %v5116_v38  ;;  %v5120_v22 = vsel %vm12484_vm8, %v5116_v38, %v12483_v23  ;;  %v5456_v63 = vadd.f32 %v10168_v31, %v5388_v46  ;;  %v3217_v52 = vadd.f32 %v12488_v47, %v3130_v45  ;;  %v12492_v30 = vld [vmem:[#allocation75_spill] sm:$0xff]  ;;  %v12498_v45 = vld [vmem:[#allocation112_spill] sm:$0xff] }
0x3331   : > { %v5125_v6 = vadd.f32 %v5119_v40, %v5092_v13  ;;  %v5126_v20 = vadd.f32 %v5120_v22, %v5093_v11  ;;  %v5762_v38 = vmul.f32 %v5757_v12, %v7539_v32  ;;  %v1289_v46 = vadd.f32 %v12485_v7, %v1221_v27  ;;  %v12496_v22 = vld [vmem:[#allocation371_spill] sm:$0xff] }
0x3332   : > { %5800 = vrot.lane.b32.xlu2 %v5794_v37, %s12487_s13  ;;  %v1421_v13 = vsel %vm853_vm12, %v12382_v44, %v12489_v15  ;;  %v1288_v43 = vadd.f32 %v1283_v29, %v1220_v28  ;;  %v3338_v1 = vadd.f32 %v12491_v24, %v3217_v52  ;;  %v1508_v33 = vsel %vm12493_vm11, %v12389_v54, %v12492_v30  ;;  %v12495_v44 = vld [vmem:[#allocation377_spill] sm:$0xff]  ;;  %v12500_v29 = vld [vmem:[#allocation254_spill] sm:$0xff] }
0x3333   : > { %v1427_v21 = vadd.f32 %v12489_v15, %v1289_v46  ;;  %v5338_v12 = vmul.f32 %v12495_v44, %v7492_v2  ;;  %vm12497_vm6 = vcmask 121856   ;;  %v12501_v15 = vld [vmem:[#allocation84_spill] sm:$0xff]  ;;  %vm12502_vm8 = vcmask 900096  }
0x3334   : > { %v10190_v11 = vpop.permute.xlu2 %5619  ;;  %v1426_v58 = vadd.f32 %v1421_v13, %v1288_v43  ;;  %v3439_v37 = vadd.f32 %v12494_v59, %v3338_v1  ;;  %vm12499_vm14 = vmmov %vm12497_vm6  ;;  %v1607_v13 = vsel %vm12502_vm8, %v12394_v26, %v12501_v15  ;;  %v5697_v1 = vmul.f32 0.0, %v9295_v41  ;;  %v12506_v26 = vld [vmem:[#allocation275_spill] sm:$0xff] }
0x3335   : > { %12490 = vst [vmem:[#allocation124_spill] sm:$0xff] %v10190_v11  ;;  %5015 = vrot.lane.b32.xlu1 %v5007_v62, %s12345_s30  ;;  %5769 = vrot.lane.b32.xlu0 %v5762_v38, %s11823_s23  ;;  %v5268_v62 = vsel %vm3673_vm13, %v12458_v16, %v12496_v22  ;;  %v1514_v7 = vadd.f32 %v12492_v30, %v1427_v21  ;;  %v12503_v16 = vld [vmem:[#allocation266_spill] sm:$0xff]  ;;  %v12504_v21 = vld [vmem:[#allocation93_spill] sm:$0xff]  ;;  %vm12505_vm2 = vcmask 891904   ;;  %vm12508_vm11 = vcmask 883712  }
0x3336   : > { %v3507_v28 = vadd.f32 %v12500_v29, %v3439_v37  ;;  %v1513_v46 = vadd.f32 %v1508_v33, %v1426_v58  ;;  %v12507_v37 = vld [vmem:[#allocation102_spill] sm:$0xff]  ;;  %vm12515_vm8 = vcmask 113664  }
0x3337   : > { %v5182_v40 = vpop.permute.xlu1 %5181  ;;  %v10202_v23 = vpop.permute.xlu0 %5512  ;;  %v1806_v41 = vsel %vm12508_vm11, %v12407_v18, %v12507_v37  ;;  %vm12520_vm11 = vcmask 867328  }
0x3338   : > { %v5185_v57 = vsel %vm12497_vm6, %v9990_v51, %v5182_v40  ;;  %v5186_v27 = vsel %vm12499_vm14, %v5182_v40, %v12498_v45  ;;  %v5524_v54 = vadd.f32 %v10202_v23, %v5456_v63  ;;  %v1613_v51 = vadd.f32 %v12501_v15, %v1514_v7  ;;  %v12514_v15 = vld [vmem:[#allocation95_spill] sm:$0xff] }
0x3339   : > { %v5191_v52 = vadd.f32 %v5185_v57, %v5125_v6  ;;  %v5192_v38 = vadd.f32 %v5186_v27, %v5126_v20  ;;  %v3645_v43 = vadd.f32 %v12503_v16, %v3507_v28  ;;  %v5273_v63 = vmul.f32 %v5268_v62, %v7539_v32  ;;  %v12509_v62 = vld [vmem:[#allocation111_spill] sm:$0xff]  ;;  %v12512_v28 = vld [vmem:[#allocation76_spill] sm:$0xff] }
0x333a   : > { %5344 = vrot.lane.b32.xlu2 %v5338_v12, %s12104_s29  ;;  %v1706_v6 = vsel %vm12505_vm2, %v12401_v14, %v12504_v21  ;;  %v1612_v58 = vadd.f32 %v1607_v13, %v1513_v46  ;;  %v1712_v30 = vadd.f32 %v12504_v21, %v1613_v51  ;;  %vm12510_vm6 = vcmask 875520   ;;  %v12511_v57 = vld [vmem:[#allocation287_spill] sm:$0xff]  ;;  %v12516_v51 = vld [vmem:[#allocation118_spill] sm:$0xff]  ;;  %vm12517_vm2 = vmmov %vm12515_vm8 }
0x333b   : > { %v3746_v33 = vadd.f32 %v12506_v26, %v3645_v43  ;;  %v1907_v14 = vsel %vm12510_vm6, %v12412_v3, %v12509_v62  ;;  %vm12513_vm14 = vcmask 531456   ;;  %v5827_v13 = vmul.f32 %v12514_v15, %v7492_v2  ;;  %v12518_v3 = vld [vmem:[#allocation299_spill] sm:$0xff] }
0x333c   : > { %v10225_v20 = vpop.permute.xlu2 %4842  ;;  %v1711_v12 = vadd.f32 %v1706_v6, %v1612_v58  ;;  %v1812_v40 = vadd.f32 %v12507_v37, %v1712_v30  ;;  %v5790_v46 = vsel %vm12513_vm14, %v12479_v17, %v12512_v28  ;;  %v12519_v30 = vld [vmem:[#allocation117_spill] sm:$0xff]  ;;  %v12522_v37 = vld [vmem:[#allocation311_spill] sm:$0xff]  ;;  %vm12526_vm6 = vcmask 777216  }
0x333d   : > { %5705 = vrot.lane.b32.xlu1 %v5697_v1, %s11892_s27  ;;  %5280 = vrot.lane.b32.xlu0 %v5273_v63, %s12115_s19  ;;  %v3880_v45 = vadd.f32 %v12511_v57, %v3746_v33  ;;  %v1975_v17 = vsel %vm12520_vm11, %v12422_v56, %v12519_v30  ;;  %vm12528_vm14 = vcmask 769024   ;;  %vm12536_vm11 = vcmask 760832   ;;  %s12562_s27 = smov 121  }
0x333e   : > { %v1811_v1 = vadd.f32 %v1806_v41, %v1711_v12  ;;  %v1913_v58 = vadd.f32 %v12509_v62, %v1812_v40  ;;  %v12523_v12 = vld [vmem:[#allocation129_spill] sm:$0xff]  ;;  %v12524_v62 = vld [vmem:[#allocation320_spill] sm:$0xff] }
0x333f   : > { %v5248_v27 = vpop.permute.xlu1 %5247  ;;  %v10239_v7 = vpop.permute.xlu0 %4643  ;;  %v4014_v63 = vadd.f32 %v12518_v3, %v3880_v45 }
0x3340   : > { %v5251_v18 = vsel %vm12515_vm8, %v10036_v35, %v5248_v27  ;;  %v5252_v43 = vsel %vm12517_vm2, %v5248_v27, %v12516_v51  ;;  %v1912_v33 = vadd.f32 %v1907_v14, %v1811_v1  ;;  %v5142_v35 = vmul.f32 0.0, %v12419_v61  ;;  %v12525_v61 = vld [vmem:[#allocation138_spill] sm:$0xff] }
0x3341   : > { %v5257_v21 = vadd.f32 %v5251_v18, %v5191_v52  ;;  %v5258_v6 = vadd.f32 %v5252_v43, %v5192_v38  ;;  %v4148_v11 = vadd.f32 %v12522_v37, %v4014_v63  ;;  %v5795_v27 = vmul.f32 %v5790_v46, %v7539_v32  ;;  %v12529_v18 = vld [vmem:[#allocation326_spill] sm:$0xff] }
0x3342   : > { %5833 = vrot.lane.b32.xlu2 %v5827_v13, %s12521_s28  ;;  %v1981_v41 = vadd.f32 %v12519_v30, %v1913_v58  ;;  %v2110_v52 = vsel %vm1385_vm3, %v12425_v0, %v12523_v12  ;;  %v1980_v40 = vadd.f32 %v1975_v17, %v1912_v33  ;;  %v2209_v45 = vsel %vm12526_vm6, %v12430_v50, %v12525_v61  ;;  %v12527_v13 = vld [vmem:[#allocation149_spill] sm:$0xff]  ;;  %v12530_v43 = vld [vmem:[#allocation34_spill] sm:$0xff]  ;;  %v12531_v58 = vld [vmem:[#allocation359_spill] sm:$0xff] }
0x3343   : > { %v4249_v56 = vadd.f32 %v12524_v62, %v4148_v11  ;;  %v2326_v0 = vsel %vm12528_vm14, %v12433_v49, %v12527_v13  ;;  %v5334_v11 = vsel %vm3605_vm7, %v12495_v44, %v12530_v43  ;;  %v4604_v30 = vmul.f32 %v12531_v58, %v7492_v2  ;;  %v12533_v17 = vld [vmem:[#allocation38_spill] sm:$0xff]  ;;  %v12535_v44 = vld [vmem:[#allocation161_spill] sm:$0xff] }
0x3344   : > { %v10263_v38 = vpop.permute.xlu2 %4943  ;;  %v2116_v14 = vadd.f32 %v12523_v12, %v1981_v41  ;;  %v2115_v46 = vadd.f32 %v2110_v52, %v1980_v40  ;;  %vm12532_vm8 = vcmask 105472   ;;  %v2458_v52 = vsel %vm12536_vm11, %v12442_v55, %v12535_v44  ;;  %v12537_v40 = vld [vmem:[#allocation338_spill] sm:$0xff] }
0x3345   : > { %5150 = vrot.lane.b32.xlu1 %v5142_v35, %s12132_s15  ;;  %5802 = vrot.lane.b32.xlu0 %v5795_v27, %s12487_s13  ;;  %v4317_v51 = vadd.f32 %v12529_v18, %v4249_v56  ;;  %vm12534_vm2 = vmmov %vm12532_vm8  ;;  %vm12539_vm6 = vcmask 752640   ;;  %vm12545_vm14 = vcmask 539648   ;;  %vm5450_vm11 = vcmask 89088  }
0x3346   : > { %v2214_v35 = vadd.f32 %v2209_v45, %v2115_v46  ;;  %v2215_v27 = vadd.f32 %v12525_v61, %v2116_v14  ;;  %v12538_v45 = vld [vmem:[#allocation173_spill] sm:$0xff] }
0x3347   : > { %v5314_v1 = vpop.permute.xlu1 %5313  ;;  %v10279_v63 = vpop.permute.xlu0 %5580  ;;  %v4454_v56 = vadd.f32 %v12537_v40, %v4317_v51 }
0x3348   : > { %v5317_v50 = vsel %vm12532_vm8, %v10085_v25, %v5314_v1  ;;  %v5318_v33 = vsel %vm12534_vm2, %v5314_v1, %v12533_v17  ;;  %v5592_v49 = vadd.f32 %v10279_v63, %v5524_v54  ;;  %v2332_v25 = vadd.f32 %v12527_v13, %v2215_v27  ;;  %v12541_v13 = vld [vmem:[#allocation182_spill] sm:$0xff] }
0x3349   : > { %v5323_v41 = vadd.f32 %v5317_v50, %v5257_v21  ;;  %v5324_v12 = vadd.f32 %v5318_v33, %v5258_v6  ;;  %v2331_v43 = vadd.f32 %v2326_v0, %v2214_v35  ;;  %v5730_v1 = vmul.f32 0.0, %v12437_v39  ;;  %v12540_v6 = vld [vmem:[#allocation347_spill] sm:$0xff]  ;;  %v12543_v50 = vld [vmem:[#allocation380_spill] sm:$0xff]  ;;  %v12544_v35 = vld [vmem:[#allocation378_spill] sm:$0xff] }
0x334a   : > { %4610 = vrot.lane.b32.xlu2 %v4604_v30, %s11933_s18  ;;  %v5339_v54 = vmul.f32 %v5334_v11, %v7539_v32  ;;  %v2591_v21 = vsel %vm12539_vm6, %v12447_v4, %v12538_v45  ;;  %v4555_v14 = vadd.f32 %v12540_v6, %v4454_v56  ;;  %v2464_v55 = vadd.f32 %v12535_v44, %v2332_v25  ;;  %v12542_v11 = vld [vmem:[#allocation188_spill] sm:$0xff] }
0x334b   : > { %v2463_v46 = vadd.f32 %v2458_v52, %v2331_v43  ;;  %v2692_v39 = vsel %vm1838_vm5, %v12453_v5, %v12541_v13  ;;  %v2760_v30 = vsel %vm1939_vm0, %v12455_v10, %v12542_v11  ;;  %v5405_v43 = vmul.f32 %v12543_v50, %v7492_v2 }
0x334c   : > { %v10301_v61 = vpop.permute.xlu2 %5668  ;;  %v4654_v0 = vadd.f32 %v10239_v7, %v4555_v14  ;;  %v2597_v4 = vadd.f32 %v12538_v45, %v2464_v55  ;;  %v5823_v27 = vsel %vm12545_vm14, %v12514_v15, %v12544_v35  ;;  %vm12546_vm5 = vcmask 97280   ;;  %v12550_v55 = vld [vmem:[#allocation209_spill] sm:$0xff] }
0x334d   : > { %5738 = vrot.lane.b32.xlu1 %v5730_v1, %s11927_s5  ;;  %5346 = vrot.lane.b32.xlu0 %v5339_v54, %s12104_s29  ;;  %v2596_v51 = vadd.f32 %v2591_v21, %v2463_v46  ;;  %vm12547_vm8 = vmmov %vm12546_vm5  ;;  %v12548_v54 = vld [vmem:[#allocation200_spill] sm:$0xff]  ;;  %vm12549_vm0 = vcmask 654336   ;;  %v5828_v14 = vmul.f32 %v5823_v27, %v7539_v32  ;;  %vm12551_vm2 = vcmask 646144   ;;  %s12841_s5 = sld [smem:[#allocation21_spill]] }
0x334e   : > { %v2698_v10 = vadd.f32 %v12541_v13, %v2597_v4  ;;  %v2895_v45 = vsel %vm12549_vm0, %v12463_v8, %v12548_v54  ;;  %vm12553_vm6 = vcmask 637952   ;;  %v12554_v4 = vld [vmem:[#allocation228_spill] sm:$0xff]  ;;  %vm12555_vm14 = vcmask 629760  }
0x334f   : > { %v5380_v17 = vpop.permute.xlu1 %5379  ;;  %v10316_v33 = vpop.permute.xlu0 %4742  ;;  %v2697_v56 = vadd.f32 %v2692_v39, %v2596_v51  ;;  %v12552_v39 = vld [vmem:[#allocation221_spill] sm:$0xff] }
0x3350   : > { %v5383_v5 = vsel %vm12546_vm5, %v10128_v36, %v5380_v17  ;;  %v5384_v44 = vsel %vm12547_vm8, %v5380_v17, %v9925_v60  ;;  %v4753_v52 = vadd.f32 %v10316_v33, %v4654_v0  ;;  %v2766_v36 = vadd.f32 %v12542_v11, %v2698_v10 }
0x3351   : > { %v5389_v25 = vadd.f32 %v5383_v5, %v5323_v41  ;;  %v5390_v1 = vadd.f32 %v5384_v44, %v5324_v12  ;;  %v2765_v15 = vadd.f32 %v2760_v30, %v2697_v56  ;;  %v5208_v60 = vmul.f32 0.0, %v12457_v53  ;;  %v12556_v30 = vld [vmem:[#allocation94_spill] sm:$0xff]  ;;  %v12558_v5 = vld [vmem:[#allocation113_spill] sm:$0xff] }
0x3352   : > { %v4853_v21 = vadd.f32 %v10225_v20, %v4753_v52  ;;  %5411 = vrot.lane.b32.xlu2 %v5405_v43, %s12121_s24  ;;  %v2994_v41 = vsel %vm12551_vm2, %v12468_v34, %v12550_v55  ;;  %v2901_v13 = vadd.f32 %v12548_v54, %v2766_v36  ;;  %v3126_v53 = vsel %vm12553_vm6, %v12474_v42, %v12552_v39  ;;  %v12559_v52 = vld [vmem:[#allocation121_spill] sm:$0xff]  ;;  %v12560_v36 = vld [vmem:[#allocation240_spill] sm:$0xff] }
0x3353   : > { %v2900_v8 = vadd.f32 %v2895_v45, %v2765_v15  ;;  %v3213_v11 = vsel %vm12555_vm14, %v12488_v47, %v12554_v4  ;;  %vm12557_vm5 = vcmask 252928   ;;  %v5860_v44 = vmul.f32 %v12558_v5, %v7492_v2 }
0x3354   : > { %v4954_v12 = vadd.f32 %v10263_v38, %v4853_v21  ;;  %v10339_v46 = vpop.permute.xlu2 %5011  ;;  %v3000_v34 = vadd.f32 %v12550_v55, %v2901_v13  ;;  %v4600_v43 = vsel %vm12557_vm5, %v12531_v58, %v12556_v30  ;;  %vm12561_vm8 = vcmask 621568   ;;  %v12567_v13 = vld [vmem:[#allocation255_spill] sm:$0xff] }
0x3355   : > { %5216 = vrot.lane.b32.xlu1 %v5208_v60, %s12106_s3  ;;  %5835 = vrot.lane.b32.xlu0 %v5828_v14, %s12521_s28  ;;  %v2999_v51 = vadd.f32 %v2994_v41, %v2900_v8  ;;  %v3333_v58 = vsel %vm12561_vm8, %v12491_v24, %v12560_v36  ;;  %v12563_v60 = vld [vmem:[#allocation241_spill] sm:$0xff]  ;;  %vm12564_vm0 = vmmov %vm12561_vm8  ;;  %v5763_v14 = vmul.f32 0.0, %v12480_v9  ;;  %vm5518_vm2 = vcmask 80896   ;;  %v12566_v8 = vld [vmem:[#allocation250_spill] sm:$0xff] }
0x3356   : > { %v5022_v0 = vadd.f32 %v10339_v46, %v4954_v12  ;;  %v3132_v47 = vadd.f32 %v12552_v39, %v3000_v34  ;;  %v3502_v39 = vsel %vm2724_vm10, %v12500_v29, %v12567_v13  ;;  %v12569_v34 = vld [vmem:[#allocation267_spill] sm:$0xff]  ;;  %vm12572_vm6 = vcmask 400384  }
0x3357   : > { %v5447_v17 = vpop.permute.xlu1 %5446  ;;  %v10355_v27 = vpop.permute.xlu0 %5615  ;;  %v3131_v54 = vadd.f32 %v3126_v53, %v2999_v51  ;;  %v12568_v51 = vld [vmem:[#allocation256_spill] sm:$0xff]  ;;  %vm12581_vm5 = vcmask 506880  }
0x3358   : > { %v5451_v42 = vsel %vm5450_vm11, %v10168_v31, %v5447_v17  ;;  %v5452_v56 = vsel %vm5450_vm11, %v5447_v17, %v12559_v52  ;;  %v5627_v10 = vadd.f32 %v10355_v27, %v5592_v49  ;;  %v3334_v31 = vsel %vm12564_vm0, %v12560_v36, %v12563_v60  ;;  %v12576_v60 = vld [vmem:[#allocation276_spill] sm:$0xff]  ;;  %vm12583_vm8 = vmmov %vm12581_vm5 }
0x3359   : > { %v5457_v45 = vadd.f32 %v5451_v42, %v5389_v25  ;;  %v5458_v21 = vadd.f32 %v5452_v56, %v5390_v1  ;;  %v3218_v15 = vadd.f32 %v3213_v11, %v3131_v54  ;;  %v4605_v49 = vmul.f32 %v4600_v43, %v7539_v32  ;;  %v12565_v1 = vld [vmem:[#allocation249_spill] sm:$0xff]  ;;  %v12571_v11 = vld [vmem:[#allocation351_spill] sm:$0xff] }
0x335a   : > { %5866 = vrot.lane.b32.xlu2 %v5860_v44, %s12562_s27  ;;  %v3219_v25 = vadd.f32 %v12554_v4, %v3132_v47  ;;  %v3434_v55 = vsel %vm2623_vm4, %v12494_v59, %v12565_v1  ;;  %v3435_v9 = vsel %vm2623_vm4, %v12565_v1, %v12566_v8  ;;  %v3503_v59 = vsel %vm2724_vm10, %v12567_v13, %v12568_v51  ;;  %v12573_v42 = vld [vmem:[#allocation85_spill] sm:$0xff]  ;;  %v12580_v1 = vld [vmem:[#allocation288_spill] sm:$0xff] }
0x335b   : > { %v3339_v24 = vadd.f32 %v3333_v58, %v3218_v15  ;;  %vm12570_vm11 = vcmask 523264   ;;  %v5401_v43 = vsel %vm12572_vm6, %v12543_v50, %v12571_v11  ;;  %v4703_v52 = vmul.f32 %v12573_v42, %v7492_v2  ;;  %v12574_v15 = vld [vmem:[#allocation268_spill] sm:$0xff] }
0x335c   : > { %v10376_v41 = vpop.permute.xlu2 %5701  ;;  %v3340_v12 = vadd.f32 %v3334_v31, %v3219_v25  ;;  %v3640_v4 = vsel %vm12570_vm11, %v12503_v16, %v12569_v34  ;;  %vm12575_vm4 = vmmov %vm12570_vm11  ;;  %vm12577_vm10 = vcmask 515072   ;;  %v5406_v25 = vmul.f32 %v5401_v43, %v7539_v32  ;;  %v12589_v43 = vld [vmem:[#allocation382_spill] sm:$0xff] }
0x335d   : > { %5771 = vrot.lane.b32.xlu1 %v5763_v14, %s11823_s23  ;;  %4612 = vrot.lane.b32.xlu0 %v4605_v49, %s11933_s18  ;;  %v3440_v53 = vadd.f32 %v3434_v55, %v3339_v24  ;;  %v3641_v50 = vsel %vm12575_vm4, %v12569_v34, %v12574_v15  ;;  %v3741_v31 = vsel %vm12577_vm10, %v12506_v26, %v12576_v60  ;;  %v5274_v49 = vmul.f32 0.0, %v12496_v22  ;;  %vm12579_vm14 = vmmov %vm12577_vm10  ;;  %v12582_v22 = vld [vmem:[#allocation289_spill] sm:$0xff]  ;;  %v12588_v34 = vld [vmem:[#allocation63_spill] sm:$0xff] }
0x335e   : > { %v3441_v47 = vadd.f32 %v3435_v9, %v3340_v12  ;;  %v3875_v55 = vsel %vm12581_vm5, %v12511_v57, %v12580_v1  ;;  %v3876_v8 = vsel %vm12583_vm8, %v12580_v1, %v12582_v22  ;;  %vm12585_vm0 = vcmask 498688   ;;  %v12605_v22 = vld [vmem:[#allocation340_spill] sm:$0xff] }
0x335f   : > { %v5515_v17 = vpop.permute.xlu1 %5514  ;;  %v10395_v44 = vpop.permute.xlu0 %5635  ;;  %v3508_v36 = vadd.f32 %v3502_v39, %v3440_v53  ;;  %v12584_v39 = vld [vmem:[#allocation300_spill] sm:$0xff]  ;;  %v12586_v53 = vld [vmem:[#allocation301_spill] sm:$0xff]  ;;  %vm12590_vm11 = vcmask 547840   ;;  %vm12591_vm6 = vcmask 359424   ;;  %vm12593_vm4 = vcmask 490496  }
0x3360   : > { %v5519_v29 = vsel %vm5518_vm2, %v10202_v23, %v5515_v17  ;;  %v5520_v56 = vsel %vm5518_vm2, %v5515_v17, %v10021_v19  ;;  %v5643_v54 = vmul.f32 %v10395_v44, %v7492_v2  ;;  %v3509_v19 = vadd.f32 %v3503_v59, %v3441_v47  ;;  %vm12587_vm2 = vmmov %vm12585_vm0 }
0x3361   : > { %v5525_v16 = vadd.f32 %v5519_v29, %v5457_v45  ;;  %v5526_v58 = vadd.f32 %v5520_v56, %v5458_v21  ;;  %v3646_v23 = vadd.f32 %v3640_v4, %v3508_v36  ;;  %v12578_v45 = vld [vmem:[#allocation277_spill] sm:$0xff]  ;;  %v4009_v57 = vsel %vm12585_vm0, %v12518_v3, %v12584_v39  ;;  %v12592_v56 = vld [vmem:[#allocation312_spill] sm:$0xff]  ;;  %vm12595_vm10 = vmmov %vm12593_vm4 }
0x3362   : > { %v10409_v14 = vadd.f32 %v5643_v54, %v5627_v10  ;;  %4709 = vrot.lane.b32.xlu2 %v4703_v52, %s11944_s2  ;;  %v3742_v21 = vsel %vm12579_vm14, %v12576_v60, %v12578_v45  ;;  %v3647_v26 = vadd.f32 %v3641_v50, %v3509_v19  ;;  %v4010_v51 = vsel %vm12587_vm2, %v12584_v39, %v12586_v53  ;;  %v12594_v36 = vld [vmem:[#allocation313_spill] sm:$0xff] }
0x3363   : > { %v3747_v10 = vadd.f32 %v3741_v31, %v3646_v23  ;;  %v5473_v4 = vmul.f32 %v12588_v34, %v7492_v2  ;;  %v5856_v17 = vsel %vm12590_vm11, %v12558_v5, %v12589_v43  ;;  %v4143_v54 = vsel %vm12593_vm4, %v12522_v37, %v12592_v56  ;;  %v12596_v50 = vld [vmem:[#allocation321_spill] sm:$0xff]  ;;  %v12598_v37 = vld [vmem:[#allocation322_spill] sm:$0xff] }
0x3364   : > { %v10420_v24 = vpop.permute.xlu2 %5146  ;;  %v3748_v9 = vadd.f32 %v3742_v21, %v3647_v26  ;;  %v4144_v15 = vsel %vm12595_vm10, %v12592_v56, %v12594_v36  ;;  %v6571_v5 = vmul.f32 -1.442695, %v7492_v2  ;;  %vm12597_vm14 = vcmask 482304   ;;  %v12600_v21 = vld [vmem:[#allocation327_spill] sm:$0xff]  ;;  %v12611_v36 = vld [vmem:[#allocation350_spill] sm:$0xff] }
0x3365   : > { %v5157_v12 = vadd.f32 %v10420_v24, %v5022_v0  ;;  %5282 = vrot.lane.b32.xlu1 %v5274_v49, %s12115_s19  ;;  %5413 = vrot.lane.b32.xlu0 %v5406_v25, %s12121_s24  ;;  %v3881_v13 = vadd.f32 %v3875_v55, %v3747_v10  ;;  %v5796_v60 = vmul.f32 0.0, %v12512_v28  ;;  %v5861_v31 = vmul.f32 %v5856_v17, %v7539_v32  ;;  %vm12599_vm5 = vmmov %vm12597_vm14  ;;  %v12604_v26 = vld [vmem:[#allocation339_spill] sm:$0xff]  ;;  %s12612_s19 = smov 120  }
0x3366   : > { %v3882_v29 = vadd.f32 %v3876_v8, %v3748_v9  ;;  %v4245_v23 = vsel %vm12599_vm5, %v12596_v50, %v12598_v37  ;;  %vm5586_vm8 = vcmask 72704   ;;  %vm12601_vm0 = vcmask 474112   ;;  %v12606_v9 = vld [vmem:[#allocation373_spill] sm:$0xff] }
0x3367   : > { %v4646_v59 = vpop.permute.xlu1 %4645  ;;  %v10434_v0 = vpop.permute.xlu0 %4844  ;;  %v4015_v47 = vadd.f32 %v4009_v57, %v3881_v13  ;;  %v4312_v28 = vsel %vm12601_vm0, %v12529_v18, %v12600_v21  ;;  %vm12603_vm2 = vmmov %vm12601_vm0  ;;  %6846 = vpow2.f32 %v6571_v5  ;;  %v4449_v10 = vsel %vm3605_vm7, %v12537_v40, %v12604_v26  ;;  %v12608_v57 = vld [vmem:[#allocation36_spill] sm:$0xff]  ;;  %v12615_v37 = vld [vmem:[#allocation349_spill] sm:$0xff] }
0x3368   : > { %v4649_v52 = vsel %vm3774_vm9, %v10239_v7, %v4646_v59  ;;  %v10446_v3 = vsel %vm12591_vm6, %v10225_v20, %v10434_v0  ;;  %v4016_v7 = vadd.f32 %v4010_v51, %v3882_v29  ;;  %v4244_v20 = vsel %vm12597_vm14, %v12524_v62, %v12596_v50  ;;  %v12602_v62 = vld [vmem:[#allocation328_spill] sm:$0xff] }
0x3369   : > { %v4149_v19 = vadd.f32 %v4143_v54, %v4015_v47  ;;  %v4313_v1 = vsel %vm12603_vm2, %v12600_v21, %v12602_v62  ;;  %v4450_v8 = vsel %vm3605_vm7, %v12604_v26, %v12605_v22  ;;  %vm12607_vm11 = vcmask 261120   ;;  %v12610_v47 = vld [vmem:[#allocation348_spill] sm:$0xff] }
0x336a   : > { %5479 = vrot.lane.b32.xlu2 %v5473_v4, %s12136_s16  ;;  %v4150_v25 = vadd.f32 %v4144_v15, %v4016_v7  ;;  %v4699_v13 = vsel %vm12607_vm11, %v12573_v42, %v12606_v9  ;;  %v5893_v53 = vmul.f32 %v12608_v57, %v7492_v2  ;;  %vm12609_vm6 = vcmask 351232   ;;  %v12613_v7 = vld [vmem:[#allocation34_spill] sm:$0xff] }
0x336b   : > { %v4250_v45 = vadd.f32 %v4244_v20, %v4149_v19  ;;  %v4550_v42 = vsel %vm3673_vm13, %v12540_v6, %v12610_v47  ;;  %v4551_v15 = vsel %vm3673_vm13, %v12610_v47, %v12611_v36  ;;  %v4704_v50 = vmul.f32 %v4699_v13, %v7539_v32  ;;  %v12625_v47 = vld [vmem:[#allocation124_spill] sm:$0xff] }
0x336c   : > { %v10464_v49 = vpop.permute.xlu2 %5734  ;;  %v4251_v55 = vadd.f32 %v4245_v23, %v4150_v25  ;;  %vm12616_vm13 = vcmask 408576   ;;  %vm12621_vm4 = vcmask 1039360   ;;  %vm5621_vm10 = vcmask 64512  }
0x336d   : > { %5804 = vrot.lane.b32.xlu1 %v5796_v60, %s12487_s13  ;;  %5868 = vrot.lane.b32.xlu0 %v5861_v31, %s12562_s27  ;;  %v4318_v17 = vadd.f32 %v4312_v28, %v4250_v45  ;;  %v5469_v23 = vsel %vm12616_vm13, %v12588_v34, %v12615_v37  ;;  %vm12624_vm14 = vcmask 556032   ;;  %vm12626_vm5 = vcmask 343040   ;;  %vm12633_vm11 = vmmov %vm12621_vm4 }
0x336e   : > { %v4319_v29 = vadd.f32 %v4313_v1, %v4251_v55  ;;  %v12619_v1 = vld [vmem:[#allocation125_spill] sm:$0xff]  ;;  %vm12629_vm0 = vcmask 490496   ;;  %vm12630_vm2 = vcmask 1031168  }
0x336f   : > { %v5583_v39 = vpop.permute.xlu1 %5582  ;;  %v10483_v18 = vpop.permute.xlu0 %4945 }
0x3370   : > { %v5587_v51 = vsel %vm5586_vm8, %v10279_v63, %v5583_v39  ;;  %v5588_v4 = vsel %vm5586_vm8, %v5583_v39, %v10110_v48  ;;  %v4949_v40 = vsel %vm12609_vm6, %v10263_v38, %v10483_v18  ;;  %v6572_v48 = vmul.f32 -1.442695, %v7539_v32 }
0x3371   : > { %v5593_v56 = vadd.f32 %v5587_v51, %v5525_v16  ;;  %v5594_v54 = vadd.f32 %v5588_v4, %v5526_v58  ;;  %v4455_v63 = vadd.f32 %v4449_v10, %v4318_v17  ;;  %v4456_v5 = vadd.f32 %v4450_v8, %v4319_v29  ;;  %v6847_v16 = vpop.eup %6846  ;;  %v12614_v58 = vld [vmem:[#allocation40_spill] sm:$0xff]  ;;  %v12623_v17 = vld [vmem:[#allocation71_spill] sm:$0xff] }
0x3372   : > { %5899 = vrot.lane.b32.xlu2 %v5893_v53, %s12612_s19  ;;  %v5340_v38 = vmul.f32 0.0, %v12613_v7  ;;  %v4650_v20 = vsel %vm3774_vm9, %v4646_v59, %v12614_v58  ;;  %6848 = vpow2.f32 %v6572_v48  ;;  %v12617_v59 = vld [vmem:[#allocation104_spill] sm:$0xff]  ;;  %vm12618_vm9 = vcmask 367616  }
0x3373   : > { %v4556_v6 = vadd.f32 %v4550_v42, %v4455_v63  ;;  %v4557_v31 = vadd.f32 %v4551_v15, %v4456_v5  ;;  %v4803_v62 = vmul.f32 %v12617_v59, %v7492_v2  ;;  %vm12620_vm7 = vmmov %vm12618_vm9  ;;  %v10526_v22 = vadd.f32 1.0, %v6847_v16 }
0x3374   : > { %v10504_v60 = vpop.permute.xlu2 %5212  ;;  %v5829_v8 = vmul.f32 0.0, %v12544_v35  ;;  %v4606_v7 = vmul.f32 0.0, %v12556_v30  ;;  %v6575_v30 = vld [vmem:[%s11218_s4 + $0x18] sm:$0xff]  ;;  %vm12628_vm8 = vcmask 269312  }
0x3375   : > { %v5223_v19 = vadd.f32 %v10504_v60, %v5157_v12  ;;  %5348 = vrot.lane.b32.xlu1 %v5340_v38, %s12104_s29  ;;  %4711 = vrot.lane.b32.xlu0 %v4704_v50, %s11944_s2  ;;  %v4655_v25 = vadd.f32 %v4649_v52, %v4556_v6  ;;  %v4656_v45 = vadd.f32 %v4650_v20, %v4557_v31  ;;  %6850 = vrcp.f32 %v10526_v22  ;;  %v12627_v50 = vld [vmem:[#allocation122_spill] sm:$0xff] }
0x3376   : > { %v4799_v16 = vsel %vm12628_vm8, %v12617_v59, %v12627_v50  ;;  %vm493_vm6 = vweird.f32 %v10526_v22  ;;  %vm12650_vm8 = vcmask 1014784  }
0x3377   : > { %v4745_v21 = vpop.permute.xlu1 %4744  ;;  %v10512_v28 = vpop.permute.xlu0 %5670  ;;  %v4804_v59 = vmul.f32 %v4799_v16, %v7539_v32 }
0x3378   : > { %v4748_v12 = vsel %vm12618_vm9, %v10316_v33, %v4745_v21  ;;  %v4749_v55 = vsel %vm12620_vm7, %v4745_v21, %v12619_v1  ;;  %v5674_v26 = vsel %vm12621_vm4, %v10301_v61, %v10512_v28  ;;  %v5474_v33 = vmul.f32 %v5469_v23, %v7539_v32  ;;  %v6849_v53 = vpop.eup %6848  ;;  %v12631_v1 = vld [vmem:[#allocation80_spill] sm:$0xff] }
0x3379   : > { %v4754_v34 = vadd.f32 %v4748_v12, %v4655_v25  ;;  %v10523_v52 = vadd.f32 %v4749_v55, %v4656_v45  ;;  %v5679_v10 = vadd.f32 %v5674_v26, %v10409_v14  ;;  %v12622_v14 = vld [vmem:[#allocation86_spill] sm:$0xff]  ;;  %v10549_v63 = vadd.f32 1.0, %v6849_v53  ;;  %v12632_v55 = vld [vmem:[#allocation79_spill] sm:$0xff] }
0x337a   : > { %4809 = vrot.lane.b32.xlu2 %v4803_v62, %s11959_s7  ;;  %v5541_v51 = vmul.f32 %v12622_v14, %v7492_v2  ;;  %v5407_v21 = vmul.f32 0.0, %v12571_v11  ;;  %v1573_v26 = vsel %vm12633_vm11, %v12632_v55, %v12631_v1  ;;  %vm12636_vm9 = vcmask 416768   ;;  %v12652_v55 = vld [vmem:[#allocation133_spill] sm:$0xff] }
0x337b   : > { %v4854_v13 = vadd.f32 %v10446_v3, %v4754_v34  ;;  %v5889_v3 = vsel %vm12624_vm14, %v12608_v57, %v12623_v17  ;;  %v10552_v5 = vpop.eup %6850  ;;  %6852 = vrcp.f32 %v10549_v63  ;;  %vm12637_vm7 = vcmask 359424  }
0x337c   : > { %v10532_v39 = vpop.permute.xlu2 %5767  ;;  %v5894_v57 = vmul.f32 %v5889_v3, %v7539_v32  ;;  %vm494_vm13 = vweird.f32 %v10552_v5  ;;  %vm12638_vm4 = vcmask 261120   ;;  %vm12653_vm11 = vcmask 351232  }
0x337d   : > { %5837 = vrot.lane.b32.xlu1 %v5829_v8, %s12521_s28  ;;  %5481 = vrot.lane.b32.xlu0 %v5474_v33, %s12136_s16  ;;  %v4955_v61 = vadd.f32 %v4949_v40, %v4854_v13  ;;  %v12635_v33 = vld [vmem:[#allocation119_spill] sm:$0xff]  ;;  %vm10624_vm14 = vmor %vm493_vm6, %vm494_vm13  ;;  %s12838_s28 = sld [smem:[#allocation27_spill]] }
0x337e   : > { %v5537_v13 = vsel %vm12636_vm9, %v12622_v14, %v12635_v33  ;;  %vm12657_vm9 = vcmask 908288  }
0x337f   : > { %v5618_v4 = vpop.permute.xlu1 %5617  ;;  %v10539_v35 = vpop.permute.xlu0 %5013 }
0x3380   : > { %v5622_v29 = vsel %vm5621_vm10, %v10355_v27, %v5618_v4  ;;  %v5623_v42 = vsel %vm5621_vm10, %v5618_v4, %v12625_v47  ;;  %v5017_v40 = vsel %vm12626_vm5, %v10339_v46, %v10539_v35  ;;  %v489_v46 = vmul.f32 %v10552_v5, %v10526_v22  ;;  %vm12642_vm10 = vmmov %vm12630_vm2 }
0x3381   : > { %v5628_v36 = vadd.f32 %v5622_v29, %v5593_v56  ;;  %v5629_v15 = vadd.f32 %v5623_v42, %v5594_v54  ;;  %v5023_v48 = vadd.f32 %v5017_v40, %v4955_v61  ;;  %v10580_v45 = vpop.eup %6852  ;;  %v499_v47 = vand.u32 2147483648, %v10526_v22  ;;  %v12640_v42 = vld [vmem:[#allocation89_spill] sm:$0xff]  ;;  %v12641_v40 = vld [vmem:[#allocation88_spill] sm:$0xff] }
0x3382   : > { %5547 = vrot.lane.b32.xlu2 %v5541_v51, %s12155_s25  ;;  %v490_v23 = vsub.f32 1.0, %v489_v46  ;;  %v504_v12 = vmul.f32 %v10580_v45, %v10549_v63  ;;  %v12639_v51 = vld [vmem:[#allocation70_spill] sm:$0xff]  ;;  %v12646_v46 = vld [vmem:[#allocation97_spill] sm:$0xff]  ;;  %vm12647_vm5 = vcmask 1022976   ;;  %vm509_vm13 = vweird.f32 %v10580_v45 }
0x3383   : > { %v1476_v4 = vmul.f32 0.0, %v12639_v51  ;;  %vm12654_vm6 = vmmov %vm12647_vm5 }
0x3384   : > { %v10556_v27 = vpop.permute.xlu2 %5278 }
0x3385   : > { %v5289_v38 = vadd.f32 %v10556_v27, %v5223_v19  ;;  %4614 = vrot.lane.b32.xlu1 %v4606_v7, %s11933_s18  ;;  %5901 = vrot.lane.b32.xlu0 %v5894_v57, %s12612_s19  ;;  %v1578_v7 = vadd.f32 %v1573_v26, %v1476_v4  ;;  %v5542_v57 = vmul.f32 %v5537_v13, %v7539_v32  ;;  %v12655_v4 = vld [vmem:[#allocation143_spill] sm:$0xff] }
0x3387   : > { %v5638_v56 = vpop.permute.xlu1 %5637  ;;  %v10564_v54 = vpop.permute.xlu0 %5703 }
0x3388   : > { %v5639_v58 = vsel %vm12629_vm0, %v10395_v44, %v5638_v56  ;;  %v5645_v20 = vmul.f32 0.0, %v5638_v56  ;;  %v5707_v6 = vsel %vm12630_vm2, %v10376_v41, %v10564_v54  ;;  %v491_v41 = vmul.f32 %v10552_v5, %v490_v23 }
0x3389   : > { %v5644_v31 = vmul.f32 %v5639_v58, %v7539_v32  ;;  %v5712_v19 = vadd.f32 %v5707_v6, %v5679_v10  ;;  %v12634_v10 = vld [vmem:[#allocation33_spill] sm:$0xff]  ;;  %vm508_vm2 = vweird.f32 %v10549_v63 }
0x338a   : > { %6008 = vperm.xlu2 %6799, %v6575_v30   ;;  %v10578_v25 = vadd.f32 %v5645_v20, %v5629_v15  ;;  %v4906_v8 = vmul.f32 0.0, %v12634_v10  ;;  %v492_v14 = vadd.f32 %v10552_v5, %v491_v41  ;;  %v505_v15 = vsub.f32 1.0, %v504_v12  ;;  %v12649_v20 = vld [vmem:[#allocation106_spill] sm:$0xff] }
0x338b   : > { %v10584_v62 = vadd.f32 %v5644_v31, %v5628_v36  ;;  %v1672_v36 = vsel %vm12642_vm10, %v12641_v40, %v12640_v42  ;;  %v514_v41 = vand.u32 2147483648, %v10549_v63  ;;  %v12651_v12 = vld [vmem:[#allocation134_spill] sm:$0xff]  ;;  %vm12666_vm10 = vcmask 891904  }
0x338c   : > { %v10586_v44 = vpop.permute.xlu2 %5800  ;;  %v1677_v16 = vadd.f32 %v1672_v36, %v1578_v7  ;;  %v496_v31 = vsel %vm10624_vm14, %v10552_v5, %v492_v14  ;;  %v506_v23 = vmul.f32 %v10580_v45, %v505_v15  ;;  %v2175_v26 = vsel %vm853_vm12, %v12652_v55, %v12651_v12  ;;  %v12661_v15 = vld [vmem:[#allocation157_spill] sm:$0xff]  ;;  %v12662_v7 = vld [vmem:[#allocation156_spill] sm:$0xff] }
0x338d   : > { %5415 = vrot.lane.b32.xlu1 %v5407_v21, %s12121_s24  ;;  %4811 = vrot.lane.b32.xlu0 %v4804_v59, %s11959_s7  ;;  %v512_v36 = vand.u32 2147483647, %v10549_v63 }
0x338f   : > { %v4847_v11 = vpop.permute.xlu1 %4846  ;;  %v10596_v34 = vpop.permute.xlu0 %5148  ;;  %vm513_vm14 = vcmp.eq.f32.partialorder %v512_v36, 8.507059e+37  ;;  %v12675_v36 = vld [vmem:[#allocation216_spill] sm:$0xff] }
0x3390   : > { %v4849_v53 = vsel %vm12637_vm7, %v10434_v0, %v4847_v11  ;;  %v5152_v61 = vsel %vm12638_vm4, %v10420_v24, %v10596_v34  ;;  %v497_v0 = vand.u32 2147483647, %v10526_v22  ;;  %v5862_v24 = vmul.f32 0.0, %v12589_v43  ;;  %v12648_v22 = vld [vmem:[#allocation107_spill] sm:$0xff]  ;;  %vm10672_vm7 = vmor %vm508_vm2, %vm509_vm13 }
0x3391   : > { %v4855_v3 = vadd.f32 %v4849_v53, %v10523_v52  ;;  %v5158_v29 = vadd.f32 %v5152_v61, %v5023_v48  ;;  %v12645_v48 = vld [vmem:[#allocation98_spill] sm:$0xff]  ;;  %v500_v43 = vor.u32 1.1754944e-38, %v499_v47  ;;  %v1873_v6 = vsel %vm12650_vm8, %v12649_v20, %v12648_v22  ;;  %v12656_v47 = vld [vmem:[#allocation145_spill] sm:$0xff] }
0x3392   : > { %4914 = vrot.lane.b32.xlu2 %v4906_v8, %s11963_s17  ;;  %v1772_v56 = vsel %vm12647_vm5, %v12646_v46, %v12645_v48  ;;  %vm498_vm0 = vcmp.eq.f32.partialorder %v497_v0, 8.507059e+37  ;;  %v2292_v40 = vsel %vm12657_vm9, %v12656_v47, %v12655_v4  ;;  %v12658_v0 = vld [vmem:[#allocation370_spill] sm:$0xff]  ;;  %vm12663_vm4 = vcmask 900096   ;;  %v12664_v46 = vld [vmem:[#allocation169_spill] sm:$0xff]  ;;  %v12673_v47 = vld [vmem:[#allocation204_spill] sm:$0xff] }
0x3393   : > { %v1777_v21 = vadd.f32 %v1772_v56, %v1677_v16  ;;  %v10658_v61 = vsel %vm498_vm0, %v500_v43, %v496_v31  ;;  %v12665_v56 = vld [vmem:[#allocation168_spill] sm:$0xff]  ;;  %v12667_v31 = vld [vmem:[#allocation178_spill] sm:$0xff]  ;;  %vm12669_vm5 = vcmask 883712   ;;  %vm12670_vm8 = vcmask 1039360  }
0x3394   : > { %v10631_v30 = vpop.permute.xlu2 %5344  ;;  %v2557_v63 = vsel %vm12666_vm10, %v12665_v56, %v12664_v46  ;;  %vm12671_vm0 = vcmask 252928   ;;  %vm12676_vm2 = vcmask 777216   ;;  %vm12683_vm13 = vcmask 1031168  }
0x3395   : > { %v10634_v58 = vadd.f32 %v10631_v30, %v5289_v38  ;;  %5870 = vrot.lane.b32.xlu1 %v5862_v24, %s12562_s27  ;;  %5549 = vrot.lane.b32.xlu0 %v5542_v57, %s12155_s25  ;;  %v1878_v8 = vadd.f32 %v1873_v6, %v1777_v21  ;;  %v2424_v24 = vsel %vm12663_vm4, %v12662_v7, %v12661_v15  ;;  %v5913_v7 = vld [vmem:[%s11218_s4] sm:$0xff]  ;;  %vm12684_vm9 = vcmask 244736   ;;  %s12839_s27 = sld [smem:[#allocation26_spill]] }
0x3396   : > { %vm12690_vm4 = vcmask 1006592   ;;  %vm12693_vm10 = vcmask 769024  }
0x3397   : > { %v4948_v59 = vpop.permute.xlu1 %4947  ;;  %v10645_v38 = vpop.permute.xlu0 %5736  ;;  %v2180_v14 = vadd.f32 %v2175_v26, %v1878_v8  ;;  %v12672_v8 = vld [vmem:[#allocation205_spill] sm:$0xff] }
0x3398   : > { %v4950_v11 = vsel %vm12653_vm11, %v10483_v18, %v4948_v59  ;;  %v5740_v5 = vsel %vm12654_vm6, %v10464_v49, %v10645_v38  ;;  %v507_v18 = vadd.f32 %v10580_v45, %v506_v23  ;;  %v4705_v49 = vmul.f32 0.0, %v12606_v9  ;;  %v12668_v23 = vld [vmem:[#allocation177_spill] sm:$0xff] }
0x3399   : > { %v4956_v13 = vadd.f32 %v4950_v11, %v4855_v3  ;;  %v5745_v53 = vadd.f32 %v5740_v5, %v5712_v19  ;;  %v4904_v3 = vmul.f32 %v12658_v0, %v7492_v2  ;;  %v2297_v52 = vadd.f32 %v2292_v40, %v2180_v14 }
0x339a   : > { %6023 = vrot.lane.b32.xlu2 %v10658_v61, %s11963_s17  ;;  %v515_v9 = vor.u32 1.1754944e-38, %v514_v41  ;;  %v511_v16 = vsel %vm10672_vm7, %v10580_v45, %v507_v18  ;;  %v2658_v21 = vsel %vm12669_vm5, %v12668_v23, %v12667_v31  ;;  %v2960_v40 = vsel %vm1385_vm3, %v12673_v47, %v12672_v8  ;;  %v12674_v18 = vld [vmem:[#allocation217_spill] sm:$0xff]  ;;  %vm12697_vm5 = vmmov %vm12683_vm13 }
0x339b   : > { %v2429_v43 = vadd.f32 %v2424_v24, %v2297_v52  ;;  %vm12677_vm11 = vcmask 343040   ;;  %vm12678_vm6 = vcmask 1014784   ;;  %v12679_v52 = vld [vmem:[#allocation227_spill] sm:$0xff]  ;;  %vm12689_vm7 = vcmask 261120  }
0x339c   : > { %v10679_v57 = vpop.permute.xlu2 %5833  ;;  %v10701_v5 = vsel %vm513_vm14, %v515_v9, %v511_v16  ;;  %v12680_v16 = vld [vmem:[#allocation236_spill] sm:$0xff]  ;;  %vm12695_vm14 = vmmov %vm12670_vm8 }
0x339d   : > { %4713 = vrot.lane.b32.xlu1 %v4705_v49, %s11944_s2  ;;  %4910 = vrot.lane.b32.xlu0 %v4904_v3, %s11963_s17  ;;  %v2562_v26 = vadd.f32 %v2557_v63, %v2429_v43  ;;  %s6600_s2 = sshll.u32 %s12841_s5, 6 }
0x339f   : > { %v5673_v20 = vpop.permute.xlu1 %5672  ;;  %v10689_v6 = vpop.permute.xlu0 %5214 }
0x33a0   : > { %v5675_v59 = vsel %vm12670_vm8, %v10512_v28, %v5673_v20  ;;  %v5681_v41 = vadd.f32 %v5673_v20, %v10578_v25  ;;  %v5218_v55 = vsel %vm12671_vm0, %v10504_v60, %v10689_v6  ;;  %v6574_v28 = vld [vmem:[%s11218_s4 + $0x10] sm:$0xff]  ;;  %v2663_v25 = vadd.f32 %v2658_v21, %v2562_v26 }
0x33a1   : > { %v5680_v45 = vadd.f32 %v5675_v59, %v10584_v62  ;;  %v5224_v11 = vadd.f32 %v5218_v55, %v5158_v29  ;;  %v5475_v60 = vmul.f32 0.0, %v12615_v37  ;;  %v3092_v62 = vsel %vm12676_vm2, %v12675_v36, %v12674_v18  ;;  %v12681_v21 = vld [vmem:[#allocation245_spill] sm:$0xff] }
0x33a2   : > { %5995 = vrot.lane.b32.xlu2 %v10701_v5, %s11873_s14  ;;  %v2965_v14 = vadd.f32 %v2960_v40, %v2663_v25  ;;  %v5895_v20 = vmul.f32 0.0, %v12623_v17  ;;  %v12685_v40 = vld [vmem:[#allocation284_spill] sm:$0xff]  ;;  %vm12699_vm8 = vcmask 1022976   ;;  %vm12700_vm0 = vcmask 277504  }
0x33a3   : > { %vm12701_vm2 = vmmov %vm12699_vm8 }
0x33a4   : > { %v10715_v29 = vpop.permute.xlu2 %4610  ;;  %v3097_v49 = vadd.f32 %v3092_v62, %v2965_v14  ;;  %v4805_v62 = vmul.f32 0.0, %v12627_v50 }
0x33a5   : > { %5483 = vrot.lane.b32.xlu1 %v5475_v60, %s12136_s16  ;;  %5978 = vperm.xlu0 %6798, %v6574_v28   ;;  %v12686_v60 = vld [vmem:[#allocation296_spill] sm:$0xff]  ;;  %s7050_s16 = scalar_lea.hbm %s12842_s20, 128 }
0x33a6   : > { %v3199_v9 = vadd.f32 %v12679_v52, %v3097_v49  ;;  %v12687_v49 = vld [vmem:[#allocation308_spill] sm:$0xff] }
0x33a7   : > { %v5016_v3 = vpop.permute.xlu1 %5015  ;;  %v10718_v19 = vpop.permute.xlu0 %5769 }
0x33a8   : > { %v5018_v37 = vsel %vm12677_vm11, %v10539_v35, %v5016_v3  ;;  %v5773_v24 = vsel %vm12678_vm6, %v10532_v39, %v10718_v19  ;;  %v3305_v43 = vadd.f32 %v12680_v16, %v3199_v9  ;;  %v12682_v39 = vld [vmem:[#allocation272_spill] sm:$0xff]  ;;  %vm12702_vm11 = vcmask 236544  }
0x33a9   : > { %v5024_v56 = vadd.f32 %v5018_v37, %v4956_v13  ;;  %v5778_v63 = vadd.f32 %v5773_v24, %v5745_v53 }
0x33aa   : > { %5916 = vperm.xlu2 %6799, %v5913_v7   ;;  %v3406_v59 = vadd.f32 %v12681_v21, %v3305_v43  ;;  %v12692_v43 = vld [vmem:[#allocation72_spill] sm:$0xff] }
0x33ac   : > { %v10731_v23 = vpop.permute.xlu2 %5411  ;;  %v3713_v13 = vadd.f32 %v12682_v39, %v3406_v59  ;;  %v5543_v59 = vmul.f32 0.0, %v12635_v33  ;;  %v12698_v33 = vld [vmem:[#allocation99_spill] sm:$0xff] }
0x33ad   : > { %v5422_v35 = vadd.f32 %v10731_v23, %v10634_v58  ;;  %5903 = vrot.lane.b32.xlu1 %v5895_v20, %s12612_s19  ;;  %6025 = vrot.lane.b32.xlu0 %v10701_v5, %s11963_s17  ;;  %v1472_v20 = vsel %vm12693_vm10, %v12639_v51, %v12692_v43  ;;  %vm12712_vm10 = vcmask 891904   ;;  %s12840_s19 = sshll.u32 %s12839_s27, 6 }
0x33ae   : > { %v3847_v58 = vadd.f32 %v12685_v40, %v3713_v13  ;;  %s11157_s23 = scalar_lea.vmem [#allocation12], %s12840_s19 }
0x33af   : > { %v5706_v53 = vpop.permute.xlu1 %5705  ;;  %v10740_v55 = vpop.permute.xlu0 %5280 }
0x33b0   : > { %v5708_v17 = vsel %vm12683_vm13, %v10564_v54, %v5706_v53  ;;  %v5714_v26 = vadd.f32 %v5706_v53, %v5681_v41  ;;  %v5284_v47 = vsel %vm12684_vm9, %v10556_v27, %v10740_v55  ;;  %v3981_v36 = vadd.f32 %v12686_v60, %v3847_v58  ;;  %v12688_v54 = vld [vmem:[#allocation317_spill] sm:$0xff] }
0x33b1   : > { %v5713_v28 = vadd.f32 %v5708_v17, %v5680_v45  ;;  %v5290_v25 = vadd.f32 %v5284_v47, %v5224_v11  ;;  %v12691_v11 = vld [vmem:[#allocation344_spill] sm:$0xff]  ;;  %v12694_v53 = vld [vmem:[#allocation81_spill] sm:$0xff]  ;;  %v1773_v58 = vsel %vm12699_vm8, %v12645_v48, %v12698_v33  ;;  %vm12706_vm13 = vcmask 908288   ;;  %vm12718_vm8 = vmmov %vm12678_vm6 }
0x33b2   : > { %v4115_v3 = vadd.f32 %v12687_v49, %v3981_v36  ;;  %vm12708_vm9 = vcmask 900096  }
0x33b4   : > { %v10750_v14 = vpop.permute.xlu2 %5866  ;;  %v4216_v41 = vadd.f32 %v12688_v54, %v4115_v3 }
0x33b5   : > { %4813 = vrot.lane.b32.xlu1 %v4805_v62, %s11959_s7  ;;  %5963 = vrot.lane.b32.xlu0 %v10658_v61, %s11962_s10  ;;  %s6438_s7 = sshll.u32 %s11157_s23, 4  ;;  %s6439_s7 = int_to_ptr.vmem [resolvable:$true] %s6438_s7 }
0x33b6   : > { %v4522_v37 = vadd.f32 %v12691_v11, %v4216_v41 }
0x33b7   : > { %v5151_v27 = vpop.permute.xlu1 %5150  ;;  %v10757_v7 = vpop.permute.xlu0 %5802 }
0x33b8   : > { %v5153_v45 = vsel %vm12689_vm7, %v10596_v34, %v5151_v27  ;;  %v5806_v50 = vsel %vm12690_vm4, %v10586_v44, %v10757_v7  ;;  %v4621_v13 = vadd.f32 %v10715_v29, %v4522_v37  ;;  %v1574_v34 = vsel %vm12695_vm14, %v12631_v1, %v12694_v53  ;;  %v12703_v37 = vld [vmem:[#allocation108_spill] sm:$0xff] }
0x33b9   : > { %v5159_v24 = vadd.f32 %v5153_v45, %v5024_v56  ;;  %v5811_v9 = vadd.f32 %v5806_v50, %v5778_v63  ;;  %v1477_v44 = vmul.f32 %v1472_v20, %v7492_v2  ;;  %v12696_v56 = vld [vmem:[#allocation90_spill] sm:$0xff]  ;;  %v4900_v1 = vsel %vm12700_vm0, %v12658_v0, %v12634_v10 }
0x33ba   : > { %v1673_v51 = vsel %vm12697_vm5, %v12640_v42, %v12696_v56  ;;  %v1874_v48 = vsel %vm12678_vm6, %v12648_v22, %v12703_v37  ;;  %vm12709_vm7 = vcmask 252928   ;;  %vm12710_vm4 = vcmask 998400  }
0x33bb   : > { %v1579_v63 = vadd.f32 %v1574_v34, %v1477_v44  ;;  %v12707_v44 = vld [vmem:[#allocation158_spill] sm:$0xff]  ;;  %vm12714_vm14 = vcmask 883712   ;;  %vm12717_vm5 = vcmask 777216   ;;  %vm12719_vm0 = vcmask 515072  }
0x33bc   : > { %v10773_v17 = vpop.permute.xlu2 %4709  ;;  %vm12725_vm6 = vcmask 752640  }
0x33bd   : > { %v4720_v47 = vadd.f32 %v10773_v17, %v4621_v13  ;;  %5551 = vrot.lane.b32.xlu1 %v5543_v59, %s12155_s25  ;;  %v1678_v27 = vadd.f32 %v1673_v51, %v1579_v63  ;;  %v4905_v59 = vmul.f32 %v4900_v1, %v7539_v32  ;;  %v12704_v13 = vld [vmem:[#allocation135_spill] sm:$0xff] }
0x33be   : > { %v2176_v10 = vsel %vm853_vm12, %v12651_v12, %v12704_v13  ;;  %v2425_v12 = vsel %vm12708_vm9, %v12661_v15, %v12707_v44  ;;  %vm12728_vm9 = vcmask 244736  }
0x33bf   : > { %v5739_v36 = vpop.permute.xlu1 %5738  ;;  %v10784_v62 = vpop.permute.xlu0 %5346  ;;  %v1778_v20 = vadd.f32 %v1773_v58, %v1678_v27 }
0x33c0   : > { %v5741_v3 = vsel %vm12701_vm2, %v10645_v38, %v5739_v36  ;;  %v5747_v41 = vadd.f32 %v5739_v36, %v5714_v26  ;;  %v5350_v42 = vsel %vm12702_vm11, %v10631_v30, %v10784_v62  ;;  %v12705_v30 = vld [vmem:[#allocation146_spill] sm:$0xff]  ;;  %vm12721_vm2 = vcmask 769024  }
0x33c1   : > { %v5746_v45 = vadd.f32 %v5741_v3, %v5713_v28  ;;  %v5356_v50 = vadd.f32 %v5350_v42, %v5290_v25  ;;  %v1879_v0 = vadd.f32 %v1874_v48, %v1778_v20  ;;  %v2293_v28 = vsel %vm12706_vm13, %v12655_v4, %v12705_v30  ;;  %v12711_v4 = vld [vmem:[#allocation170_spill] sm:$0xff]  ;;  %v6573_v3 = vld [vmem:[%s11218_s4 + $0x8] sm:$0xff] }
0x33c2   : > { %v2558_v1 = vsel %vm12712_vm10, %v12664_v46, %v12711_v4  ;;  %v12713_v42 = vld [vmem:[#allocation179_spill] sm:$0xff]  ;;  %vm12723_vm11 = vcmask 760832   ;;  %vm12727_vm13 = vcmask 654336   ;;  %vm12733_vm10 = vcmask 637952  }
0x33c3   : > { %v2181_v22 = vadd.f32 %v2176_v10, %v1879_v0 }
0x33c4   : > { %v10801_v38 = vpop.permute.xlu2 %5479 }
0x33c5   : > { %v10804_v26 = vadd.f32 %v10801_v38, %v5422_v35  ;;  %4912 = vrot.lane.b32.xlu1 %v4905_v59, %s11963_s17  ;;  %v2298_v63 = vadd.f32 %v2293_v28, %v2181_v22  ;;  %v12716_v59 = vld [vmem:[#allocation218_spill] sm:$0xff]  ;;  %s6437_s17 = scalar_lea.hbm %s12842_s20, %s6600_s2 }
0x33c6   : > { %v3093_v10 = vsel %vm12717_vm5, %v12674_v18, %v12716_v59  ;;  %vm12737_vm5 = vcmask 621568  }
0x33c7   : > { %v5217_v25 = vpop.permute.xlu1 %5216  ;;  %v10810_v34 = vpop.permute.xlu0 %5835  ;;  %v2430_v15 = vadd.f32 %v2425_v12, %v2298_v63 }
0x33c8   : > { %v5219_v51 = vsel %vm12709_vm7, %v10689_v6, %v5217_v25  ;;  %v5839_v35 = vsel %vm12710_vm4, %v10679_v57, %v10810_v34  ;;  %v2659_v6 = vsel %vm12714_vm14, %v12667_v31, %v12713_v42  ;;  %vm12729_vm7 = vcmask 228352  }
0x33c9   : > { %v5225_v58 = vadd.f32 %v5219_v51, %v5159_v24  ;;  %v10820_v36 = vadd.f32 %v5839_v35, %v5811_v9  ;;  %v2563_v57 = vadd.f32 %v2558_v1, %v2430_v15  ;;  %v12715_v24 = vld [vmem:[#allocation206_spill] sm:$0xff]  ;;  %v12722_v35 = vld [vmem:[#allocation237_spill] sm:$0xff]  ;;  %vm12731_vm4 = vcmask 646144  }
0x33ca   : > { %v2961_v9 = vsel %vm1385_vm3, %v12672_v8, %v12715_v24  ;;  %v12720_v8 = vld [vmem:[#allocation224_spill] sm:$0xff]  ;;  %v3300_v18 = vsel %vm12723_vm11, %v12680_v16, %v12722_v35  ;;  %v12726_v15 = vld [vmem:[#allocation273_spill] sm:$0xff]  ;;  %vm12735_vm14 = vcmask 629760   ;;  %vm12742_vm11 = vcmask 506880  }
0x33cb   : > { %v2664_v48 = vadd.f32 %v2659_v6, %v2563_v57  ;;  %v3195_v12 = vsel %vm12721_vm2, %v12679_v52, %v12720_v8  ;;  %v3708_v16 = vsel %vm12727_vm13, %v12682_v39, %v12726_v15  ;;  %v12734_v39 = vld [vmem:[#allocation309_spill] sm:$0xff]  ;;  %vm12741_vm2 = vcmask 236544  }
0x33cc   : > { %v10831_v27 = vpop.permute.xlu2 %5899  ;;  %vm12744_vm13 = vcmask 515072  }
0x33cd   : > { %5948 = vperm.xlu1 %6800, %v6573_v3   ;;  %v2966_v22 = vadd.f32 %v2961_v9, %v2664_v48 }
0x33cf   : > { %v5772_v20 = vpop.permute.xlu1 %5771  ;;  %v10836_v46 = vpop.permute.xlu0 %4612  ;;  %v3098_v51 = vadd.f32 %v3093_v10, %v2966_v22 }
0x33d0   : > { %v5774_v0 = vsel %vm12718_vm8, %v10718_v19, %v5772_v20  ;;  %v10843_v31 = vadd.f32 %v5772_v20, %v5747_v41  ;;  %v4616_v28 = vsel %vm12719_vm0, %v10715_v29, %v10836_v46  ;;  %v12724_v29 = vld [vmem:[#allocation246_spill] sm:$0xff]  ;;  %v12730_v20 = vld [vmem:[#allocation285_spill] sm:$0xff]  ;;  %vm12738_vm8 = vcmask 1006592  }
0x33d1   : > { %v5779_v25 = vadd.f32 %v5774_v0, %v5746_v45  ;;  %v3200_v19 = vadd.f32 %v3195_v12, %v3098_v51  ;;  %v3401_v45 = vsel %vm12725_vm6, %v12681_v21, %v12724_v29  ;;  %v3842_v21 = vsel %vm12731_vm4, %v12685_v40, %v12730_v20  ;;  %v12732_v0 = vld [vmem:[#allocation297_spill] sm:$0xff]  ;;  %v12736_v51 = vld [vmem:[#allocation318_spill] sm:$0xff] }
0x33d2   : > { %v3976_v22 = vsel %vm12733_vm10, %v12686_v60, %v12732_v0  ;;  %v4211_v40 = vsel %vm12737_vm5, %v12688_v54, %v12736_v51  ;;  %vm12740_vm0 = vcmask 523264   ;;  %vm12743_vm6 = vcmask 998400  }
0x33d3   : > { %v3306_v1 = vadd.f32 %v3300_v18, %v3200_v19  ;;  %vm12750_vm4 = vcmask 654336   ;;  %vm12751_vm10 = vcmask 228352   ;;  %vm12754_vm5 = vcmask 646144  }
0x33d4   : > { %v10854_v63 = vpop.permute.xlu2 %4809 }
0x33d5   : > { %v10857_v41 = vadd.f32 %v10854_v63, %v4720_v47  ;;  %5993 = vrot.lane.b32.xlu1 %v10658_v61, %s11873_s14  ;;  %v3407_v57 = vadd.f32 %v3401_v45, %v3306_v1  ;;  %v12739_v45 = vld [vmem:[#allocation345_spill] sm:$0xff]  ;;  %s6426_s14 = scalar_lea.sflag [#allocation5], %s12839_s27 }
0x33d6   : > { %v4517_v1 = vsel %vm12740_vm0, %v12691_v11, %v12739_v45  ;;  %vm12758_vm0 = vcmask 629760  }
0x33d7   : > { %v5283_v52 = vpop.permute.xlu1 %5282  ;;  %v5414_v3 = vpop.permute.xlu0 %5413  ;;  %v3714_v10 = vadd.f32 %v3708_v16, %v3407_v57 }
0x33d8   : > { %v5285_v6 = vsel %vm12728_vm9, %v10740_v55, %v5283_v52  ;;  %v5417_v47 = vsel %vm12729_vm7, %v10731_v23, %v5414_v3  ;;  %v4110_v23 = vsel %vm12735_vm14, %v12687_v49, %v12734_v39  ;;  %v1478_v52 = vmul.f32 %v12692_v43, %v7539_v32 }
0x33d9   : > { %v5291_v9 = vadd.f32 %v5285_v6, %v5225_v58  ;;  %v5423_v48 = vadd.f32 %v5417_v47, %v5356_v50  ;;  %v3848_v12 = vadd.f32 %v3842_v21, %v3714_v10  ;;  %vm12746_vm9 = vcmask 760832  }
0x33da   : > { %v1580_v6 = vadd.f32 %v12694_v53, %v1478_v52  ;;  %vm12748_vm7 = vcmask 752640   ;;  %vm12752_vm14 = vcmask 498688  }
0x33db   : > { %v3982_v55 = vadd.f32 %v3976_v22, %v3848_v12 }
0x33dd   : > { %5965 = vrot.lane.b32.xlu1 %v10701_v5, %s11962_s10  ;;  %v4116_v18 = vadd.f32 %v4110_v23, %v3982_v55  ;;  %s12774_s10 = smov 17  }
0x33df   : > { %v10882_v58 = vpop.permute.xlu1 %5804  ;;  %v10884_v50 = vpop.permute.xlu0 %5868  ;;  %v4217_v49 = vadd.f32 %v4211_v40, %v4116_v18  ;;  %v12745_v18 = vld [vmem:[#allocation238_spill] sm:$0xff] }
0x33e0   : > { %v5807_v60 = vsel %vm12738_vm8, %v10757_v7, %v10882_v58  ;;  %vm12756_vm8 = vcmask 637952  }
0x33e1   : > { %v5812_v19 = vadd.f32 %v5807_v60, %v5779_v25  ;;  %v4523_v16 = vadd.f32 %v4517_v1, %v4217_v49  ;;  %v1679_v25 = vadd.f32 %v12696_v56, %v1580_v6  ;;  %v12749_v49 = vld [vmem:[#allocation274_spill] sm:$0xff] }
0x33e3   : > { %v4622_v47 = vadd.f32 %v4616_v28, %v4523_v16  ;;  %v1779_v22 = vadd.f32 %v12698_v33, %v1679_v25  ;;  %v12753_v16 = vld [vmem:[#allocation286_spill] sm:$0xff] }
0x33e5   : > { %v1880_v43 = vadd.f32 %v12703_v37, %v1779_v22  ;;  %v10955_v22 = vpop.permute.xlu2 %5547 }
0x33e7   : > { %v5349_v57 = vpop.permute.xlu1 %5348  ;;  %v4712_v54 = vpop.permute.xlu0 %4711  ;;  %v2182_v12 = vadd.f32 %v12704_v13, %v1880_v43  ;;  %v12761_v43 = vld [vmem:[#allocation346_spill] sm:$0xff] }
0x33e8   : > { %v5351_v21 = vsel %vm12741_vm2, %v10784_v62, %v5349_v57  ;;  %v4715_v7 = vsel %vm12742_vm11, %v10773_v17, %v4712_v54  ;;  %vm12760_vm2 = vcmask 621568   ;;  %vm12762_vm11 = vcmask 523264  }
0x33e9   : > { %v5357_v10 = vadd.f32 %v5351_v21, %v5291_v9  ;;  %v4721_v11 = vadd.f32 %v4715_v7, %v4622_v47  ;;  %v2299_v56 = vadd.f32 %v12705_v30, %v2182_v12  ;;  %v3301_v30 = vsel %vm12746_vm9, %v12722_v35, %v12745_v18  ;;  %v12755_v47 = vld [vmem:[#allocation298_spill] sm:$0xff] }
0x33ea   : > { %v3977_v57 = vsel %vm12756_vm8, %v12732_v0, %v12755_v47  ;;  %v12757_v21 = vld [vmem:[#allocation310_spill] sm:$0xff]  ;;  %v4518_v0 = vsel %vm12762_vm11, %v12739_v45, %v12761_v43  ;;  %vm12765_vm9 = vcmask 982016   ;;  %vm12768_vm8 = vcmask 490496  }
0x33eb   : > { %v2431_v33 = vadd.f32 %v12707_v44, %v2299_v56  ;;  %v12747_v44 = vld [vmem:[#allocation247_spill] sm:$0xff] }
0x33ed   : > { %v2564_v37 = vadd.f32 %v12711_v4, %v2431_v33  ;;  %v3402_v4 = vsel %vm12748_vm7, %v12724_v29, %v12747_v44  ;;  %v3843_v29 = vsel %vm12754_vm5, %v12730_v20, %v12753_v16 }
0x33ef   : > { %v5838_v53 = vpop.permute.xlu1 %5837  ;;  %v10906_v28 = vpop.permute.xlu0 %5481  ;;  %v2665_v13 = vadd.f32 %v12713_v42, %v2564_v37 }
0x33f0   : > { %v5840_v23 = vsel %vm12743_vm6, %v10810_v34, %v5838_v53  ;;  %v5485_v17 = vsel %vm4881_vm1, %v10801_v38, %v10906_v28  ;;  %vm12763_vm6 = vcmask 506880  }
0x33f1   : > { %v5845_v62 = vadd.f32 %v5840_v23, %v5812_v19  ;;  %v10914_v9 = vadd.f32 %v5485_v17, %v5423_v48  ;;  %v2967_v60 = vadd.f32 %v12715_v24, %v2665_v13  ;;  %v3709_v24 = vsel %vm12750_vm4, %v12726_v15, %v12749_v49  ;;  %v6009_v13 = vpop.permute.xlu2 %6008  ;;  %vm12767_vm4 = vmmov %vm12765_vm9 }
0x33f3   : > { %v3099_v38 = vadd.f32 %v12716_v59, %v2967_v60 }
0x33f5   : > { %v3201_v48 = vadd.f32 %v12720_v8, %v3099_v38 }
0x33f7   : > { %v4615_v55 = vpop.permute.xlu1 %4614  ;;  %v5902_v40 = vpop.permute.xlu0 %5901  ;;  %v3307_v42 = vadd.f32 %v3301_v30, %v3201_v48 }
0x33f8   : > { %v4617_v34 = vsel %vm12744_vm13, %v10836_v46, %v4615_v55  ;;  %vm12764_vm13 = vcmask 990208   ;;  %v5905_v55 = vsel %vm12765_vm9, %v10831_v27, %v5902_v40 }
0x33f9   : > { %v3408_v35 = vadd.f32 %v3402_v4, %v3307_v42  ;;  %v4915_v18 = vpop.permute.xlu2 %4914  ;;  %vm12766_vm7 = vmmov %vm12764_vm13 }
0x33fb   : > { %v3715_v6 = vadd.f32 %v3709_v24, %v3408_v35 }
0x33fd   : > { %v3849_v15 = vadd.f32 %v3843_v29, %v3715_v6 }
0x33ff   : > { %v5416_v19 = vpop.permute.xlu1 %5415  ;;  %v10930_v1 = vpop.permute.xlu0 %4811  ;;  %v3983_v7 = vadd.f32 %v3977_v57, %v3849_v15 }
0x3400   : > { %v5418_v46 = vsel %vm12751_vm10, %v5414_v3, %v5416_v19  ;;  %v4815_v59 = vsel %vm12752_vm14, %v10854_v63, %v10930_v1  ;;  %v4111_v3 = vsel %vm12758_vm0, %v12734_v39, %v12757_v21 }
0x3401   : > { %v5424_v8 = vadd.f32 %v5418_v46, %v5357_v10  ;;  %v10939_v52 = vadd.f32 %v4815_v59, %v4721_v11  ;;  %v12759_v10 = vld [vmem:[#allocation319_spill] sm:$0xff]  ;;  %v4117_v20 = vadd.f32 %v4111_v3, %v3983_v7  ;;  %v6024_v35 = vpop.permute.xlu2 %6023 }
0x3402   : > { %v4212_v11 = vsel %vm12760_vm2, %v12736_v51, %v12759_v10  ;;  %v5872_v51 = vsel %vm12764_vm13, %v10750_v14, %v10884_v50  ;;  %vm12770_vm2 = vmmov %vm12768_vm8  ;;  %vm12772_vm13 = vcmask 629760  }
0x3403   : > { %v4218_v12 = vadd.f32 %v4212_v11, %v4117_v20  ;;  %v5877_v45 = vadd.f32 %v5872_v51, %v10820_v36  ;;  %vm12771_vm11 = vmmov %vm12770_vm2 }
0x3405   : > { %v4524_v23 = vadd.f32 %v4518_v0, %v4218_v12  ;;  %v5910_v38 = vadd.f32 %v5905_v55, %v5877_v45 }
0x3407   : > { %v5871_v63 = vpop.permute.xlu1 %5870  ;;  %v10950_v25 = vpop.permute.xlu0 %5549  ;;  %v4623_v17 = vadd.f32 %v4617_v34, %v4524_v23  ;;  %v5813_v34 = vadd.f32 %v10882_v58, %v10843_v31  ;;  %v6011_v44 = vadd.f32 %v6009_v13, %v5910_v38 }
0x3408   : > { %v5873_v48 = vsel %vm12766_vm7, %v10884_v50, %v5871_v63 }
0x3409   : > { %v5846_v30 = vadd.f32 %v5838_v53, %v5813_v34  ;;  %v5878_v42 = vadd.f32 %v5873_v48, %v5845_v62  ;;  %v6017_v49 = vmul.f32 0.1, %v6011_v44  ;;  %vm6014_vm10 = vcmp.ge.f32.partialorder %v6011_v44, 0.0  ;;  %v5996_v20 = vpop.permute.xlu2 %5995 }
0x340b   : > { %v5879_v4 = vadd.f32 %v5871_v63, %v5846_v30  ;;  %v6020_v53 = vsel %vm6014_vm10, %v6011_v44, %v6017_v49  ;;  %vm12773_vm10 = vcmask 769024  }
0x340f   : > { %v4714_v56 = vpop.permute.xlu1 %4713  ;;  %v10961_v33 = vpop.permute.xlu0 %4910 }
0x3410   : > { %v4716_v39 = vsel %vm12763_vm6, %v4712_v54, %v4714_v56 }
0x3411   : > { %v10963_v37 = vadd.f32 %v4716_v39, %v4623_v17 }
0x3417   : > { %v5484_v60 = vpop.permute.xlu1 %5483  ;;  %v5979_v54 = vpop.permute.xlu0 %5978 }
0x3418   : > { %v5486_v15 = vsel %vm4881_vm1, %v10906_v28, %v5484_v60  ;;  %v5553_v28 = vsel %vm4982_vm15, %v10955_v22, %v10950_v25  ;;  %vm12769_vm1 = vcmask 498688  }
0x3419   : > { %v5492_v21 = vadd.f32 %v5486_v15, %v5424_v8  ;;  %v5558_v8 = vadd.f32 %v10955_v22, %v10804_v26  ;;  %v5559_v23 = vadd.f32 %v5553_v28, %v10914_v9  ;;  %v12784_v15 = vld [vmem:[#allocation215_spill] sm:$0xff] }
0x341a   : > { %v12792_v28 = vld [vmem:[#allocation235_spill] sm:$0xff] }
0x341b   : > { %v5981_v17 = vadd.f32 %v5979_v54, %v5558_v8  ;;  %v5982_v56 = vadd.f32 %v5979_v54, %v5559_v23 }
0x341d   : > { %v5987_v45 = vmul.f32 0.1, %v5981_v17  ;;  %v5988_v26 = vmul.f32 0.1, %v5982_v56  ;;  %vm5985_vm6 = vcmp.ge.f32.partialorder %v5982_v56, 0.0 }
0x341f   : > { %v5904_v14 = vpop.permute.xlu1 %5903  ;;  %v6026_v59 = vpop.permute.xlu0 %6025 }
0x3420   : > { %v5906_v19 = vsel %vm12767_vm4, %v5902_v40, %v5904_v14  ;;  %v5912_v27 = vadd.f32 %v5904_v14, %v5879_v4  ;;  %v6027_v62 = vsel %vm12768_vm8, %v6024_v35, %v6026_v59  ;;  %v6031_v40 = vmul.f32 %v6024_v35, %v6020_v53  ;;  %v12778_v35 = vld [vmem:[#allocation155_spill] sm:$0xff] }
0x3421   : > { %v5911_v36 = vadd.f32 %v5906_v19, %v5878_v42  ;;  %vm12783_vm8 = vcmask 1031168  }
0x3422   : > { %v6013_v24 = vadd.f32 %v6009_v13, %v5912_v27 }
0x3423   : > { %v6012_v46 = vadd.f32 %v6009_v13, %v5911_v36 }
0x3424   : > { %vm6016_vm14 = vcmp.ge.f32.partialorder %v6013_v24, 0.0  ;;  %v6019_v31 = vmul.f32 0.1, %v6013_v24 }
0x3425   : > { %vm6015_vm5 = vcmp.ge.f32.partialorder %v6012_v46, 0.0  ;;  %v6018_v58 = vmul.f32 0.1, %v6012_v46 }
0x3426   : > { %v6022_v50 = vsel %vm6016_vm14, %v6013_v24, %v6019_v31  ;;  %v12775_v31 = vld [vmem:[#allocation144_spill] sm:$0xff]  ;;  %vm12777_vm14 = vcmask 908288  }
0x3427   : > { %v6021_v16 = vsel %vm6015_vm5, %v6012_v46, %v6018_v58  ;;  %v6033_v29 = vmul.f32 %v6026_v59, %v6022_v50  ;;  %v4814_v6 = vpop.permute.xlu1 %4813  ;;  %v5964_v42 = vpop.permute.xlu0 %5963  ;;  %v12776_v58 = vld [vmem:[#allocation141_spill] sm:$0xff]  ;;  %v12779_v50 = vld [vmem:[#allocation154_spill] sm:$0xff]  ;;  %vm12780_vm5 = vcmask 1039360  }
0x3428   : > { %v6032_v47 = vmul.f32 %v6027_v62, %v6021_v16  ;;  %v4816_v39 = vsel %vm12769_vm1, %v10930_v1, %v4814_v6  ;;  %v2257_v53 = vsel %vm12777_vm14, %v12776_v58, %v12775_v31  ;;  %v2392_v16 = vsel %vm12780_vm5, %v12779_v50, %v12778_v35  ;;  %v12781_v6 = vld [vmem:[#allocation167_spill] sm:$0xff] }
0x3429   : > { %6063 = vrot.lane.b32.xlu1 %v6033_v29, %s12142_s1  ;;  %v4822_v51 = vadd.f32 %v4816_v39, %v10963_v37  ;;  %v2262_v62 = vmul.f32 %v2257_v53, %v7492_v2  ;;  %v2263_v29 = vmul.f32 %v12775_v31, %v7539_v32  ;;  %vm12791_vm1 = vcmask 900096  }
0x342a   : > { %v6801_v57 = vpack.i.bf16 %v6032_v47, %v6031_v40  ;;  %v12782_v40 = vld [vmem:[#allocation166_spill] sm:$0xff] }
0x342b   : > { %v2525_v47 = vsel %vm12783_vm8, %v12782_v40, %v12781_v6 }
0x342c   : > { %6802 = vrot.lane.b32.xlu0 %v6801_v57, %s12142_s1  ;;  %v2397_v57 = vadd.f32 %v2392_v16, %v2262_v62  ;;  %v12809_v16 = vld [vmem:[#allocation153_spill] sm:$0xff] }
0x342f   : > { %v5552_v3 = vpop.permute.xlu1 %5551 }
0x3430   : > { %v5554_v7 = vsel %vm4982_vm15, %v10950_v25, %v5552_v3  ;;  %v4921_v25 = vadd.f32 %v10961_v33, %v10857_v41  ;;  %vm5984_vm15 = vcmp.ge.f32.partialorder %v5981_v17, 0.0 }
0x3431   : > { %v5560_v63 = vadd.f32 %v5554_v7, %v5492_v21  ;;  %5933 = vrot.lane.b32.xlu1 %v10658_v61, %s11960_s11  ;;  %v5990_v1 = vsel %vm5984_vm15, %v5981_v17, %v5987_v45  ;;  %v12785_v21 = vld [vmem:[#allocation214_spill] sm:$0xff]  ;;  %vm12800_vm15 = vcmask 777216  }
0x3432   : > { %v3060_v3 = vsel %vm853_vm12, %v12785_v21, %v12784_v15 }
0x3433   : > { %v5983_v10 = vadd.f32 %v5979_v54, %v5560_v63  ;;  %v2530_v63 = vadd.f32 %v2525_v47, %v2397_v57 }
0x3435   : > { %vm5986_vm0 = vcmp.ge.f32.partialorder %v5983_v10, 0.0  ;;  %v5989_v11 = vmul.f32 0.1, %v5983_v10 }
0x3437   : > { %v4913_v43 = vpop.permute.xlu1 %4912  ;;  %v5992_v0 = vsel %vm5986_vm0, %v5983_v10, %v5989_v11  ;;  %v12786_v10 = vld [vmem:[#allocation230_spill] sm:$0xff]  ;;  %v12787_v11 = vld [vmem:[#allocation223_spill] sm:$0xff]  ;;  %vm12788_vm0 = vmmov %vm12777_vm14 }
0x3438   : > { %v6003_v12 = vmul.f32 %v5996_v20, %v5992_v0  ;;  %v4917_v13 = vsel %vm12770_vm2, %v4913_v43, %v4915_v18  ;;  %v4916_v55 = vsel %vm12771_vm11, %v10961_v33, %v4913_v43  ;;  %v5991_v18 = vsel %vm5985_vm6, %v5982_v56, %v5988_v26  ;;  %v12789_v43 = vld [vmem:[#allocation234_spill] sm:$0xff]  ;;  %v12790_v0 = vld [vmem:[#allocation233_spill] sm:$0xff]  ;;  %vm12793_vm2 = vmmov %vm12791_vm1  ;;  %v5917_v56 = vpop.permute.xlu2 %5916 }
0x3439   : > { %v4923_v9 = vadd.f32 %v4917_v13, %v4822_v51  ;;  %v4922_v22 = vadd.f32 %v4916_v55, %v10939_v52  ;;  %v3177_v2 = vsel %vm12788_vm0, %v12787_v11, %v12786_v10  ;;  %v3268_v8 = vsel %vm12793_vm2, %v12789_v43, %v12792_v28  ;;  %v12794_v51 = vld [vmem:[#allocation282_spill] sm:$0xff]  ;;  %v12795_v55 = vld [vmem:[#allocation281_spill] sm:$0xff]  ;;  %vm12802_vm6 = vmmov %vm12800_vm15 }
0x343a   : > { %6052 = vrot.lane.b32.xlu0 %v6003_v12, %s12101_s12  ;;  %v3267_v12 = vsel %vm12791_vm1, %v12790_v0, %v12789_v43  ;;  %v3809_v45 = vsel %vm1385_vm3, %v12795_v55, %v12794_v51  ;;  %vm12797_vm11 = vcmask 416768   ;;  %vm12815_vm1 = vcmask 138240  }
0x343b   : > { %vm12816_vm2 = vmmov %vm12815_vm1 }
0x343f   : > { %v5949_v61 = vpop.permute.xlu1 %5948 }
0x3440   : > { %v5951_v60 = vadd.f32 %v5949_v61, %v4921_v25  ;;  %v5953_v38 = vadd.f32 %v5949_v61, %v4923_v9  ;;  %v5952_v54 = vadd.f32 %v5949_v61, %v4922_v22  ;;  %v12796_v25 = vld [vmem:[#allocation283_spill] sm:$0xff] }
0x3441   : > { %v3810_v26 = vsel %vm1385_vm3, %v12794_v51, %v12796_v25  ;;  %vm12807_vm3 = vmmov %vm12773_vm10 }
0x3442   : > { %v5957_v44 = vmul.f32 0.1, %v5951_v60  ;;  %vm5954_vm9 = vcmp.ge.f32.partialorder %v5951_v60, 0.0  ;;  %v5959_v41 = vmul.f32 0.1, %v5953_v38  ;;  %vm5956_vm7 = vcmp.ge.f32.partialorder %v5953_v38, 0.0 }
0x3443   : > { %v5958_v33 = vmul.f32 0.1, %v5952_v54  ;;  %vm5955_vm4 = vcmp.ge.f32.partialorder %v5952_v54, 0.0 }
0x3444   : > { %v5960_v52 = vsel %vm5954_vm9, %v5951_v60, %v5957_v44  ;;  %v5962_v14 = vsel %vm5956_vm7, %v5953_v38, %v5959_v41  ;;  %v12798_v38 = vld [vmem:[#allocation294_spill] sm:$0xff]  ;;  %vm12808_vm9 = vmmov %vm12797_vm11 }
0x3445   : > { %v5961_v27 = vsel %vm5955_vm4, %v5952_v54, %v5958_v33  ;;  %v5971_v24 = vmul.f32 %v5964_v42, %v5960_v52  ;;  %v12801_v54 = vld [vmem:[#allocation295_spill] sm:$0xff]  ;;  %v12803_v44 = vld [vmem:[#allocation306_spill] sm:$0xff]  ;;  %vm12810_vm7 = vmmov %vm12780_vm5  ;;  %vm12811_vm4 = vcmask 277504  }
0x3446   : > { %v12806_v33 = vld [vmem:[#allocation307_spill] sm:$0xff]  ;;  %v2391_v62 = vsel %vm12810_vm7, %v12809_v16, %v12779_v50  ;;  %vm12823_vm7 = vmmov %vm12815_vm1 }
0x3447   : > { %v5994_v34 = vpop.permute.xlu1 %5993  ;;  %v4078_v52 = vsel %vm12807_vm3, %v12803_v44, %v12806_v33  ;;  %vm12821_vm3 = vmmov %vm12815_vm1 }
0x3448   : > { %v5997_v37 = vsel %vm12772_vm13, %v5994_v34, %v5996_v20  ;;  %v6001_v30 = vmul.f32 %v5994_v34, %v5990_v1  ;;  %v3065_v20 = vadd.f32 %v3060_v3, %v2530_v63  ;;  %v12799_v1 = vld [vmem:[#allocation293_spill] sm:$0xff]  ;;  %vm12805_vm13 = vmmov %vm12773_vm10 }
0x3449   : > { %v6002_v48 = vmul.f32 %v5997_v37, %v5991_v18  ;;  %v3943_v34 = vsel %vm12800_vm15, %v12799_v1, %v12798_v38  ;;  %v3944_v18 = vsel %vm12802_vm6, %v12798_v38, %v12801_v54  ;;  %vm12818_vm15 = vmmov %vm12815_vm1 }
0x344a   : > { %v3182_v17 = vadd.f32 %v3177_v2, %v3065_v20  ;;  %v12814_v20 = vld [vmem:[#allocation213_spill] sm:$0xff]  ;;  %vm12819_vm6 = vmmov %vm12815_vm1 }
0x344b   : > { %v6806_v4 = vpack.i.bf16 %v6002_v48, %v6001_v30  ;;  %v3059_v43 = vsel %vm853_vm12, %v12814_v20, %v12785_v21  ;;  %v6072_v21 = vld [vmem:[%s11220_s6 + $0x8] sm:$0xff] }
0x344c   : > { %v3273_v9 = vadd.f32 %v3267_v12, %v3182_v17 }
0x344d   : > { %6807 = vrot.lane.b32.xlu2 %v6806_v4, %s12101_s12  ;;  %v12804_v4 = vld [vmem:[#allocation305_spill] sm:$0xff] }
0x344e   : > { %v3815_v30 = vadd.f32 %v3809_v45, %v3273_v9  ;;  %v4077_v41 = vsel %vm12805_vm13, %v12804_v4, %v12803_v44  ;;  %vm12820_vm13 = vmmov %vm12815_vm1 }
0x344f   : > { %v5966_v19 = vpop.permute.xlu1 %5965 }
0x3450   : > { %v5967_v49 = vsel %vm12773_vm10, %v5964_v42, %v5966_v19  ;;  %v5973_v36 = vmul.f32 %v5966_v19, %v5962_v14  ;;  %v3949_v42 = vadd.f32 %v3943_v34, %v3815_v30  ;;  %vm12812_vm10 = vmmov %vm12811_vm4 }
0x3451   : > { %v5972_v46 = vmul.f32 %v5967_v49, %v5961_v27 }
0x3452   : > { %6041 = vrot.lane.b32.xlu1 %v5973_v36, %s12774_s10  ;;  %v4083_v27 = vadd.f32 %v4077_v41, %v3949_v42 }
0x3453   : > { %v6811_v59 = vpack.i.bf16 %v5972_v46, %v5971_v24 }
0x3454   : > { %v5920_v46 = vadd.f32 %v5917_v56, %v4083_v27 }
0x3455   : > { %6812 = vrot.lane.b32.xlu0 %v6811_v59, %s12774_s10  ;;  %5935 = vrot.lane.b32.xlu2 %v10701_v5, %s11960_s11  ;;  %v2398_v5 = vadd.f32 %v12778_v35, %v2263_v29  ;;  %s6440_s11 = sshll.u32 %s6437_s17, 4  ;;  %s6441_s11 = int_to_ptr.hbm [resolvable:$true] %s6440_s11 }
0x3456   : > { %vm5923_vm14 = vcmp.ge.f32.partialorder %v5920_v46, 0.0  ;;  %s7044_s3 = sshra.s32 %s6441_s11, 4  ;;  %s7045_s3 = int_to_ptr.hbm [resolvable:$true] %s7044_s3 }
0x3457   : > { %v2531_v7 = vadd.f32 %v12781_v6, %v2398_v5  ;;  %v5926_v6 = vmul.f32 0.1, %v5920_v46  ;;  %s7046_s12 = scalar_lea.hbm %s7045_s3, 64  ;;  %p7051_p9 = scmp.lt.s32.totalorder %s7045_s3, %s12842_s20 }
0x3458   : > { %p7047_p1 = scmp.ne.s32.totalorder %s7045_s3, %s7046_s12  ;;  %p7052_p2 = scmp.lt.s32.totalorder %s7050_s16, %s7046_s12 }
0x3459   : > { %v3066_v32 = vadd.f32 %v12784_v15, %v2531_v7  ;;  %v2261_v15 = vmul.f32 0.0, %v12776_v58  ;;  %v12813_v7 = vld [vmem:[#allocation165_spill] sm:$0xff]  ;;  %v5929_v12 = vsel %vm5923_vm14, %v5920_v46, %v5926_v6 }
0x345a   : > { %v2524_v63 = vsel %vm12783_vm8, %v12813_v7, %v12782_v40  ;;  %v6069_v7 = vld [vmem:[#allocation9 + $0x10] sm:$0xff]  ;;  %p7048_p4 = pnand %p7047_p1, %p7357_p3  ;;  %p7053_p10 = por %p7052_p2, %p7051_p9 }
0x345b   : > { %v3183_v61 = vadd.f32 %v12786_v10, %v3066_v32  ;;  %v2396_v2 = vadd.f32 %v2391_v62, %v2261_v15 }
0x345c   : > { %p7049_p8 = pneg %p7048_p4 }
0x345d   : > { %v3274_v22 = vadd.f32 %v3268_v8, %v3183_v61  ;;  %v2529_v28 = vadd.f32 %v2524_v63, %v2396_v2  ;;  %v6070_v63 = vld [vmem:[#allocation9 + $0x18] sm:$0xff] }
0x345e   : > { %p7054_p11 = pnand %p7053_p10, %p7049_p8 }
0x345f   : > { %v3816_v48 = vadd.f32 %v3810_v26, %v3274_v22  ;;  %v3064_v17 = vadd.f32 %v3059_v43, %v2529_v28 }
0x3461   : > { %v3950_v14 = vadd.f32 %v3944_v18, %v3816_v48  ;;  %v3181_v61 = vadd.f32 %v12787_v11, %v3064_v17  ;;  %v6073_v18 = vld [vmem:[%s11220_s6 + $0x10] sm:$0xff] }
0x3463   : > { %v4084_v49 = vadd.f32 %v4078_v52, %v3950_v14 }
0x3465   : > { %v5921_v59 = vadd.f32 %v5917_v56, %v4084_v49 }
0x3467   : > { %v5927_v5 = vmul.f32 0.1, %v5921_v59  ;;  %vm5924_vm5 = vcmp.ge.f32.partialorder %v5921_v59, 0.0 }
0x3469   : > { %v5930_v58 = vsel %vm5924_vm5, %v5921_v59, %v5927_v5 }
0x349b   : > { %v6064_v19 = vpop.permute.xlu1 %6063 }
0x349e   : > { %v6803_v23 = vpop.permute.xlu0 %6802 }
0x349f   : > { %v6805_v39 = vunpack.i.h.bf16 %v6803_v23  ;;  %v6804_v13 = vunpack.i.l.bf16 %v6803_v23 }
0x34a1   : > { %v6065_v60 = vsel %vm12797_vm11, %v6804_v13, %v6805_v39  ;;  %v6066_v31 = vsel %vm12808_vm9, %v6805_v39, %v6064_v19  ;;  %v3272_v39 = vadd.f32 %v12790_v0, %v3181_v61  ;;  %vm12817_vm11 = vmmov %vm12815_vm1 }
0x34a2   : > { %v6816_v37 = vpack.i.bf16 %v6065_v60, %v6804_v13  ;;  %vm12822_vm9 = vmmov %vm12815_vm1 }
0x34a3   : > { %v5934_v10 = vpop.permute.xlu1 %5933  ;;  %v3814_v13 = vadd.f32 %v12795_v55, %v3272_v39 }
0x34a4   : > { %6817 = vrot.lane.b32.xlu2 %v6816_v37, %s12774_s10  ;;  %v6071_v37 = vld [vmem:[%s11220_s6] sm:$0xff] }
0x34a5   : > { %v3948_v51 = vadd.f32 %v12799_v1, %v3814_v13 }
0x34a7   : > { %v6808_v36 = vpop.permute.xlu2 %6807  ;;  %v4082_v45 = vadd.f32 %v12804_v4, %v3948_v51 }
0x34a8   : > { %v6809_v24 = vunpack.i.l.bf16 %v6808_v36  ;;  %v6810_v53 = vunpack.i.h.bf16 %v6808_v36 }
0x34a9   : > { %v5919_v25 = vadd.f32 %v5917_v56, %v4082_v45  ;;  %v6074_v56 = vld [vmem:[%s11220_s6 + $0x18] sm:$0xff] }
0x34aa   : > { %v6821_v35 = vpack.i.bf16 %v6809_v24, %v6066_v31  ;;  %v6054_v47 = vsel %vm12811_vm4, %v6809_v24, %v6810_v53  ;;  %vm12824_vm4 = vcmask 261120  }
0x34ab   : > { %v5925_v26 = vmul.f32 0.1, %v5919_v25  ;;  %vm5922_vm12 = vcmp.ge.f32.partialorder %v5919_v25, 0.0  ;;  %vm12826_vm14 = vmmov %vm12824_vm4 }
0x34ac   : > { %v6053_v29 = vpop.permute.xlu0 %6052  ;;  %6822 = vrot.lane.b32.xlu0 %v6821_v35, %s12774_s10  ;;  %vm12827_vm5 = vmmov %vm12824_vm4 }
0x34ad   : > { %v6055_v57 = vsel %vm12812_vm10, %v6810_v53, %v6053_v29  ;;  %v5928_v9 = vsel %vm5922_vm12, %v5919_v25, %v5925_v26  ;;  %vm12825_vm10 = vmmov %vm12815_vm1 }
0x34ae   : > { %v6826_v3 = vpack.i.bf16 %v6055_v57, %v6054_v47  ;;  %v5941_v60 = vmul.f32 %v5934_v10, %v5928_v9  ;;  %v6067_v47 = vld [vmem:[#allocation9] sm:$0xff]  ;;  %vm12828_vm8 = vmmov %vm12824_vm4 }
0x34af   : > { %v5936_v50 = vpop.permute.xlu2 %5935 }
0x34b0   : > { %v5937_v32 = vsel %vm12788_vm0, %v5934_v10, %v5936_v50  ;;  %6827 = vrot.lane.b32.xlu1 %v6826_v3, %s12774_s10  ;;  %v5943_v23 = vmul.f32 %v5936_v50, %v5930_v58  ;;  %v6068_v3 = vld [vmem:[#allocation9 + $0x8] sm:$0xff]  ;;  %vm12829_vm0 = vmmov %vm12824_vm4 }
0x34b1   : > { %v5942_v8 = vmul.f32 %v5937_v32, %v5929_v12  ;;  %vm12830_vm12 = vmmov %vm12829_vm0 }
0x34b3   : > { %v6841_v40 = vpack.i.bf16 %v5943_v23, %v5942_v8 }
0x34b8   : > { %6842 = vrot.lane.b32.xlu1 %v6841_v40, %s12774_s10 }
0x34c0   : > { %6082 = vperm.xlu1 %6800, %v6072_v21  }
0x34c4   : > { %v6042_v38 = vpop.permute.xlu1 %6041 }
0x34c7   : > { %v6813_v11 = vpop.permute.xlu0 %6812 }
0x34c8   : > { %v6815_v22 = vunpack.i.h.bf16 %v6813_v11  ;;  %v6814_v0 = vunpack.i.l.bf16 %v6813_v11 }
0x34ca   : > { %v6044_v55 = vsel %vm12815_vm1, %v6815_v22, %v6042_v38  ;;  %v6043_v1 = vsel %vm12816_vm2, %v6814_v0, %v6815_v22  ;;  %vm12831_vm1 = vmmov %vm12829_vm0 }
0x34cb   : > { %v6831_v34 = vpack.i.bf16 %v6043_v1, %v6814_v0  ;;  %v6836_v54 = vpack.i.bf16 %v5941_v60, %v6044_v55  ;;  %vm12832_vm2 = vmmov %vm12829_vm0  ;;  %v7218_v0 = vmov 256.0  }
0x34cc   : > { %6854 = vrcp.f32 %v7218_v0 }
0x34cd   : > { %6832 = vrot.lane.b32.xlu2 %v6831_v34, %s12774_s10  ;;  %6837 = vrot.lane.b32.xlu0 %v6836_v54, %s12774_s10 }
0x34d2   : > { %v6855_v60 = vpop.eup %6854 }
0x34d3   : > { %v6221_v38 = vmul.f32 256.0, %v6855_v60 }
0x34d5   : > { %6092 = vperm.xlu2 %6799, %v6074_v56   ;;  %6087 = vperm.xlu0 %6798, %v6073_v18   ;;  %v6222_v55 = vsub.f32 1.0, %v6221_v38 }
0x34d7   : > { %v6223_v1 = vmul.f32 %v6855_v60, %v6222_v55 }
0x34d9   : > { %v6224_v54 = vadd.f32 %v6855_v60, %v6223_v1 }
0x34dd   : > { %6077 = vperm.xlu2 %6799, %v6071_v37  }
0x34fe   : > { %v6818_v30 = vpop.permute.xlu2 %6817 }
0x34ff   : > { %v6820_v48 = vunpack.i.h.bf16 %v6818_v30  ;;  %v6819_v44 = vunpack.i.l.bf16 %v6818_v30 }
0x3501   : > { %v6128_v4 = vsel %vm12817_vm11, %v6819_v44, %v6820_v48  ;;  %vm6225_vm11 = vweird.f32 %v6855_v60 }
0x3502   : > { %6162 = vmatpush.msra.mxu2 %v6128_v4  ;;  %v6226_v56 = vsel %vm6225_vm11, %v6855_v60, %v6224_v54 }
0x351e   : > { %v6823_v41 = vpop.permute.xlu0 %6822 }
0x351f   : > { %v6824_v33 = vunpack.i.l.bf16 %v6823_v41  ;;  %v6825_v14 = vunpack.i.h.bf16 %v6823_v41 }
0x3521   : > { %v6129_v52 = vsel %vm12818_vm15, %v6820_v48, %v6824_v33  ;;  %v6231_v33 = vld [vmem:[#allocation11] sm:$0x3]  ;;  %vm12833_vm15 = vmmov %vm12829_vm0 }
0x3522   : > { %v6828_v42 = vpop.permute.xlu1 %6827  ;;  %6191 = vmatpush.msra.mxu3 %v6129_v52 }
0x3523   : > { %v6830_v19 = vunpack.i.h.bf16 %v6828_v42  ;;  %v6829_v27 = vunpack.i.l.bf16 %v6828_v42 }
0x3525   : > { %v6126_v49 = vsel %vm12819_vm6, %v6825_v14, %v6829_v27  ;;  %v6127_v36 = vsel %vm12820_vm13, %v6829_v27, %v6830_v19  ;;  %vm6272_vm6 = vcmask 1041408   ;;  %v6256_v14 = vld [vmem:[%s11222_s8] sm:$0xff]  ;;  %vm12834_vm13 = vcmask 15360   ;;  %v6257_v19 = vld [vmem:[%s11222_s8 + $0x8] sm:$0xff]  ;;  %v6258_v27 = vld [vmem:[%s11222_s8 + $0x10] sm:$0xff] }
0x3526   : > { %6163 = vmatpush.msra.mxu2 %v6126_v49  ;;  %6192 = vmatpush.msra.mxu3 %v6127_v36  ;;  %v6259_v49 = vld [vmem:[%s11222_s8 + $0x18] sm:$0xff] }
0x3527   : > { %v6833_v24 = vpop.permute.xlu2 %6832 }
0x3528   : > { %v6835_v46 = vunpack.i.h.bf16 %v6833_v24  ;;  %v6834_v59 = vunpack.i.l.bf16 %v6833_v24 }
0x352a   : > { %v6124_v31 = vsel %vm12821_vm3, %v6834_v59, %v6835_v46  ;;  %v6843_v53 = vpop.permute.xlu1 %6842  ;;  %vm12835_vm3 = vmmov %vm12834_vm13 }
0x352b   : > { %6164 = vmatpush.msra.mxu2 %v6124_v31  ;;  %v6845_v16 = vunpack.i.h.bf16 %v6843_v53  ;;  %v6844_v62 = vunpack.i.l.bf16 %v6843_v53 }
0x352d   : > { %v6123_v15 = vsel %vm12825_vm10, %v6844_v62, %v6845_v16 }
0x352f   : > { %v6093_v2 = vpop.permute.xlu2 %6092 }
0x3532   : > { %v6083_v20 = vpop.permute.xlu1 %6082 }
0x3537   : > { %v6078_v8 = vpop.permute.xlu2 %6077 }
0x353f   : > { %v6838_v35 = vpop.permute.xlu0 %6837 }
0x3540   : > { %v6840_v29 = vunpack.i.h.bf16 %v6838_v35  ;;  %v6839_v6 = vunpack.i.l.bf16 %v6838_v35 }
0x3542   : > { %v6122_v57 = vsel %vm12822_vm9, %v6840_v29, %v6844_v62  ;;  %v6125_v5 = vsel %vm12823_vm7, %v6835_v46, %v6839_v6  ;;  %vm12836_vm9 = vmmov %vm12835_vm3 }
0x3543   : > { %6165 = vmatpush.msra.mxu2 %v6122_v57  ;;  %6193 = vmatpush.msra.mxu3 %v6125_v5  ;;  %vm12837_vm7 = vmmov %vm12835_vm3 }
0x3544   : > { %6576 = vmatmul.msk.f32.vlgmr.msra.gmra.mxu2 %vm12824_vm4, %v6067_v47 }
0x3545   : > { %6194 = vmatpush.msra.mxu3 %v6123_v15 }
0x3546   : > { %6580 = vmatmul.msk.f32.vlgmr.msra.gmra.mxu3 %vm12826_vm14, %v6067_v47 }
0x3547   : > { %v6088_v61 = vpop.permute.xlu0 %6087 }
0x354c   : > { %6577 = vmatmul.msk.f32.gmra.mxu2 %vm12827_vm5, %v6068_v3 }
0x354e   : > { %6581 = vmatmul.msk.f32.gmra.mxu3 %vm12828_vm8, %v6068_v3 }
0x3554   : > { %6578 = vmatmul.msk.f32.gmra.mxu2 %vm12829_vm0, %v6069_v7 }
0x3556   : > { %6582 = vmatmul.msk.f32.gmra.mxu3 %vm12830_vm12, %v6069_v7 }
0x355c   : > { %6579 = vmatmul.msk.f32.gmra.mxu2 %vm12831_vm1, %v6070_v63 }
0x355e   : > { %6583 = vmatmul.msk.f32.gmra.mxu3 %vm12832_vm2, %v6070_v63 }
0x35c7   : > { %v6167_v10 = vpop.f32.mrf.mxu2 }
0x35c8   : > { %v11118_v39 = vadd.f32 %v6167_v10, %v6078_v8 }
0x35c9   : > { %v6196_v50 = vpop.f32.mrf.mxu3 }
0x35ca   : > { %v11116_v17 = vadd.f32 %v6196_v50, %v6078_v8 }
0x35cc   : > { %v6208_v21 = vadd.f32 %v11116_v17, %v11118_v39 }
0x35cf   : > { %v6170_v32 = vpop.f32.mrf.mxu2 }
0x35d0   : > { %v11110_v12 = vadd.f32 %v6170_v32, %v6083_v20 }
0x35d1   : > { %v6199_v43 = vpop.f32.mrf.mxu3 }
0x35d2   : > { %v11112_v58 = vadd.f32 %v6199_v43, %v6083_v20 }
0x35d4   : > { %v6211_v28 = vadd.f32 %v11112_v58, %v11110_v12 }
0x35d6   : > { %6212 = vadd.xlane.f32.xlu2 %v6211_v28 }
0x35d7   : > { %v6173_v23 = vpop.f32.mrf.mxu2 }
0x35d8   : > { %v11120_v13 = vadd.f32 %v6173_v23, %v6088_v61 }
0x35d9   : > { %v6202_v40 = vpop.f32.mrf.mxu3 }
0x35da   : > { %v11122_v51 = vadd.f32 %v6202_v40, %v6088_v61 }
0x35dc   : > { %v6214_v45 = vadd.f32 %v11122_v51, %v11120_v13 }
0x35de   : > { %6215 = vadd.xlane.f32.xlu1 %v6214_v45  ;;  %6209 = vadd.xlane.f32.xlu2 %v6208_v21 }
0x35df   : > { %v6176_v25 = vpop.f32.mrf.mxu2 }
0x35e0   : > { %v11128_v11 = vadd.f32 %v6176_v25, %v6093_v2 }
0x35e1   : > { %v6205_v26 = vpop.f32.mrf.mxu3 }
0x35e2   : > { %v11130_v9 = vadd.f32 %v6205_v26, %v6093_v2 }
0x35e4   : > { %v6217_v22 = vadd.f32 %v11130_v9, %v11128_v11 }
0x35e6   : > { %6218 = vadd.xlane.f32.xlu0 %v6217_v22 }
0x3649   : > { %v6213_v34 = vpop.xlane.xlu2 %6212 }
0x364a   : > { %v6228_v4 = vmul.f32 %v6226_v56, %v6213_v34 }
0x3651   : > { %v6216_v18 = vpop.xlane.xlu1 %6215  ;;  %v6210_v44 = vpop.xlane.xlu2 %6209 }
0x3652   : > { %v6229_v48 = vmul.f32 %v6226_v56, %v6216_v18  ;;  %v6227_v41 = vmul.f32 %v6226_v56, %v6210_v44 }
0x3659   : > { %v6219_v37 = vpop.xlane.xlu0 %6218 }
0x365a   : > { %v6230_v30 = vmul.f32 %v6226_v56, %v6219_v37 }
0x365c   : > { %6247 = vmatpush.msra.mxu0 %v6230_v30 }
0x365e   : > { %6248 = vmatpush.msra.mxu0 %v6229_v48 }
0x3660   : > { %6249 = vmatpush.msra.mxu0 %v6228_v4 }
0x3662   : > { %6250 = vmatpush.msra.mxu0 %v6227_v41 }
0x3663   : > { %6584 = vmatmul.msk.f32.vlgmr.msra.gmra.mxu0 %vm12833_vm15, %v6231_v33 }
0x36e0   : > { %v6252_v52 = vpop.f32.mrf.mxu0 }
0x36e1   : > { %v6255_v42 = vmax.f32 %v6252_v52, 0.0 }
0x36e3   : > { %6585 = vmatpush.msk.msra.mxu1 %vm6272_vm6, %v6255_v42 }
0x36e4   : > { %6586 = vmatmul.msk.f32.vlgmr.msra.gmra.mxu1 %vm12834_vm13, %v6256_v14 }
0x36ec   : > { %6587 = vmatmul.msk.f32.gmra.mxu1 %vm12835_vm3, %v6257_v19 }
0x36f4   : > { %6588 = vmatmul.msk.f32.gmra.mxu1 %vm12836_vm9, %v6258_v27 }
0x36fc   : > { %6589 = vmatmul.msk.f32.gmra.mxu1 %vm12837_vm7, %v6259_v49 }
0x3761   : > { %v6293_v36 = vpop.f32.mrf.mxu1 }
0x3762   : > { %v6590_v24 = vmul.f32 -1.442695, %v6293_v36 }
0x3764   : > { %6856 = vpow2.f32 %v6590_v24 }
0x3769   : > { %v6296_v46 = vpop.f32.mrf.mxu1 }
0x376a   : > { %v6857_v59 = vpop.eup %6856  ;;  %v6591_v31 = vmul.f32 -1.442695, %v6296_v46 }
0x376b   : > { %v6317_v53 = vadd.f32 1.0, %v6857_v59  ;;  %v6872_v59 = vld [vmem:[%s12838_s28 + $0x20] sm:$0xff] }
0x376c   : > { %6858 = vpow2.f32 %v6591_v31 }
0x376d   : > { %6860 = vrcp.f32 %v6317_v53  ;;  %v6332_v5 = vand.u32 2147483648, %v6317_v53  ;;  %v6330_v3 = vand.u32 2147483647, %v6317_v53  ;;  %vm6326_vm10 = vweird.f32 %v6317_v53 }
0x376f   : > { %v6333_v20 = vor.u32 1.1754944e-38, %v6332_v5  ;;  %vm6331_vm5 = vcmp.eq.f32.partialorder %v6330_v3, 8.507059e+37  ;;  %v6876_v3 = vld [vmem:[%s12838_s28 + $0x10] sm:$0xff] }
0x3771   : > { %v6299_v35 = vpop.f32.mrf.mxu1 }
0x3772   : > { %v6859_v16 = vpop.eup %6858  ;;  %v6592_v62 = vmul.f32 -1.442695, %v6299_v35 }
0x3773   : > { %v6861_v29 = vpop.eup %6860  ;;  %v6318_v6 = vadd.f32 1.0, %v6859_v16 }
0x3774   : > { %6862 = vpow2.f32 %v6592_v62  ;;  %v6322_v47 = vmul.f32 %v6861_v29, %v6317_v53  ;;  %vm6327_vm4 = vweird.f32 %v6861_v29  ;;  %v6873_v53 = vld [vmem:[%s12838_s28 + $0x28] sm:$0xff]  ;;  %v6874_v62 = vld [vmem:[%s12838_s28] sm:$0xff] }
0x3775   : > { %6864 = vrcp.f32 %v6318_v6  ;;  %vm6328_vm14 = vmor %vm6326_vm10, %vm6327_vm4  ;;  %v6347_v61 = vand.u32 2147483648, %v6318_v6  ;;  %v6345_v21 = vand.u32 2147483647, %v6318_v6  ;;  %vm6341_vm0 = vweird.f32 %v6318_v6 }
0x3776   : > { %v6323_v57 = vsub.f32 1.0, %v6322_v47 }
0x3777   : > { %v6348_v0 = vor.u32 1.1754944e-38, %v6347_v61  ;;  %vm6346_vm1 = vcmp.eq.f32.partialorder %v6345_v21, 8.507059e+37 }
0x3778   : > { %v6324_v15 = vmul.f32 %v6861_v29, %v6323_v57 }
0x3779   : > { %v6302_v7 = vpop.f32.mrf.mxu1 }
0x377a   : > { %v6863_v63 = vpop.eup %6862  ;;  %v6593_v10 = vmul.f32 -1.442695, %v6302_v7  ;;  %v6325_v50 = vadd.f32 %v6861_v29, %v6324_v15  ;;  %v6877_v7 = vld [vmem:[%s12838_s28 + $0x18] sm:$0xff] }
0x377b   : > { %v6865_v2 = vpop.eup %6864  ;;  %v6319_v32 = vadd.f32 1.0, %v6863_v63 }
0x377c   : > { %6866 = vpow2.f32 %v6593_v10  ;;  %v6329_v43 = vsel %vm6328_vm14, %v6861_v29, %v6325_v50  ;;  %v6337_v28 = vmul.f32 %v6865_v2, %v6318_v6  ;;  %vm6342_vm8 = vweird.f32 %v6865_v2  ;;  %v6875_v6 = vld [vmem:[%s12838_s28 + $0x8] sm:$0xff]  ;;  %v6878_v10 = vld [vmem:[%s12838_s28 + $0x30] sm:$0xff] }
0x377d   : > { %6868 = vrcp.f32 %v6319_v32  ;;  %v6334_v8 = vsel %vm6331_vm5, %v6333_v20, %v6329_v43  ;;  %vm6343_vm12 = vmor %vm6341_vm0, %vm6342_vm8  ;;  %v6362_v34 = vand.u32 2147483648, %v6319_v32  ;;  %v6360_v56 = vand.u32 2147483647, %v6319_v32 }
0x377e   : > { %6383 = vperm.xlu0 %6798, %v6334_v8   ;;  %v6338_v23 = vsub.f32 1.0, %v6337_v28  ;;  %vm6356_vm11 = vweird.f32 %v6319_v32 }
0x377f   : > { %v6363_v30 = vor.u32 1.1754944e-38, %v6362_v34  ;;  %vm6361_vm6 = vcmp.eq.f32.partialorder %v6360_v56, 8.507059e+37 }
0x3780   : > { %v6339_v40 = vmul.f32 %v6865_v2, %v6338_v23 }
0x3782   : > { %v6867_v45 = vpop.eup %6866  ;;  %v6340_v25 = vadd.f32 %v6865_v2, %v6339_v40 }
0x3783   : > { %v6869_v26 = vpop.eup %6868  ;;  %v6320_v22 = vadd.f32 1.0, %v6867_v45 }
0x3784   : > { %v6344_v60 = vsel %vm6343_vm12, %v6865_v2, %v6340_v25  ;;  %v6352_v38 = vmul.f32 %v6869_v26, %v6319_v32  ;;  %vm6357_vm2 = vweird.f32 %v6869_v26  ;;  %v6879_v2 = vld [vmem:[%s12838_s28 + $0x38] sm:$0xff] }
0x3785   : > { %6870 = vrcp.f32 %v6320_v22  ;;  %v6349_v55 = vsel %vm6346_vm1, %v6348_v0, %v6344_v60  ;;  %vm6358_vm15 = vmor %vm6356_vm11, %vm6357_vm2  ;;  %v6377_v33 = vand.u32 2147483648, %v6320_v22  ;;  %v6375_v42 = vand.u32 2147483647, %v6320_v22 }
0x3786   : > { %6388 = vperm.xlu1 %6800, %v6349_v55   ;;  %v6353_v1 = vsub.f32 1.0, %v6352_v38  ;;  %vm6371_vm3 = vweird.f32 %v6320_v22 }
0x3787   : > { %v6378_v19 = vor.u32 1.1754944e-38, %v6377_v33  ;;  %vm6376_vm7 = vcmp.eq.f32.partialorder %v6375_v42, 8.507059e+37 }
0x3788   : > { %v6354_v54 = vmul.f32 %v6869_v26, %v6353_v1 }
0x378a   : > { %v6355_v18 = vadd.f32 %v6869_v26, %v6354_v54 }
0x378b   : > { %v6871_v37 = vpop.eup %6870 }
0x378c   : > { %v6367_v48 = vmul.f32 %v6871_v37, %v6320_v22  ;;  %v6359_v44 = vsel %vm6358_vm15, %v6869_v26, %v6355_v18  ;;  %vm6372_vm13 = vweird.f32 %v6871_v37 }
0x378d   : > { %v6364_v4 = vsel %vm6361_vm6, %v6363_v30, %v6359_v44  ;;  %vm6373_vm9 = vmor %vm6371_vm3, %vm6372_vm13 }
0x378e   : > { %6393 = vperm.xlu2 %6799, %v6364_v4   ;;  %v6368_v41 = vsub.f32 1.0, %v6367_v48 }
0x3790   : > { %v6369_v52 = vmul.f32 %v6871_v37, %v6368_v41 }
0x3792   : > { %v6370_v14 = vadd.f32 %v6871_v37, %v6369_v52 }
0x3794   : > { %v6374_v27 = vsel %vm6373_vm9, %v6871_v37, %v6370_v14 }
0x3795   : > { %v6379_v49 = vsel %vm6376_vm7, %v6378_v19, %v6374_v27 }
0x3796   : > { %6398 = vperm.xlu0 %6798, %v6379_v49  }
0x37e8   : > { %v6394_v36 = vpop.permute.xlu2 %6393 }
0x37e9   : > { %v6405_v24 = vmul.f32 %v6394_v36, %v11120_v13  ;;  %v6406_v46 = vmul.f32 %v6394_v36, %v11122_v51 }
0x37eb   : > { %v6413_v31 = vadd.f32 %v6872_v59, %v6405_v24  ;;  %v6414_v35 = vadd.f32 %v6873_v53, %v6406_v46 }
0x37ed   : > { %6421 = vst [vmem:[%s11157_s23 + $0x20] sm:$0xff] %v6413_v31 }
0x37ee   : > { %6422 = vst [vmem:[%s11157_s23 + $0x28] sm:$0xff] %v6414_v35 }
0x37f0   : > { %v6384_v16 = vpop.permute.xlu0 %6383 }
0x37f1   : > { %v6401_v13 = vmul.f32 %v6384_v16, %v11118_v39  ;;  %v6402_v51 = vmul.f32 %v6384_v16, %v11116_v17 }
0x37f3   : > { %v6409_v29 = vadd.f32 %v6874_v62, %v6401_v13  ;;  %v6410_v47 = vadd.f32 %v6875_v6, %v6402_v51 }
0x37f5   : > { %6417 = vst [vmem:[%s11157_s23] sm:$0xff] %v6409_v29 }
0x37f6   : > { %6418 = vst [vmem:[%s11157_s23 + $0x8] sm:$0xff] %v6410_v47 }
0x37f8   : > { %v6389_v57 = vpop.permute.xlu1 %6388 }
0x37f9   : > { %v6403_v5 = vmul.f32 %v6389_v57, %v11110_v12  ;;  %v6404_v15 = vmul.f32 %v6389_v57, %v11112_v58 }
0x37fb   : > { %v6411_v39 = vadd.f32 %v6876_v3, %v6403_v5  ;;  %v6412_v63 = vadd.f32 %v6877_v7, %v6404_v15 }
0x37fd   : > { %6419 = vst [vmem:[%s11157_s23 + $0x10] sm:$0xff] %v6411_v39 }
0x37fe   : > { %6420 = vst [vmem:[%s11157_s23 + $0x18] sm:$0xff] %v6412_v63 }
0x3808   : > { %v6399_v12 = vpop.permute.xlu0 %6398 }
0x3809   : > { %v6407_v17 = vmul.f32 %v6399_v12, %v11128_v11  ;;  %v6408_v58 = vmul.f32 %v6399_v12, %v11130_v9 }
0x380b   : > { %v6415_v50 = vadd.f32 %v6878_v10, %v6407_v17  ;;  %v6416_v32 = vadd.f32 %v6879_v2, %v6408_v58 }
0x380d   : > { %6423 = vst [vmem:[%s11157_s23 + $0x30] sm:$0xff] %v6415_v50 }
0x380e   : > { %6424 = vst [vmem:[%s11157_s23 + $0x38] sm:$0xff] %v6416_v32 }
0x380f   : > { %7057 = shalt.err (!%p7054_p11)
}
0x3810   : > { %s7219_s26 = smov 256   ;;  %s12844_s21 = smov 16  }
0x3811   : > { %6619 = dma.vmem_to_hbm [thread:$0]  (%p7357_p3), %s6439_s7, 1024, %s6441_s11, %s6426_s14, %s7219_s26, %s7219_s26, %s12844_s21  }
0x3812 PF: > { %s12845_s9 = sld [smem:[#allocation17_spill]] }
0x3813   : > { %s12847_s0 = sld [smem:[#allocation20_spill]] }
0x3818   : > { %s6455_s30 = sand.u32 1, %s12845_s9  }
0x3819   : > { %p12848_p12 = scmp.ge.s32.totalorder %s12847_s0, 2  ;;  %s6456_s13 = scalar_lea.sflag [#allocation5], %s6455_s30 }
0x381b   : > { %p6639_p13 = pnand %p12848_p12, %p7305_p6 }
0x381d   : > { %p6640_p0 = pneg %p6639_p13 }
0x381f   : > { %7087 = dma.done.wait (%p6640_p0), %s6456_s13, 1024  }
0x3820   : > { %7089 = vsyncadd (%p6640_p0), %s6456_s13, 4294966272  ;;  %s12849_s12 = sld [smem:[#allocation23_spill]] }
0x3821   : > { %s12850_s30 = sld [smem:[#allocation18_spill]] }
0x3822   : > { %s12851_s10 = sld [smem:[#allocation19_spill]] }
0x3823   : > { %s12852_s11 = sld [smem:[#allocation25_spill]] }
0x3826   : > { %p24_p5 = scmp.ge.s32.totalorder %s12849_s12, 4  }
0x3828   :  { %26 = sbr.rel (!%p24_p5) target bundleno = 15 (0xf), region = 283 }
0x382d   :  { %6462 = vsyncpa [#allocation4], 1 }
0x382e   :  { %6464 = vsyncpa [#allocation4 + $0x1], 1 }
0x382f   :  { %6465 = vsyncpa [#allocation7], 1 }
0x3830   :  { %6466 = vsyncpa [#allocation10], 1 }
0x3831   :  { %6467 = vsyncpa [#allocation5], 1 }
0x3832   :  { %6469 = vsyncpa [#allocation5 + $0x1], 1 }

</bundles_post_ra>
